<compile_context>
chip_gen: v7x
topology: tpu7x:2x2x1
jax: 0.10.0
libtpu: 0.0.40
codegen_flags: <defaults>
</compile_context>

<pallas_src>
import functools
import math

import jax
import jax.numpy as jnp
from jax.experimental import pallas as pl
from jax.experimental.pallas import tpu as pltpu


VMEM_LIMIT = 32 * 1024 * 1024  # safe explicit scoped-VMEM budget on v5e/v6e/v7x


def _cparams(*sem):
    return pltpu.CompilerParams(dimension_semantics=sem,
                                vmem_limit_bytes=VMEM_LIMIT)


def _pick_tile(dim, cap, align):
    """Largest `align`-multiple tile <= cap that divides dim, else the full dim."""
    if dim <= cap:
        return dim
    t = (cap // align) * align
    while t >= align:
        if dim % t == 0:
            return t
        t -= align
    return dim


# --------------------------- fc2: Linear/ReLU x2 ----------------------------

def _fc2_kernel(x_ref, w1_ref, b1_ref, w2_ref, b2_ref, o_ref):
    x = x_ref[...].astype(jnp.bfloat16)
    h = jnp.dot(x, w1_ref[...], preferred_element_type=jnp.float32) + b1_ref[...]
    h = jnp.maximum(h, 0.0)
    y = jnp.dot(h.astype(jnp.bfloat16), w2_ref[...],
                preferred_element_type=jnp.float32) + b2_ref[...]
    o_ref[...] = jnp.maximum(y, 0.0)


def fc2(x, w1, b1, w2, b2, *, tile_m_cap=256):
    M, D = x.shape
    tile_m = _pick_tile(M, tile_m_cap, 8)
    return pl.pallas_call(
        _fc2_kernel,
        out_shape=jax.ShapeDtypeStruct((M, D), jnp.float32),
        grid=(M // tile_m,),
        in_specs=[pl.BlockSpec((tile_m, D), lambda i: (i, 0)),
                  pl.BlockSpec((D, D), lambda i: (0, 0)),
                  pl.BlockSpec((1, D), lambda i: (0, 0)),
                  pl.BlockSpec((D, D), lambda i: (0, 0)),
                  pl.BlockSpec((1, D), lambda i: (0, 0))],
        out_specs=pl.BlockSpec((tile_m, D), lambda i: (i, 0)),
        compiler_params=_cparams("parallel"),
    )(x, w1, b1.reshape(1, D), w2, b2.reshape(1, D))


# ------------------- back-projection: x @ sys^T (*coef) + b ------------------

def _backproj_kernel(x_ref, a_ref, b_ref, o_ref, acc_ref):
    k = pl.program_id(1)
    part = jax.lax.dot_general(
        x_ref[...].astype(jnp.bfloat16), a_ref[...],
        (((1,), (1,)), ((), ())), preferred_element_type=jnp.float32)

    @pl.when(k == 0)
    def _():
        acc_ref[...] = part

    @pl.when(k > 0)
    def _():
        acc_ref[...] += part

    @pl.when(k == pl.num_programs(1) - 1)
    def _():
        o_ref[...] = acc_ref[...] + b_ref[...]


def back_proj(x, sys_bf16, bias, *, tile_n_cap=512, tile_k_cap=2048):
    M, K = x.shape                  # (b*c, num_views*num_det)
    N = sys_bf16.shape[0]           # prod(image_size); coef already folded into sys
    tile_n = _pick_tile(N, tile_n_cap, 128)
    tile_k = _pick_tile(K, tile_k_cap, 128)
    return pl.pallas_call(
        _backproj_kernel,
        out_shape=jax.ShapeDtypeStruct((M, N), jnp.float32),
        grid=(N // tile_n, K // tile_k),   # K innermost (reduction, "arbitrary")
        in_specs=[pl.BlockSpec((M, tile_k), lambda j, k: (0, k)),
                  pl.BlockSpec((tile_n, tile_k), lambda j, k: (j, k)),
                  pl.BlockSpec((1, tile_n), lambda j, k: (0, j))],
        out_specs=pl.BlockSpec((M, tile_n), lambda j, k: (0, j)),
        scratch_shapes=[pltpu.VMEM((M, tile_n), jnp.float32)],
        compiler_params=_cparams("parallel", "arbitrary"),
    )(x, sys_bf16, bias.reshape(1, N))


# ----------------------------- fused conv kernels ----------------------------

def _fill_padded(pad_ref, x_hwc, H, W):
    """Zero the (H+2, W+2, C) scratch and write x into its interior (padding=1)."""
    pad_ref[...] = jnp.zeros_like(pad_ref)
    pad_ref[pl.ds(1, H), pl.ds(1, W), :] = x_hwc


def _fill_patches(patch_ref, pad_ref, H, W, C):
    """im2col: patch[:, (3*ky+kx)*C : +C] = padded[ky:ky+H, kx:kx+W, :]."""
    for ky in range(3):
        for kx in range(3):
            idx = ky * 3 + kx
            patch_ref[:, pl.ds(idx * C, C)] = (
                pad_ref[pl.ds(ky, H), pl.ds(kx, W), :].reshape(H * W, C))


def _conv_kernel(x_ref, w_ref, b_ref, o_ref, pad_ref, patch_ref, *,
                 H, W, Cin, Cout, apply_gn, apply_relu, eps):
    x = x_ref[0]                                            # (H, W, Cin) f32
    _fill_padded(pad_ref, x, H, W)
    _fill_patches(patch_ref, pad_ref, H, W, Cin)
    y = jnp.dot(patch_ref[...].astype(jnp.bfloat16), w_ref[...],
                preferred_element_type=jnp.float32) + b_ref[...]   # (H*W, Cout)
    if apply_gn:   # GroupNorm(num_groups=1, affine=False) over the whole sample
        mean = jnp.mean(y, axis=(0, 1), keepdims=True)
        var = jnp.mean((y - mean) ** 2, axis=(0, 1), keepdims=True)
        y = (y - mean) * jax.lax.rsqrt(var + eps)
    if apply_relu:
        y = jnp.maximum(y, 0.0)
    o_ref[...] = y.reshape(1, H, W, Cout)


def conv3x3(x_nhwc, w_2d, b, *, apply_gn=False, apply_relu=False):
    N, H, W, Cin = x_nhwc.shape
    Cout = w_2d.shape[-1]
    kern = functools.partial(_conv_kernel, H=H, W=W, Cin=Cin, Cout=Cout,
                             apply_gn=apply_gn, apply_relu=apply_relu, eps=1e-5)
    return pl.pallas_call(
        kern,
        out_shape=jax.ShapeDtypeStruct((N, H, W, Cout), jnp.float32),
        grid=(N,),
        in_specs=[pl.BlockSpec((1, H, W, Cin), lambda n: (n, 0, 0, 0)),
                  pl.BlockSpec((9 * Cin, Cout), lambda n: (0, 0)),
                  pl.BlockSpec((1, Cout), lambda n: (0, 0))],
        out_specs=pl.BlockSpec((1, H, W, Cout), lambda n: (n, 0, 0, 0)),
        scratch_shapes=[pltpu.VMEM((H + 2, W + 2, Cin), jnp.float32),
                        pltpu.VMEM((H * W, 9 * Cin), jnp.float32)],
        compiler_params=_cparams("parallel"),
    )(x_nhwc, w_2d, b.reshape(1, Cout))


def _resblock_kernel(x_ref, w1_ref, b1_ref, w2_ref, b2_ref, o_ref,
                     pad_ref, patch_ref, *, H, W, C):
    """y = relu(x + conv2(relu(conv1(x)+b1)) + b2), both convs 3x3 pad=1."""
    x = x_ref[0]                                            # (H, W, C) f32
    # conv1 + relu
    _fill_padded(pad_ref, x, H, W)
    _fill_patches(patch_ref, pad_ref, H, W, C)
    h = jnp.dot(patch_ref[...].astype(jnp.bfloat16), w1_ref[...],
                preferred_element_type=jnp.float32) + b1_ref[...]
    h = jnp.maximum(h, 0.0)                                 # (H*W, C)
    # conv2 + residual + relu
    _fill_padded(pad_ref, h.reshape(H, W, C), H, W)
    _fill_patches(patch_ref, pad_ref, H, W, C)
    y = jnp.dot(patch_ref[...].astype(jnp.bfloat16), w2_ref[...],
                preferred_element_type=jnp.float32) + b2_ref[...]
    y = jnp.maximum(y + x.reshape(H * W, C), 0.0)
    o_ref[...] = y.reshape(1, H, W, C)


def res_block(x_nhwc, w1, b1, w2, b2):
    N, H, W, C = x_nhwc.shape
    kern = functools.partial(_resblock_kernel, H=H, W=W, C=C)
    return pl.pallas_call(
        kern,
        out_shape=jax.ShapeDtypeStruct((N, H, W, C), jnp.float32),
        grid=(N,),
        in_specs=[pl.BlockSpec((1, H, W, C), lambda n: (n, 0, 0, 0)),
                  pl.BlockSpec((9 * C, C), lambda n: (0, 0)),
                  pl.BlockSpec((1, C), lambda n: (0, 0)),
                  pl.BlockSpec((9 * C, C), lambda n: (0, 0)),
                  pl.BlockSpec((1, C), lambda n: (0, 0))],
        out_specs=pl.BlockSpec((1, H, W, C), lambda n: (n, 0, 0, 0)),
        scratch_shapes=[pltpu.VMEM((H + 2, W + 2, C), jnp.float32),
                        pltpu.VMEM((H * W, 9 * C), jnp.float32)],
        compiler_params=_cparams("parallel"),
    )(x_nhwc, w1, b1.reshape(1, C), w2, b2.reshape(1, C))


# ------------------------- parameter construction ---------------------------

def xavier_uniform(key, shape, fan_in, fan_out):
    bound = math.sqrt(6.0 / (fan_in + fan_out))
    return jax.random.uniform(key, shape, jnp.float32, -bound, bound)


def build_params(key, *, num_det, num_views, image_size, in_channel,
                 out_channel, hid_channel, depth, coef):
    H, W = image_size
    n_img = H * W
    hw = num_views * num_det
    keys = jax.random.split(key, 6 + 2 * (depth - 2))
    ki = iter(keys)

    params = {}
    # Linear(num_det, num_det) x2 — (in, out) layout, bf16 weights, zero f32 bias.
    params['w1'] = xavier_uniform(next(ki), (num_det, num_det),
                                  num_det, num_det).astype(jnp.bfloat16)
    params['b1'] = jnp.zeros((num_det,), jnp.float32)
    params['w2'] = xavier_uniform(next(ki), (num_det, num_det),
                                  num_det, num_det).astype(jnp.bfloat16)
    params['b2'] = jnp.zeros((num_det,), jnp.float32)

    # Synthetic sparse-ish system matrix, transposed: (prod(image_size), hw).
    vals = jax.random.uniform(next(ki), (n_img, hw), jnp.float32)
    mask = jax.random.uniform(next(ki), (n_img, hw), jnp.float32) < 0.1
    sys_f32 = jnp.where(mask, vals, 0.0)
    params['sys'] = (sys_f32 * coef).astype(jnp.bfloat16)   # coef folded in
    params['bp_bias'] = jnp.zeros((n_img,), jnp.float32)     # learn=True -> zero bias

    def conv_w(k, cin, cout):   # HWIO xavier -> (9*cin, cout) bf16 (im2col layout)
        w = xavier_uniform(k, (3, 3, cin, cout), cin * 9, cout * 9)
        return w.reshape(9 * cin, cout).astype(jnp.bfloat16)

    params['conv_in_w'] = conv_w(next(ki), in_channel, hid_channel)
    params['conv_in_b'] = jnp.zeros((hid_channel,), jnp.float32)
    blocks = []
    for _ in range(depth - 2):
        w1c = conv_w(next(ki), hid_channel, hid_channel)
        w2c = conv_w(next(ki), hid_channel, hid_channel)
        blocks.append((w1c, jnp.zeros((hid_channel,), jnp.float32),
                       w2c, jnp.zeros((hid_channel,), jnp.float32)))
    params['blocks'] = blocks
    params['conv_out_w'] = conv_w(next(ki), hid_channel, out_channel)
    params['conv_out_b'] = jnp.zeros((out_channel,), jnp.float32)
    return params


# ------------------------------ forward pass --------------------------------

def iradon_map_forward(p, params, image_size):
    b, c, h, w = p.shape
    # Linear -> ReLU -> Linear -> ReLU on the detector dimension.
    x = p.reshape(b * c * h, w)
    x = fc2(x, params['w1'], params['b1'], params['w2'], params['b2'])

    # back_proj_net: (b*c, h*w) @ sys^T (coef folded) + bias -> (b, c, H, W)
    x = x.reshape(b * c, h * w)
    x = back_proj(x, params['sys'], params['bp_bias'])
    H, W = image_size
    x = x.reshape(b, c, H, W).transpose(0, 2, 3, 1)          # NCHW -> NHWC

    # rcnn: fused conv+GN+ReLU, fused residual blocks, final conv.
    x = conv3x3(x, params['conv_in_w'], params['conv_in_b'],
                apply_gn=True, apply_relu=True)
    for (w1c, b1c, w2c, b2c) in params['blocks']:
        x = res_block(x, w1c, b1c, w2c, b2c)
    x = conv3x3(x, params['conv_out_w'], params['conv_out_b'])
    return x.transpose(0, 3, 1, 2)                           # NHWC -> NCHW


# ---------------------------------- main -------------------------------------

if __name__ == "__main__":
    batch = 2
    in_channel, out_channel = 1, 1
    hid_channel, depth = 8, 4
    num_views, num_det = 8, 16
    image_size = (16, 16)

    # views = arange(num_views) * 2*pi / num_views ; coef = (v[-1]-v[0])/(2*(n-1))
    views_last = (num_views - 1) * 2.0 * math.pi / num_views
    coef = views_last / (2.0 * (num_views - 1))

    key = jax.random.PRNGKey(0)
    kp, kx = jax.random.split(key)
    params = build_params(kp, num_det=num_det, num_views=num_views,
                          image_size=image_size, in_channel=in_channel,
                          out_channel=out_channel, hid_channel=hid_channel,
                          depth=depth, coef=coef)

    p = jax.random.normal(kx, (batch, in_channel, num_views, num_det), jnp.float32)

    fwd = jax.jit(functools.partial(iradon_map_forward, image_size=image_size))
    out = fwd(p, params)
    out = jax.block_until_ready(out)
    assert out.shape == (batch, out_channel, image_size[0], image_size[1])
    assert out.dtype == jnp.float32
    print("KERNEL_OK")
</pallas_src>

<mosaic_0001>
module attributes {stable_mosaic.version = 11 : i64} {
  func.func @_backproj_kernel(%arg0: i32, %arg1: i32, %arg2: memref<2x128xf32, #tpu.memory_space<vmem>>, %arg3: memref<256x128xbf16, #tpu.memory_space<vmem>>, %arg4: memref<1x256xf32, #tpu.memory_space<vmem>>, %arg5: memref<2x256xf32, #tpu.memory_space<vmem>>, %arg6: memref<2x256xf32, #tpu.memory_space<vmem>>) attributes {dimension_semantics = [#tpu.dimension_semantics<parallel>, #tpu.dimension_semantics<arbitrary>], iteration_bounds = array<i64: 1, 1>, scalar_prefetch = 0 : i64, scratch_operands = 1 : i64, tpu.core_type = #tpu.core_type<tc>, window_params = [{transform_indices = @transform_0, window_bounds = array<i64: 2, 128>}, {transform_indices = @transform_1, window_bounds = array<i64: 256, 128>}, {transform_indices = @transform_2, window_bounds = array<i64: 1, 256>}, {transform_indices = @transform_3, window_bounds = array<i64: 2, 256>}]} {
    %c0 = arith.constant 0 : index
    %c0_0 = arith.constant 0 : index
    %0 = vector.load %arg2[%c0, %c0_0] : memref<2x128xf32, #tpu.memory_space<vmem>>, vector<2x128xf32>
    %1 = arith.truncf %0 : vector<2x128xf32> to vector<2x128xbf16>
    %c0_1 = arith.constant 0 : index
    %c0_2 = arith.constant 0 : index
    %2 = vector.load %arg3[%c0_1, %c0_2] : memref<256x128xbf16, #tpu.memory_space<vmem>>, vector<256x128xbf16>
    %cst = arith.constant dense<0.000000e+00> : vector<2x256xf32>
    %3 = tpu.matmul %1, %2, %cst {dimension_numbers = #tpu.dot_dimension_numbers<[1], [1], [0], [0], [0, 0, 1, 0], [], []>} : vector<2x128xbf16>, vector<256x128xbf16>, vector<2x256xf32> -> vector<2x256xf32>
    %c0_i32 = arith.constant 0 : i32
    %4 = arith.cmpi eq, %arg1, %c0_i32 : i32
    %5 = arith.extui %4 : i1 to i32
    %c0_i32_3 = arith.constant 0 : i32
    %6 = arith.cmpi ne, %5, %c0_i32_3 : i32
    scf.if %6 {
      %c0_8 = arith.constant 0 : index
      %c0_9 = arith.constant 0 : index
      %13 = vector.load %arg6[%c0_8, %c0_9] : memref<2x256xf32, #tpu.memory_space<vmem>>, vector<2x256xf32>
      tpu.vector_store %arg6[%c0_8, %c0_9], %3 {strides = array<i32>} : memref<2x256xf32, #tpu.memory_space<vmem>>, vector<2x256xf32>,
    } else {
    }
    %c0_i32_4 = arith.constant 0 : i32
    %7 = arith.cmpi sgt, %arg1, %c0_i32_4 : i32
    %8 = arith.extui %7 : i1 to i32
    %c0_i32_5 = arith.constant 0 : i32
    %9 = arith.cmpi ne, %8, %c0_i32_5 : i32
    scf.if %9 {
      %c0_8 = arith.constant 0 : index
      %c0_9 = arith.constant 0 : index
      %13 = vector.load %arg6[%c0_8, %c0_9] : memref<2x256xf32, #tpu.memory_space<vmem>>, vector<2x256xf32>
      %14 = arith.addf %13, %3 : vector<2x256xf32>
      %c0_10 = arith.constant 0 : index
      %c0_11 = arith.constant 0 : index
      %15 = vector.load %arg6[%c0_10, %c0_11] : memref<2x256xf32, #tpu.memory_space<vmem>>, vector<2x256xf32>
      tpu.vector_store %arg6[%c0_10, %c0_11], %14 {strides = array<i32>} : memref<2x256xf32, #tpu.memory_space<vmem>>, vector<2x256xf32>,
    } else {
    }
    %c0_i32_6 = arith.constant 0 : i32
    %10 = arith.cmpi eq, %arg1, %c0_i32_6 : i32
    %11 = arith.extui %10 : i1 to i32
    %c0_i32_7 = arith.constant 0 : i32
    %12 = arith.cmpi ne, %11, %c0_i32_7 : i32
    scf.if %12 {
      %c0_8 = arith.constant 0 : index
      %c0_9 = arith.constant 0 : index
      %13 = vector.load %arg6[%c0_8, %c0_9] : memref<2x256xf32, #tpu.memory_space<vmem>>, vector<2x256xf32>
      %c0_10 = arith.constant 0 : index
      %c0_11 = arith.constant 0 : index
      %14 = vector.load %arg4[%c0_10, %c0_11] : memref<1x256xf32, #tpu.memory_space<vmem>>, vector<1x256xf32>
      %15 = vector.broadcast %14 : vector<1x256xf32> to vector<2x256xf32>
      %16 = arith.addf %13, %15 : vector<2x256xf32>
      %c0_12 = arith.constant 0 : index
      %c0_13 = arith.constant 0 : index
      %17 = vector.load %arg5[%c0_12, %c0_13] : memref<2x256xf32, #tpu.memory_space<vmem>>, vector<2x256xf32>
      tpu.vector_store %arg5[%c0_12, %c0_13], %16 {strides = array<i32>} : memref<2x256xf32, #tpu.memory_space<vmem>>, vector<2x256xf32>,
    } else {
    }
    return
  }
  func.func @transform_0(%arg0: i32, %arg1: i32) -> (i32, i32) {
    %c0_i32 = arith.constant 0 : i32
    %c0_i32_0 = arith.constant 0 : i32
    return %c0_i32, %arg1 : i32, i32
  }
  func.func @transform_1(%arg0: i32, %arg1: i32) -> (i32, i32) {
    %c0_i32 = arith.constant 0 : i32
    return %arg0, %arg1 : i32, i32
  }
  func.func @transform_2(%arg0: i32, %arg1: i32) -> (i32, i32) {
    %c0_i32 = arith.constant 0 : i32
    %c0_i32_0 = arith.constant 0 : i32
    return %c0_i32, %arg0 : i32, i32
  }
  func.func @transform_3(%arg0: i32, %arg1: i32) -> (i32, i32) {
    %c0_i32 = arith.constant 0 : i32
    %c0_i32_0 = arith.constant 0 : i32
    return %c0_i32, %arg0 : i32, i32
  }
}

module attributes {stable_mosaic.version = 11 : i64} {
  func.func @_fc2_kernel(%arg0: i32, %arg1: memref<16x16xf32, #tpu.memory_space<vmem>>, %arg2: memref<16x16xbf16, #tpu.memory_space<vmem>>, %arg3: memref<1x16xf32, #tpu.memory_space<vmem>>, %arg4: memref<16x16xbf16, #tpu.memory_space<vmem>>, %arg5: memref<1x16xf32, #tpu.memory_space<vmem>>, %arg6: memref<16x16xf32, #tpu.memory_space<vmem>>) attributes {dimension_semantics = [#tpu.dimension_semantics<parallel>], iteration_bounds = array<i64: 1>, scalar_prefetch = 0 : i64, scratch_operands = 0 : i64, tpu.core_type = #tpu.core_type<tc>, window_params = [{transform_indices = @transform_0, window_bounds = array<i64: 16, 16>}, {pipeline_mode = #tpu.pipeline_mode<synchronous>, transform_indices = @transform_1, window_bounds = array<i64: 16, 16>}, {pipeline_mode = #tpu.pipeline_mode<synchronous>, transform_indices = @transform_2, window_bounds = array<i64: 1, 16>}, {pipeline_mode = #tpu.pipeline_mode<synchronous>, transform_indices = @transform_3, window_bounds = array<i64: 16, 16>}, {pipeline_mode = #tpu.pipeline_mode<synchronous>, transform_indices = @transform_4, window_bounds = array<i64: 1, 16>}, {transform_indices = @transform_5, window_bounds = array<i64: 16, 16>}]} {
    %c0 = arith.constant 0 : index
    %c0_0 = arith.constant 0 : index
    %0 = vector.load %arg1[%c0, %c0_0] : memref<16x16xf32, #tpu.memory_space<vmem>>, vector<16x16xf32>
    %1 = arith.truncf %0 : vector<16x16xf32> to vector<16x16xbf16>
    %c0_1 = arith.constant 0 : index
    %c0_2 = arith.constant 0 : index
    %2 = vector.load %arg2[%c0_1, %c0_2] : memref<16x16xbf16, #tpu.memory_space<vmem>>, vector<16x16xbf16>
    %cst = arith.constant dense<0.000000e+00> : vector<16x16xf32>
    %3 = tpu.matmul %1, %2, %cst {dimension_numbers = #tpu.dot_dimension_numbers<[1], [0], [0], [1], [0, 0, 1, 1], [], []>} : vector<16x16xbf16>, vector<16x16xbf16>, vector<16x16xf32> -> vector<16x16xf32>
    %c0_3 = arith.constant 0 : index
    %c0_4 = arith.constant 0 : index
    %4 = vector.load %arg3[%c0_3, %c0_4] : memref<1x16xf32, #tpu.memory_space<vmem>>, vector<1x16xf32>
    %5 = vector.broadcast %4 : vector<1x16xf32> to vector<16x16xf32>
    %6 = arith.addf %3, %5 : vector<16x16xf32>
    %cst_5 = arith.constant 0.000000e+00 : f32
    %7 = vector.broadcast %cst_5 : f32 to vector<16x16xf32>
    %8 = arith.maximumf %6, %7 : vector<16x16xf32>
    %9 = arith.truncf %8 : vector<16x16xf32> to vector<16x16xbf16>
    %c0_6 = arith.constant 0 : index
    %c0_7 = arith.constant 0 : index
    %10 = vector.load %arg4[%c0_6, %c0_7] : memref<16x16xbf16, #tpu.memory_space<vmem>>, vector<16x16xbf16>
    %cst_8 = arith.constant dense<0.000000e+00> : vector<16x16xf32>
    %11 = tpu.matmul %9, %10, %cst_8 {dimension_numbers = #tpu.dot_dimension_numbers<[1], [0], [0], [1], [0, 0, 1, 1], [], []>} : vector<16x16xbf16>, vector<16x16xbf16>, vector<16x16xf32> -> vector<16x16xf32>
    %c0_9 = arith.constant 0 : index
    %c0_10 = arith.constant 0 : index
    %12 = vector.load %arg5[%c0_9, %c0_10] : memref<1x16xf32, #tpu.memory_space<vmem>>, vector<1x16xf32>
    %13 = vector.broadcast %12 : vector<1x16xf32> to vector<16x16xf32>
    %14 = arith.addf %11, %13 : vector<16x16xf32>
    %cst_11 = arith.constant 0.000000e+00 : f32
    %15 = vector.broadcast %cst_11 : f32 to vector<16x16xf32>
    %16 = arith.maximumf %14, %15 : vector<16x16xf32>
    %c0_12 = arith.constant 0 : index
    %c0_13 = arith.constant 0 : index
    %17 = vector.load %arg6[%c0_12, %c0_13] : memref<16x16xf32, #tpu.memory_space<vmem>>, vector<16x16xf32>
    tpu.vector_store %arg6[%c0_12, %c0_13], %16 {strides = array<i32>} : memref<16x16xf32, #tpu.memory_space<vmem>>, vector<16x16xf32>,
    return
  }
  func.func @transform_0(%arg0: i32) -> (i32, i32) {
    %c0_i32 = arith.constant 0 : i32
    %c0_i32_0 = arith.constant 0 : i32
    return %arg0, %c0_i32 : i32, i32
  }
  func.func @transform_1(%arg0: i32) -> (i32, i32) {
    %c0_i32 = arith.constant 0 : i32
    %c0_i32_0 = arith.constant 0 : i32
    %c0_i32_1 = arith.constant 0 : i32
    return %c0_i32, %c0_i32_0 : i32, i32
  }
  func.func @transform_2(%arg0: i32) -> (i32, i32) {
    %c0_i32 = arith.constant 0 : i32
    %c0_i32_0 = arith.constant 0 : i32
    %c0_i32_1 = arith.constant 0 : i32
    return %c0_i32, %c0_i32_0 : i32, i32
  }
  func.func @transform_3(%arg0: i32) -> (i32, i32) {
    %c0_i32 = arith.constant 0 : i32
    %c0_i32_0 = arith.constant 0 : i32
    %c0_i32_1 = arith.constant 0 : i32
    return %c0_i32, %c0_i32_0 : i32, i32
  }
  func.func @transform_4(%arg0: i32) -> (i32, i32) {
    %c0_i32 = arith.constant 0 : i32
    %c0_i32_0 = arith.constant 0 : i32
    %c0_i32_1 = arith.constant 0 : i32
    return %c0_i32, %c0_i32_0 : i32, i32
  }
  func.func @transform_5(%arg0: i32) -> (i32, i32) {
    %c0_i32 = arith.constant 0 : i32
    %c0_i32_0 = arith.constant 0 : i32
    return %arg0, %c0_i32 : i32, i32
  }
}

module attributes {stable_mosaic.version = 11 : i64} {
  func.func @_conv_kernel(%arg0: i32, %arg1: memref<1x16x16x1xf32, #tpu.memory_space<vmem>>, %arg2: memref<9x8xbf16, #tpu.memory_space<vmem>>, %arg3: memref<1x8xf32, #tpu.memory_space<vmem>>, %arg4: memref<1x16x16x8xf32, #tpu.memory_space<vmem>>, %arg5: memref<18x18x1xf32, #tpu.memory_space<vmem>>, %arg6: memref<256x9xf32, #tpu.memory_space<vmem>>) attributes {dimension_semantics = [#tpu.dimension_semantics<parallel>], iteration_bounds = array<i64: 2>, scalar_prefetch = 0 : i64, scratch_operands = 2 : i64, tpu.core_type = #tpu.core_type<tc>, window_params = [{transform_indices = @transform_0, window_bounds = array<i64: 1, 16, 16, 1>}, {pipeline_mode = #tpu.pipeline_mode<synchronous>, transform_indices = @transform_1, window_bounds = array<i64: 9, 8>}, {pipeline_mode = #tpu.pipeline_mode<synchronous>, transform_indices = @transform_2, window_bounds = array<i64: 1, 8>}, {transform_indices = @transform_3, window_bounds = array<i64: 1, 16, 16, 8>}]} {
    %c0 = arith.constant 0 : index
    %c0_0 = arith.constant 0 : index
    %c0_1 = arith.constant 0 : index
    %c0_2 = arith.constant 0 : index
    %0 = vector.load %arg1[%c0, %c0_0, %c0_1, %c0_2] : memref<1x16x16x1xf32, #tpu.memory_space<vmem>>, vector<1x16x16x1xf32>
    %1 = vector.shape_cast %0 : vector<1x16x16x1xf32> to vector<16x16x1xf32>
    %cst = arith.constant 0.000000e+00 : f32
    %2 = vector.broadcast %cst : f32 to vector<18x18x1xf32>
    %c0_3 = arith.constant 0 : index
    %c0_4 = arith.constant 0 : index
    %c0_5 = arith.constant 0 : index
    %3 = vector.load %arg5[%c0_3, %c0_4, %c0_5] : memref<18x18x1xf32, #tpu.memory_space<vmem>>, vector<18x18x1xf32>
    tpu.vector_store %arg5[%c0_3, %c0_4, %c0_5], %2 {strides = array<i32>} : memref<18x18x1xf32, #tpu.memory_space<vmem>>, vector<18x18x1xf32>,
    %c1 = arith.constant 1 : index
    %c1_6 = arith.constant 1 : index
    %c0_7 = arith.constant 0 : index
    %4 = vector.load %arg5[%c1, %c1_6, %c0_7] : memref<18x18x1xf32, #tpu.memory_space<vmem>>, vector<16x16x1xf32>
    tpu.vector_store %arg5[%c1, %c1_6, %c0_7], %1 {strides = array<i32>} : memref<18x18x1xf32, #tpu.memory_space<vmem>>, vector<16x16x1xf32>,
    %c0_8 = arith.constant 0 : index
    %c0_9 = arith.constant 0 : index
    %c0_10 = arith.constant 0 : index
    %5 = vector.load %arg5[%c0_8, %c0_9, %c0_10] : memref<18x18x1xf32, #tpu.memory_space<vmem>>, vector<16x16x1xf32>
    %6 = vector.shape_cast %5 : vector<16x16x1xf32> to vector<256x1xf32>
    %c0_11 = arith.constant 0 : index
    %c0_12 = arith.constant 0 : index
    %7 = vector.load %arg6[%c0_11, %c0_12] : memref<256x9xf32, #tpu.memory_space<vmem>>, vector<256x1xf32>
    tpu.vector_store %arg6[%c0_11, %c0_12], %6 {strides = array<i32>} : memref<256x9xf32, #tpu.memory_space<vmem>>, vector<256x1xf32>,
    %c0_13 = arith.constant 0 : index
    %c1_14 = arith.constant 1 : index
    %c0_15 = arith.constant 0 : index
    %8 = vector.load %arg5[%c0_13, %c1_14, %c0_15] : memref<18x18x1xf32, #tpu.memory_space<vmem>>, vector<16x16x1xf32>
    %9 = vector.shape_cast %8 : vector<16x16x1xf32> to vector<256x1xf32>
    %c0_16 = arith.constant 0 : index
    %c1_17 = arith.constant 1 : index
    %10 = vector.load %arg6[%c0_16, %c1_17] : memref<256x9xf32, #tpu.memory_space<vmem>>, vector<256x1xf32>
    tpu.vector_store %arg6[%c0_16, %c1_17], %9 {strides = array<i32>} : memref<256x9xf32, #tpu.memory_space<vmem>>, vector<256x1xf32>,
    %c0_18 = arith.constant 0 : index
    %c2 = arith.constant 2 : index
    %c0_19 = arith.constant 0 : index
    %11 = vector.load %arg5[%c0_18, %c2, %c0_19] : memref<18x18x1xf32, #tpu.memory_space<vmem>>, vector<16x16x1xf32>
    %12 = vector.shape_cast %11 : vector<16x16x1xf32> to vector<256x1xf32>
    %c0_20 = arith.constant 0 : index
    %c2_21 = arith.constant 2 : index
    %13 = vector.load %arg6[%c0_20, %c2_21] : memref<256x9xf32, #tpu.memory_space<vmem>>, vector<256x1xf32>
    tpu.vector_store %arg6[%c0_20, %c2_21], %12 {strides = array<i32>} : memref<256x9xf32, #tpu.memory_space<vmem>>, vector<256x1xf32>,
    %c1_22 = arith.constant 1 : index
    %c0_23 = arith.constant 0 : index
    %c0_24 = arith.constant 0 : index
    %14 = vector.load %arg5[%c1_22, %c0_23, %c0_24] : memref<18x18x1xf32, #tpu.memory_space<vmem>>, vector<16x16x1xf32>
    %15 = vector.shape_cast %14 : vector<16x16x1xf32> to vector<256x1xf32>
    %c0_25 = arith.constant 0 : index
    %c3 = arith.constant 3 : index
    %16 = vector.load %arg6[%c0_25, %c3] : memref<256x9xf32, #tpu.memory_space<vmem>>, vector<256x1xf32>
    tpu.vector_store %arg6[%c0_25, %c3], %15 {strides = array<i32>} : memref<256x9xf32, #tpu.memory_space<vmem>>, vector<256x1xf32>,
    %c1_26 = arith.constant 1 : index
    %c1_27 = arith.constant 1 : index
    %c0_28 = arith.constant 0 : index
    %17 = vector.load %arg5[%c1_26, %c1_27, %c0_28] : memref<18x18x1xf32, #tpu.memory_space<vmem>>, vector<16x16x1xf32>
    %18 = vector.shape_cast %17 : vector<16x16x1xf32> to vector<256x1xf32>
    %c0_29 = arith.constant 0 : index
    %c4 = arith.constant 4 : index
    %19 = vector.load %arg6[%c0_29, %c4] : memref<256x9xf32, #tpu.memory_space<vmem>>, vector<256x1xf32>
    tpu.vector_store %arg6[%c0_29, %c4], %18 {strides = array<i32>} : memref<256x9xf32, #tpu.memory_space<vmem>>, vector<256x1xf32>,
    %c1_30 = arith.constant 1 : index
    %c2_31 = arith.constant 2 : index
    %c0_32 = arith.constant 0 : index
    %20 = vector.load %arg5[%c1_30, %c2_31, %c0_32] : memref<18x18x1xf32, #tpu.memory_space<vmem>>, vector<16x16x1xf32>
    %21 = vector.shape_cast %20 : vector<16x16x1xf32> to vector<256x1xf32>
    %c0_33 = arith.constant 0 : index
    %c5 = arith.constant 5 : index
    %22 = vector.load %arg6[%c0_33, %c5] : memref<256x9xf32, #tpu.memory_space<vmem>>, vector<256x1xf32>
    tpu.vector_store %arg6[%c0_33, %c5], %21 {strides = array<i32>} : memref<256x9xf32, #tpu.memory_space<vmem>>, vector<256x1xf32>,
    %c2_34 = arith.constant 2 : index
    %c0_35 = arith.constant 0 : index
    %c0_36 = arith.constant 0 : index
    %23 = vector.load %arg5[%c2_34, %c0_35, %c0_36] : memref<18x18x1xf32, #tpu.memory_space<vmem>>, vector<16x16x1xf32>
    %24 = vector.shape_cast %23 : vector<16x16x1xf32> to vector<256x1xf32>
    %c0_37 = arith.constant 0 : index
    %c6 = arith.constant 6 : index
    %25 = vector.load %arg6[%c0_37, %c6] : memref<256x9xf32, #tpu.memory_space<vmem>>, vector<256x1xf32>
    tpu.vector_store %arg6[%c0_37, %c6], %24 {strides = array<i32>} : memref<256x9xf32, #tpu.memory_space<vmem>>, vector<256x1xf32>,
    %c2_38 = arith.constant 2 : index
    %c1_39 = arith.constant 1 : index
    %c0_40 = arith.constant 0 : index
    %26 = vector.load %arg5[%c2_38, %c1_39, %c0_40] : memref<18x18x1xf32, #tpu.memory_space<vmem>>, vector<16x16x1xf32>
    %27 = vector.shape_cast %26 : vector<16x16x1xf32> to vector<256x1xf32>
    %c0_41 = arith.constant 0 : index
    %c7 = arith.constant 7 : index
    %28 = vector.load %arg6[%c0_41, %c7] : memref<256x9xf32, #tpu.memory_space<vmem>>, vector<256x1xf32>
    tpu.vector_store %arg6[%c0_41, %c7], %27 {strides = array<i32>} : memref<256x9xf32, #tpu.memory_space<vmem>>, vector<256x1xf32>,
    %c2_42 = arith.constant 2 : index
    %c2_43 = arith.constant 2 : index
    %c0_44 = arith.constant 0 : index
    %29 = vector.load %arg5[%c2_42, %c2_43, %c0_44] : memref<18x18x1xf32, #tpu.memory_space<vmem>>, vector<16x16x1xf32>
    %30 = vector.shape_cast %29 : vector<16x16x1xf32> to vector<256x1xf32>
    %c0_45 = arith.constant 0 : index
    %c8 = arith.constant 8 : index
    %31 = vector.load %arg6[%c0_45, %c8] : memref<256x9xf32, #tpu.memory_space<vmem>>, vector<256x1xf32>
    tpu.vector_store %arg6[%c0_45, %c8], %30 {strides = array<i32>} : memref<256x9xf32, #tpu.memory_space<vmem>>, vector<256x1xf32>,
    %c0_46 = arith.constant 0 : index
    %c0_47 = arith.constant 0 : index
    %32 = vector.load %arg6[%c0_46, %c0_47] : memref<256x9xf32, #tpu.memory_space<vmem>>, vector<256x9xf32>
    %33 = arith.truncf %32 : vector<256x9xf32> to vector<256x9xbf16>
    %c0_48 = arith.constant 0 : index
    %c0_49 = arith.constant 0 : index
    %34 = vector.load %arg2[%c0_48, %c0_49] : memref<9x8xbf16, #tpu.memory_space<vmem>>, vector<9x8xbf16>
    %cst_50 = arith.constant dense<0.000000e+00> : vector<256x8xf32>
    %35 = tpu.matmul %33, %34, %cst_50 {dimension_numbers = #tpu.dot_dimension_numbers<[1], [0], [0], [1], [0, 0, 1, 1], [], []>} : vector<256x9xbf16>, vector<9x8xbf16>, vector<256x8xf32> -> vector<256x8xf32>
    %c0_51 = arith.constant 0 : index
    %c0_52 = arith.constant 0 : index
    %36 = vector.load %arg3[%c0_51, %c0_52] : memref<1x8xf32, #tpu.memory_space<vmem>>, vector<1x8xf32>
    %37 = vector.broadcast %36 : vector<1x8xf32> to vector<256x8xf32>
    %38 = arith.addf %35, %37 : vector<256x8xf32>
    %39 = vector.shape_cast %38 : vector<256x8xf32> to vector<1x256x8xf32>
    %cst_53 = arith.constant dense<0.000000e+00> : vector<1xf32>
    %40 = vector.multi_reduction <add>, %39, %cst_53 [1, 2] : vector<1x256x8xf32> to vector<1xf32>
    %41 = vector.shape_cast %40 : vector<1xf32> to vector<1x1x1xf32>
    %42 = vector.extract %41[0, 0, 0] : f32 from vector<1x1x1xf32>
    %43 = vector.broadcast %42 : f32 to vector<1x1xf32>
    %cst_54 = arith.constant 2.048000e+03 : f32
    %44 = vector.broadcast %cst_54 : f32 to vector<1x1xf32>
    %45 = arith.divf %43, %44 : vector<1x1xf32>
    %46 = vector.broadcast %45 : vector<1x1xf32> to vector<256x8xf32>
    %47 = arith.subf %38, %46 : vector<256x8xf32>
    %48 = arith.mulf %47, %47 : vector<256x8xf32>
    %49 = vector.shape_cast %48 : vector<256x8xf32> to vector<1x256x8xf32>
    %cst_55 = arith.constant dense<0.000000e+00> : vector<1xf32>
    %50 = vector.multi_reduction <add>, %49, %cst_55 [1, 2] : vector<1x256x8xf32> to vector<1xf32>
    %51 = vector.shape_cast %50 : vector<1xf32> to vector<1x1x1xf32>
    %52 = vector.extract %51[0, 0, 0] : f32 from vector<1x1x1xf32>
    %53 = vector.broadcast %52 : f32 to vector<1x1xf32>
    %cst_56 = arith.constant 2.048000e+03 : f32
    %54 = vector.broadcast %cst_56 : f32 to vector<1x1xf32>
    %55 = arith.divf %53, %54 : vector<1x1xf32>
    %56 = vector.broadcast %45 : vector<1x1xf32> to vector<256x8xf32>
    %57 = arith.subf %38, %56 : vector<256x8xf32>
    %cst_57 = arith.constant 9.99999974E-6 : f32
    %58 = vector.broadcast %cst_57 : f32 to vector<1x1xf32>
    %59 = arith.addf %55, %58 : vector<1x1xf32>
    %60 = math.rsqrt %59 : vector<1x1xf32>
    %61 = vector.broadcast %60 : vector<1x1xf32> to vector<256x8xf32>
    %62 = arith.mulf %57, %61 : vector<256x8xf32>
    %cst_58 = arith.constant 0.000000e+00 : f32
    %63 = vector.broadcast %cst_58 : f32 to vector<256x8xf32>
    %64 = arith.maximumf %62, %63 : vector<256x8xf32>
    %65 = vector.shape_cast %64 : vector<256x8xf32> to vector<1x16x16x8xf32>
    %c0_59 = arith.constant 0 : index
    %c0_60 = arith.constant 0 : index
    %c0_61 = arith.constant 0 : index
    %c0_62 = arith.constant 0 : index
    %66 = vector.load %arg4[%c0_59, %c0_60, %c0_61, %c0_62] : memref<1x16x16x8xf32, #tpu.memory_space<vmem>>, vector<1x16x16x8xf32>
    tpu.vector_store %arg4[%c0_59, %c0_60, %c0_61, %c0_62], %65 {strides = array<i32>} : memref<1x16x16x8xf32, #tpu.memory_space<vmem>>, vector<1x16x16x8xf32>,
    return
  }
  func.func @transform_0(%arg0: i32) -> (i32, i32, i32, i32) {
    %c0_i32 = arith.constant 0 : i32
    %c0_i32_0 = arith.constant 0 : i32
    %c0_i32_1 = arith.constant 0 : i32
    %c0_i32_2 = arith.constant 0 : i32
    return %arg0, %c0_i32, %c0_i32_0, %c0_i32_1 : i32, i32, i32, i32
  }
  func.func @transform_1(%arg0: i32) -> (i32, i32) {
    %c0_i32 = arith.constant 0 : i32
    %c0_i32_0 = arith.constant 0 : i32
    %c0_i32_1 = arith.constant 0 : i32
    return %c0_i32, %c0_i32_0 : i32, i32
  }
  func.func @transform_2(%arg0: i32) -> (i32, i32) {
    %c0_i32 = arith.constant 0 : i32
    %c0_i32_0 = arith.constant 0 : i32
    %c0_i32_1 = arith.constant 0 : i32
    return %c0_i32, %c0_i32_0 : i32, i32
  }
  func.func @transform_3(%arg0: i32) -> (i32, i32, i32, i32) {
    %c0_i32 = arith.constant 0 : i32
    %c0_i32_0 = arith.constant 0 : i32
    %c0_i32_1 = arith.constant 0 : i32
    %c0_i32_2 = arith.constant 0 : i32
    return %arg0, %c0_i32, %c0_i32_0, %c0_i32_1 : i32, i32, i32, i32
  }
}

module attributes {stable_mosaic.version = 11 : i64} {
  func.func @_resblock_kernel(%arg0: i32, %arg1: memref<1x16x16x8xf32, #tpu.memory_space<vmem>>, %arg2: memref<72x8xbf16, #tpu.memory_space<vmem>>, %arg3: memref<1x8xf32, #tpu.memory_space<vmem>>, %arg4: memref<72x8xbf16, #tpu.memory_space<vmem>>, %arg5: memref<1x8xf32, #tpu.memory_space<vmem>>, %arg6: memref<1x16x16x8xf32, #tpu.memory_space<vmem>>, %arg7: memref<18x18x8xf32, #tpu.memory_space<vmem>>, %arg8: memref<256x72xf32, #tpu.memory_space<vmem>>) attributes {dimension_semantics = [#tpu.dimension_semantics<parallel>], iteration_bounds = array<i64: 2>, scalar_prefetch = 0 : i64, scratch_operands = 2 : i64, tpu.core_type = #tpu.core_type<tc>, window_params = [{transform_indices = @transform_0, window_bounds = array<i64: 1, 16, 16, 8>}, {pipeline_mode = #tpu.pipeline_mode<synchronous>, transform_indices = @transform_1, window_bounds = array<i64: 72, 8>}, {pipeline_mode = #tpu.pipeline_mode<synchronous>, transform_indices = @transform_2, window_bounds = array<i64: 1, 8>}, {pipeline_mode = #tpu.pipeline_mode<synchronous>, transform_indices = @transform_3, window_bounds = array<i64: 72, 8>}, {pipeline_mode = #tpu.pipeline_mode<synchronous>, transform_indices = @transform_4, window_bounds = array<i64: 1, 8>}, {transform_indices = @transform_5, window_bounds = array<i64: 1, 16, 16, 8>}]} {
    %c0 = arith.constant 0 : index
    %c0_0 = arith.constant 0 : index
    %c0_1 = arith.constant 0 : index
    %c0_2 = arith.constant 0 : index
    %0 = vector.load %arg1[%c0, %c0_0, %c0_1, %c0_2] : memref<1x16x16x8xf32, #tpu.memory_space<vmem>>, vector<1x16x16x8xf32>
    %1 = vector.shape_cast %0 : vector<1x16x16x8xf32> to vector<16x16x8xf32>
    %cst = arith.constant 0.000000e+00 : f32
    %2 = vector.broadcast %cst : f32 to vector<18x18x8xf32>
    %c0_3 = arith.constant 0 : index
    %c0_4 = arith.constant 0 : index
    %c0_5 = arith.constant 0 : index
    %3 = vector.load %arg7[%c0_3, %c0_4, %c0_5] : memref<18x18x8xf32, #tpu.memory_space<vmem>>, vector<18x18x8xf32>
    tpu.vector_store %arg7[%c0_3, %c0_4, %c0_5], %2 {strides = array<i32>} : memref<18x18x8xf32, #tpu.memory_space<vmem>>, vector<18x18x8xf32>,
    %c1 = arith.constant 1 : index
    %c1_6 = arith.constant 1 : index
    %c0_7 = arith.constant 0 : index
    %4 = vector.load %arg7[%c1, %c1_6, %c0_7] : memref<18x18x8xf32, #tpu.memory_space<vmem>>, vector<16x16x8xf32>
    tpu.vector_store %arg7[%c1, %c1_6, %c0_7], %1 {strides = array<i32>} : memref<18x18x8xf32, #tpu.memory_space<vmem>>, vector<16x16x8xf32>,
    %c0_8 = arith.constant 0 : index
    %c0_9 = arith.constant 0 : index
    %c0_10 = arith.constant 0 : index
    %5 = vector.load %arg7[%c0_8, %c0_9, %c0_10] : memref<18x18x8xf32, #tpu.memory_space<vmem>>, vector<16x16x8xf32>
    %6 = vector.shape_cast %5 : vector<16x16x8xf32> to vector<256x8xf32>
    %c0_11 = arith.constant 0 : index
    %c0_12 = arith.constant 0 : index
    %7 = vector.load %arg8[%c0_11, %c0_12] : memref<256x72xf32, #tpu.memory_space<vmem>>, vector<256x8xf32>
    tpu.vector_store %arg8[%c0_11, %c0_12], %6 {strides = array<i32>} : memref<256x72xf32, #tpu.memory_space<vmem>>, vector<256x8xf32>,
    %c0_13 = arith.constant 0 : index
    %c1_14 = arith.constant 1 : index
    %c0_15 = arith.constant 0 : index
    %8 = vector.load %arg7[%c0_13, %c1_14, %c0_15] : memref<18x18x8xf32, #tpu.memory_space<vmem>>, vector<16x16x8xf32>
    %9 = vector.shape_cast %8 : vector<16x16x8xf32> to vector<256x8xf32>
    %c0_16 = arith.constant 0 : index
    %c8 = arith.constant 8 : index
    %10 = vector.load %arg8[%c0_16, %c8] : memref<256x72xf32, #tpu.memory_space<vmem>>, vector<256x8xf32>
    tpu.vector_store %arg8[%c0_16, %c8], %9 {strides = array<i32>} : memref<256x72xf32, #tpu.memory_space<vmem>>, vector<256x8xf32>,
    %c0_17 = arith.constant 0 : index
    %c2 = arith.constant 2 : index
    %c0_18 = arith.constant 0 : index
    %11 = vector.load %arg7[%c0_17, %c2, %c0_18] : memref<18x18x8xf32, #tpu.memory_space<vmem>>, vector<16x16x8xf32>
    %12 = vector.shape_cast %11 : vector<16x16x8xf32> to vector<256x8xf32>
    %c0_19 = arith.constant 0 : index
    %c16 = arith.constant 16 : index
    %13 = vector.load %arg8[%c0_19, %c16] : memref<256x72xf32, #tpu.memory_space<vmem>>, vector<256x8xf32>
    tpu.vector_store %arg8[%c0_19, %c16], %12 {strides = array<i32>} : memref<256x72xf32, #tpu.memory_space<vmem>>, vector<256x8xf32>,
    %c1_20 = arith.constant 1 : index
    %c0_21 = arith.constant 0 : index
    %c0_22 = arith.constant 0 : index
    %14 = vector.load %arg7[%c1_20, %c0_21, %c0_22] : memref<18x18x8xf32, #tpu.memory_space<vmem>>, vector<16x16x8xf32>
    %15 = vector.shape_cast %14 : vector<16x16x8xf32> to vector<256x8xf32>
    %c0_23 = arith.constant 0 : index
    %c24 = arith.constant 24 : index
    %16 = vector.load %arg8[%c0_23, %c24] : memref<256x72xf32, #tpu.memory_space<vmem>>, vector<256x8xf32>
    tpu.vector_store %arg8[%c0_23, %c24], %15 {strides = array<i32>} : memref<256x72xf32, #tpu.memory_space<vmem>>, vector<256x8xf32>,
    %c1_24 = arith.constant 1 : index
    %c1_25 = arith.constant 1 : index
    %c0_26 = arith.constant 0 : index
    %17 = vector.load %arg7[%c1_24, %c1_25, %c0_26] : memref<18x18x8xf32, #tpu.memory_space<vmem>>, vector<16x16x8xf32>
    %18 = vector.shape_cast %17 : vector<16x16x8xf32> to vector<256x8xf32>
    %c0_27 = arith.constant 0 : index
    %c32 = arith.constant 32 : index
    %19 = vector.load %arg8[%c0_27, %c32] : memref<256x72xf32, #tpu.memory_space<vmem>>, vector<256x8xf32>
    tpu.vector_store %arg8[%c0_27, %c32], %18 {strides = array<i32>} : memref<256x72xf32, #tpu.memory_space<vmem>>, vector<256x8xf32>,
    %c1_28 = arith.constant 1 : index
    %c2_29 = arith.constant 2 : index
    %c0_30 = arith.constant 0 : index
    %20 = vector.load %arg7[%c1_28, %c2_29, %c0_30] : memref<18x18x8xf32, #tpu.memory_space<vmem>>, vector<16x16x8xf32>
    %21 = vector.shape_cast %20 : vector<16x16x8xf32> to vector<256x8xf32>
    %c0_31 = arith.constant 0 : index
    %c40 = arith.constant 40 : index
    %22 = vector.load %arg8[%c0_31, %c40] : memref<256x72xf32, #tpu.memory_space<vmem>>, vector<256x8xf32>
    tpu.vector_store %arg8[%c0_31, %c40], %21 {strides = array<i32>} : memref<256x72xf32, #tpu.memory_space<vmem>>, vector<256x8xf32>,
    %c2_32 = arith.constant 2 : index
    %c0_33 = arith.constant 0 : index
    %c0_34 = arith.constant 0 : index
    %23 = vector.load %arg7[%c2_32, %c0_33, %c0_34] : memref<18x18x8xf32, #tpu.memory_space<vmem>>, vector<16x16x8xf32>
    %24 = vector.shape_cast %23 : vector<16x16x8xf32> to vector<256x8xf32>
    %c0_35 = arith.constant 0 : index
    %c48 = arith.constant 48 : index
    %25 = vector.load %arg8[%c0_35, %c48] : memref<256x72xf32, #tpu.memory_space<vmem>>, vector<256x8xf32>
    tpu.vector_store %arg8[%c0_35, %c48], %24 {strides = array<i32>} : memref<256x72xf32, #tpu.memory_space<vmem>>, vector<256x8xf32>,
    %c2_36 = arith.constant 2 : index
    %c1_37 = arith.constant 1 : index
    %c0_38 = arith.constant 0 : index
    %26 = vector.load %arg7[%c2_36, %c1_37, %c0_38] : memref<18x18x8xf32, #tpu.memory_space<vmem>>, vector<16x16x8xf32>
    %27 = vector.shape_cast %26 : vector<16x16x8xf32> to vector<256x8xf32>
    %c0_39 = arith.constant 0 : index
    %c56 = arith.constant 56 : index
    %28 = vector.load %arg8[%c0_39, %c56] : memref<256x72xf32, #tpu.memory_space<vmem>>, vector<256x8xf32>
    tpu.vector_store %arg8[%c0_39, %c56], %27 {strides = array<i32>} : memref<256x72xf32, #tpu.memory_space<vmem>>, vector<256x8xf32>,
    %c2_40 = arith.constant 2 : index
    %c2_41 = arith.constant 2 : index
    %c0_42 = arith.constant 0 : index
    %29 = vector.load %arg7[%c2_40, %c2_41, %c0_42] : memref<18x18x8xf32, #tpu.memory_space<vmem>>, vector<16x16x8xf32>
    %30 = vector.shape_cast %29 : vector<16x16x8xf32> to vector<256x8xf32>
    %c0_43 = arith.constant 0 : index
    %c64 = arith.constant 64 : index
    %31 = vector.load %arg8[%c0_43, %c64] : memref<256x72xf32, #tpu.memory_space<vmem>>, vector<256x8xf32>
    tpu.vector_store %arg8[%c0_43, %c64], %30 {strides = array<i32>} : memref<256x72xf32, #tpu.memory_space<vmem>>, vector<256x8xf32>,
    %c0_44 = arith.constant 0 : index
    %c0_45 = arith.constant 0 : index
    %32 = vector.load %arg8[%c0_44, %c0_45] : memref<256x72xf32, #tpu.memory_space<vmem>>, vector<256x72xf32>
    %33 = arith.truncf %32 : vector<256x72xf32> to vector<256x72xbf16>
    %c0_46 = arith.constant 0 : index
    %c0_47 = arith.constant 0 : index
    %34 = vector.load %arg2[%c0_46, %c0_47] : memref<72x8xbf16, #tpu.memory_space<vmem>>, vector<72x8xbf16>
    %cst_48 = arith.constant dense<0.000000e+00> : vector<256x8xf32>
    %35 = tpu.matmul %33, %34, %cst_48 {dimension_numbers = #tpu.dot_dimension_numbers<[1], [0], [0], [1], [0, 0, 1, 1], [], []>} : vector<256x72xbf16>, vector<72x8xbf16>, vector<256x8xf32> -> vector<256x8xf32>
    %c0_49 = arith.constant 0 : index
    %c0_50 = arith.constant 0 : index
    %36 = vector.load %arg3[%c0_49, %c0_50] : memref<1x8xf32, #tpu.memory_space<vmem>>, vector<1x8xf32>
    %37 = vector.broadcast %36 : vector<1x8xf32> to vector<256x8xf32>
    %38 = arith.addf %35, %37 : vector<256x8xf32>
    %cst_51 = arith.constant 0.000000e+00 : f32
    %39 = vector.broadcast %cst_51 : f32 to vector<256x8xf32>
    %40 = arith.maximumf %38, %39 : vector<256x8xf32>
    %41 = vector.shape_cast %40 : vector<256x8xf32> to vector<16x16x8xf32>
    %cst_52 = arith.constant 0.000000e+00 : f32
    %42 = vector.broadcast %cst_52 : f32 to vector<18x18x8xf32>
    %c0_53 = arith.constant 0 : index
    %c0_54 = arith.constant 0 : index
    %c0_55 = arith.constant 0 : index
    %43 = vector.load %arg7[%c0_53, %c0_54, %c0_55] : memref<18x18x8xf32, #tpu.memory_space<vmem>>, vector<18x18x8xf32>
    tpu.vector_store %arg7[%c0_53, %c0_54, %c0_55], %42 {strides = array<i32>} : memref<18x18x8xf32, #tpu.memory_space<vmem>>, vector<18x18x8xf32>,
    %c1_56 = arith.constant 1 : index
    %c1_57 = arith.constant 1 : index
    %c0_58 = arith.constant 0 : index
    %44 = vector.load %arg7[%c1_56, %c1_57, %c0_58] : memref<18x18x8xf32, #tpu.memory_space<vmem>>, vector<16x16x8xf32>
    tpu.vector_store %arg7[%c1_56, %c1_57, %c0_58], %41 {strides = array<i32>} : memref<18x18x8xf32, #tpu.memory_space<vmem>>, vector<16x16x8xf32>,
    %c0_59 = arith.constant 0 : index
    %c0_60 = arith.constant 0 : index
    %c0_61 = arith.constant 0 : index
    %45 = vector.load %arg7[%c0_59, %c0_60, %c0_61] : memref<18x18x8xf32, #tpu.memory_space<vmem>>, vector<16x16x8xf32>
    %46 = vector.shape_cast %45 : vector<16x16x8xf32> to vector<256x8xf32>
    %c0_62 = arith.constant 0 : index
    %c0_63 = arith.constant 0 : index
    %47 = vector.load %arg8[%c0_62, %c0_63] : memref<256x72xf32, #tpu.memory_space<vmem>>, vector<256x8xf32>
    tpu.vector_store %arg8[%c0_62, %c0_63], %46 {strides = array<i32>} : memref<256x72xf32, #tpu.memory_space<vmem>>, vector<256x8xf32>,
    %c0_64 = arith.constant 0 : index
    %c1_65 = arith.constant 1 : index
    %c0_66 = arith.constant 0 : index
    %48 = vector.load %arg7[%c0_64, %c1_65, %c0_66] : memref<18x18x8xf32, #tpu.memory_space<vmem>>, vector<16x16x8xf32>
    %49 = vector.shape_cast %48 : vector<16x16x8xf32> to vector<256x8xf32>
    %c0_67 = arith.constant 0 : index
    %c8_68 = arith.constant 8 : index
    %50 = vector.load %arg8[%c0_67, %c8_68] : memref<256x72xf32, #tpu.memory_space<vmem>>, vector<256x8xf32>
    tpu.vector_store %arg8[%c0_67, %c8_68], %49 {strides = array<i32>} : memref<256x72xf32, #tpu.memory_space<vmem>>, vector<256x8xf32>,
    %c0_69 = arith.constant 0 : index
    %c2_70 = arith.constant 2 : index
    %c0_71 = arith.constant 0 : index
    %51 = vector.load %arg7[%c0_69, %c2_70, %c0_71] : memref<18x18x8xf32, #tpu.memory_space<vmem>>, vector<16x16x8xf32>
    %52 = vector.shape_cast %51 : vector<16x16x8xf32> to vector<256x8xf32>
    %c0_72 = arith.constant 0 : index
    %c16_73 = arith.constant 16 : index
    %53 = vector.load %arg8[%c0_72, %c16_73] : memref<256x72xf32, #tpu.memory_space<vmem>>, vector<256x8xf32>
    tpu.vector_store %arg8[%c0_72, %c16_73], %52 {strides = array<i32>} : memref<256x72xf32, #tpu.memory_space<vmem>>, vector<256x8xf32>,
    %c1_74 = arith.constant 1 : index
    %c0_75 = arith.constant 0 : index
    %c0_76 = arith.constant 0 : index
    %54 = vector.load %arg7[%c1_74, %c0_75, %c0_76] : memref<18x18x8xf32, #tpu.memory_space<vmem>>, vector<16x16x8xf32>
    %55 = vector.shape_cast %54 : vector<16x16x8xf32> to vector<256x8xf32>
    %c0_77 = arith.constant 0 : index
    %c24_78 = arith.constant 24 : index
    %56 = vector.load %arg8[%c0_77, %c24_78] : memref<256x72xf32, #tpu.memory_space<vmem>>, vector<256x8xf32>
    tpu.vector_store %arg8[%c0_77, %c24_78], %55 {strides = array<i32>} : memref<256x72xf32, #tpu.memory_space<vmem>>, vector<256x8xf32>,
    %c1_79 = arith.constant 1 : index
    %c1_80 = arith.constant 1 : index
    %c0_81 = arith.constant 0 : index
    %57 = vector.load %arg7[%c1_79, %c1_80, %c0_81] : memref<18x18x8xf32, #tpu.memory_space<vmem>>, vector<16x16x8xf32>
    %58 = vector.shape_cast %57 : vector<16x16x8xf32> to vector<256x8xf32>
    %c0_82 = arith.constant 0 : index
    %c32_83 = arith.constant 32 : index
    %59 = vector.load %arg8[%c0_82, %c32_83] : memref<256x72xf32, #tpu.memory_space<vmem>>, vector<256x8xf32>
    tpu.vector_store %arg8[%c0_82, %c32_83], %58 {strides = array<i32>} : memref<256x72xf32, #tpu.memory_space<vmem>>, vector<256x8xf32>,
    %c1_84 = arith.constant 1 : index
    %c2_85 = arith.constant 2 : index
    %c0_86 = arith.constant 0 : index
    %60 = vector.load %arg7[%c1_84, %c2_85, %c0_86] : memref<18x18x8xf32, #tpu.memory_space<vmem>>, vector<16x16x8xf32>
    %61 = vector.shape_cast %60 : vector<16x16x8xf32> to vector<256x8xf32>
    %c0_87 = arith.constant 0 : index
    %c40_88 = arith.constant 40 : index
    %62 = vector.load %arg8[%c0_87, %c40_88] : memref<256x72xf32, #tpu.memory_space<vmem>>, vector<256x8xf32>
    tpu.vector_store %arg8[%c0_87, %c40_88], %61 {strides = array<i32>} : memref<256x72xf32, #tpu.memory_space<vmem>>, vector<256x8xf32>,
    %c2_89 = arith.constant 2 : index
    %c0_90 = arith.constant 0 : index
    %c0_91 = arith.constant 0 : index
    %63 = vector.load %arg7[%c2_89, %c0_90, %c0_91] : memref<18x18x8xf32, #tpu.memory_space<vmem>>, vector<16x16x8xf32>
    %64 = vector.shape_cast %63 : vector<16x16x8xf32> to vector<256x8xf32>
    %c0_92 = arith.constant 0 : index
    %c48_93 = arith.constant 48 : index
    %65 = vector.load %arg8[%c0_92, %c48_93] : memref<256x72xf32, #tpu.memory_space<vmem>>, vector<256x8xf32>
    tpu.vector_store %arg8[%c0_92, %c48_93], %64 {strides = array<i32>} : memref<256x72xf32, #tpu.memory_space<vmem>>, vector<256x8xf32>,
    %c2_94 = arith.constant 2 : index
    %c1_95 = arith.constant 1 : index
    %c0_96 = arith.constant 0 : index
    %66 = vector.load %arg7[%c2_94, %c1_95, %c0_96] : memref<18x18x8xf32, #tpu.memory_space<vmem>>, vector<16x16x8xf32>
    %67 = vector.shape_cast %66 : vector<16x16x8xf32> to vector<256x8xf32>
    %c0_97 = arith.constant 0 : index
    %c56_98 = arith.constant 56 : index
    %68 = vector.load %arg8[%c0_97, %c56_98] : memref<256x72xf32, #tpu.memory_space<vmem>>, vector<256x8xf32>
    tpu.vector_store %arg8[%c0_97, %c56_98], %67 {strides = array<i32>} : memref<256x72xf32, #tpu.memory_space<vmem>>, vector<256x8xf32>,
    %c2_99 = arith.constant 2 : index
    %c2_100 = arith.constant 2 : index
    %c0_101 = arith.constant 0 : index
    %69 = vector.load %arg7[%c2_99, %c2_100, %c0_101] : memref<18x18x8xf32, #tpu.memory_space<vmem>>, vector<16x16x8xf32>
    %70 = vector.shape_cast %69 : vector<16x16x8xf32> to vector<256x8xf32>
    %c0_102 = arith.constant 0 : index
    %c64_103 = arith.constant 64 : index
    %71 = vector.load %arg8[%c0_102, %c64_103] : memref<256x72xf32, #tpu.memory_space<vmem>>, vector<256x8xf32>
    tpu.vector_store %arg8[%c0_102, %c64_103], %70 {strides = array<i32>} : memref<256x72xf32, #tpu.memory_space<vmem>>, vector<256x8xf32>,
    %c0_104 = arith.constant 0 : index
    %c0_105 = arith.constant 0 : index
    %72 = vector.load %arg8[%c0_104, %c0_105] : memref<256x72xf32, #tpu.memory_space<vmem>>, vector<256x72xf32>
    %73 = arith.truncf %72 : vector<256x72xf32> to vector<256x72xbf16>
    %c0_106 = arith.constant 0 : index
    %c0_107 = arith.constant 0 : index
    %74 = vector.load %arg4[%c0_106, %c0_107] : memref<72x8xbf16, #tpu.memory_space<vmem>>, vector<72x8xbf16>
    %cst_108 = arith.constant dense<0.000000e+00> : vector<256x8xf32>
    %75 = tpu.matmul %73, %74, %cst_108 {dimension_numbers = #tpu.dot_dimension_numbers<[1], [0], [0], [1], [0, 0, 1, 1], [], []>} : vector<256x72xbf16>, vector<72x8xbf16>, vector<256x8xf32> -> vector<256x8xf32>
    %c0_109 = arith.constant 0 : index
    %c0_110 = arith.constant 0 : index
    %76 = vector.load %arg5[%c0_109, %c0_110] : memref<1x8xf32, #tpu.memory_space<vmem>>, vector<1x8xf32>
    %77 = vector.broadcast %76 : vector<1x8xf32> to vector<256x8xf32>
    %78 = arith.addf %75, %77 : vector<256x8xf32>
    %79 = vector.shape_cast %1 : vector<16x16x8xf32> to vector<256x8xf32>
    %80 = arith.addf %78, %79 : vector<256x8xf32>
    %cst_111 = arith.constant 0.000000e+00 : f32
    %81 = vector.broadcast %cst_111 : f32 to vector<256x8xf32>
    %82 = arith.maximumf %80, %81 : vector<256x8xf32>
    %83 = vector.shape_cast %82 : vector<256x8xf32> to vector<1x16x16x8xf32>
    %c0_112 = arith.constant 0 : index
    %c0_113 = arith.constant 0 : index
    %c0_114 = arith.constant 0 : index
    %c0_115 = arith.constant 0 : index
    %84 = vector.load %arg6[%c0_112, %c0_113, %c0_114, %c0_115] : memref<1x16x16x8xf32, #tpu.memory_space<vmem>>, vector<1x16x16x8xf32>
    tpu.vector_store %arg6[%c0_112, %c0_113, %c0_114, %c0_115], %83 {strides = array<i32>} : memref<1x16x16x8xf32, #tpu.memory_space<vmem>>, vector<1x16x16x8xf32>,
    return
  }
  func.func @transform_0(%arg0: i32) -> (i32, i32, i32, i32) {
    %c0_i32 = arith.constant 0 : i32
    %c0_i32_0 = arith.constant 0 : i32
    %c0_i32_1 = arith.constant 0 : i32
    %c0_i32_2 = arith.constant 0 : i32
    return %arg0, %c0_i32, %c0_i32_0, %c0_i32_1 : i32, i32, i32, i32
  }
  func.func @transform_1(%arg0: i32) -> (i32, i32) {
    %c0_i32 = arith.constant 0 : i32
    %c0_i32_0 = arith.constant 0 : i32
    %c0_i32_1 = arith.constant 0 : i32
    return %c0_i32, %c0_i32_0 : i32, i32
  }
  func.func @transform_2(%arg0: i32) -> (i32, i32) {
    %c0_i32 = arith.constant 0 : i32
    %c0_i32_0 = arith.constant 0 : i32
    %c0_i32_1 = arith.constant 0 : i32
    return %c0_i32, %c0_i32_0 : i32, i32
  }
  func.func @transform_3(%arg0: i32) -> (i32, i32) {
    %c0_i32 = arith.constant 0 : i32
    %c0_i32_0 = arith.constant 0 : i32
    %c0_i32_1 = arith.constant 0 : i32
    return %c0_i32, %c0_i32_0 : i32, i32
  }
  func.func @transform_4(%arg0: i32) -> (i32, i32) {
    %c0_i32 = arith.constant 0 : i32
    %c0_i32_0 = arith.constant 0 : i32
    %c0_i32_1 = arith.constant 0 : i32
    return %c0_i32, %c0_i32_0 : i32, i32
  }
  func.func @transform_5(%arg0: i32) -> (i32, i32, i32, i32) {
    %c0_i32 = arith.constant 0 : i32
    %c0_i32_0 = arith.constant 0 : i32
    %c0_i32_1 = arith.constant 0 : i32
    %c0_i32_2 = arith.constant 0 : i32
    return %arg0, %c0_i32, %c0_i32_0, %c0_i32_1 : i32, i32, i32, i32
  }
}

module attributes {stable_mosaic.version = 11 : i64} {
  func.func @_conv_kernel(%arg0: i32, %arg1: memref<1x16x16x8xf32, #tpu.memory_space<vmem>>, %arg2: memref<72x1xbf16, #tpu.memory_space<vmem>>, %arg3: memref<1x1xf32, #tpu.memory_space<vmem>>, %arg4: memref<1x16x16x1xf32, #tpu.memory_space<vmem>>, %arg5: memref<18x18x8xf32, #tpu.memory_space<vmem>>, %arg6: memref<256x72xf32, #tpu.memory_space<vmem>>) attributes {dimension_semantics = [#tpu.dimension_semantics<parallel>], iteration_bounds = array<i64: 2>, scalar_prefetch = 0 : i64, scratch_operands = 2 : i64, tpu.core_type = #tpu.core_type<tc>, window_params = [{transform_indices = @transform_0, window_bounds = array<i64: 1, 16, 16, 8>}, {pipeline_mode = #tpu.pipeline_mode<synchronous>, transform_indices = @transform_1, window_bounds = array<i64: 72, 1>}, {pipeline_mode = #tpu.pipeline_mode<synchronous>, transform_indices = @transform_2, window_bounds = array<i64: 1, 1>}, {transform_indices = @transform_3, window_bounds = array<i64: 1, 16, 16, 1>}]} {
    %c0 = arith.constant 0 : index
    %c0_0 = arith.constant 0 : index
    %c0_1 = arith.constant 0 : index
    %c0_2 = arith.constant 0 : index
    %0 = vector.load %arg1[%c0, %c0_0, %c0_1, %c0_2] : memref<1x16x16x8xf32, #tpu.memory_space<vmem>>, vector<1x16x16x8xf32>
    %1 = vector.shape_cast %0 : vector<1x16x16x8xf32> to vector<16x16x8xf32>
    %cst = arith.constant 0.000000e+00 : f32
    %2 = vector.broadcast %cst : f32 to vector<18x18x8xf32>
    %c0_3 = arith.constant 0 : index
    %c0_4 = arith.constant 0 : index
    %c0_5 = arith.constant 0 : index
    %3 = vector.load %arg5[%c0_3, %c0_4, %c0_5] : memref<18x18x8xf32, #tpu.memory_space<vmem>>, vector<18x18x8xf32>
    tpu.vector_store %arg5[%c0_3, %c0_4, %c0_5], %2 {strides = array<i32>} : memref<18x18x8xf32, #tpu.memory_space<vmem>>, vector<18x18x8xf32>,
    %c1 = arith.constant 1 : index
    %c1_6 = arith.constant 1 : index
    %c0_7 = arith.constant 0 : index
    %4 = vector.load %arg5[%c1, %c1_6, %c0_7] : memref<18x18x8xf32, #tpu.memory_space<vmem>>, vector<16x16x8xf32>
    tpu.vector_store %arg5[%c1, %c1_6, %c0_7], %1 {strides = array<i32>} : memref<18x18x8xf32, #tpu.memory_space<vmem>>, vector<16x16x8xf32>,
    %c0_8 = arith.constant 0 : index
    %c0_9 = arith.constant 0 : index
    %c0_10 = arith.constant 0 : index
    %5 = vector.load %arg5[%c0_8, %c0_9, %c0_10] : memref<18x18x8xf32, #tpu.memory_space<vmem>>, vector<16x16x8xf32>
    %6 = vector.shape_cast %5 : vector<16x16x8xf32> to vector<256x8xf32>
    %c0_11 = arith.constant 0 : index
    %c0_12 = arith.constant 0 : index
    %7 = vector.load %arg6[%c0_11, %c0_12] : memref<256x72xf32, #tpu.memory_space<vmem>>, vector<256x8xf32>
    tpu.vector_store %arg6[%c0_11, %c0_12], %6 {strides = array<i32>} : memref<256x72xf32, #tpu.memory_space<vmem>>, vector<256x8xf32>,
    %c0_13 = arith.constant 0 : index
    %c1_14 = arith.constant 1 : index
    %c0_15 = arith.constant 0 : index
    %8 = vector.load %arg5[%c0_13, %c1_14, %c0_15] : memref<18x18x8xf32, #tpu.memory_space<vmem>>, vector<16x16x8xf32>
    %9 = vector.shape_cast %8 : vector<16x16x8xf32> to vector<256x8xf32>
    %c0_16 = arith.constant 0 : index
    %c8 = arith.constant 8 : index
    %10 = vector.load %arg6[%c0_16, %c8] : memref<256x72xf32, #tpu.memory_space<vmem>>, vector<256x8xf32>
    tpu.vector_store %arg6[%c0_16, %c8], %9 {strides = array<i32>} : memref<256x72xf32, #tpu.memory_space<vmem>>, vector<256x8xf32>,
    %c0_17 = arith.constant 0 : index
    %c2 = arith.constant 2 : index
    %c0_18 = arith.constant 0 : index
    %11 = vector.load %arg5[%c0_17, %c2, %c0_18] : memref<18x18x8xf32, #tpu.memory_space<vmem>>, vector<16x16x8xf32>
    %12 = vector.shape_cast %11 : vector<16x16x8xf32> to vector<256x8xf32>
    %c0_19 = arith.constant 0 : index
    %c16 = arith.constant 16 : index
    %13 = vector.load %arg6[%c0_19, %c16] : memref<256x72xf32, #tpu.memory_space<vmem>>, vector<256x8xf32>
    tpu.vector_store %arg6[%c0_19, %c16], %12 {strides = array<i32>} : memref<256x72xf32, #tpu.memory_space<vmem>>, vector<256x8xf32>,
    %c1_20 = arith.constant 1 : index
    %c0_21 = arith.constant 0 : index
    %c0_22 = arith.constant 0 : index
    %14 = vector.load %arg5[%c1_20, %c0_21, %c0_22] : memref<18x18x8xf32, #tpu.memory_space<vmem>>, vector<16x16x8xf32>
    %15 = vector.shape_cast %14 : vector<16x16x8xf32> to vector<256x8xf32>
    %c0_23 = arith.constant 0 : index
    %c24 = arith.constant 24 : index
    %16 = vector.load %arg6[%c0_23, %c24] : memref<256x72xf32, #tpu.memory_space<vmem>>, vector<256x8xf32>
    tpu.vector_store %arg6[%c0_23, %c24], %15 {strides = array<i32>} : memref<256x72xf32, #tpu.memory_space<vmem>>, vector<256x8xf32>,
    %c1_24 = arith.constant 1 : index
    %c1_25 = arith.constant 1 : index
    %c0_26 = arith.constant 0 : index
    %17 = vector.load %arg5[%c1_24, %c1_25, %c0_26] : memref<18x18x8xf32, #tpu.memory_space<vmem>>, vector<16x16x8xf32>
    %18 = vector.shape_cast %17 : vector<16x16x8xf32> to vector<256x8xf32>
    %c0_27 = arith.constant 0 : index
    %c32 = arith.constant 32 : index
    %19 = vector.load %arg6[%c0_27, %c32] : memref<256x72xf32, #tpu.memory_space<vmem>>, vector<256x8xf32>
    tpu.vector_store %arg6[%c0_27, %c32], %18 {strides = array<i32>} : memref<256x72xf32, #tpu.memory_space<vmem>>, vector<256x8xf32>,
    %c1_28 = arith.constant 1 : index
    %c2_29 = arith.constant 2 : index
    %c0_30 = arith.constant 0 : index
    %20 = vector.load %arg5[%c1_28, %c2_29, %c0_30] : memref<18x18x8xf32, #tpu.memory_space<vmem>>, vector<16x16x8xf32>
    %21 = vector.shape_cast %20 : vector<16x16x8xf32> to vector<256x8xf32>
    %c0_31 = arith.constant 0 : index
    %c40 = arith.constant 40 : index
    %22 = vector.load %arg6[%c0_31, %c40] : memref<256x72xf32, #tpu.memory_space<vmem>>, vector<256x8xf32>
    tpu.vector_store %arg6[%c0_31, %c40], %21 {strides = array<i32>} : memref<256x72xf32, #tpu.memory_space<vmem>>, vector<256x8xf32>,
    %c2_32 = arith.constant 2 : index
    %c0_33 = arith.constant 0 : index
    %c0_34 = arith.constant 0 : index
    %23 = vector.load %arg5[%c2_32, %c0_33, %c0_34] : memref<18x18x8xf32, #tpu.memory_space<vmem>>, vector<16x16x8xf32>
    %24 = vector.shape_cast %23 : vector<16x16x8xf32> to vector<256x8xf32>
    %c0_35 = arith.constant 0 : index
    %c48 = arith.constant 48 : index
    %25 = vector.load %arg6[%c0_35, %c48] : memref<256x72xf32, #tpu.memory_space<vmem>>, vector<256x8xf32>
    tpu.vector_store %arg6[%c0_35, %c48], %24 {strides = array<i32>} : memref<256x72xf32, #tpu.memory_space<vmem>>, vector<256x8xf32>,
    %c2_36 = arith.constant 2 : index
    %c1_37 = arith.constant 1 : index
    %c0_38 = arith.constant 0 : index
    %26 = vector.load %arg5[%c2_36, %c1_37, %c0_38] : memref<18x18x8xf32, #tpu.memory_space<vmem>>, vector<16x16x8xf32>
    %27 = vector.shape_cast %26 : vector<16x16x8xf32> to vector<256x8xf32>
    %c0_39 = arith.constant 0 : index
    %c56 = arith.constant 56 : index
    %28 = vector.load %arg6[%c0_39, %c56] : memref<256x72xf32, #tpu.memory_space<vmem>>, vector<256x8xf32>
    tpu.vector_store %arg6[%c0_39, %c56], %27 {strides = array<i32>} : memref<256x72xf32, #tpu.memory_space<vmem>>, vector<256x8xf32>,
    %c2_40 = arith.constant 2 : index
    %c2_41 = arith.constant 2 : index
    %c0_42 = arith.constant 0 : index
    %29 = vector.load %arg5[%c2_40, %c2_41, %c0_42] : memref<18x18x8xf32, #tpu.memory_space<vmem>>, vector<16x16x8xf32>
    %30 = vector.shape_cast %29 : vector<16x16x8xf32> to vector<256x8xf32>
    %c0_43 = arith.constant 0 : index
    %c64 = arith.constant 64 : index
    %31 = vector.load %arg6[%c0_43, %c64] : memref<256x72xf32, #tpu.memory_space<vmem>>, vector<256x8xf32>
    tpu.vector_store %arg6[%c0_43, %c64], %30 {strides = array<i32>} : memref<256x72xf32, #tpu.memory_space<vmem>>, vector<256x8xf32>,
    %c0_44 = arith.constant 0 : index
    %c0_45 = arith.constant 0 : index
    %32 = vector.load %arg6[%c0_44, %c0_45] : memref<256x72xf32, #tpu.memory_space<vmem>>, vector<256x72xf32>
    %33 = arith.truncf %32 : vector<256x72xf32> to vector<256x72xbf16>
    %c0_46 = arith.constant 0 : index
    %c0_47 = arith.constant 0 : index
    %34 = vector.load %arg2[%c0_46, %c0_47] : memref<72x1xbf16, #tpu.memory_space<vmem>>, vector<72x1xbf16>
    %cst_48 = arith.constant dense<0.000000e+00> : vector<256x1xf32>
    %35 = tpu.matmul %33, %34, %cst_48 {dimension_numbers = #tpu.dot_dimension_numbers<[1], [0], [0], [1], [0, 0, 1, 1], [], []>} : vector<256x72xbf16>, vector<72x1xbf16>, vector<256x1xf32> -> vector<256x1xf32>
    %c0_49 = arith.constant 0 : index
    %c0_50 = arith.constant 0 : index
    %36 = vector.load %arg3[%c0_49, %c0_50] : memref<1x1xf32, #tpu.memory_space<vmem>>, vector<1x1xf32>
    %37 = vector.broadcast %36 : vector<1x1xf32> to vector<256x1xf32>
    %38 = arith.addf %35, %37 : vector<256x1xf32>
    %39 = vector.shape_cast %38 : vector<256x1xf32> to vector<1x16x16x1xf32>
    %c0_51 = arith.constant 0 : index
    %c0_52 = arith.constant 0 : index
    %c0_53 = arith.constant 0 : index
    %c0_54 = arith.constant 0 : index
    %40 = vector.load %arg4[%c0_51, %c0_52, %c0_53, %c0_54] : memref<1x16x16x1xf32, #tpu.memory_space<vmem>>, vector<1x16x16x1xf32>
    tpu.vector_store %arg4[%c0_51, %c0_52, %c0_53, %c0_54], %39 {strides = array<i32>} : memref<1x16x16x1xf32, #tpu.memory_space<vmem>>, vector<1x16x16x1xf32>,
    return
  }
  func.func @transform_0(%arg0: i32) -> (i32, i32, i32, i32) {
    %c0_i32 = arith.constant 0 : i32
    %c0_i32_0 = arith.constant 0 : i32
    %c0_i32_1 = arith.constant 0 : i32
    %c0_i32_2 = arith.constant 0 : i32
    return %arg0, %c0_i32, %c0_i32_0, %c0_i32_1 : i32, i32, i32, i32
  }
  func.func @transform_1(%arg0: i32) -> (i32, i32) {
    %c0_i32 = arith.constant 0 : i32
    %c0_i32_0 = arith.constant 0 : i32
    %c0_i32_1 = arith.constant 0 : i32
    return %c0_i32, %c0_i32_0 : i32, i32
  }
  func.func @transform_2(%arg0: i32) -> (i32, i32) {
    %c0_i32 = arith.constant 0 : i32
    %c0_i32_0 = arith.constant 0 : i32
    %c0_i32_1 = arith.constant 0 : i32
    return %c0_i32, %c0_i32_0 : i32, i32
  }
  func.func @transform_3(%arg0: i32) -> (i32, i32, i32, i32) {
    %c0_i32 = arith.constant 0 : i32
    %c0_i32_0 = arith.constant 0 : i32
    %c0_i32_1 = arith.constant 0 : i32
    %c0_i32_2 = arith.constant 0 : i32
    return %arg0, %c0_i32, %c0_i32_0, %c0_i32_1 : i32, i32, i32, i32
  }
}

</mosaic_0001>

<bundles_post_ra>
// kernel: iradon_map_forward.6
= control target key start
LH: loop header
LB: loop body
LE: loop exit
PB: predicated region body
PF: predicated region fallthrough
CT: control target
= control target key end

     0   :  { %v180_v0 = vmov 0.0   ;;  %vm181_vm0 = vmmov 0   ;;  %vm39_vm1 = vcmask 130048   ;;  %s240_s1 = inlined_call_operand.vmem [shape: bf16[16,16], index: 1, kind: input, shape index: {}]   ;;  %s241_s0 = inlined_call_operand.vmem [shape: f32[16,16], index: 0, kind: input, shape index: {}]   ;;  %s242_s3 = inlined_call_operand.vmem [shape: bf16[16,16], index: 3, kind: input, shape index: {}]   ;;  %s243_s2 = inlined_call_operand.vmem [shape: f32[1,16], index: 2, kind: input, shape index: {}]   ;;  %s244_s4 = inlined_call_operand.vmem [shape: f32[1,16], index: 4, kind: input, shape index: {}]   ;;  %s245_s5 = inlined_call_operand.vmem [shape: f32[16,16], index: 5, kind: output, shape index: {}]  }
   0x1   :  { %164 = vmatprep.subr.bf16.mxu0 %v180_v0  ;;  %v178_v1 = vld [vmem:[%s240_s1] sm:$0xff]   ;;  %166 = vmatprep.mubr.msk.bf16.mxu0 %vm181_vm0, %v180_v0  ;;  %v22_v3 = vld [vmem:[%s241_s0 + $0x8] sm:$0xff] }
   0x2   :  { %v21_v2 = vld [vmem:[%s241_s0] sm:$0xff]  ;;  %170 = vmatprep.subr.bf16.mxu1 %v180_v0  ;;  %172 = vmatprep.mubr.msk.bf16.mxu1 %vm181_vm0, %v180_v0 }
   0x3   :  { %165 = vmatpush3.bf16.msra.mxu0 %v178_v1  ;;  %v23_v4 = vpack.c.bf16 %v22_v3, %v21_v2  ;;  %v179_v5 = vld [vmem:[%s242_s3] sm:$0xff]  }
   0x4   :  { %171 = vmatpush3.bf16.msra.mxu1 %v179_v5  ;;  %v154_v6 = vld [vmem:[%s243_s2] ss:$0 sm:$0xff] }
   0x5   :  { %v157_v16 = vld [vmem:[%s244_s4] ss:$0 sm:$0xff] }
   0x6   :  { %167 = vmatmul.mubr.msk.bf16.vlgmr.msra.gmra.mrb[0].mxu0 %vm39_vm1, %v23_v4 }
  0xd9   :  { %v77_v7 = vpop.f32.mrb[0].mxu0 }
  0xda   :  { %v78_v8 = vadd.f32 %v154_v6, %v77_v7  ;;  %v168_v9 = vpop.f32.mrb[1].mxu0 }
  0xdb   :  { %v80_v10 = vpop.f32.mrb[2].mxu0 }
  0xdc   :  { %v81_v11 = vadd.f32 %v154_v6, %v80_v10  ;;  %v169_v12 = vpop.f32.mrb[3].mxu0  ;;  %v84_v13 = vmax.f32 %v78_v8, 0.0 }
  0xde   :  { %v85_v14 = vmax.f32 %v81_v11, 0.0 }
  0xe0   :  { %v86_v15 = vpack.c.bf16 %v85_v14, %v84_v13 }
  0xe2   :  { %173 = vmatmul.mubr.msk.bf16.vlgmr.msra.gmra.mrb[0].mxu1 %vm39_vm1, %v86_v15 }
 0x1b5   :  { %v139_v17 = vpop.f32.mrb[0].mxu1 }
 0x1b6   :  { %v140_v18 = vadd.f32 %v157_v16, %v139_v17  ;;  %v174_v19 = vpop.f32.mrb[1].mxu1 }
 0x1b7   :  { %v142_v20 = vpop.f32.mrb[2].mxu1 }
 0x1b8   :  { %v146_v21 = vmax.f32 %v140_v18, 0.0  ;;  %v143_v22 = vadd.f32 %v157_v16, %v142_v20  ;;  %v175_v23 = vpop.f32.mrb[3].mxu1 }
 0x1ba   :  { %148 = vst.msk [vmem:[%s245_s5] sm:$0xff] %vm39_vm1, %v146_v21  ;;  %v147_v24 = vmax.f32 %v143_v22, 0.0 }
 0x1bc   :  { %149 = vst.msk [vmem:[%s245_s5 + $0x8] sm:$0xff] %vm39_vm1, %v147_v24 }

// kernel: iradon_map_forward.7
= control target key start
LH: loop header
LB: loop body
LE: loop exit
PB: predicated region body
PF: predicated region fallthrough
CT: control target
= control target key end

     0   :  { %8 = vsyncpa [#allocation4], 0  ;;  %s343_s12 = smov [#allocation3]   ;;  %s388_s0 = inlined_call_operand.vmem [shape: f32[2,128], index: 0, kind: input, shape index: {}]   ;;  %s389_s1 = inlined_call_operand.hbm [shape: bf16[256,128], index: 1, kind: input, shape index: {}]   ;;  %s390_s2 = inlined_call_operand.vmem [shape: f32[1,256], index: 2, kind: input, shape index: {}]   ;;  %s391_s3 = inlined_call_operand.vmem [shape: f32[2,256], index: 3, kind: output, shape index: {}]  }
   0x1   :  { %s16_s13 = sshll.u32 %s343_s12, 4  ;;  %s319_s16 = scalar_lea.hbm %s389_s1, 2048  ;;  %s17_s13 = int_to_ptr.vmem [resolvable:$true] %s16_s13 }
   0x2   :  { %p320_p0 = scmp.ne.s32.totalorder %s389_s1, %s319_s16  ;;  %p323_p1 = scmp.lt.u32.totalorder %s319_s16, %s389_s1 }
   0x4   :  { %p325_p2 = pnand %p323_p1, %p320_p0 }
   0x6   :  { %328 = shalt.err (!%p325_p2)
}
   0x7   :  { %s329_s21 = scalar_lea.vmem %s17_s13, 2048  ;;  %p334_p4 = scmp.lt.s32.totalorder %s17_s13, %s17_s13 }
   0x8   :  { %p330_p3 = scmp.ne.s32.totalorder %s17_s13, %s329_s21  ;;  %p335_p5 = scmp.lt.s32.totalorder %s329_s21, %s329_s21 }
   0xa   :  { %p336_p6 = por %p335_p5, %p334_p4 }
   0xc   :  { %p337_p7 = pnand %p336_p6, %p330_p3 }
   0xe   :  { %340 = shalt.err (!%p337_p7)
}
   0xf   :  { %s344_s22 = smov 64   ;;  %s345_s23 = smov 4  }
  0x10   :  { %22 = dma.hbm_to_vmem [thread:$0]  %s389_s1, 2048, %s17_s13, [#allocation4], %s344_s22, %s344_s22, %s345_s23  }
  0x11   :  { %341 = dma.done.wait [#allocation4], 2048  }
  0x12   :  { %342 = vsyncadd [#allocation4], 4294965248  ;;  %v303_v0 = vld [vmem:[#allocation3 + $0x40] sm:$0xff]   ;;  %v305_v2 = vld [vmem:[#allocation3 + $0x48] sm:$0xff]   ;;  %v240_v18 = vlaneseq  ;;  %v346_v22 = vmov 1983009808  }
  0x13   :  { %v304_v1 = vld [vmem:[#allocation3] sm:$0xff]   ;;  %281 = vmatprep.subr.bf16.mxu0 %v303_v0  ;;  %v306_v3 = vld [vmem:[#allocation3 + $0x8] sm:$0xff]   ;;  %v307_v4 = vld [vmem:[#allocation3 + $0x50] sm:$0xff]   ;;  %v250_v23 = vunpack.c.l.s4 %v346_v22 }
  0x14   :  { %282 = vmatpush3.bf16.xpose.msra.mxu0 %v304_v1  ;;  %v308_v5 = vld [vmem:[#allocation3 + $0x10] sm:$0xff]   ;;  %v309_v6 = vld [vmem:[#allocation3 + $0x58] sm:$0xff]   ;;  %v311_v10 = vld [vmem:[#allocation3 + $0x60] sm:$0xff]   ;;  %v241_v19 = vshrl.u32 %v240_v18, 7 }
  0x15   :  { %283 = vmatprep.subr.bf16.mxu0 %v305_v2  ;;  %v29_v7 = vld [vmem:[%s388_s0] sm:$0x3]  ;;  %v312_v11 = vld [vmem:[#allocation3 + $0x20] sm:$0xff]   ;;  %v313_v12 = vld [vmem:[#allocation3 + $0x68] sm:$0xff]   ;;  %v251_v28 = vunpack.c.0.s8 %v250_v23 }
  0x16   :  { %v30_v8 = vpack.c.bf16 %v29_v7, %v29_v7  ;;  %v310_v9 = vld [vmem:[#allocation3 + $0x18] sm:$0xff]   ;;  %v314_v13 = vld [vmem:[#allocation3 + $0x28] sm:$0xff]   ;;  %v315_v14 = vld [vmem:[#allocation3 + $0x70] sm:$0xff]   ;;  %v242_v20 = vsub.s32 0, %v241_v19  ;;  %v246_v21 = vsub.s32 1, %v241_v19 }
  0x17   :  { %v316_v15 = vld [vmem:[#allocation3 + $0x30] sm:$0xff]   ;;  %v317_v16 = vld [vmem:[#allocation3 + $0x78] sm:$0xff]   ;;  %v254_v34 = vsub.s32 %v251_v28, %v241_v19 }
  0x18   :  { %297 = vmatprep.mubr.bf16.mxu0 %v30_v8  ;;  %v318_v17 = vld [vmem:[#allocation3 + $0x38] sm:$0xff]  }
  0x19   :  { %v238_v24 = vld [vmem:[%s390_s2] sm:$0x3] }
  0x1a   :  { %v243_v26 = vrot.slane %v238_v24, %v242_v20  ;;  %v247_v27 = vrot.slane %v238_v24, %v246_v21 }
  0x1c   :  { %284 = vmatpush3.bf16.xpose.msra.mxu0 %v306_v3  ;;  %v248_v33 = vcombine.low %v243_v26, %v247_v27 }
  0x1d   :  { %285 = vmatprep.subr.bf16.mxu0 %v307_v4 }
  0x1e   :  { %v255_v35 = vrot.slane %v248_v33, %v254_v34 }
  0x24   :  { %286 = vmatpush3.bf16.xpose.msra.mxu0 %v308_v5 }
  0x25   :  { %287 = vmatprep.subr.bf16.mxu0 %v309_v6 }
  0x2c   :  { %288 = vmatpush3.bf16.xpose.msra.mxu0 %v310_v9 }
  0x2d   :  { %289 = vmatprep.subr.bf16.mxu0 %v311_v10 }
  0x34   :  { %290 = vmatpush3.bf16.xpose.msra.mxu0 %v312_v11 }
  0x35   :  { %291 = vmatprep.subr.bf16.mxu0 %v313_v12 }
  0x3c   :  { %292 = vmatpush3.bf16.xpose.msra.mxu0 %v314_v13 }
  0x3d   :  { %293 = vmatprep.subr.bf16.mxu0 %v315_v14 }
  0x44   :  { %294 = vmatpush3.bf16.xpose.msra.mxu0 %v316_v15 }
  0x45   :  { %295 = vmatprep.subr.bf16.mxu0 %v317_v16 }
  0x4c   :  { %296 = vmatpush3.bf16.xpose.msra.mxu0 %v318_v17 }
  0x53   :  { %298 = vmatmul.mubr.bf16.vlgmr.msra.gmra.mrb[0].mxu0 %v30_v8 }
 0x126   :  { %v193_v25 = vpop.f32.mrb[0].mxu0 }
 0x127   :  { %v195_v29 = vpop.f32.mrb[1].mxu0 }
 0x128   :  { %v206_v30 = vcombine.low %v193_v25, %v195_v29  ;;  %v197_v31 = vpop.f32.mrb[2].mxu0 }
 0x129   :  { %v198_v32 = vpop.f32.mrb[3].mxu0 }
 0x12a   :  { %280 = vst.sshfl [vmem:[#allocation2] sm:$0x33 pattern:$0x76325410] %v206_v30 }
 0x131   :  { %v237_v36 = vld [vmem:[#allocation2] sm:$0xf] }
 0x132   :  { %v257_v37 = vadd.f32 %v255_v35, %v237_v36 }
 0x134   :  { %258 = vst [vmem:[%s391_s3] sm:$0xf] %v257_v37 }
 0x135   :  { %263 = vsyncpa [#allocation4], 1 }

// kernel: iradon_map_forward.8
= control target key start
LH: loop header
LB: loop body
LE: loop exit
PB: predicated region body
PF: predicated region fallthrough
CT: control target
= control target key end

     0   :  { %s2695_s12 = smov 0   ;;  %s4297_s0 = inlined_call_operand.vmem [shape: f32[2,16,16,1], index: 0, kind: input, shape index: {}]   ;;  %s4298_s1 = inlined_call_operand.vmem [shape: bf16[9,8], index: 1, kind: input, shape index: {}]   ;;  %s4299_s2 = inlined_call_operand.vmem [shape: f32[1,8], index: 2, kind: input, shape index: {}]   ;;  %s4300_s3 = inlined_call_operand.vmem [shape: f32[2,16,16,8], index: 3, kind: output, shape index: {}]  }
   0x1 LB: > { %s2548_s13 = sadd.s32 4294967295, %s2663_s12   ;;  %p2552_p0 = scmp.ge.s32.totalorder %s2663_s12, 1  ;;  %s2663_s12 = sphi %s2695_s12, %s13_s12  }
   0x2   : > { %p137_p1 = scmp.lt.s32.totalorder %s2663_s12, 3 }
   0x4   : > { %p138_p2 = pnand %p2552_p0, %p137_p1 }
   0x5   : > { %vm204_vm0 = vcmask (!%p138_p2), 7168   ;;  %vm207_vm1 = vcmask (!%p138_p2), 1024   ;;  %v2665_v0 = vmov (!%p138_p2), 0.0   ;;  %p161_p3 = scmp.lt.s32.totalorder (!%p138_p2), %s2548_s13, 1  ;;  %s2666_s18 = smov (!%p138_p2), 1   ;;  %vm2013_vm2 = vcmask (!%p138_p2), 1043456  }
   0x6   : > { %141 = sbr.rel (%p138_p2) target bundleno = 1414 (0x586), region = 32  ;;  %205 = vst.msk [vmem:[#allocation2] sm:$0xff] (!%p138_p2), %vm204_vm0, %v2665_v0  ;;  %206 = vst.msk [vmem:[#allocation2 + $0x8] sm:$0xff] (!%p138_p2), %vm204_vm0, %v2665_v0  ;;  %s2667_s19 = smov (!%p138_p2), 2   ;;  %v2654_v45 = vld [vmem:[%s4298_s1] sm:$0x1f] (!%p138_p2)  }
   0x7   : > { %209 = vst.msk [vmem:[#allocation2 + $0x18] sm:$0xff] (!%p138_p2), %vm204_vm0, %v2665_v0  ;;  %210 = vst.msk [vmem:[#allocation2 + $0x20] sm:$0xff] (!%p138_p2), %vm204_vm0, %v2665_v0  ;;  %s2668_s20 = smov (!%p138_p2), 3   ;;  %s2669_s21 = smov (!%p138_p2), 4   ;;  %vm2014_vm3 = vcmask (!%p138_p2), 1044480   ;;  %v2674_v46 = vmov (!%p138_p2), 65535  }
   0x8   : > { %212 = vst.msk [vmem:[#allocation2 + $0x30] sm:$0xff] (!%p138_p2), %vm204_vm0, %v2665_v0  ;;  %213 = vst.msk [vmem:[#allocation2 + $0x38] sm:$0xff] (!%p138_p2), %vm204_vm0, %v2665_v0  ;;  %s2670_s22 = smov (!%p138_p2), 5   ;;  %s2671_s23 = smov (!%p138_p2), 6   ;;  %v2015_v47 = vsel (!%p138_p2), %vm2013_vm2, 4294967295, %v2674_v46  ;;  %vm517_vm4 = vcmask (!%p138_p2), 15368  }
   0x9   : > { %215 = vst.msk [vmem:[#allocation2 + $0x48] sm:$0xff] (!%p138_p2), %vm204_vm0, %v2665_v0  ;;  %216 = vst.msk [vmem:[#allocation2 + $0x50] sm:$0xff] (!%p138_p2), %vm204_vm0, %v2665_v0  ;;  %s2672_s24 = smov (!%p138_p2), 7   ;;  %s2673_s25 = smov (!%p138_p2), 8   ;;  %v2016_v48 = vsel (!%p138_p2), %vm2014_vm3, %v2015_v47, 0  ;;  %vm710_vm5 = vcmask (!%p138_p2), 23568  }
   0xa   : > { %218 = vst.msk [vmem:[#allocation2 + $0x60] sm:$0xff] (!%p138_p2), %vm204_vm0, %v2665_v0  ;;  %219 = vst.msk [vmem:[#allocation2 + $0x68] sm:$0xff] (!%p138_p2), %vm204_vm0, %v2665_v0  ;;  %v2018_v49 = vand.u32 (!%p138_p2), %v2654_v45, %v2016_v48  ;;  %vm903_vm6 = vcmask (!%p138_p2), 31768   ;;  %vm1096_vm7 = vcmask (!%p138_p2), 39968   ;;  %vm1289_vm8 = vcmask (!%p138_p2), 48168  }
   0xb   : > { %221 = vst.msk [vmem:[#allocation2 + $0x78] sm:$0xff] (!%p138_p2), %vm204_vm0, %v2665_v0  ;;  %222 = vst.msk [vmem:[#allocation2 + $0x80] sm:$0xff] (!%p138_p2), %vm204_vm0, %v2665_v0  ;;  %vm1483_vm9 = vcmask (!%p138_p2), 56368   ;;  %vm1676_vm10 = vcmask (!%p138_p2), 64568   ;;  %vm1869_vm11 = vcmask (!%p138_p2), 72768   ;;  %vm1964_vm12 = vcmask (!%p138_p2), 72704  }
   0xc   : > { %224 = vst.msk [vmem:[#allocation2 + $0x90] sm:$0xff] (!%p138_p2), %vm204_vm0, %v2665_v0  ;;  %225 = vst.msk [vmem:[#allocation2 + $0x98] sm:$0xff] (!%p138_p2), %vm204_vm0, %v2665_v0  ;;  %2596 = vmatprep.subr.bf16.mxu0 (!%p138_p2), %v2018_v49  ;;  %2630 = vmatprep.subr.bf16.mxu1 (!%p138_p2), %v2018_v49  ;;  %vm2181_vm13 = vcmask (!%p138_p2), 64512  }
   0xd   : > { %227 = vst.msk [vmem:[#allocation2 + $0xa8] sm:$0xff] %vm204_vm0, %v2665_v0  ;;  %228 = vst.msk [vmem:[#allocation2 + $0xb0] sm:$0xff] %vm204_vm0, %v2665_v0  ;;  %s4302_s13 = smov (!%p161_p3, %s2548_s13), 1  ;;  %v357_v4 = vld [vmem:[#allocation2 + $0x1] sm:$0xff]  ;;  %2597 = vmatpush3.bf16.msra.mxu0 %v2018_v49  ;;  %2631 = vmatpush3.bf16.msra.mxu1 %v2018_v49 }
   0xe   : > { %230 = vst.msk [vmem:[#allocation2 + $0xc0] sm:$0xff] %vm204_vm0, %v2665_v0  ;;  %231 = vst.msk [vmem:[#allocation2 + $0xc8] sm:$0xff] %vm204_vm0, %v2665_v0  ;;  %s2577_s14 = sshll.u32 %s4302_s13, 8  ;;  %421 = vrot.lane.b32.xlu0 %v357_v4, %s2666_s18  ;;  %v293_v14 = vld [vmem:[#allocation2] sm:$0xff]  ;;  %v294_v15 = vld [vmem:[#allocation2 + $0x8] sm:$0xff] }
   0xf   : > { %233 = vst.msk [vmem:[#allocation2 + $0xd8] sm:$0xff] %vm204_vm0, %v2665_v0  ;;  %234 = vst.msk [vmem:[#allocation2 + $0xe0] sm:$0xff] %vm204_vm0, %v2665_v0  ;;  %s2769_s17 = scalar_lea.vmem %s4297_s0, %s2577_s14  ;;  %v550_v16 = vld [vmem:[#allocation2 + $0x2] sm:$0xff]  ;;  %s4205_s7 = scalar_lea.vmem %s4300_s3, %s2577_s14 }
  0x10   : > { %236 = vst.msk [vmem:[#allocation2 + $0xf0] sm:$0xff] %vm204_vm0, %v2665_v0  ;;  %237 = vst.msk [vmem:[#allocation2 + $0xf8] sm:$0xff] %vm204_vm0, %v2665_v0  ;;  %v172_v1 = vld [vmem:[%s2769_s17] sm:$0xff]  ;;  %v173_v2 = vld [vmem:[%s2769_s17 + $0x8] sm:$0xff] }
  0x11   : > { %239 = vst.msk [vmem:[#allocation2 + $0x108] sm:$0xff] %vm204_vm0, %v2665_v0  ;;  %240 = vst.msk [vmem:[#allocation2 + $0x110] sm:$0xff] %vm204_vm0, %v2665_v0  ;;  %v174_v3 = vld [vmem:[%s2769_s17 + $0x10] sm:$0xff]  ;;  %v175_v7 = vld [vmem:[%s2769_s17 + $0x18] sm:$0xff] }
  0x12   : > { %242 = vst.msk [vmem:[#allocation2 + $0x120] sm:$0xff] %vm204_vm0, %v2665_v0  ;;  %243 = vst.msk [vmem:[#allocation2 + $0x128] sm:$0xff] %vm204_vm0, %v2665_v0  ;;  %v176_v8 = vld [vmem:[%s2769_s17 + $0x20] sm:$0xff]  ;;  %v177_v9 = vld [vmem:[%s2769_s17 + $0x28] sm:$0xff] }
  0x13   : > { %245 = vst.msk [vmem:[#allocation2 + $0x138] sm:$0xff] %vm204_vm0, %v2665_v0  ;;  %246 = vst.msk [vmem:[#allocation2 + $0x140] sm:$0xff] %vm204_vm0, %v2665_v0  ;;  %v178_v10 = vld [vmem:[%s2769_s17 + $0x30] sm:$0xff]  ;;  %v179_v11 = vld [vmem:[%s2769_s17 + $0x38] sm:$0xff] }
  0x14   : > { %248 = vst.msk [vmem:[#allocation2 + $0x150] sm:$0xff] %vm204_vm0, %v2665_v0  ;;  %249 = vst.msk [vmem:[#allocation2 + $0x158] sm:$0xff] %vm204_vm0, %v2665_v0  ;;  %v180_v12 = vld [vmem:[%s2769_s17 + $0x40] sm:$0xff]  ;;  %v181_v13 = vld [vmem:[%s2769_s17 + $0x48] sm:$0xff] }
  0x15   : > { %251 = vst.msk [vmem:[#allocation2 + $0x168] sm:$0xff] %vm204_vm0, %v2665_v0  ;;  %252 = vst.msk [vmem:[#allocation2 + $0x170] sm:$0xff] %vm204_vm0, %v2665_v0  ;;  %v182_v31 = vld [vmem:[%s2769_s17 + $0x50] sm:$0xff]  ;;  %v183_v32 = vld [vmem:[%s2769_s17 + $0x58] sm:$0xff] }
  0x16   : > { %254 = vst.msk [vmem:[#allocation2 + $0x180] sm:$0xff] %vm204_vm0, %v2665_v0  ;;  %255 = vst.msk [vmem:[#allocation2 + $0x188] sm:$0xff] %vm204_vm0, %v2665_v0  ;;  %v184_v39 = vld [vmem:[%s2769_s17 + $0x60] sm:$0xff]  ;;  %v185_v40 = vld [vmem:[%s2769_s17 + $0x68] sm:$0xff] }
  0x17   : > { %257 = vst.msk [vmem:[#allocation2 + $0x198] sm:$0xff] %vm204_vm0, %v2665_v0  ;;  %258 = vst.msk [vmem:[#allocation2 + $0x1a0] sm:$0xff] %vm204_vm0, %v2665_v0  ;;  %v186_v52 = vld [vmem:[%s2769_s17 + $0x70] sm:$0xff]  ;;  %v187_v53 = vld [vmem:[%s2769_s17 + $0x78] sm:$0xff] }
  0x18   : > { %208 = vst.msk [vmem:[#allocation2 + $0x10] sm:$0x3] %vm207_vm1, %v2665_v0  ;;  %211 = vst.msk [vmem:[#allocation2 + $0x28] sm:$0x3] %vm207_vm1, %v2665_v0  ;;  %v188_v60 = vld [vmem:[%s2769_s17 + $0x80] sm:$0xff]  ;;  %v189_v61 = vld [vmem:[%s2769_s17 + $0x88] sm:$0xff] }
  0x19   : > { %214 = vst.msk [vmem:[#allocation2 + $0x40] sm:$0x3] %vm207_vm1, %v2665_v0  ;;  %217 = vst.msk [vmem:[#allocation2 + $0x58] sm:$0x3] %vm207_vm1, %v2665_v0 }
  0x1a   : > { %220 = vst.msk [vmem:[#allocation2 + $0x70] sm:$0x3] %vm207_vm1, %v2665_v0  ;;  %223 = vst.msk [vmem:[#allocation2 + $0x88] sm:$0x3] %vm207_vm1, %v2665_v0 }
  0x1b   : > { %226 = vst.msk [vmem:[#allocation2 + $0xa0] sm:$0x3] %vm207_vm1, %v2665_v0  ;;  %229 = vst.msk [vmem:[#allocation2 + $0xb8] sm:$0x3] %vm207_vm1, %v2665_v0 }
  0x1c   : > { %232 = vst.msk [vmem:[#allocation2 + $0xd0] sm:$0x3] %vm207_vm1, %v2665_v0  ;;  %235 = vst.msk [vmem:[#allocation2 + $0xe8] sm:$0x3] %vm207_vm1, %v2665_v0 }
  0x1d   : > { %238 = vst.msk [vmem:[#allocation2 + $0x100] sm:$0x3] %vm207_vm1, %v2665_v0  ;;  %241 = vst.msk [vmem:[#allocation2 + $0x118] sm:$0x3] %vm207_vm1, %v2665_v0 }
  0x1e   : > { %244 = vst.msk [vmem:[#allocation2 + $0x130] sm:$0x3] %vm207_vm1, %v2665_v0  ;;  %247 = vst.msk [vmem:[#allocation2 + $0x148] sm:$0x3] %vm207_vm1, %v2665_v0 }
  0x1f   : > { %250 = vst.msk [vmem:[#allocation2 + $0x160] sm:$0x3] %vm207_vm1, %v2665_v0  ;;  %253 = vst.msk [vmem:[#allocation2 + $0x178] sm:$0x3] %vm207_vm1, %v2665_v0  ;;  %v551_v5 = vld [vmem:[#allocation2 + $0xa] sm:$0xff] }
  0x20   : > { %256 = vst.msk [vmem:[#allocation2 + $0x190] sm:$0x3] %vm207_vm1, %v2665_v0  ;;  %259 = vst.msk [vmem:[#allocation2 + $0x1a8] sm:$0x3] %vm207_vm1, %v2665_v0  ;;  %616 = vrot.lane.b32.xlu1 %v551_v5, %s2667_s19  ;;  %v358_v6 = vld [vmem:[#allocation2 + $0x9] sm:$0xff] }
  0x21   : > { %261 = vst.msk [vmem:[#allocation2 + $0x19] sm:$0xff] %vm204_vm0, %v172_v1  ;;  %262 = vst.msk [vmem:[#allocation2 + $0x21] sm:$0xff] %vm204_vm0, %v173_v2  ;;  %423 = vrot.lane.b32.xlu0 %v358_v6, %s2666_s18 }
  0x22   : > { %263 = vst.msk [vmem:[#allocation2 + $0x31] sm:$0xff] %vm204_vm0, %v174_v3  ;;  %264 = vst.msk [vmem:[#allocation2 + $0x39] sm:$0xff] %vm204_vm0, %v175_v7 }
  0x23   : > { %265 = vst.msk [vmem:[#allocation2 + $0x49] sm:$0xff] %vm204_vm0, %v176_v8  ;;  %266 = vst.msk [vmem:[#allocation2 + $0x51] sm:$0xff] %vm204_vm0, %v177_v9 }
  0x24   : > { %267 = vst.msk [vmem:[#allocation2 + $0x61] sm:$0xff] %vm204_vm0, %v178_v10  ;;  %268 = vst.msk [vmem:[#allocation2 + $0x69] sm:$0xff] %vm204_vm0, %v179_v11 }
  0x25   : > { %269 = vst.msk [vmem:[#allocation2 + $0x79] sm:$0xff] %vm204_vm0, %v180_v12  ;;  %270 = vst.msk [vmem:[#allocation2 + $0x81] sm:$0xff] %vm204_vm0, %v181_v13  ;;  %614 = vrot.lane.b32.xlu0 %v550_v16, %s2667_s19 }
  0x26   : > { %325 = vst.msk [vmem:[#allocation3] sm:$0xff] %vm204_vm0, %v293_v14  ;;  %326 = vst.msk [vmem:[#allocation3 + $0x8] sm:$0xff] %vm204_vm0, %v294_v15 }
  0x27   : > { %271 = vst.msk [vmem:[#allocation2 + $0x91] sm:$0xff] %vm204_vm0, %v182_v31  ;;  %272 = vst.msk [vmem:[#allocation2 + $0x99] sm:$0xff] %vm204_vm0, %v183_v32 }
  0x28   : > { %v359_v17 = vld [vmem:[#allocation2 + $0x19] sm:$0xff]  ;;  %v360_v20 = vld [vmem:[#allocation2 + $0x21] sm:$0xff]  ;;  %273 = vst.msk [vmem:[#allocation2 + $0xa9] sm:$0xff] %vm204_vm0, %v184_v39  ;;  %274 = vst.msk [vmem:[#allocation2 + $0xb1] sm:$0xff] %vm204_vm0, %v185_v40 }
  0x29   : > { %425 = vrot.lane.b32.xlu1 %v359_v17, %s2666_s18  ;;  %v743_v18 = vld [vmem:[#allocation2 + $0x18] sm:$0xff]  ;;  %v744_v19 = vld [vmem:[#allocation2 + $0x20] sm:$0xff]  ;;  %v745_v21 = vld [vmem:[#allocation2 + $0x30] sm:$0xff]  ;;  %275 = vst.msk [vmem:[#allocation2 + $0xc1] sm:$0xff] %vm204_vm0, %v186_v52 }
  0x2a   : > { %v746_v22 = vld [vmem:[#allocation2 + $0x38] sm:$0xff]  ;;  %327 = vst.msk [vmem:[#allocation3 + $0x10] sm:$0xff] %vm204_vm0, %v743_v18  ;;  %328 = vst.msk [vmem:[#allocation3 + $0x18] sm:$0xff] %vm204_vm0, %v744_v19  ;;  %v2802_v24 = vld [vmem:[#allocation2 + $0x48] sm:$0xff] }
  0x2b   : > { %v552_v23 = vld [vmem:[#allocation2 + $0x1a] sm:$0xff]  ;;  %329 = vst.msk [vmem:[#allocation3 + $0x20] sm:$0xff] %vm204_vm0, %v745_v21  ;;  %330 = vst.msk [vmem:[#allocation3 + $0x28] sm:$0xff] %vm204_vm0, %v746_v22  ;;  %v2804_v25 = vld [vmem:[#allocation2 + $0x50] sm:$0xff] }
  0x2c   : > { %331 = vst.msk [vmem:[#allocation3 + $0x30] sm:$0xff] %vm204_vm0, %v2802_v24  ;;  %332 = vst.msk [vmem:[#allocation3 + $0x38] sm:$0xff] %vm204_vm0, %v2804_v25  ;;  %618 = vrot.lane.b32.xlu0 %v552_v23, %s2667_s19  ;;  %v553_v26 = vld [vmem:[#allocation2 + $0x22] sm:$0xff]  ;;  %v2820_v29 = vld [vmem:[#allocation2 + $0x78] sm:$0xff] }
  0x2d   : > { %427 = vrot.lane.b32.xlu1 %v360_v20, %s2666_s18  ;;  %v2812_v27 = vld [vmem:[#allocation2 + $0x60] sm:$0xff]  ;;  %v2814_v28 = vld [vmem:[#allocation2 + $0x68] sm:$0xff]  ;;  %335 = vst.msk [vmem:[#allocation3 + $0x50] sm:$0xff] %vm204_vm0, %v2820_v29  ;;  %v938_v35 = vld [vmem:[#allocation2 + $0x31] sm:$0xff] }
  0x2e   : > { %333 = vst.msk [vmem:[#allocation3 + $0x40] sm:$0xff] %vm204_vm0, %v2812_v27  ;;  %334 = vst.msk [vmem:[#allocation3 + $0x48] sm:$0xff] %vm204_vm0, %v2814_v28  ;;  %v2822_v30 = vld [vmem:[#allocation2 + $0x80] sm:$0xff]  ;;  %v2838_v33 = vld [vmem:[#allocation2 + $0x90] sm:$0xff] }
  0x2f   : > { %336 = vst.msk [vmem:[#allocation3 + $0x58] sm:$0xff] %vm204_vm0, %v2822_v30  ;;  %v2840_v34 = vld [vmem:[#allocation2 + $0x98] sm:$0xff]  ;;  %337 = vst.msk [vmem:[#allocation3 + $0x60] sm:$0xff] %vm204_vm0, %v2838_v33  ;;  %v2861_v41 = vld [vmem:[#allocation2 + $0xa8] sm:$0xff] }
  0x30   : > { %807 = vrot.lane.b32.xlu0 %v743_v18, %s2668_s20  ;;  %338 = vst.msk [vmem:[#allocation3 + $0x68] sm:$0xff] %vm204_vm0, %v2840_v34  ;;  %v939_v36 = vld [vmem:[#allocation2 + $0x39] sm:$0xff]  ;;  %v2865_v42 = vld [vmem:[#allocation2 + $0xb0] sm:$0xff]  ;;  %339 = vst.msk [vmem:[#allocation3 + $0x70] sm:$0xff] %vm204_vm0, %v2861_v41 }
  0x31   : > { %620 = vrot.lane.b32.xlu1 %v553_v26, %s2667_s19  ;;  %v1131_v37 = vld [vmem:[#allocation2 + $0x32] sm:$0xff]  ;;  %v1132_v38 = vld [vmem:[#allocation2 + $0x3a] sm:$0xff]  ;;  %340 = vst.msk [vmem:[#allocation3 + $0x78] sm:$0xff] %vm204_vm0, %v2865_v42  ;;  %v1518_v43 = vld [vmem:[#allocation2 + $0x49] sm:$0xff] }
  0x32   : > { %v1519_v44 = vld [vmem:[#allocation2 + $0x51] sm:$0xff]  ;;  %276 = vst.msk [vmem:[#allocation2 + $0xc9] sm:$0xff] %vm204_vm0, %v187_v53  ;;  %v2900_v54 = vld [vmem:[#allocation2 + $0xc0] sm:$0xff]  ;;  %v943_v57 = vld [vmem:[#allocation2 + $0x69] sm:$0xff] }
  0x33   : > { %v1711_v50 = vld [vmem:[#allocation2 + $0x4a] sm:$0xff]  ;;  %v1712_v51 = vld [vmem:[#allocation2 + $0x52] sm:$0xff]  ;;  %341 = vst.msk [vmem:[#allocation3 + $0x80] sm:$0xff] %vm204_vm0, %v2900_v54  ;;  %v942_v56 = vld [vmem:[#allocation2 + $0x61] sm:$0xff] }
  0x34   : > { %811 = vrot.lane.b32.xlu0 %v745_v21, %s2668_s20  ;;  %v1135_v58 = vld [vmem:[#allocation2 + $0x62] sm:$0xff]  ;;  %v1136_v59 = vld [vmem:[#allocation2 + $0x6a] sm:$0xff]  ;;  %277 = vst.msk [vmem:[#allocation2 + $0xd9] sm:$0xff] %vm204_vm0, %v188_v60  ;;  %278 = vst.msk [vmem:[#allocation2 + $0xe1] sm:$0xff] %vm204_vm0, %v189_v61 }
  0x35   : > { %809 = vrot.lane.b32.xlu1 %v744_v19, %s2668_s20  ;;  %v2939_v0 = vld [vmem:[#allocation2 + $0x79] sm:$0xff]  ;;  %v2945_v3 = vld [vmem:[#allocation2 + $0x81] sm:$0xff]  ;;  %v190_v19 = vld [vmem:[%s2769_s17 + $0x90] sm:$0xff] }
  0x36   : > { %v2956_v8 = vld [vmem:[#allocation2 + $0x7a] sm:$0xff]  ;;  %v2963_v10 = vld [vmem:[#allocation2 + $0x82] sm:$0xff]  ;;  %279 = vst.msk [vmem:[#allocation2 + $0xf1] sm:$0xff] %vm204_vm0, %v190_v19  ;;  %v3075_v53 = vld [vmem:[#allocation2 + $0xb1] sm:$0xff] }
  0x38   : > { %1000 = vrot.lane.b32.xlu0 %v359_v17, %s2669_s21 }
  0x39   : > { %813 = vrot.lane.b32.xlu1 %v746_v22, %s2668_s20  ;;  %v2902_v55 = vld [vmem:[#allocation2 + $0xc8] sm:$0xff] }
  0x3a   : > { %342 = vst.msk [vmem:[#allocation3 + $0x88] sm:$0xff] %vm204_vm0, %v2902_v55 }
  0x3b   : > { %v2928_v62 = vld [vmem:[#allocation2 + $0xd8] sm:$0xff]  ;;  %v2932_v63 = vld [vmem:[#allocation2 + $0xe0] sm:$0xff] }
  0x3c   : > { %1004 = vrot.lane.b32.xlu0 %v938_v35, %s2669_s21  ;;  %343 = vst.msk [vmem:[#allocation3 + $0x90] sm:$0xff] %vm204_vm0, %v2928_v62  ;;  %344 = vst.msk [vmem:[#allocation3 + $0x98] sm:$0xff] %vm204_vm0, %v2932_v63 }
  0x3d   : > { %1002 = vrot.lane.b32.xlu1 %v360_v20, %s2669_s21  ;;  %v191_v20 = vld [vmem:[%s2769_s17 + $0x98] sm:$0xff] }
  0x3e   : > { %280 = vst.msk [vmem:[#allocation2 + $0xf9] sm:$0xff] %vm204_vm0, %v191_v20 }
  0x40   : > { %1193 = vrot.lane.b32.xlu0 %v552_v23, %s2670_s22 }
  0x41   : > { %1006 = vrot.lane.b32.xlu1 %v939_v36, %s2669_s21 }
  0x44   : > { %1197 = vrot.lane.b32.xlu0 %v1131_v37, %s2670_s22 }
  0x45   : > { %1195 = vrot.lane.b32.xlu1 %v553_v26, %s2670_s22  ;;  %v3000_v26 = vld [vmem:[#allocation2 + $0xf8] sm:$0xff] }
  0x46   : > { %346 = vst.msk [vmem:[#allocation3 + $0xa8] sm:$0xff] %vm204_vm0, %v3000_v26 }
  0x48   : > { %1387 = vrot.lane.b32.xlu0 %v745_v21, %s2671_s23 }
  0x49   : > { %1199 = vrot.lane.b32.xlu1 %v1132_v38, %s2670_s22 }
  0x4c   : > { %1391 = vrot.lane.b32.xlu0 %v2802_v24, %s2671_s23 }
  0x4d   : > { %1389 = vrot.lane.b32.xlu1 %v746_v22, %s2671_s23 }
  0x50   : > { %1580 = vrot.lane.b32.xlu0 %v938_v35, %s2672_s24 }
  0x51   : > { %1393 = vrot.lane.b32.xlu1 %v2804_v25, %s2671_s23 }
  0x54   : > { %1584 = vrot.lane.b32.xlu0 %v1518_v43, %s2672_s24 }
  0x55   : > { %1582 = vrot.lane.b32.xlu1 %v939_v36, %s2672_s24 }
  0x58   : > { %1773 = vrot.lane.b32.xlu0 %v1131_v37, %s2673_s25 }
  0x59   : > { %1586 = vrot.lane.b32.xlu1 %v1519_v44, %s2672_s24 }
  0x5c   : > { %429 = vrot.lane.b32.xlu0 %v938_v35, %s2666_s18 }
  0x5d   : > { %1775 = vrot.lane.b32.xlu1 %v1132_v38, %s2673_s25 }
  0x60   : > { %1777 = vrot.lane.b32.xlu0 %v1711_v50, %s2673_s25 }
  0x61   : > { %431 = vrot.lane.b32.xlu1 %v939_v36, %s2666_s18  ;;  %v3027_v36 = vld [vmem:[#allocation2 + $0x92] sm:$0xff] }
  0x64   : > { %433 = vrot.lane.b32.xlu0 %v1518_v43, %s2666_s18 }
  0x65   : > { %1779 = vrot.lane.b32.xlu1 %v1712_v51, %s2673_s25 }
  0x68   : > { %622 = vrot.lane.b32.xlu0 %v1131_v37, %s2667_s19 }
  0x69   : > { %435 = vrot.lane.b32.xlu1 %v1519_v44, %s2666_s18 }
  0x6c   : > { %626 = vrot.lane.b32.xlu0 %v1711_v50, %s2667_s19 }
  0x6d   : > { %624 = vrot.lane.b32.xlu1 %v1132_v38, %s2667_s19  ;;  %v3035_v38 = vld [vmem:[#allocation2 + $0x9a] sm:$0xff] }
  0x70   : > { %815 = vrot.lane.b32.xlu0 %v2802_v24, %s2668_s20 }
  0x71   : > { %628 = vrot.lane.b32.xlu1 %v1712_v51, %s2667_s19 }
  0x74   : > { %819 = vrot.lane.b32.xlu0 %v2812_v27, %s2668_s20 }
  0x75   : > { %817 = vrot.lane.b32.xlu1 %v2804_v25, %s2668_s20  ;;  %v2998_v25 = vld [vmem:[#allocation2 + $0xf0] sm:$0xff] }
  0x76   : > { %345 = vst.msk [vmem:[#allocation3 + $0xa0] sm:$0xff] %vm204_vm0, %v2998_v25 }
  0x78   : > { %1008 = vrot.lane.b32.xlu0 %v1518_v43, %s2669_s21  ;;  %v192_v43 = vld [vmem:[%s2769_s17 + $0xa0] sm:$0xff] }
  0x79   : > { %821 = vrot.lane.b32.xlu1 %v2814_v28, %s2668_s20  ;;  %281 = vst.msk [vmem:[#allocation2 + $0x109] sm:$0xff] %vm204_vm0, %v192_v43 }
  0x7c   : > { %1012 = vrot.lane.b32.xlu0 %v942_v56, %s2669_s21 }
  0x7d   : > { %1010 = vrot.lane.b32.xlu1 %v1519_v44, %s2669_s21  ;;  %v193_v44 = vld [vmem:[%s2769_s17 + $0xa8] sm:$0xff] }
  0x7e   : > { %282 = vst.msk [vmem:[#allocation2 + $0x111] sm:$0xff] %vm204_vm0, %v193_v44 }
  0x80   : > { %1201 = vrot.lane.b32.xlu0 %v1711_v50, %s2670_s22  ;;  %v422_v1 = vpop.permute.xlu0 %421  ;;  %v3067_v50 = vld [vmem:[#allocation2 + $0xa9] sm:$0xff] }
  0x81   : > { %1014 = vrot.lane.b32.xlu1 %v943_v57, %s2669_s21  ;;  %518 = vst.msk [vmem:[#allocation3] sm:$0xff] %vm517_vm4, %v422_v1 }
  0x84   : > { %1205 = vrot.lane.b32.xlu0 %v1135_v58, %s2670_s22 }
  0x85   : > { %1203 = vrot.lane.b32.xlu1 %v1712_v51, %s2670_s22  ;;  %v3059_v49 = vld [vmem:[#allocation2 + $0x110] sm:$0xff] }
  0x86   : > { %348 = vst.msk [vmem:[#allocation3 + $0xb8] sm:$0xff] %vm204_vm0, %v3059_v49 }
  0x88   : > { %1395 = vrot.lane.b32.xlu0 %v2812_v27, %s2671_s23 }
  0x89   : > { %1207 = vrot.lane.b32.xlu1 %v1136_v59, %s2670_s22 }
  0x8c   : > { %1399 = vrot.lane.b32.xlu0 %v2820_v29, %s2671_s23 }
  0x8d   : > { %1397 = vrot.lane.b32.xlu1 %v2814_v28, %s2671_s23  ;;  %v3011_v28 = vld [vmem:[#allocation2 + $0x91] sm:$0xff] }
  0x90   : > { %1588 = vrot.lane.b32.xlu0 %v942_v56, %s2672_s24 }
  0x91   : > { %1401 = vrot.lane.b32.xlu1 %v2822_v30, %s2671_s23 }
  0x92   : > { %v617_v2 = vpop.permute.xlu1 %616 }
  0x93   : > { %v424_v4 = vpop.permute.xlu0 %423 }
  0x94   : > { %1592 = vrot.lane.b32.xlu0 %v2939_v0, %s2672_s24  ;;  %519 = vst.msk [vmem:[#allocation3 + $0x8] sm:$0xff] %vm517_vm4, %v424_v4 }
  0x95   : > { %1590 = vrot.lane.b32.xlu1 %v943_v57, %s2672_s24  ;;  %712 = vst.msk [vmem:[#allocation3 + $0x8] sm:$0xff] %vm710_vm5, %v617_v2 }
  0x97   : > { %v615_v6 = vpop.permute.xlu0 %614 }
  0x98   : > { %1781 = vrot.lane.b32.xlu0 %v1135_v58, %s2673_s25  ;;  %711 = vst.msk [vmem:[#allocation3] sm:$0xff] %vm710_vm5, %v615_v6  ;;  %v1720_v6 = vld [vmem:[#allocation2 + $0xb2] sm:$0xff] }
  0x99   : > { %1594 = vrot.lane.b32.xlu1 %v2945_v3, %s2672_s24 }
  0x9b   : > { %v426_v5 = vpop.permute.xlu1 %425 }
  0x9c   : > { %520 = vst.msk [vmem:[#allocation3 + $0x10] sm:$0xff] %vm517_vm4, %v426_v5  ;;  %437 = vrot.lane.b32.xlu0 %v942_v56, %s2666_s18 }
  0x9d   : > { %1783 = vrot.lane.b32.xlu1 %v1136_v59, %s2673_s25 }
  0x9e   : > { %v619_v9 = vpop.permute.xlu0 %618 }
  0x9f   : > { %v428_v7 = vpop.permute.xlu1 %427  ;;  %713 = vst.msk [vmem:[#allocation3 + $0x10] sm:$0xff] %vm710_vm5, %v619_v9 }
  0xa0   : > { %521 = vst.msk [vmem:[#allocation3 + $0x18] sm:$0xff] %vm517_vm4, %v428_v7  ;;  %1785 = vrot.lane.b32.xlu0 %v2956_v8, %s2673_s25 }
  0xa1   : > { %439 = vrot.lane.b32.xlu1 %v943_v57, %s2666_s18 }
  0xa2   : > { %v808_v12 = vpop.permute.xlu0 %807 }
  0xa3   : > { %v621_v11 = vpop.permute.xlu1 %620  ;;  %904 = vst.msk [vmem:[#allocation3] sm:$0xff] %vm903_vm6, %v808_v12 }
  0xa4   : > { %714 = vst.msk [vmem:[#allocation3 + $0x18] sm:$0xff] %vm710_vm5, %v621_v11  ;;  %441 = vrot.lane.b32.xlu0 %v2939_v0, %s2666_s18 }
  0xa5   : > { %1787 = vrot.lane.b32.xlu1 %v2963_v10, %s2673_s25 }
  0xa6   : > { %v812_v14 = vpop.permute.xlu0 %811 }
  0xa7   : > { %v810_v13 = vpop.permute.xlu1 %809  ;;  %906 = vst.msk [vmem:[#allocation3 + $0x10] sm:$0xff] %vm903_vm6, %v812_v14 }
  0xa8   : > { %905 = vst.msk [vmem:[#allocation3 + $0x8] sm:$0xff] %vm903_vm6, %v810_v13  ;;  %630 = vrot.lane.b32.xlu0 %v1135_v58, %s2667_s19 }
  0xa9   : > { %443 = vrot.lane.b32.xlu1 %v2945_v3, %s2666_s18 }
  0xaa   : > { %v1001_v16 = vpop.permute.xlu0 %1000 }
  0xab   : > { %v814_v15 = vpop.permute.xlu1 %813  ;;  %1097 = vst.msk [vmem:[#allocation3] sm:$0xff] %vm1096_vm7, %v1001_v16  ;;  %v195_v16 = vld [vmem:[%s2769_s17 + $0xb8] sm:$0xff] }
  0xac   : > { %907 = vst.msk [vmem:[#allocation3 + $0x18] sm:$0xff] %vm903_vm6, %v814_v15  ;;  %634 = vrot.lane.b32.xlu0 %v2956_v8, %s2667_s19  ;;  %v194_v15 = vld [vmem:[%s2769_s17 + $0xb0] sm:$0xff] }
  0xad   : > { %632 = vrot.lane.b32.xlu1 %v1136_v59, %s2667_s19  ;;  %283 = vst.msk [vmem:[#allocation2 + $0x121] sm:$0xff] %vm204_vm0, %v194_v15  ;;  %284 = vst.msk [vmem:[#allocation2 + $0x129] sm:$0xff] %vm204_vm0, %v195_v16 }
  0xae   : > { %v1005_v18 = vpop.permute.xlu0 %1004 }
  0xaf   : > { %v1003_v17 = vpop.permute.xlu1 %1002  ;;  %1099 = vst.msk [vmem:[#allocation3 + $0x10] sm:$0xff] %vm1096_vm7, %v1005_v18 }
  0xb0   : > { %1098 = vst.msk [vmem:[#allocation3 + $0x8] sm:$0xff] %vm1096_vm7, %v1003_v17  ;;  %823 = vrot.lane.b32.xlu0 %v2820_v29, %s2668_s20 }
  0xb1   : > { %636 = vrot.lane.b32.xlu1 %v2963_v10, %s2667_s19 }
  0xb2   : > { %v1194_v22 = vpop.permute.xlu0 %1193 }
  0xb3   : > { %v1007_v21 = vpop.permute.xlu1 %1006  ;;  %1290 = vst.msk [vmem:[#allocation3] sm:$0xff] %vm1289_vm8, %v1194_v22 }
  0xb4   : > { %1100 = vst.msk [vmem:[#allocation3 + $0x18] sm:$0xff] %vm1096_vm7, %v1007_v21  ;;  %827 = vrot.lane.b32.xlu0 %v2838_v33, %s2668_s20  ;;  %v3132_v21 = vld [vmem:[#allocation2 + $0x120] sm:$0xff]  ;;  %v3134_v22 = vld [vmem:[#allocation2 + $0x128] sm:$0xff] }
  0xb5   : > { %825 = vrot.lane.b32.xlu1 %v2822_v30, %s2668_s20  ;;  %v3019_v30 = vld [vmem:[#allocation2 + $0x99] sm:$0xff]  ;;  %349 = vst.msk [vmem:[#allocation3 + $0xc0] sm:$0xff] %vm204_vm0, %v3132_v21  ;;  %350 = vst.msk [vmem:[#allocation3 + $0xc8] sm:$0xff] %vm204_vm0, %v3134_v22 }
  0xb6   : > { %v1198_v24 = vpop.permute.xlu0 %1197 }
  0xb7   : > { %v1196_v23 = vpop.permute.xlu1 %1195  ;;  %1292 = vst.msk [vmem:[#allocation3 + $0x10] sm:$0xff] %vm1289_vm8, %v1198_v24  ;;  %v3153_v24 = vld [vmem:[#allocation2 + $0xc9] sm:$0xff] }
  0xb8   : > { %1291 = vst.msk [vmem:[#allocation3 + $0x8] sm:$0xff] %vm1289_vm8, %v1196_v23  ;;  %1016 = vrot.lane.b32.xlu0 %v2939_v0, %s2669_s21 }
  0xb9   : > { %829 = vrot.lane.b32.xlu1 %v2840_v34, %s2668_s20 }
  0xba   : > { %v1388_v29 = vpop.permute.xlu0 %1387 }
  0xbb   : > { %v1200_v27 = vpop.permute.xlu1 %1199  ;;  %1484 = vst.msk [vmem:[#allocation3] sm:$0xff] %vm1483_vm9, %v1388_v29 }
  0xbc   : > { %1293 = vst.msk [vmem:[#allocation3 + $0x18] sm:$0xff] %vm1289_vm8, %v1200_v27  ;;  %1020 = vrot.lane.b32.xlu0 %v3011_v28, %s2669_s21 }
  0xbd   : > { %1018 = vrot.lane.b32.xlu1 %v2945_v3, %s2669_s21  ;;  %v3090_v3 = vld [vmem:[#allocation2 + $0xaa] sm:$0xff] }
  0xbe   : > { %v1392_v32 = vpop.permute.xlu0 %1391 }
  0xbf   : > { %v1390_v31 = vpop.permute.xlu1 %1389  ;;  %1486 = vst.msk [vmem:[#allocation3 + $0x10] sm:$0xff] %vm1483_vm9, %v1392_v32  ;;  %v3168_v32 = vld [vmem:[#allocation2 + $0xca] sm:$0xff] }
  0xc0   : > { %1485 = vst.msk [vmem:[#allocation3 + $0x8] sm:$0xff] %vm1483_vm9, %v1390_v31  ;;  %1209 = vrot.lane.b32.xlu0 %v2956_v8, %s2670_s22 }
  0xc1   : > { %1022 = vrot.lane.b32.xlu1 %v3019_v30, %s2669_s21 }
  0xc2   : > { %v1581_v37 = vpop.permute.xlu0 %1580 }
  0xc3   : > { %v1394_v35 = vpop.permute.xlu1 %1393  ;;  %1677 = vst.msk [vmem:[#allocation3] sm:$0xff] %vm1676_vm10, %v1581_v37  ;;  %v196_v37 = vld [vmem:[%s2769_s17 + $0xc0] sm:$0xff] }
  0xc4   : > { %1487 = vst.msk [vmem:[#allocation3 + $0x18] sm:$0xff] %vm1483_vm9, %v1394_v35  ;;  %1213 = vrot.lane.b32.xlu0 %v3027_v36, %s2670_s22 }
  0xc5   : > { %1211 = vrot.lane.b32.xlu1 %v2963_v10, %s2670_s22  ;;  %285 = vst.msk [vmem:[#allocation2 + $0x139] sm:$0xff] %vm204_vm0, %v196_v37 }
  0xc6   : > { %v1585_v40 = vpop.permute.xlu0 %1584 }
  0xc7   : > { %v1583_v39 = vpop.permute.xlu1 %1582  ;;  %1679 = vst.msk [vmem:[#allocation3 + $0x10] sm:$0xff] %vm1676_vm10, %v1585_v40 }
  0xc8   : > { %1678 = vst.msk [vmem:[#allocation3 + $0x8] sm:$0xff] %vm1676_vm10, %v1583_v39  ;;  %1403 = vrot.lane.b32.xlu0 %v2838_v33, %s2671_s23  ;;  %v3054_v33 = vld [vmem:[#allocation2 + $0x108] sm:$0xff] }
  0xc9   : > { %1215 = vrot.lane.b32.xlu1 %v3035_v38, %s2670_s22  ;;  %347 = vst.msk [vmem:[#allocation3 + $0xb0] sm:$0xff] %vm204_vm0, %v3054_v33 }
  0xca   : > { %v1774_v46 = vpop.permute.xlu0 %1773 }
  0xcb   : > { %v1587_v45 = vpop.permute.xlu1 %1586  ;;  %1870 = vst.msk [vmem:[#allocation3] sm:$0xff] %vm1869_vm11, %v1774_v46  ;;  %v3200_v46 = vld [vmem:[#allocation2 + $0xd9] sm:$0xff] }
  0xcc   : > { %1680 = vst.msk [vmem:[#allocation3 + $0x18] sm:$0xff] %vm1676_vm10, %v1587_v45  ;;  %1407 = vrot.lane.b32.xlu0 %v2861_v41, %s2671_s23  ;;  %v3187_v45 = vld [vmem:[#allocation2 + $0x138] sm:$0xff] }
  0xcd   : > { %1405 = vrot.lane.b32.xlu1 %v2840_v34, %s2671_s23  ;;  %351 = vst.msk [vmem:[#allocation3 + $0xd0] sm:$0xff] %vm204_vm0, %v3187_v45 }
  0xce   : > { %v430_v48 = vpop.permute.xlu0 %429 }
  0xcf   : > { %v1776_v47 = vpop.permute.xlu1 %1775  ;;  %522 = vst.msk [vmem:[#allocation3 + $0x20] sm:$0xff] %vm517_vm4, %v430_v48 }
  0xd0   : > { %1871 = vst.msk [vmem:[#allocation3 + $0x8] sm:$0xff] %vm1869_vm11, %v1776_v47  ;;  %1596 = vrot.lane.b32.xlu0 %v3011_v28, %s2672_s24 }
  0xd1   : > { %1409 = vrot.lane.b32.xlu1 %v2865_v42, %s2671_s23 }
  0xd2   : > { %v1778_v51 = vpop.permute.xlu0 %1777  ;;  %v1902_v52 = vld [vmem:[#allocation3] sm:$0xff] }
  0xd3   : > { %v432_v34 = vpop.permute.xlu1 %431  ;;  %1872 = vst.msk [vmem:[#allocation3 + $0x10] sm:$0xff] %vm1869_vm11, %v1778_v51 }
  0xd4   : > { %523 = vst.msk [vmem:[#allocation3 + $0x28] sm:$0xff] %vm517_vm4, %v432_v34  ;;  %1600 = vrot.lane.b32.xlu0 %v3067_v50, %s2672_s24  ;;  %v3208_v34 = vld [vmem:[#allocation2 + $0xe1] sm:$0xff] }
  0xd5   : > { %1598 = vrot.lane.b32.xlu1 %v3019_v30, %s2672_s24 }
  0xd6   : > { %v434_v59 = vpop.permute.xlu0 %433 }
  0xd7   : > { %v1780_v56 = vpop.permute.xlu1 %1779  ;;  %v1903_v57 = vld [vmem:[#allocation3 + $0x8] sm:$0xff]  ;;  %524 = vst.msk [vmem:[#allocation3 + $0x30] sm:$0xff] %vm517_vm4, %v434_v59 }
  0xd8   : > { %1873 = vst.msk [vmem:[#allocation3 + $0x18] sm:$0xff] %vm1869_vm11, %v1780_v56  ;;  %v1934_v58 = vpack.c.bf16 %v1903_v57, %v1902_v52  ;;  %1789 = vrot.lane.b32.xlu0 %v3027_v36, %s2673_s25 }
  0xd9   : > { %1602 = vrot.lane.b32.xlu1 %v3075_v53, %s2672_s24 }
  0xda   : > { %2598 = vmatprep.mubr.msk.bf16.mxu0 %vm1964_vm12, %v1934_v58  ;;  %v623_v61 = vpop.permute.xlu0 %622  ;;  %v1904_v0 = vld [vmem:[#allocation3 + $0x10] sm:$0xff] }
  0xdb   : > { %v436_v60 = vpop.permute.xlu1 %435  ;;  %715 = vst.msk [vmem:[#allocation3 + $0x20] sm:$0xff] %vm710_vm5, %v623_v61  ;;  %v3223_v61 = vld [vmem:[#allocation2 + $0xda] sm:$0xff] }
  0xdc   : > { %525 = vst.msk [vmem:[#allocation3 + $0x38] sm:$0xff] %vm517_vm4, %v436_v60  ;;  %445 = vrot.lane.b32.xlu0 %v3011_v28, %s2666_s18 }
  0xdd   : > { %1791 = vrot.lane.b32.xlu1 %v3035_v38, %s2673_s25 }
  0xde   : > { %v627_v5 = vpop.permute.xlu0 %626 }
  0xdf   : > { %v625_v1 = vpop.permute.xlu1 %624  ;;  %v1905_v2 = vld [vmem:[#allocation3 + $0x18] sm:$0xff]  ;;  %717 = vst.msk [vmem:[#allocation3 + $0x30] sm:$0xff] %vm710_vm5, %v627_v5 }
  0xe0   : > { %716 = vst.msk [vmem:[#allocation3 + $0x28] sm:$0xff] %vm710_vm5, %v625_v1  ;;  %v1935_v4 = vpack.c.bf16 %v1905_v2, %v1904_v0  ;;  %1793 = vrot.lane.b32.xlu0 %v3090_v3, %s2673_s25  ;;  %v1724_v2 = vld [vmem:[#allocation2 + $0xe2] sm:$0xff] }
  0xe1   : > { %447 = vrot.lane.b32.xlu1 %v3019_v30, %s2666_s18  ;;  %v3161_v30 = vld [vmem:[#allocation2 + $0xc2] sm:$0xff] }
  0xe2   : > { %2599 = vmatmul.mubr.msk.bf16.vlgmr.msra.gmra.mrb[0].mxu0 %vm1964_vm12, %v1935_v4  ;;  %v816_v8 = vpop.permute.xlu0 %815 }
  0xe3   : > { %v629_v7 = vpop.permute.xlu1 %628  ;;  %908 = vst.msk [vmem:[#allocation3 + $0x20] sm:$0xff] %vm903_vm6, %v816_v8 }
  0xe4   : > { %718 = vst.msk [vmem:[#allocation3 + $0x38] sm:$0xff] %vm710_vm5, %v629_v7  ;;  %449 = vrot.lane.b32.xlu0 %v3067_v50, %s2666_s18 }
  0xe5   : > { %1795 = vrot.lane.b32.xlu1 %v1720_v6, %s2673_s25 }
  0xe6   : > { %v820_v10 = vpop.permute.xlu0 %819 }
  0xe7   : > { %v818_v9 = vpop.permute.xlu1 %817  ;;  %910 = vst.msk [vmem:[#allocation3 + $0x30] sm:$0xff] %vm903_vm6, %v820_v10 }
  0xe8   : > { %909 = vst.msk [vmem:[#allocation3 + $0x28] sm:$0xff] %vm903_vm6, %v818_v9  ;;  %638 = vrot.lane.b32.xlu0 %v3027_v36, %s2667_s19 }
  0xe9   : > { %451 = vrot.lane.b32.xlu1 %v3075_v53, %s2666_s18 }
  0xea   : > { %v1009_v12 = vpop.permute.xlu0 %1008 }
  0xeb   : > { %v822_v11 = vpop.permute.xlu1 %821  ;;  %1101 = vst.msk [vmem:[#allocation3 + $0x20] sm:$0xff] %vm1096_vm7, %v1009_v12  ;;  %v199_v12 = vld [vmem:[%s2769_s17 + $0xd8] sm:$0xff] }
  0xec   : > { %911 = vst.msk [vmem:[#allocation3 + $0x38] sm:$0xff] %vm903_vm6, %v822_v11  ;;  %642 = vrot.lane.b32.xlu0 %v3090_v3, %s2667_s19  ;;  %v198_v11 = vld [vmem:[%s2769_s17 + $0xd0] sm:$0xff] }
  0xed   : > { %640 = vrot.lane.b32.xlu1 %v3035_v38, %s2667_s19  ;;  %v197_v38 = vld [vmem:[%s2769_s17 + $0xc8] sm:$0xff]  ;;  %287 = vst.msk [vmem:[#allocation2 + $0x151] sm:$0xff] %vm204_vm0, %v198_v11  ;;  %288 = vst.msk [vmem:[#allocation2 + $0x159] sm:$0xff] %vm204_vm0, %v199_v12 }
  0xee   : > { %v1013_v14 = vpop.permute.xlu0 %1012  ;;  %286 = vst.msk [vmem:[#allocation2 + $0x141] sm:$0xff] %vm204_vm0, %v197_v38 }
  0xef   : > { %v1011_v13 = vpop.permute.xlu1 %1010  ;;  %1103 = vst.msk [vmem:[#allocation3 + $0x30] sm:$0xff] %vm1096_vm7, %v1013_v14 }
  0xf0   : > { %1102 = vst.msk [vmem:[#allocation3 + $0x28] sm:$0xff] %vm1096_vm7, %v1011_v13  ;;  %831 = vrot.lane.b32.xlu0 %v2861_v41, %s2668_s20 }
  0xf1   : > { %644 = vrot.lane.b32.xlu1 %v1720_v6, %s2667_s19 }
  0xf2   : > { %v1202_v18 = vpop.permute.xlu0 %1201 }
  0xf3   : > { %v1015_v17 = vpop.permute.xlu1 %1014  ;;  %1294 = vst.msk [vmem:[#allocation3 + $0x20] sm:$0xff] %vm1289_vm8, %v1202_v18 }
  0xf4   : > { %1104 = vst.msk [vmem:[#allocation3 + $0x38] sm:$0xff] %vm1096_vm7, %v1015_v17  ;;  %835 = vrot.lane.b32.xlu0 %v2900_v54, %s2668_s20  ;;  %v3265_v17 = vld [vmem:[#allocation2 + $0x150] sm:$0xff]  ;;  %v3267_v18 = vld [vmem:[#allocation2 + $0x158] sm:$0xff] }
  0xf5   : > { %833 = vrot.lane.b32.xlu1 %v2865_v42, %s2668_s20  ;;  %v3145_v42 = vld [vmem:[#allocation2 + $0xc1] sm:$0xff]  ;;  %353 = vst.msk [vmem:[#allocation3 + $0xe0] sm:$0xff] %vm204_vm0, %v3265_v17  ;;  %354 = vst.msk [vmem:[#allocation3 + $0xe8] sm:$0xff] %vm204_vm0, %v3267_v18 }
  0xf6   : > { %v1206_v20 = vpop.permute.xlu0 %1205 }
  0xf7   : > { %v1204_v19 = vpop.permute.xlu1 %1203  ;;  %1296 = vst.msk [vmem:[#allocation3 + $0x30] sm:$0xff] %vm1289_vm8, %v1206_v20  ;;  %v3286_v20 = vld [vmem:[#allocation2 + $0xf9] sm:$0xff] }
  0xf8   : > { %1295 = vst.msk [vmem:[#allocation3 + $0x28] sm:$0xff] %vm1289_vm8, %v1204_v19  ;;  %1024 = vrot.lane.b32.xlu0 %v3067_v50, %s2669_s21 }
  0xf9   : > { %837 = vrot.lane.b32.xlu1 %v2902_v55, %s2668_s20 }
  0xfa   : > { %v1396_v23 = vpop.permute.xlu0 %1395 }
  0xfb   : > { %v1208_v41 = vpop.permute.xlu1 %1207  ;;  %1488 = vst.msk [vmem:[#allocation3 + $0x20] sm:$0xff] %vm1483_vm9, %v1396_v23 }
  0xfc   : > { %1297 = vst.msk [vmem:[#allocation3 + $0x38] sm:$0xff] %vm1289_vm8, %v1208_v41  ;;  %1028 = vrot.lane.b32.xlu0 %v3145_v42, %s2669_s21 }
  0xfd   : > { %1026 = vrot.lane.b32.xlu1 %v3075_v53, %s2669_s21 }
  0xfe   : > { %v1400_v28 = vpop.permute.xlu0 %1399 }
  0xff   : > { %v1398_v27 = vpop.permute.xlu1 %1397  ;;  %1490 = vst.msk [vmem:[#allocation3 + $0x30] sm:$0xff] %vm1483_vm9, %v1400_v28  ;;  %v3301_v28 = vld [vmem:[#allocation2 + $0xfa] sm:$0xff] }
 0x100   : > { %1489 = vst.msk [vmem:[#allocation3 + $0x28] sm:$0xff] %vm1483_vm9, %v1398_v27  ;;  %1217 = vrot.lane.b32.xlu0 %v3090_v3, %s2670_s22 }
 0x101   : > { %1030 = vrot.lane.b32.xlu1 %v3153_v24, %s2669_s21 }
 0x102   : > { %v1589_v31 = vpop.permute.xlu0 %1588 }
 0x103   : > { %v1402_v29 = vpop.permute.xlu1 %1401  ;;  %1681 = vst.msk [vmem:[#allocation3 + $0x20] sm:$0xff] %vm1676_vm10, %v1589_v31  ;;  %v200_v31 = vld [vmem:[%s2769_s17 + $0xe0] sm:$0xff] }
 0x104   : > { %1491 = vst.msk [vmem:[#allocation3 + $0x38] sm:$0xff] %vm1483_vm9, %v1402_v29  ;;  %1221 = vrot.lane.b32.xlu0 %v3161_v30, %s2670_s22 }
 0x105   : > { %1219 = vrot.lane.b32.xlu1 %v1720_v6, %s2670_s22  ;;  %289 = vst.msk [vmem:[#allocation2 + $0x169] sm:$0xff] %vm204_vm0, %v200_v31  ;;  %v3445_v31 = vld [vmem:[#allocation2 + $0x141] sm:$0xff] }
 0x106   : > { %v1593_v36 = vpop.permute.xlu0 %1592 }
 0x107   : > { %v1591_v35 = vpop.permute.xlu1 %1590  ;;  %1683 = vst.msk [vmem:[#allocation3 + $0x30] sm:$0xff] %vm1676_vm10, %v1593_v36 }
 0x108   : > { %1682 = vst.msk [vmem:[#allocation3 + $0x28] sm:$0xff] %vm1676_vm10, %v1591_v35  ;;  %1411 = vrot.lane.b32.xlu0 %v2900_v54, %s2671_s23  ;;  %v3192_v54 = vld [vmem:[#allocation2 + $0x140] sm:$0xff] }
 0x109   : > { %1223 = vrot.lane.b32.xlu1 %v3168_v32, %s2670_s22  ;;  %352 = vst.msk [vmem:[#allocation3 + $0xd8] sm:$0xff] %vm204_vm0, %v3192_v54 }
 0x10a   : > { %v1782_v40 = vpop.permute.xlu0 %1781 }
 0x10b   : > { %v1595_v39 = vpop.permute.xlu1 %1594  ;;  %1874 = vst.msk [vmem:[#allocation3 + $0x20] sm:$0xff] %vm1869_vm11, %v1782_v40  ;;  %v3333_v40 = vld [vmem:[#allocation2 + $0x109] sm:$0xff] }
 0x10c   : > { %1684 = vst.msk [vmem:[#allocation3 + $0x38] sm:$0xff] %vm1676_vm10, %v1595_v39  ;;  %1415 = vrot.lane.b32.xlu0 %v2928_v62, %s2671_s23  ;;  %v3320_v39 = vld [vmem:[#allocation2 + $0x168] sm:$0xff] }
 0x10d   : > { %1413 = vrot.lane.b32.xlu1 %v2902_v55, %s2671_s23  ;;  %355 = vst.msk [vmem:[#allocation3 + $0xf0] sm:$0xff] %vm204_vm0, %v3320_v39 }
 0x10e   : > { %v438_v44 = vpop.permute.xlu0 %437 }
 0x10f   : > { %v1784_v43 = vpop.permute.xlu1 %1783  ;;  %526 = vst.msk [vmem:[#allocation3 + $0x40] sm:$0xff] %vm517_vm4, %v438_v44 }
 0x110   : > { %1875 = vst.msk [vmem:[#allocation3 + $0x28] sm:$0xff] %vm1869_vm11, %v1784_v43  ;;  %1604 = vrot.lane.b32.xlu0 %v3145_v42, %s2672_s24 }
 0x111   : > { %1417 = vrot.lane.b32.xlu1 %v2932_v63, %s2671_s23 }
 0x112   : > { %v1786_v47 = vpop.permute.xlu0 %1785  ;;  %v1906_v48 = vld [vmem:[#allocation3 + $0x20] sm:$0xff] }
 0x113   : > { %v440_v55 = vpop.permute.xlu1 %439  ;;  %1876 = vst.msk [vmem:[#allocation3 + $0x30] sm:$0xff] %vm1869_vm11, %v1786_v47 }
 0x114   : > { %527 = vst.msk [vmem:[#allocation3 + $0x48] sm:$0xff] %vm517_vm4, %v440_v55  ;;  %1608 = vrot.lane.b32.xlu0 %v3200_v46, %s2672_s24  ;;  %v3341_v55 = vld [vmem:[#allocation2 + $0x111] sm:$0xff] }
 0x115   : > { %1606 = vrot.lane.b32.xlu1 %v3153_v24, %s2672_s24 }
 0x116   : > { %v442_v53 = vpop.permute.xlu0 %441 }
 0x117   : > { %v1788_v50 = vpop.permute.xlu1 %1787  ;;  %v1907_v51 = vld [vmem:[#allocation3 + $0x28] sm:$0xff]  ;;  %528 = vst.msk [vmem:[#allocation3 + $0x50] sm:$0xff] %vm517_vm4, %v442_v53 }
 0x118   : > { %1877 = vst.msk [vmem:[#allocation3 + $0x38] sm:$0xff] %vm1869_vm11, %v1788_v50  ;;  %v1936_v52 = vpack.c.bf16 %v1907_v51, %v1906_v48  ;;  %1797 = vrot.lane.b32.xlu0 %v3161_v30, %s2673_s25 }
 0x119   : > { %1610 = vrot.lane.b32.xlu1 %v3208_v34, %s2672_s24 }
 0x11a   : > { %2602 = vmatprep.mubr.msk.bf16.mxu0 %vm1964_vm12, %v1936_v52  ;;  %v631_v57 = vpop.permute.xlu0 %630  ;;  %v1908_v58 = vld [vmem:[#allocation3 + $0x30] sm:$0xff] }
 0x11b   : > { %v444_v56 = vpop.permute.xlu1 %443  ;;  %719 = vst.msk [vmem:[#allocation3 + $0x40] sm:$0xff] %vm710_vm5, %v631_v57  ;;  %v1727_v57 = vld [vmem:[#allocation2 + $0x10a] sm:$0xff] }
 0x11c   : > { %529 = vst.msk [vmem:[#allocation3 + $0x58] sm:$0xff] %vm517_vm4, %v444_v56  ;;  %453 = vrot.lane.b32.xlu0 %v3145_v42, %s2666_s18 }
 0x11d   : > { %1799 = vrot.lane.b32.xlu1 %v3168_v32, %s2673_s25 }
 0x11e   : > { %v635_v1 = vpop.permute.xlu0 %634 }
 0x11f   : > { %v633_v59 = vpop.permute.xlu1 %632  ;;  %v1909_v60 = vld [vmem:[#allocation3 + $0x38] sm:$0xff]  ;;  %721 = vst.msk [vmem:[#allocation3 + $0x50] sm:$0xff] %vm710_vm5, %v635_v1 }
 0x120   : > { %720 = vst.msk [vmem:[#allocation3 + $0x48] sm:$0xff] %vm710_vm5, %v633_v59  ;;  %v1937_v0 = vpack.c.bf16 %v1909_v60, %v1908_v58  ;;  %1801 = vrot.lane.b32.xlu0 %v3223_v61, %s2673_s25  ;;  %v1728_v60 = vld [vmem:[#allocation2 + $0x112] sm:$0xff] }
 0x121   : > { %455 = vrot.lane.b32.xlu1 %v3153_v24, %s2666_s18  ;;  %v3294_v24 = vld [vmem:[#allocation2 + $0xf2] sm:$0xff] }
 0x122   : > { %2603 = vmatmul.mubr.msk.bf16.gmra.mrb[4].mxu0 %vm1964_vm12, %v1937_v0  ;;  %v824_v4 = vpop.permute.xlu0 %823 }
 0x123   : > { %v637_v3 = vpop.permute.xlu1 %636  ;;  %912 = vst.msk [vmem:[#allocation3 + $0x40] sm:$0xff] %vm903_vm6, %v824_v4 }
 0x124   : > { %722 = vst.msk [vmem:[#allocation3 + $0x58] sm:$0xff] %vm710_vm5, %v637_v3  ;;  %457 = vrot.lane.b32.xlu0 %v3200_v46, %s2666_s18 }
 0x125   : > { %1803 = vrot.lane.b32.xlu1 %v1724_v2, %s2673_s25 }
 0x126   : > { %v828_v6 = vpop.permute.xlu0 %827 }
 0x127   : > { %v826_v5 = vpop.permute.xlu1 %825  ;;  %914 = vst.msk [vmem:[#allocation3 + $0x50] sm:$0xff] %vm903_vm6, %v828_v6 }
 0x128   : > { %913 = vst.msk [vmem:[#allocation3 + $0x48] sm:$0xff] %vm903_vm6, %v826_v5  ;;  %646 = vrot.lane.b32.xlu0 %v3161_v30, %s2667_s19 }
 0x129   : > { %459 = vrot.lane.b32.xlu1 %v3208_v34, %s2666_s18 }
 0x12a   : > { %v1017_v8 = vpop.permute.xlu0 %1016 }
 0x12b   : > { %v830_v7 = vpop.permute.xlu1 %829  ;;  %1105 = vst.msk [vmem:[#allocation3 + $0x40] sm:$0xff] %vm1096_vm7, %v1017_v8  ;;  %v203_v8 = vld [vmem:[%s2769_s17 + $0xf8] sm:$0xff] }
 0x12c   : > { %915 = vst.msk [vmem:[#allocation3 + $0x58] sm:$0xff] %vm903_vm6, %v830_v7  ;;  %650 = vrot.lane.b32.xlu0 %v3223_v61, %s2667_s19  ;;  %v202_v7 = vld [vmem:[%s2769_s17 + $0xf0] sm:$0xff] }
 0x12d   : > { %648 = vrot.lane.b32.xlu1 %v3168_v32, %s2667_s19  ;;  %v201_v32 = vld [vmem:[%s2769_s17 + $0xe8] sm:$0xff]  ;;  %291 = vst.msk [vmem:[#allocation2 + $0x181] sm:$0xff] %vm204_vm0, %v202_v7  ;;  %292 = vst.msk [vmem:[#allocation2 + $0x189] sm:$0xff] %vm204_vm0, %v203_v8 }
 0x12e   : > { %v1021_v10 = vpop.permute.xlu0 %1020  ;;  %290 = vst.msk [vmem:[#allocation2 + $0x171] sm:$0xff] %vm204_vm0, %v201_v32 }
 0x12f   : > { %v1019_v9 = vpop.permute.xlu1 %1018  ;;  %1107 = vst.msk [vmem:[#allocation3 + $0x50] sm:$0xff] %vm1096_vm7, %v1021_v10 }
 0x130   : > { %1106 = vst.msk [vmem:[#allocation3 + $0x48] sm:$0xff] %vm1096_vm7, %v1019_v9  ;;  %839 = vrot.lane.b32.xlu0 %v2928_v62, %s2668_s20 }
 0x131   : > { %652 = vrot.lane.b32.xlu1 %v1724_v2, %s2667_s19 }
 0x132   : > { %v1210_v14 = vpop.permute.xlu0 %1209 }
 0x133   : > { %v1023_v13 = vpop.permute.xlu1 %1022  ;;  %1298 = vst.msk [vmem:[#allocation3 + $0x40] sm:$0xff] %vm1289_vm8, %v1210_v14  ;;  %v3404_v14 = vld [vmem:[#allocation2 + $0x129] sm:$0xff] }
 0x134   : > { %1108 = vst.msk [vmem:[#allocation3 + $0x58] sm:$0xff] %vm1096_vm7, %v1023_v13  ;;  %843 = vrot.lane.b32.xlu0 %v2998_v25, %s2668_s20  ;;  %v958_v13 = vld [vmem:[#allocation2 + $0x121] sm:$0xff] }
 0x135   : > { %841 = vrot.lane.b32.xlu1 %v2932_v63, %s2668_s20  ;;  %v3278_v63 = vld [vmem:[#allocation2 + $0xf1] sm:$0xff] }
 0x136   : > { %v1214_v16 = vpop.permute.xlu0 %1213 }
 0x137   : > { %v1212_v15 = vpop.permute.xlu1 %1211  ;;  %1300 = vst.msk [vmem:[#allocation3 + $0x50] sm:$0xff] %vm1289_vm8, %v1214_v16 }
 0x138   : > { %1299 = vst.msk [vmem:[#allocation3 + $0x48] sm:$0xff] %vm1289_vm8, %v1212_v15  ;;  %1032 = vrot.lane.b32.xlu0 %v3200_v46, %s2669_s21 }
 0x139   : > { %845 = vrot.lane.b32.xlu1 %v3000_v26, %s2668_s20 }
 0x13a   : > { %v1404_v19 = vpop.permute.xlu0 %1403 }
 0x13b   : > { %v1216_v62 = vpop.permute.xlu1 %1215  ;;  %1492 = vst.msk [vmem:[#allocation3 + $0x40] sm:$0xff] %vm1483_vm9, %v1404_v19 }
 0x13c   : > { %1301 = vst.msk [vmem:[#allocation3 + $0x58] sm:$0xff] %vm1289_vm8, %v1216_v62  ;;  %1036 = vrot.lane.b32.xlu0 %v3278_v63, %s2669_s21 }
 0x13d   : > { %1034 = vrot.lane.b32.xlu1 %v3208_v34, %s2669_s21 }
 0x13e   : > { %v1408_v42 = vpop.permute.xlu0 %1407 }
 0x13f   : > { %v1406_v41 = vpop.permute.xlu1 %1405  ;;  %1494 = vst.msk [vmem:[#allocation3 + $0x50] sm:$0xff] %vm1483_vm9, %v1408_v42 }
 0x140   : > { %1493 = vst.msk [vmem:[#allocation3 + $0x48] sm:$0xff] %vm1483_vm9, %v1406_v41  ;;  %1225 = vrot.lane.b32.xlu0 %v3223_v61, %s2670_s22 }
 0x141   : > { %1038 = vrot.lane.b32.xlu1 %v3286_v20, %s2669_s21 }
 0x142   : > { %v1597_v27 = vpop.permute.xlu0 %1596 }
 0x143   : > { %v1410_v23 = vpop.permute.xlu1 %1409  ;;  %1685 = vst.msk [vmem:[#allocation3 + $0x40] sm:$0xff] %vm1676_vm10, %v1597_v27 }
 0x144   : > { %1495 = vst.msk [vmem:[#allocation3 + $0x58] sm:$0xff] %vm1483_vm9, %v1410_v23  ;;  %1229 = vrot.lane.b32.xlu0 %v3294_v24, %s2670_s22 }
 0x145   : > { %1227 = vrot.lane.b32.xlu1 %v1724_v2, %s2670_s22 }
 0x146   : > { %v1601_v30 = vpop.permute.xlu0 %1600 }
 0x147   : > { %v1599_v29 = vpop.permute.xlu1 %1598  ;;  %1687 = vst.msk [vmem:[#allocation3 + $0x50] sm:$0xff] %vm1676_vm10, %v1601_v30 }
 0x148   : > { %1686 = vst.msk [vmem:[#allocation3 + $0x48] sm:$0xff] %vm1676_vm10, %v1599_v29  ;;  %1419 = vrot.lane.b32.xlu0 %v2998_v25, %s2671_s23  ;;  %v3325_v25 = vld [vmem:[#allocation2 + $0x170] sm:$0xff]  ;;  %v3437_v29 = vld [vmem:[#allocation2 + $0x139] sm:$0xff] }
 0x149   : > { %1231 = vrot.lane.b32.xlu1 %v3301_v28, %s2670_s22  ;;  %356 = vst.msk [vmem:[#allocation3 + $0xf8] sm:$0xff] %vm204_vm0, %v3325_v25 }
 0x14a   : > { %v1790_v36 = vpop.permute.xlu0 %1789 }
 0x14b   : > { %v1603_v35 = vpop.permute.xlu1 %1602  ;;  %1878 = vst.msk [vmem:[#allocation3 + $0x40] sm:$0xff] %vm1869_vm11, %v1790_v36 }
 0x14c   : > { %1688 = vst.msk [vmem:[#allocation3 + $0x58] sm:$0xff] %vm1676_vm10, %v1603_v35  ;;  %1423 = vrot.lane.b32.xlu0 %v3054_v33, %s2671_s23 }
 0x14d   : > { %1421 = vrot.lane.b32.xlu1 %v3000_v26, %s2671_s23 }
 0x14e   : > { %v446_v38 = vpop.permute.xlu0 %445 }
 0x14f   : > { %v1792_v37 = vpop.permute.xlu1 %1791  ;;  %530 = vst.msk [vmem:[#allocation3 + $0x60] sm:$0xff] %vm517_vm4, %v446_v38 }
 0x150   : > { %1879 = vst.msk [vmem:[#allocation3 + $0x48] sm:$0xff] %vm1869_vm11, %v1792_v37  ;;  %1612 = vrot.lane.b32.xlu0 %v3278_v63, %s2672_s24 }
 0x151   : > { %1425 = vrot.lane.b32.xlu1 %v3059_v49, %s2671_s23 }
 0x152   : > { %v1794_v43 = vpop.permute.xlu0 %1793  ;;  %v1910_v44 = vld [vmem:[#allocation3 + $0x40] sm:$0xff] }
 0x153   : > { %v448_v26 = vpop.permute.xlu1 %447  ;;  %1880 = vst.msk [vmem:[#allocation3 + $0x50] sm:$0xff] %vm1869_vm11, %v1794_v43 }
 0x154   : > { %531 = vst.msk [vmem:[#allocation3 + $0x68] sm:$0xff] %vm517_vm4, %v448_v26  ;;  %1616 = vrot.lane.b32.xlu0 %v3333_v40, %s2672_s24 }
 0x155   : > { %1614 = vrot.lane.b32.xlu1 %v3286_v20, %s2672_s24 }
 0x156   : > { %v450_v34 = vpop.permute.xlu0 %449 }
 0x157   : > { %v1796_v46 = vpop.permute.xlu1 %1795  ;;  %v1911_v47 = vld [vmem:[#allocation3 + $0x48] sm:$0xff]  ;;  %532 = vst.msk [vmem:[#allocation3 + $0x70] sm:$0xff] %vm517_vm4, %v450_v34 }
 0x158   : > { %1881 = vst.msk [vmem:[#allocation3 + $0x58] sm:$0xff] %vm1869_vm11, %v1796_v46  ;;  %v1938_v48 = vpack.c.bf16 %v1911_v47, %v1910_v44  ;;  %1805 = vrot.lane.b32.xlu0 %v3294_v24, %s2673_s25 }
 0x159   : > { %1618 = vrot.lane.b32.xlu1 %v3341_v55, %s2672_s24 }
 0x15a   : > { %2606 = vmatprep.mubr.msk.bf16.mxu0 %vm1964_vm12, %v1938_v48  ;;  %v639_v51 = vpop.permute.xlu0 %638  ;;  %v1912_v52 = vld [vmem:[#allocation3 + $0x50] sm:$0xff] }
 0x15b   : > { %v452_v50 = vpop.permute.xlu1 %451  ;;  %723 = vst.msk [vmem:[#allocation3 + $0x60] sm:$0xff] %vm710_vm5, %v639_v51  ;;  %v1732_v48 = vld [vmem:[#allocation2 + $0x142] sm:$0xff] }
 0x15c   : > { %533 = vst.msk [vmem:[#allocation3 + $0x78] sm:$0xff] %vm517_vm4, %v452_v50  ;;  %461 = vrot.lane.b32.xlu0 %v3278_v63, %s2666_s18  ;;  %v3411_v63 = vld [vmem:[#allocation2 + $0x122] sm:$0xff] }
 0x15d   : > { %1807 = vrot.lane.b32.xlu1 %v3301_v28, %s2673_s25 }
 0x15e   : > { %v643_v59 = vpop.permute.xlu0 %642 }
 0x15f   : > { %v641_v53 = vpop.permute.xlu1 %640  ;;  %v1913_v56 = vld [vmem:[#allocation3 + $0x58] sm:$0xff]  ;;  %725 = vst.msk [vmem:[#allocation3 + $0x70] sm:$0xff] %vm710_vm5, %v643_v59 }
 0x160   : > { %724 = vst.msk [vmem:[#allocation3 + $0x68] sm:$0xff] %vm710_vm5, %v641_v53  ;;  %v1939_v58 = vpack.c.bf16 %v1913_v56, %v1912_v52  ;;  %1809 = vrot.lane.b32.xlu0 %v1727_v57, %s2673_s25 }
 0x161   : > { %463 = vrot.lane.b32.xlu1 %v3286_v20, %s2666_s18  ;;  %v3418_v20 = vld [vmem:[#allocation2 + $0x12a] sm:$0xff] }
 0x162   : > { %2607 = vmatmul.mubr.msk.bf16.gmra.mrb[8].mxu0 %vm1964_vm12, %v1939_v58  ;;  %v832_v0 = vpop.permute.xlu0 %831 }
 0x163   : > { %v645_v61 = vpop.permute.xlu1 %644  ;;  %916 = vst.msk [vmem:[#allocation3 + $0x60] sm:$0xff] %vm903_vm6, %v832_v0 }
 0x164   : > { %726 = vst.msk [vmem:[#allocation3 + $0x78] sm:$0xff] %vm710_vm5, %v645_v61  ;;  %465 = vrot.lane.b32.xlu0 %v3333_v40, %s2666_s18 }
 0x165   : > { %1811 = vrot.lane.b32.xlu1 %v1728_v60, %s2673_s25 }
 0x166   : > { %v836_v2 = vpop.permute.xlu0 %835 }
 0x167   : > { %v834_v1 = vpop.permute.xlu1 %833  ;;  %918 = vst.msk [vmem:[#allocation3 + $0x70] sm:$0xff] %vm903_vm6, %v836_v2 }
 0x168   : > { %917 = vst.msk [vmem:[#allocation3 + $0x68] sm:$0xff] %vm903_vm6, %v834_v1  ;;  %654 = vrot.lane.b32.xlu0 %v3294_v24, %s2667_s19 }
 0x169   : > { %467 = vrot.lane.b32.xlu1 %v3341_v55, %s2666_s18 }
 0x16a   : > { %v1025_v4 = vpop.permute.xlu0 %1024 }
 0x16b   : > { %v838_v3 = vpop.permute.xlu1 %837  ;;  %1109 = vst.msk [vmem:[#allocation3 + $0x60] sm:$0xff] %vm1096_vm7, %v1025_v4  ;;  %v962_v4 = vld [vmem:[#allocation2 + $0x151] sm:$0xff] }
 0x16c   : > { %919 = vst.msk [vmem:[#allocation3 + $0x78] sm:$0xff] %vm903_vm6, %v838_v3  ;;  %658 = vrot.lane.b32.xlu0 %v1727_v57, %s2667_s19 }
 0x16d   : > { %656 = vrot.lane.b32.xlu1 %v3301_v28, %s2667_s19 }
 0x16e   : > { %v1029_v6 = vpop.permute.xlu0 %1028 }
 0x16f   : > { %v1027_v5 = vpop.permute.xlu1 %1026  ;;  %1111 = vst.msk [vmem:[#allocation3 + $0x70] sm:$0xff] %vm1096_vm7, %v1029_v6  ;;  %v3511_v6 = vld [vmem:[#allocation2 + $0x159] sm:$0xff] }
 0x170   : > { %1110 = vst.msk [vmem:[#allocation3 + $0x68] sm:$0xff] %vm1096_vm7, %v1027_v5  ;;  %847 = vrot.lane.b32.xlu0 %v3054_v33, %s2668_s20 }
 0x171   : > { %660 = vrot.lane.b32.xlu1 %v1728_v60, %s2667_s19 }
 0x172   : > { %v1218_v10 = vpop.permute.xlu0 %1217 }
 0x173   : > { %v1031_v9 = vpop.permute.xlu1 %1030  ;;  %1302 = vst.msk [vmem:[#allocation3 + $0x60] sm:$0xff] %vm1289_vm8, %v1218_v10  ;;  %v3518_v10 = vld [vmem:[#allocation2 + $0x152] sm:$0xff] }
 0x174   : > { %1112 = vst.msk [vmem:[#allocation3 + $0x78] sm:$0xff] %vm1096_vm7, %v1031_v9  ;;  %851 = vrot.lane.b32.xlu0 %v3132_v21, %s2668_s20 }
 0x175   : > { %849 = vrot.lane.b32.xlu1 %v3059_v49, %s2668_s20 }
 0x176   : > { %v1222_v12 = vpop.permute.xlu0 %1221 }
 0x177   : > { %v1220_v11 = vpop.permute.xlu1 %1219  ;;  %1304 = vst.msk [vmem:[#allocation3 + $0x70] sm:$0xff] %vm1289_vm8, %v1222_v12  ;;  %v3525_v12 = vld [vmem:[#allocation2 + $0x15a] sm:$0xff] }
 0x178   : > { %1303 = vst.msk [vmem:[#allocation3 + $0x68] sm:$0xff] %vm1289_vm8, %v1220_v11  ;;  %1040 = vrot.lane.b32.xlu0 %v3333_v40, %s2669_s21 }
 0x179   : > { %853 = vrot.lane.b32.xlu1 %v3134_v22, %s2668_s20 }
 0x17a   : > { %v1412_v49 = vpop.permute.xlu0 %1411 }
 0x17b   : > { %v1224_v33 = vpop.permute.xlu1 %1223  ;;  %1496 = vst.msk [vmem:[#allocation3 + $0x60] sm:$0xff] %vm1483_vm9, %v1412_v49 }
 0x17c   : > { %1305 = vst.msk [vmem:[#allocation3 + $0x78] sm:$0xff] %vm1289_vm8, %v1224_v33  ;;  %1044 = vrot.lane.b32.xlu0 %v958_v13, %s2669_s21 }
 0x17d   : > { %1042 = vrot.lane.b32.xlu1 %v3341_v55, %s2669_s21  ;;  %v1731_v55 = vld [vmem:[#allocation2 + $0x13a] sm:$0xff] }
 0x17e   : > { %v1416_v16 = vpop.permute.xlu0 %1415 }
 0x17f   : > { %v1414_v15 = vpop.permute.xlu1 %1413  ;;  %1498 = vst.msk [vmem:[#allocation3 + $0x70] sm:$0xff] %vm1483_vm9, %v1416_v16 }
 0x180   : > { %1497 = vst.msk [vmem:[#allocation3 + $0x68] sm:$0xff] %vm1483_vm9, %v1414_v15  ;;  %1233 = vrot.lane.b32.xlu0 %v1727_v57, %s2670_s22 }
 0x181   : > { %1046 = vrot.lane.b32.xlu1 %v3404_v14, %s2669_s21 }
 0x182   : > { %v1605_v19 = vpop.permute.xlu0 %1604 }
 0x183   : > { %v1418_v62 = vpop.permute.xlu1 %1417  ;;  %1689 = vst.msk [vmem:[#allocation3 + $0x60] sm:$0xff] %vm1676_vm10, %v1605_v19  ;;  %v3552_v19 = vld [vmem:[#allocation2 + $0x171] sm:$0xff] }
 0x184   : > { %1499 = vst.msk [vmem:[#allocation3 + $0x78] sm:$0xff] %vm1483_vm9, %v1418_v62  ;;  %1237 = vrot.lane.b32.xlu0 %v3411_v63, %s2670_s22  ;;  %v3544_v62 = vld [vmem:[#allocation2 + $0x169] sm:$0xff] }
 0x185   : > { %1235 = vrot.lane.b32.xlu1 %v1728_v60, %s2670_s22 }
 0x186   : > { %v1609_v42 = vpop.permute.xlu0 %1608 }
 0x187   : > { %v1607_v41 = vpop.permute.xlu1 %1606  ;;  %1691 = vst.msk [vmem:[#allocation3 + $0x70] sm:$0xff] %vm1676_vm10, %v1609_v42 }
 0x188   : > { %1690 = vst.msk [vmem:[#allocation3 + $0x68] sm:$0xff] %vm1676_vm10, %v1607_v41  ;;  %1427 = vrot.lane.b32.xlu0 %v3132_v21, %s2671_s23 }
 0x189   : > { %1239 = vrot.lane.b32.xlu1 %v3418_v20, %s2670_s22 }
 0x18a   : > { %v1798_v24 = vpop.permute.xlu0 %1797 }
 0x18b   : > { %v1611_v23 = vpop.permute.xlu1 %1610  ;;  %1882 = vst.msk [vmem:[#allocation3 + $0x60] sm:$0xff] %vm1869_vm11, %v1798_v24 }
 0x18c   : > { %1692 = vst.msk [vmem:[#allocation3 + $0x78] sm:$0xff] %vm1676_vm10, %v1611_v23  ;;  %1431 = vrot.lane.b32.xlu0 %v3187_v45, %s2671_s23 }
 0x18d   : > { %1429 = vrot.lane.b32.xlu1 %v3134_v22, %s2671_s23 }
 0x18e   : > { %v454_v28 = vpop.permute.xlu0 %453 }
 0x18f   : > { %v1800_v27 = vpop.permute.xlu1 %1799  ;;  %534 = vst.msk [vmem:[#allocation3 + $0x80] sm:$0xff] %vm517_vm4, %v454_v28 }
 0x190   : > { %1883 = vst.msk [vmem:[#allocation3 + $0x68] sm:$0xff] %vm1869_vm11, %v1800_v27  ;;  %1620 = vrot.lane.b32.xlu0 %v958_v13, %s2672_s24 }
 0x191   : > { %1433 = vrot.lane.b32.xlu1 %v3192_v54, %s2671_s23 }
 0x192   : > { %v1802_v22 = vpop.permute.xlu0 %1801  ;;  %v1914_v30 = vld [vmem:[#allocation3 + $0x60] sm:$0xff] }
 0x193   : > { %v456_v21 = vpop.permute.xlu1 %455  ;;  %1884 = vst.msk [vmem:[#allocation3 + $0x70] sm:$0xff] %vm1869_vm11, %v1802_v22  ;;  %v3566_v22 = vld [vmem:[#allocation2 + $0x16a] sm:$0xff] }
 0x194   : > { %535 = vst.msk [vmem:[#allocation3 + $0x88] sm:$0xff] %vm517_vm4, %v456_v21  ;;  %1624 = vrot.lane.b32.xlu0 %v3437_v29, %s2672_s24 }
 0x195   : > { %1622 = vrot.lane.b32.xlu1 %v3404_v14, %s2672_s24 }
 0x196   : > { %v458_v37 = vpop.permute.xlu0 %457 }
 0x197   : > { %v1804_v32 = vpop.permute.xlu1 %1803  ;;  %v1915_v35 = vld [vmem:[#allocation3 + $0x68] sm:$0xff]  ;;  %536 = vst.msk [vmem:[#allocation3 + $0x90] sm:$0xff] %vm517_vm4, %v458_v37 }
 0x198   : > { %1885 = vst.msk [vmem:[#allocation3 + $0x78] sm:$0xff] %vm1869_vm11, %v1804_v32  ;;  %v1940_v36 = vpack.c.bf16 %v1915_v35, %v1914_v30  ;;  %1813 = vrot.lane.b32.xlu0 %v3411_v63, %s2673_s25  ;;  %v1736_v32 = vld [vmem:[#allocation2 + $0x172] sm:$0xff] }
 0x199   : > { %1626 = vrot.lane.b32.xlu1 %v3445_v31, %s2672_s24 }
 0x19a   : > { %2610 = vmatprep.mubr.msk.bf16.mxu0 %vm1964_vm12, %v1940_v36  ;;  %v647_v26 = vpop.permute.xlu0 %646  ;;  %v1916_v40 = vld [vmem:[#allocation3 + $0x70] sm:$0xff] }
 0x19b   : > { %v460_v38 = vpop.permute.xlu1 %459  ;;  %727 = vst.msk [vmem:[#allocation3 + $0x80] sm:$0xff] %vm710_vm5, %v647_v26 }
 0x19c   : > { %537 = vst.msk [vmem:[#allocation3 + $0x98] sm:$0xff] %vm517_vm4, %v460_v38  ;;  %469 = vrot.lane.b32.xlu0 %v958_v13, %s2666_s18 }
 0x19d   : > { %1815 = vrot.lane.b32.xlu1 %v3418_v20, %s2673_s25 }
 0x19e   : > { %v651_v47 = vpop.permute.xlu0 %650 }
 0x19f   : > { %v649_v43 = vpop.permute.xlu1 %648  ;;  %v1917_v44 = vld [vmem:[#allocation3 + $0x78] sm:$0xff]  ;;  %729 = vst.msk [vmem:[#allocation3 + $0x90] sm:$0xff] %vm710_vm5, %v651_v47 }
 0x1a0   : > { %728 = vst.msk [vmem:[#allocation3 + $0x88] sm:$0xff] %vm710_vm5, %v649_v43  ;;  %v1941_v46 = vpack.c.bf16 %v1917_v44, %v1916_v40  ;;  %1817 = vrot.lane.b32.xlu0 %v1731_v55, %s2673_s25 }
 0x1a1   : > { %471 = vrot.lane.b32.xlu1 %v3404_v14, %s2666_s18 }
 0x1a2   : > { %2611 = vmatmul.mubr.msk.bf16.gmra.mrb[12].mxu0 %vm1964_vm12, %v1941_v46  ;;  %v840_v50 = vpop.permute.xlu0 %839  ;;  %v773_v46 = vld [vmem:[#allocation2 + $0x180] sm:$0xff] }
 0x1a3   : > { %v653_v34 = vpop.permute.xlu1 %652  ;;  %920 = vst.msk [vmem:[#allocation3 + $0x80] sm:$0xff] %vm903_vm6, %v840_v50  ;;  %v774_v50 = vld [vmem:[#allocation2 + $0x188] sm:$0xff] }
 0x1a4   : > { %730 = vst.msk [vmem:[#allocation3 + $0x98] sm:$0xff] %vm710_vm5, %v653_v34  ;;  %473 = vrot.lane.b32.xlu0 %v3437_v29, %s2666_s18 }
 0x1a5   : > { %1819 = vrot.lane.b32.xlu1 %v1732_v48, %s2673_s25 }
 0x1a6   : > { %v844_v52 = vpop.permute.xlu0 %843 }
 0x1a7   : > { %v842_v51 = vpop.permute.xlu1 %841  ;;  %922 = vst.msk [vmem:[#allocation3 + $0x90] sm:$0xff] %vm903_vm6, %v844_v52 }
 0x1a8   : > { %921 = vst.msk [vmem:[#allocation3 + $0x88] sm:$0xff] %vm903_vm6, %v842_v51  ;;  %662 = vrot.lane.b32.xlu0 %v3411_v63, %s2667_s19 }
 0x1a9   : > { %475 = vrot.lane.b32.xlu1 %v3445_v31, %s2666_s18 }
 0x1aa   : > { %v1033_v56 = vpop.permute.xlu0 %1032 }
 0x1ab   : > { %v846_v53 = vpop.permute.xlu1 %845  ;;  %1113 = vst.msk [vmem:[#allocation3 + $0x80] sm:$0xff] %vm1096_vm7, %v1033_v56  ;;  %v966_v56 = vld [vmem:[#allocation2 + $0x181] sm:$0xff] }
 0x1ac   : > { %923 = vst.msk [vmem:[#allocation3 + $0x98] sm:$0xff] %vm903_vm6, %v846_v53  ;;  %666 = vrot.lane.b32.xlu0 %v1731_v55, %s2667_s19 }
 0x1ad   : > { %664 = vrot.lane.b32.xlu1 %v3418_v20, %s2667_s19 }
 0x1ae   : > { %v1037_v58 = vpop.permute.xlu0 %1036 }
 0x1af   : > { %v1035_v57 = vpop.permute.xlu1 %1034  ;;  %1115 = vst.msk [vmem:[#allocation3 + $0x90] sm:$0xff] %vm1096_vm7, %v1037_v58  ;;  %v967_v58 = vld [vmem:[#allocation2 + $0x189] sm:$0xff] }
 0x1b0   : > { %1114 = vst.msk [vmem:[#allocation3 + $0x88] sm:$0xff] %vm1096_vm7, %v1035_v57  ;;  %855 = vrot.lane.b32.xlu0 %v3187_v45, %s2668_s20 }
 0x1b1   : > { %668 = vrot.lane.b32.xlu1 %v1732_v48, %s2667_s19 }
 0x1b2   : > { %v1226_v60 = vpop.permute.xlu0 %1225 }
 0x1b3   : > { %v1039_v59 = vpop.permute.xlu1 %1038  ;;  %1306 = vst.msk [vmem:[#allocation3 + $0x80] sm:$0xff] %vm1289_vm8, %v1226_v60 }
 0x1b4   : > { %1116 = vst.msk [vmem:[#allocation3 + $0x98] sm:$0xff] %vm1096_vm7, %v1039_v59  ;;  %859 = vrot.lane.b32.xlu0 %v3265_v17, %s2668_s20 }
 0x1b5   : > { %857 = vrot.lane.b32.xlu1 %v3192_v54, %s2668_s20  ;;  %v3489_v61 = vpop.f32.mrb[0].mxu0 }
 0x1b6   : > { %v3492_v0 = vpop.f32.mrb[1].mxu0  ;;  %v1230_v3 = vpop.permute.xlu0 %1229 }
 0x1b7   : > { %v1228_v1 = vpop.permute.xlu1 %1227  ;;  %v3496_v2 = vpop.f32.mrb[2].mxu0  ;;  %1308 = vst.msk [vmem:[#allocation3 + $0x90] sm:$0xff] %vm1289_vm8, %v1230_v3  ;;  %v1159_v3 = vld [vmem:[#allocation2 + $0x182] sm:$0xff] }
 0x1b8   : > { %1307 = vst.msk [vmem:[#allocation3 + $0x88] sm:$0xff] %vm1289_vm8, %v1228_v1  ;;  %v3499_v45 = vpop.f32.mrb[3].mxu0  ;;  %1048 = vrot.lane.b32.xlu0 %v3437_v29, %s2669_s21 }
 0x1b9   : > { %861 = vrot.lane.b32.xlu1 %v3267_v18, %s2668_s20 }
 0x1ba   : > { %v1420_v5 = vpop.permute.xlu0 %1419 }
 0x1bb   : > { %v1232_v54 = vpop.permute.xlu1 %1231  ;;  %1500 = vst.msk [vmem:[#allocation3 + $0x80] sm:$0xff] %vm1483_vm9, %v1420_v5 }
 0x1bc   : > { %1309 = vst.msk [vmem:[#allocation3 + $0x98] sm:$0xff] %vm1289_vm8, %v1232_v54  ;;  %1052 = vrot.lane.b32.xlu0 %v962_v4, %s2669_s21 }
 0x1bd   : > { %1050 = vrot.lane.b32.xlu1 %v3445_v31, %s2669_s21 }
 0x1be   : > { %v1424_v8 = vpop.permute.xlu0 %1423 }
 0x1bf   : > { %v1422_v7 = vpop.permute.xlu1 %1421  ;;  %1502 = vst.msk [vmem:[#allocation3 + $0x90] sm:$0xff] %vm1483_vm9, %v1424_v8  ;;  %v1353_v8 = vld [vmem:[#allocation2 + $0x198] sm:$0xff] }
 0x1c0   : > { %1501 = vst.msk [vmem:[#allocation3 + $0x88] sm:$0xff] %vm1483_vm9, %v1422_v7  ;;  %1241 = vrot.lane.b32.xlu0 %v1731_v55, %s2670_s22 }
 0x1c1   : > { %1054 = vrot.lane.b32.xlu1 %v3511_v6, %s2669_s21 }
 0x1c2   : > { %v1613_v11 = vpop.permute.xlu0 %1612 }
 0x1c3   : > { %v1426_v9 = vpop.permute.xlu1 %1425  ;;  %1693 = vst.msk [vmem:[#allocation3 + $0x80] sm:$0xff] %vm1676_vm10, %v1613_v11 }
 0x1c4   : > { %1503 = vst.msk [vmem:[#allocation3 + $0x98] sm:$0xff] %vm1483_vm9, %v1426_v9  ;;  %1245 = vrot.lane.b32.xlu0 %v3518_v10, %s2670_s22 }
 0x1c5   : > { %1243 = vrot.lane.b32.xlu1 %v1732_v48, %s2670_s22 }
 0x1c6   : > { %v1617_v13 = vpop.permute.xlu0 %1616 }
 0x1c7   : > { %v1615_v33 = vpop.permute.xlu1 %1614  ;;  %1695 = vst.msk [vmem:[#allocation3 + $0x90] sm:$0xff] %vm1676_vm10, %v1617_v13  ;;  %v1546_v13 = vld [vmem:[#allocation2 + $0x199] sm:$0xff] }
 0x1c8   : > { %1694 = vst.msk [vmem:[#allocation3 + $0x88] sm:$0xff] %vm1676_vm10, %v1615_v33  ;;  %1435 = vrot.lane.b32.xlu0 %v3265_v17, %s2671_s23 }
 0x1c9   : > { %1247 = vrot.lane.b32.xlu1 %v3525_v12, %s2670_s22 }
 0x1ca   : > { %v1806_v14 = vpop.permute.xlu0 %1805 }
 0x1cb   : > { %v1619_v49 = vpop.permute.xlu1 %1618  ;;  %1886 = vst.msk [vmem:[#allocation3 + $0x80] sm:$0xff] %vm1869_vm11, %v1806_v14 }
 0x1cc   : > { %1696 = vst.msk [vmem:[#allocation3 + $0x98] sm:$0xff] %vm1676_vm10, %v1619_v49  ;;  %1439 = vrot.lane.b32.xlu0 %v3320_v39, %s2671_s23 }
 0x1cd   : > { %1437 = vrot.lane.b32.xlu1 %v3267_v18, %s2671_s23 }
 0x1ce   : > { %v462_v16 = vpop.permute.xlu0 %461 }
 0x1cf   : > { %v1808_v15 = vpop.permute.xlu1 %1807  ;;  %538 = vst.msk [vmem:[#allocation3 + $0xa0] sm:$0xff] %vm517_vm4, %v462_v16 }
 0x1d0   : > { %1887 = vst.msk [vmem:[#allocation3 + $0x88] sm:$0xff] %vm1869_vm11, %v1808_v15  ;;  %1628 = vrot.lane.b32.xlu0 %v962_v4, %s2672_s24  ;;  %v1547_v15 = vld [vmem:[#allocation2 + $0x1a1] sm:$0xff] }
 0x1d1   : > { %1441 = vrot.lane.b32.xlu1 %v3325_v25, %s2671_s23 }
 0x1d2   : > { %v1810_v18 = vpop.permute.xlu0 %1809  ;;  %v1918_v63 = vld [vmem:[#allocation3 + $0x80] sm:$0xff] }
 0x1d3   : > { %v464_v17 = vpop.permute.xlu1 %463  ;;  %1888 = vst.msk [vmem:[#allocation3 + $0x90] sm:$0xff] %vm1869_vm11, %v1810_v18 }
 0x1d4   : > { %539 = vst.msk [vmem:[#allocation3 + $0xa8] sm:$0xff] %vm517_vm4, %v464_v17  ;;  %1632 = vrot.lane.b32.xlu0 %v3544_v62, %s2672_s24 }
 0x1d5   : > { %1630 = vrot.lane.b32.xlu1 %v3511_v6, %s2672_s24 }
 0x1d6   : > { %v466_v23 = vpop.permute.xlu0 %465 }
 0x1d7   : > { %v1812_v20 = vpop.permute.xlu1 %1811  ;;  %v1919_v41 = vld [vmem:[#allocation3 + $0x88] sm:$0xff]  ;;  %540 = vst.msk [vmem:[#allocation3 + $0xb0] sm:$0xff] %vm517_vm4, %v466_v23 }
 0x1d8   : > { %1889 = vst.msk [vmem:[#allocation3 + $0x98] sm:$0xff] %vm1869_vm11, %v1812_v20  ;;  %v1942_v42 = vpack.c.bf16 %v1919_v41, %v1918_v63  ;;  %1821 = vrot.lane.b32.xlu0 %v3518_v10, %s2673_s25 }
 0x1d9   : > { %1634 = vrot.lane.b32.xlu1 %v3552_v19, %s2672_s24 }
 0x1da   : > { %2614 = vmatprep.mubr.msk.bf16.mxu1 %vm1964_vm12, %v1942_v42  ;;  %v655_v27 = vpop.permute.xlu0 %654  ;;  %v1920_v28 = vld [vmem:[#allocation3 + $0x90] sm:$0xff] }
 0x1db   : > { %v468_v24 = vpop.permute.xlu1 %467  ;;  %731 = vst.msk [vmem:[#allocation3 + $0xa0] sm:$0xff] %vm710_vm5, %v655_v27  ;;  %v1740_v42 = vld [vmem:[#allocation2 + $0x1a2] sm:$0xff] }
 0x1dc   : > { %541 = vst.msk [vmem:[#allocation3 + $0xb8] sm:$0xff] %vm517_vm4, %v468_v24  ;;  %477 = vrot.lane.b32.xlu0 %v962_v4, %s2666_s18  ;;  %v1160_v4 = vld [vmem:[#allocation2 + $0x18a] sm:$0xff] }
 0x1dd   : > { %1823 = vrot.lane.b32.xlu1 %v3525_v12, %s2673_s25 }
 0x1de   : > { %v659_v31 = vpop.permute.xlu0 %658 }
 0x1df   : > { %v657_v21 = vpop.permute.xlu1 %656  ;;  %v1921_v29 = vld [vmem:[#allocation3 + $0x98] sm:$0xff]  ;;  %733 = vst.msk [vmem:[#allocation3 + $0xb0] sm:$0xff] %vm710_vm5, %v659_v31 }
 0x1e0   : > { %732 = vst.msk [vmem:[#allocation3 + $0xa8] sm:$0xff] %vm710_vm5, %v657_v21  ;;  %v1943_v30 = vpack.c.bf16 %v1921_v29, %v1920_v28  ;;  %1825 = vrot.lane.b32.xlu0 %v3566_v22, %s2673_s25 }
 0x1e1   : > { %479 = vrot.lane.b32.xlu1 %v3511_v6, %s2666_s18 }
 0x1e2   : > { %2615 = vmatmul.mubr.msk.bf16.vlgmr.msra.gmra.mrb[0].mxu1 %vm1964_vm12, %v1943_v30  ;;  %v848_v36 = vpop.permute.xlu0 %847 }
 0x1e3   : > { %v661_v35 = vpop.permute.xlu1 %660  ;;  %924 = vst.msk [vmem:[#allocation3 + $0xa0] sm:$0xff] %vm903_vm6, %v848_v36 }
 0x1e4   : > { %734 = vst.msk [vmem:[#allocation3 + $0xb8] sm:$0xff] %vm710_vm5, %v661_v35  ;;  %481 = vrot.lane.b32.xlu0 %v3544_v62, %s2666_s18 }
 0x1e5   : > { %1827 = vrot.lane.b32.xlu1 %v1736_v32, %s2673_s25 }
 0x1e6   : > { %v852_v38 = vpop.permute.xlu0 %851 }
 0x1e7   : > { %v850_v37 = vpop.permute.xlu1 %849  ;;  %926 = vst.msk [vmem:[#allocation3 + $0xb0] sm:$0xff] %vm903_vm6, %v852_v38 }
 0x1e8   : > { %925 = vst.msk [vmem:[#allocation3 + $0xa8] sm:$0xff] %vm903_vm6, %v850_v37  ;;  %670 = vrot.lane.b32.xlu0 %v3518_v10, %s2667_s19  ;;  %v1354_v10 = vld [vmem:[#allocation2 + $0x1a0] sm:$0xff] }
 0x1e9   : > { %483 = vrot.lane.b32.xlu1 %v3552_v19, %s2666_s18 }
 0x1ea   : > { %v1041_v40 = vpop.permute.xlu0 %1040 }
 0x1eb   : > { %v854_v26 = vpop.permute.xlu1 %853  ;;  %1117 = vst.msk [vmem:[#allocation3 + $0xa0] sm:$0xff] %vm1096_vm7, %v1041_v40 }
 0x1ec   : > { %927 = vst.msk [vmem:[#allocation3 + $0xb8] sm:$0xff] %vm903_vm6, %v854_v26  ;;  %674 = vrot.lane.b32.xlu0 %v3566_v22, %s2667_s19 }
 0x1ed   : > { %672 = vrot.lane.b32.xlu1 %v3525_v12, %s2667_s19 }
 0x1ee   : > { %v1045_v44 = vpop.permute.xlu0 %1044 }
 0x1ef   : > { %v1043_v43 = vpop.permute.xlu1 %1042  ;;  %1119 = vst.msk [vmem:[#allocation3 + $0xb0] sm:$0xff] %vm1096_vm7, %v1045_v44 }
 0x1f0   : > { %1118 = vst.msk [vmem:[#allocation3 + $0xa8] sm:$0xff] %vm1096_vm7, %v1043_v43  ;;  %863 = vrot.lane.b32.xlu0 %v3320_v39, %s2668_s20 }
 0x1f1   : > { %676 = vrot.lane.b32.xlu1 %v1736_v32, %s2667_s19 }
 0x1f2   : > { %v1234_v47 = vpop.permute.xlu0 %1233 }
 0x1f3   : > { %v1047_v55 = vpop.permute.xlu1 %1046  ;;  %1310 = vst.msk [vmem:[#allocation3 + $0xa0] sm:$0xff] %vm1289_vm8, %v1234_v47 }
 0x1f4   : > { %1120 = vst.msk [vmem:[#allocation3 + $0xb8] sm:$0xff] %vm1096_vm7, %v1047_v55  ;;  %867 = vrot.lane.b32.xlu0 %v773_v46, %s2668_s20 }
 0x1f5   : > { %865 = vrot.lane.b32.xlu1 %v3325_v25, %s2668_s20  ;;  %v3600_v48 = vpop.f32.mrb[4].mxu0 }
 0x1f6   : > { %v3603_v34 = vpop.f32.mrb[5].mxu0  ;;  %v1238_v53 = vpop.permute.xlu0 %1237 }
 0x1f7   : > { %v1236_v51 = vpop.permute.xlu1 %1235  ;;  %v3606_v52 = vpop.f32.mrb[6].mxu0  ;;  %1312 = vst.msk [vmem:[#allocation3 + $0xb0] sm:$0xff] %vm1289_vm8, %v1238_v53 }
 0x1f8   : > { %1311 = vst.msk [vmem:[#allocation3 + $0xa8] sm:$0xff] %vm1289_vm8, %v1236_v51  ;;  %v3609_v39 = vpop.f32.mrb[7].mxu0  ;;  %1056 = vrot.lane.b32.xlu0 %v3544_v62, %s2669_s21 }
 0x1f9   : > { %869 = vrot.lane.b32.xlu1 %v774_v50, %s2668_s20 }
 0x1fa   : > { %v1428_v57 = vpop.permute.xlu0 %1427 }
 0x1fb   : > { %v1240_v25 = vpop.permute.xlu1 %1239  ;;  %1504 = vst.msk [vmem:[#allocation3 + $0xa0] sm:$0xff] %vm1483_vm9, %v1428_v57 }
 0x1fc   : > { %1313 = vst.msk [vmem:[#allocation3 + $0xb8] sm:$0xff] %vm1289_vm8, %v1240_v25  ;;  %1060 = vrot.lane.b32.xlu0 %v966_v56, %s2669_s21 }
 0x1fd   : > { %1058 = vrot.lane.b32.xlu1 %v3552_v19, %s2669_s21  ;;  %v1739_v19 = vld [vmem:[#allocation2 + $0x19a] sm:$0xff] }
 0x1fe   : > { %v1432_v60 = vpop.permute.xlu0 %1431 }
 0x1ff   : > { %v1430_v59 = vpop.permute.xlu1 %1429  ;;  %1506 = vst.msk [vmem:[#allocation3 + $0xb0] sm:$0xff] %vm1483_vm9, %v1432_v60 }
 0x200   : > { %1505 = vst.msk [vmem:[#allocation3 + $0xa8] sm:$0xff] %vm1483_vm9, %v1430_v59  ;;  %1249 = vrot.lane.b32.xlu0 %v3566_v22, %s2670_s22 }
 0x201   : > { %1062 = vrot.lane.b32.xlu1 %v967_v58, %s2669_s21 }
 0x202   : > { %v1621_v54 = vpop.permute.xlu0 %1620 }
 0x203   : > { %v1434_v1 = vpop.permute.xlu1 %1433  ;;  %1697 = vst.msk [vmem:[#allocation3 + $0xa0] sm:$0xff] %vm1676_vm10, %v1621_v54 }
 0x204   : > { %1507 = vst.msk [vmem:[#allocation3 + $0xb8] sm:$0xff] %vm1483_vm9, %v1434_v1  ;;  %1253 = vrot.lane.b32.xlu0 %v1159_v3, %s2670_s22 }
 0x205   : > { %1251 = vrot.lane.b32.xlu1 %v1736_v32, %s2670_s22 }
 0x206   : > { %v1625_v6 = vpop.permute.xlu0 %1624 }
 0x207   : > { %v1623_v5 = vpop.permute.xlu1 %1622  ;;  %1699 = vst.msk [vmem:[#allocation3 + $0xb0] sm:$0xff] %vm1676_vm10, %v1625_v6 }
 0x208   : > { %1698 = vst.msk [vmem:[#allocation3 + $0xa8] sm:$0xff] %vm1676_vm10, %v1623_v5  ;;  %1443 = vrot.lane.b32.xlu0 %v773_v46, %s2671_s23 }
 0x209   : > { %1255 = vrot.lane.b32.xlu1 %v1160_v4, %s2670_s22 }
 0x20a   : > { %v1814_v9 = vpop.permute.xlu0 %1813 }
 0x20b   : > { %v1627_v7 = vpop.permute.xlu1 %1626  ;;  %1890 = vst.msk [vmem:[#allocation3 + $0xa0] sm:$0xff] %vm1869_vm11, %v1814_v9 }
 0x20c   : > { %1700 = vst.msk [vmem:[#allocation3 + $0xb8] sm:$0xff] %vm1676_vm10, %v1627_v7  ;;  %1447 = vrot.lane.b32.xlu0 %v1353_v8, %s2671_s23 }
 0x20d   : > { %1445 = vrot.lane.b32.xlu1 %v774_v50, %s2671_s23 }
 0x20e   : > { %v470_v12 = vpop.permute.xlu0 %469 }
 0x20f   : > { %v1816_v11 = vpop.permute.xlu1 %1815  ;;  %542 = vst.msk [vmem:[#allocation3 + $0xc0] sm:$0xff] %vm517_vm4, %v470_v12 }
 0x210   : > { %1891 = vst.msk [vmem:[#allocation3 + $0xa8] sm:$0xff] %vm1869_vm11, %v1816_v11  ;;  %1636 = vrot.lane.b32.xlu0 %v966_v56, %s2672_s24 }
 0x211   : > { %1449 = vrot.lane.b32.xlu1 %v1354_v10, %s2671_s23 }
 0x212   : > { %v1818_v49 = vpop.permute.xlu0 %1817  ;;  %v1922_v14 = vld [vmem:[#allocation3 + $0xa0] sm:$0xff] }
 0x213   : > { %v472_v33 = vpop.permute.xlu1 %471  ;;  %1892 = vst.msk [vmem:[#allocation3 + $0xb0] sm:$0xff] %vm1869_vm11, %v1818_v49 }
 0x214   : > { %543 = vst.msk [vmem:[#allocation3 + $0xc8] sm:$0xff] %vm517_vm4, %v472_v33  ;;  %1640 = vrot.lane.b32.xlu0 %v1546_v13, %s2672_s24 }
 0x215   : > { %1638 = vrot.lane.b32.xlu1 %v967_v58, %s2672_s24 }
 0x216   : > { %v474_v18 = vpop.permute.xlu0 %473 }
 0x217   : > { %v1820_v16 = vpop.permute.xlu1 %1819  ;;  %v1923_v17 = vld [vmem:[#allocation3 + $0xa8] sm:$0xff]  ;;  %544 = vst.msk [vmem:[#allocation3 + $0xd0] sm:$0xff] %vm517_vm4, %v474_v18 }
 0x218   : > { %1893 = vst.msk [vmem:[#allocation3 + $0xb8] sm:$0xff] %vm1869_vm11, %v1820_v16  ;;  %v1944_v62 = vpack.c.bf16 %v1923_v17, %v1922_v14  ;;  %1829 = vrot.lane.b32.xlu0 %v1159_v3, %s2673_s25 }
 0x219   : > { %1642 = vrot.lane.b32.xlu1 %v1547_v15, %s2672_s24 }
 0x21a   : > { %2618 = vmatprep.mubr.msk.bf16.mxu1 %vm1964_vm12, %v1944_v62  ;;  %v663_v20 = vpop.permute.xlu0 %662  ;;  %v1924_v41 = vld [vmem:[#allocation3 + $0xb0] sm:$0xff] }
 0x21b   : > { %v476_v63 = vpop.permute.xlu1 %475  ;;  %735 = vst.msk [vmem:[#allocation3 + $0xc0] sm:$0xff] %vm710_vm5, %v663_v20 }
 0x21c   : > { %545 = vst.msk [vmem:[#allocation3 + $0xd8] sm:$0xff] %vm517_vm4, %v476_v63  ;;  %1833 = vrot.lane.b32.xlu0 %v1739_v19, %s2673_s25 }
 0x21d   : > { %1831 = vrot.lane.b32.xlu1 %v1160_v4, %s2673_s25 }
 0x21e   : > { %v667_v28 = vpop.permute.xlu0 %666 }
 0x21f   : > { %v665_v23 = vpop.permute.xlu1 %664  ;;  %v1925_v24 = vld [vmem:[#allocation3 + $0xb8] sm:$0xff]  ;;  %737 = vst.msk [vmem:[#allocation3 + $0xd0] sm:$0xff] %vm710_vm5, %v667_v28 }
 0x220   : > { %736 = vst.msk [vmem:[#allocation3 + $0xc8] sm:$0xff] %vm710_vm5, %v665_v23  ;;  %v1945_v27 = vpack.c.bf16 %v1925_v24, %v1924_v41 }
 0x221   : > { %1835 = vrot.lane.b32.xlu1 %v1740_v42, %s2673_s25 }
 0x222   : > { %2619 = vmatmul.mubr.msk.bf16.gmra.mrb[4].mxu1 %vm1964_vm12, %v1945_v27  ;;  %v856_v29 = vpop.permute.xlu0 %855 }
 0x223   : > { %v669_v21 = vpop.permute.xlu1 %668  ;;  %928 = vst.msk [vmem:[#allocation3 + $0xc0] sm:$0xff] %vm903_vm6, %v856_v29 }
 0x224   : > { %738 = vst.msk [vmem:[#allocation3 + $0xd8] sm:$0xff] %vm710_vm5, %v669_v21 }
 0x226   : > { %v860_v30 = vpop.permute.xlu0 %859 }
 0x227   : > { %v858_v22 = vpop.permute.xlu1 %857  ;;  %930 = vst.msk [vmem:[#allocation3 + $0xd0] sm:$0xff] %vm903_vm6, %v860_v30 }
 0x228   : > { %929 = vst.msk [vmem:[#allocation3 + $0xc8] sm:$0xff] %vm903_vm6, %v858_v22 }
 0x22a   : > { %v1049_v32 = vpop.permute.xlu0 %1048 }
 0x22b   : > { %v862_v31 = vpop.permute.xlu1 %861  ;;  %1121 = vst.msk [vmem:[#allocation3 + $0xc0] sm:$0xff] %vm1096_vm7, %v1049_v32 }
 0x22c   : > { %931 = vst.msk [vmem:[#allocation3 + $0xd8] sm:$0xff] %vm903_vm6, %v862_v31 }
 0x22e   : > { %v1053_v36 = vpop.permute.xlu0 %1052 }
 0x22f   : > { %v1051_v35 = vpop.permute.xlu1 %1050  ;;  %1123 = vst.msk [vmem:[#allocation3 + $0xd0] sm:$0xff] %vm1096_vm7, %v1053_v36 }
 0x230   : > { %1122 = vst.msk [vmem:[#allocation3 + $0xc8] sm:$0xff] %vm1096_vm7, %v1051_v35 }
 0x232   : > { %v1242_v38 = vpop.permute.xlu0 %1241 }
 0x233   : > { %v1055_v37 = vpop.permute.xlu1 %1054  ;;  %1314 = vst.msk [vmem:[#allocation3 + $0xc0] sm:$0xff] %vm1289_vm8, %v1242_v38 }
 0x234   : > { %1124 = vst.msk [vmem:[#allocation3 + $0xd8] sm:$0xff] %vm1096_vm7, %v1055_v37 }
 0x235   : > { %v3667_v26 = vpop.f32.mrb[8].mxu0 }
 0x236   : > { %v3670_v40 = vpop.f32.mrb[9].mxu0  ;;  %v1246_v46 = vpop.permute.xlu0 %1245 }
 0x237   : > { %v1244_v43 = vpop.permute.xlu1 %1243  ;;  %v3672_v44 = vpop.f32.mrb[10].mxu0  ;;  %1316 = vst.msk [vmem:[#allocation3 + $0xd0] sm:$0xff] %vm1289_vm8, %v1246_v46 }
 0x238   : > { %1315 = vst.msk [vmem:[#allocation3 + $0xc8] sm:$0xff] %vm1289_vm8, %v1244_v43  ;;  %v3675_v55 = vpop.f32.mrb[11].mxu0 }
 0x23a   : > { %v1436_v50 = vpop.permute.xlu0 %1435 }
 0x23b   : > { %v1248_v47 = vpop.permute.xlu1 %1247  ;;  %1508 = vst.msk [vmem:[#allocation3 + $0xc0] sm:$0xff] %vm1483_vm9, %v1436_v50 }
 0x23c   : > { %1317 = vst.msk [vmem:[#allocation3 + $0xd8] sm:$0xff] %vm1289_vm8, %v1248_v47 }
 0x23e   : > { %v1440_v53 = vpop.permute.xlu0 %1439 }
 0x23f   : > { %v1438_v51 = vpop.permute.xlu1 %1437  ;;  %1510 = vst.msk [vmem:[#allocation3 + $0xd0] sm:$0xff] %vm1483_vm9, %v1440_v53 }
 0x240   : > { %1509 = vst.msk [vmem:[#allocation3 + $0xc8] sm:$0xff] %vm1483_vm9, %v1438_v51 }
 0x242   : > { %v1629_v56 = vpop.permute.xlu0 %1628 }
 0x243   : > { %v1442_v25 = vpop.permute.xlu1 %1441  ;;  %1701 = vst.msk [vmem:[#allocation3 + $0xc0] sm:$0xff] %vm1676_vm10, %v1629_v56 }
 0x244   : > { %1511 = vst.msk [vmem:[#allocation3 + $0xd8] sm:$0xff] %vm1483_vm9, %v1442_v25 }
 0x246   : > { %v1633_v58 = vpop.permute.xlu0 %1632 }
 0x247   : > { %v1631_v57 = vpop.permute.xlu1 %1630  ;;  %1703 = vst.msk [vmem:[#allocation3 + $0xd0] sm:$0xff] %vm1676_vm10, %v1633_v58 }
 0x248   : > { %1702 = vst.msk [vmem:[#allocation3 + $0xc8] sm:$0xff] %vm1676_vm10, %v1631_v57 }
 0x24a   : > { %v1822_v60 = vpop.permute.xlu0 %1821 }
 0x24b   : > { %v1635_v59 = vpop.permute.xlu1 %1634  ;;  %1894 = vst.msk [vmem:[#allocation3 + $0xc0] sm:$0xff] %vm1869_vm11, %v1822_v60 }
 0x24c   : > { %1704 = vst.msk [vmem:[#allocation3 + $0xd8] sm:$0xff] %vm1676_vm10, %v1635_v59 }
 0x24e   : > { %v478_v3 = vpop.permute.xlu0 %477 }
 0x24f   : > { %v1824_v1 = vpop.permute.xlu1 %1823  ;;  %546 = vst.msk [vmem:[#allocation3 + $0xe0] sm:$0xff] %vm517_vm4, %v478_v3 }
 0x250   : > { %1895 = vst.msk [vmem:[#allocation3 + $0xc8] sm:$0xff] %vm1869_vm11, %v1824_v1 }
 0x252   : > { %v1826_v4 = vpop.permute.xlu0 %1825  ;;  %v1926_v5 = vld [vmem:[#allocation3 + $0xc0] sm:$0xff] }
 0x253   : > { %v480_v54 = vpop.permute.xlu1 %479  ;;  %1896 = vst.msk [vmem:[#allocation3 + $0xd0] sm:$0xff] %vm1869_vm11, %v1826_v4 }
 0x254   : > { %547 = vst.msk [vmem:[#allocation3 + $0xe8] sm:$0xff] %vm517_vm4, %v480_v54 }
 0x256   : > { %v482_v9 = vpop.permute.xlu0 %481 }
 0x257   : > { %v1828_v6 = vpop.permute.xlu1 %1827  ;;  %v1927_v7 = vld [vmem:[#allocation3 + $0xc8] sm:$0xff]  ;;  %548 = vst.msk [vmem:[#allocation3 + $0xf0] sm:$0xff] %vm517_vm4, %v482_v9 }
 0x258   : > { %1897 = vst.msk [vmem:[#allocation3 + $0xd8] sm:$0xff] %vm1869_vm11, %v1828_v6  ;;  %v1946_v8 = vpack.c.bf16 %v1927_v7, %v1926_v5 }
 0x25a   : > { %2622 = vmatprep.mubr.msk.bf16.mxu1 %vm1964_vm12, %v1946_v8  ;;  %v671_v11 = vpop.permute.xlu0 %670  ;;  %v1928_v12 = vld [vmem:[#allocation3 + $0xd0] sm:$0xff] }
 0x25b   : > { %v484_v10 = vpop.permute.xlu1 %483  ;;  %739 = vst.msk [vmem:[#allocation3 + $0xe0] sm:$0xff] %vm710_vm5, %v671_v11  ;;  %v3750_v8 = vld [vmem:[%s4299_s2] ss:$0 sm:$0xff] }
 0x25c   : > { %549 = vst.msk [vmem:[#allocation3 + $0xf8] sm:$0xff] %vm517_vm4, %v484_v10  ;;  %v3754_v9 = vadd.f32 %v3750_v8, %v3499_v45  ;;  %v3758_v10 = vadd.f32 %v3750_v8, %v3492_v0  ;;  %v3776_v0 = vadd.f32 %v3750_v8, %v3603_v34  ;;  %v3790_v34 = vadd.f32 %v3600_v48, %v3750_v8 }
 0x25e   : > { %v675_v14 = vpop.permute.xlu0 %674  ;;  %v2183_v11 = vsel %vm2181_vm13, %v3754_v9, 0.0 }
 0x25f   : > { %v673_v33 = vpop.permute.xlu1 %672  ;;  %v1929_v13 = vld [vmem:[#allocation3 + $0xd8] sm:$0xff]  ;;  %741 = vst.msk [vmem:[#allocation3 + $0xf0] sm:$0xff] %vm710_vm5, %v675_v14 }
 0x260   : > { %740 = vst.msk [vmem:[#allocation3 + $0xe8] sm:$0xff] %vm710_vm5, %v673_v33  ;;  %v1947_v49 = vpack.c.bf16 %v1929_v13, %v1928_v12  ;;  %v3764_v12 = vadd.f32 %v3489_v61, %v3750_v8  ;;  %v2182_v33 = vsel %vm2181_vm13, %v3758_v10, 0.0 }
 0x261   : > { %v2184_v13 = vadd.f32 %v2183_v11, %v2182_v33 }
 0x262   : > { %2623 = vmatmul.mubr.msk.bf16.gmra.mrb[8].mxu1 %vm1964_vm12, %v1947_v49  ;;  %v864_v16 = vpop.permute.xlu0 %863  ;;  %v2185_v45 = vsel %vm2181_vm13, %v3764_v12, 0.0  ;;  %v3772_v49 = vadd.f32 %v3496_v2, %v3750_v8 }
 0x263   : > { %v677_v15 = vpop.permute.xlu1 %676  ;;  %932 = vst.msk [vmem:[#allocation3 + $0xe0] sm:$0xff] %vm903_vm6, %v864_v16  ;;  %v2186_v14 = vadd.f32 %v2185_v45, %v2184_v13  ;;  %v3784_v16 = vadd.f32 %v3750_v8, %v3609_v39  ;;  %v3800_v39 = vadd.f32 %v3750_v8, %v3670_v40  ;;  %v3814_v40 = vadd.f32 %v3667_v26, %v3750_v8 }
 0x264   : > { %742 = vst.msk [vmem:[#allocation3 + $0xf8] sm:$0xff] %vm710_vm5, %v677_v15  ;;  %v2187_v61 = vsel %vm2181_vm13, %v3772_v49, 0.0  ;;  %v2189_v15 = vsel %vm2181_vm13, %v3776_v0, 0.0 }
 0x265   : > { %v2191_v2 = vsel %vm2181_vm13, %v3784_v16, 0.0  ;;  %v2197_v48 = vsel %vm2181_vm13, %v3800_v39, 0.0 }
 0x266   : > { %v868_v62 = vpop.permute.xlu0 %867 }
 0x267   : > { %v866_v17 = vpop.permute.xlu1 %865  ;;  %934 = vst.msk [vmem:[#allocation3 + $0xf0] sm:$0xff] %vm903_vm6, %v868_v62 }
 0x268   : > { %933 = vst.msk [vmem:[#allocation3 + $0xe8] sm:$0xff] %vm903_vm6, %v866_v17  ;;  %v2188_v17 = vadd.f32 %v2187_v61, %v2186_v14 }
 0x26a   : > { %v1057_v63 = vpop.permute.xlu0 %1056  ;;  %v2190_v62 = vadd.f32 %v2189_v15, %v2188_v17 }
 0x26b   : > { %v870_v18 = vpop.permute.xlu1 %869  ;;  %1125 = vst.msk [vmem:[#allocation3 + $0xe0] sm:$0xff] %vm1096_vm7, %v1057_v63  ;;  %v2193_v63 = vsel %vm2181_vm13, %v3790_v34, 0.0 }
 0x26c   : > { %935 = vst.msk [vmem:[#allocation3 + $0xf8] sm:$0xff] %vm903_vm6, %v870_v18  ;;  %v2192_v18 = vadd.f32 %v2191_v2, %v2190_v62 }
 0x26e   : > { %v1061_v20 = vpop.permute.xlu0 %1060 }
 0x26f   : > { %v1059_v19 = vpop.permute.xlu1 %1058  ;;  %1127 = vst.msk [vmem:[#allocation3 + $0xf0] sm:$0xff] %vm1096_vm7, %v1061_v20  ;;  %v2194_v20 = vadd.f32 %v2193_v63, %v2192_v18 }
 0x270   : > { %1126 = vst.msk [vmem:[#allocation3 + $0xe8] sm:$0xff] %vm1096_vm7, %v1059_v19  ;;  %v3796_v19 = vadd.f32 %v3606_v52, %v3750_v8 }
 0x272   : > { %v1250_v42 = vpop.permute.xlu0 %1249 }
 0x273   : > { %v1063_v41 = vpop.permute.xlu1 %1062  ;;  %1318 = vst.msk [vmem:[#allocation3 + $0xe0] sm:$0xff] %vm1289_vm8, %v1250_v42  ;;  %v3808_v42 = vadd.f32 %v3750_v8, %v3675_v55 }
 0x274   : > { %1128 = vst.msk [vmem:[#allocation3 + $0xf8] sm:$0xff] %vm1096_vm7, %v1063_v41  ;;  %v2195_v41 = vsel %vm2181_vm13, %v3796_v19, 0.0 }
 0x275   : > { %v3709_v23 = vpop.f32.mrb[12].mxu0  ;;  %v2199_v52 = vsel %vm2181_vm13, %v3808_v42, 0.0 }
 0x276   : > { %v3712_v24 = vpop.f32.mrb[13].mxu0  ;;  %v1254_v29 = vpop.permute.xlu0 %1253 }
 0x277   : > { %v1252_v27 = vpop.permute.xlu1 %1251  ;;  %v3714_v28 = vpop.f32.mrb[14].mxu0  ;;  %1320 = vst.msk [vmem:[#allocation3 + $0xf0] sm:$0xff] %vm1289_vm8, %v1254_v29  ;;  %v3824_v55 = vadd.f32 %v3750_v8, %v3712_v24  ;;  %v3838_v24 = vadd.f32 %v3709_v23, %v3750_v8 }
 0x278   : > { %1319 = vst.msk [vmem:[#allocation3 + $0xe8] sm:$0xff] %vm1289_vm8, %v1252_v27  ;;  %v3717_v21 = vpop.f32.mrb[15].mxu0  ;;  %v2196_v27 = vadd.f32 %v2195_v41, %v2194_v20 }
 0x27a   : > { %v1444_v30 = vpop.permute.xlu0 %1443  ;;  %v2198_v29 = vadd.f32 %v2197_v48, %v2196_v27 }
 0x27b   : > { %v1256_v22 = vpop.permute.xlu1 %1255  ;;  %1512 = vst.msk [vmem:[#allocation3 + $0xe0] sm:$0xff] %vm1483_vm9, %v1444_v30 }
 0x27c   : > { %1321 = vst.msk [vmem:[#allocation3 + $0xf8] sm:$0xff] %vm1289_vm8, %v1256_v22  ;;  %v2200_v22 = vadd.f32 %v2199_v52, %v2198_v29 }
 0x27e   : > { %v1448_v32 = vpop.permute.xlu0 %1447 }
 0x27f   : > { %v1446_v31 = vpop.permute.xlu1 %1445  ;;  %1514 = vst.msk [vmem:[#allocation3 + $0xf0] sm:$0xff] %vm1483_vm9, %v1448_v32  ;;  %v2201_v32 = vsel %vm2181_vm13, %v3814_v40, 0.0 }
 0x280   : > { %1513 = vst.msk [vmem:[#allocation3 + $0xe8] sm:$0xff] %vm1483_vm9, %v1446_v31 }
 0x282   : > { %v1637_v36 = vpop.permute.xlu0 %1636 }
 0x283   : > { %v1450_v35 = vpop.permute.xlu1 %1449  ;;  %1705 = vst.msk [vmem:[#allocation3 + $0xe0] sm:$0xff] %vm1676_vm10, %v1637_v36 }
 0x284   : > { %1515 = vst.msk [vmem:[#allocation3 + $0xf8] sm:$0xff] %vm1483_vm9, %v1450_v35  ;;  %v3820_v35 = vadd.f32 %v3672_v44, %v3750_v8 }
 0x286   : > { %v1641_v38 = vpop.permute.xlu0 %1640  ;;  %v2203_v26 = vsel %vm2181_vm13, %v3820_v35, 0.0 }
 0x287   : > { %v1639_v37 = vpop.permute.xlu1 %1638  ;;  %1707 = vst.msk [vmem:[#allocation3 + $0xf0] sm:$0xff] %vm1676_vm10, %v1641_v38 }
 0x288   : > { %1706 = vst.msk [vmem:[#allocation3 + $0xe8] sm:$0xff] %vm1676_vm10, %v1639_v37  ;;  %v2202_v37 = vadd.f32 %v2201_v32, %v2200_v22 }
 0x28a   : > { %v1830_v46 = vpop.permute.xlu0 %1829 }
 0x28b   : > { %v1643_v43 = vpop.permute.xlu1 %1642  ;;  %1898 = vst.msk [vmem:[#allocation3 + $0xe0] sm:$0xff] %vm1869_vm11, %v1830_v46  ;;  %v3832_v46 = vadd.f32 %v3750_v8, %v3717_v21 }
 0x28c   : > { %1708 = vst.msk [vmem:[#allocation3 + $0xf8] sm:$0xff] %vm1676_vm10, %v1643_v43  ;;  %v2205_v43 = vsel %vm2181_vm13, %v3824_v55, 0.0 }
 0x28e   : > { %v1834_v50 = vpop.permute.xlu0 %1833 }
 0x28f   : > { %v1832_v47 = vpop.permute.xlu1 %1831  ;;  %1900 = vst.msk [vmem:[#allocation3 + $0xf0] sm:$0xff] %vm1869_vm11, %v1834_v50  ;;  %v2207_v50 = vsel %vm2181_vm13, %v3832_v46, 0.0 }
 0x290   : > { %1899 = vst.msk [vmem:[#allocation3 + $0xe8] sm:$0xff] %vm1869_vm11, %v1832_v47  ;;  %v2204_v47 = vadd.f32 %v2203_v26, %v2202_v37 }
 0x292   : > { %v1930_v53 = vld [vmem:[#allocation3 + $0xe0] sm:$0xff]  ;;  %v2206_v44 = vadd.f32 %v2205_v43, %v2204_v47 }
 0x293   : > { %v1836_v51 = vpop.permute.xlu1 %1835 }
 0x294   : > { %1901 = vst.msk [vmem:[#allocation3 + $0xf8] sm:$0xff] %vm1869_vm11, %v1836_v51  ;;  %v2208_v51 = vadd.f32 %v2207_v50, %v2206_v44 }
 0x296   : > { %v1932_v57 = vld [vmem:[#allocation3 + $0xf0] sm:$0xff] }
 0x297   : > { %v1931_v25 = vld [vmem:[#allocation3 + $0xe8] sm:$0xff] }
 0x298   : > { %v1948_v56 = vpack.c.bf16 %v1931_v25, %v1930_v53  ;;  %v2209_v53 = vsel %vm2181_vm13, %v3838_v24, 0.0  ;;  %v3844_v25 = vadd.f32 %v3714_v28, %v3750_v8 }
 0x29a   : > { %2626 = vmatprep.mubr.msk.bf16.mxu1 %vm1964_vm12, %v1948_v56  ;;  %v2210_v56 = vadd.f32 %v2209_v53, %v2208_v51 }
 0x29b   : > { %v1933_v58 = vld [vmem:[#allocation3 + $0xf8] sm:$0xff] }
 0x29c   : > { %v1949_v59 = vpack.c.bf16 %v1933_v58, %v1932_v57  ;;  %v2211_v57 = vsel %vm2181_vm13, %v3844_v25, 0.0 }
 0x29e   : > { %2627 = vmatmul.mubr.msk.bf16.gmra.mrb[12].mxu1 %vm1964_vm12, %v1949_v59  ;;  %v2212_v59 = vadd.f32 %v2211_v57, %v2210_v56 }
 0x2b5   : > { %v3735_v60 = vpop.f32.mrb[0].mxu1 }
 0x2b6   : > { %v2118_v1 = vpop.f32.mrb[1].mxu1  ;;  %v3860_v28 = vadd.f32 %v3735_v60, %v3750_v8 }
 0x2b7   : > { %v3737_v3 = vpop.f32.mrb[2].mxu1  ;;  %v3847_v21 = vadd.f32 %v3750_v8, %v2118_v1 }
 0x2b8   : > { %v2121_v54 = vpop.f32.mrb[3].mxu1  ;;  %v2217_v13 = vsel %vm2181_vm13, %v3860_v28, 0.0  ;;  %v3866_v45 = vadd.f32 %v3737_v3, %v3750_v8 }
 0x2b9   : > { %v2213_v58 = vsel %vm2181_vm13, %v3847_v21, 0.0  ;;  %v3854_v23 = vadd.f32 %v3750_v8, %v2121_v54 }
 0x2ba   : > { %v2214_v11 = vadd.f32 %v2213_v58, %v2212_v59  ;;  %v2219_v61 = vsel %vm2181_vm13, %v3866_v45, 0.0 }
 0x2bb   : > { %v2215_v33 = vsel %vm2181_vm13, %v3854_v23, 0.0 }
 0x2bc   : > { %v2216_v1 = vadd.f32 %v2215_v33, %v2214_v11 }
 0x2be   : > { %v2218_v14 = vadd.f32 %v2217_v13, %v2216_v1 }
 0x2c0   : > { %v2220_v17 = vadd.f32 %v2219_v61, %v2218_v14 }
 0x2f5   : > { %v3739_v4 = vpop.f32.mrb[4].mxu1 }
 0x2f6   : > { %v3741_v5 = vpop.f32.mrb[5].mxu1 }
 0x2f7   : > { %v3743_v6 = vpop.f32.mrb[6].mxu1  ;;  %v3870_v54 = vadd.f32 %v3750_v8, %v3741_v5  ;;  %v3884_v5 = vadd.f32 %v3739_v4, %v3750_v8 }
 0x2f8   : > { %v3745_v7 = vpop.f32.mrb[7].mxu1  ;;  %v3890_v63 = vadd.f32 %v3743_v6, %v3750_v8 }
 0x2f9   : > { %v2221_v60 = vsel %vm2181_vm13, %v3870_v54, 0.0  ;;  %v3878_v15 = vadd.f32 %v3750_v8, %v3745_v7  ;;  %v2225_v18 = vsel %vm2181_vm13, %v3884_v5, 0.0 }
 0x2fa   : > { %v2222_v62 = vadd.f32 %v2221_v60, %v2220_v17  ;;  %v2227_v41 = vsel %vm2181_vm13, %v3890_v63, 0.0 }
 0x2fb   : > { %v2223_v3 = vsel %vm2181_vm13, %v3878_v15, 0.0 }
 0x2fc   : > { %v2224_v2 = vadd.f32 %v2223_v3, %v2222_v62 }
 0x2fe   : > { %v2226_v20 = vadd.f32 %v2225_v18, %v2224_v2 }
 0x300   : > { %v2228_v27 = vadd.f32 %v2227_v41, %v2226_v20 }
 0x335   : > { %v2624_v30 = vpop.f32.mrb[8].mxu1 }
 0x336   : > { %v2150_v31 = vpop.f32.mrb[9].mxu1  ;;  %v3905_v6 = vadd.f32 %v2624_v30, %v3750_v8 }
 0x337   : > { %v2625_v36 = vpop.f32.mrb[10].mxu1  ;;  %v3893_v7 = vadd.f32 %v3750_v8, %v2150_v31 }
 0x338   : > { %v2153_v38 = vpop.f32.mrb[11].mxu1  ;;  %v2233_v31 = vsel %vm2181_vm13, %v3905_v6, 0.0  ;;  %v3910_v32 = vadd.f32 %v2625_v36, %v3750_v8 }
 0x339   : > { %v2229_v48 = vsel %vm2181_vm13, %v3893_v7, 0.0  ;;  %v3900_v4 = vadd.f32 %v3750_v8, %v2153_v38 }
 0x33a   : > { %v2230_v29 = vadd.f32 %v2229_v48, %v2228_v27  ;;  %v2235_v38 = vsel %vm2181_vm13, %v3910_v32, 0.0 }
 0x33b   : > { %v2231_v52 = vsel %vm2181_vm13, %v3900_v4, 0.0 }
 0x33c   : > { %v2232_v22 = vadd.f32 %v2231_v52, %v2230_v29 }
 0x33e   : > { %v2234_v37 = vadd.f32 %v2233_v31, %v2232_v22 }
 0x340   : > { %v2236_v50 = vadd.f32 %v2235_v38, %v2234_v37 }
 0x371   : > { %v2628_v26 = vpop.f32.mrb[12].mxu1 }
 0x372   : > { %v2166_v43 = vpop.f32.mrb[13].mxu1  ;;  %v3918_v51 = vadd.f32 %v2628_v26, %v3750_v8 }
 0x373   : > { %v3915_v47 = vadd.f32 %v3750_v8, %v2166_v43  ;;  %v2629_v44 = vpop.f32.mrb[14].mxu1 }
 0x374   : > { %v2169_v30 = vpop.f32.mrb[15].mxu1  ;;  %v3926_v57 = vadd.f32 %v2629_v44, %v3750_v8  ;;  %v2241_v11 = vsel %vm2181_vm13, %v3918_v51, 0.0 }
 0x375   : > { %v2237_v53 = vsel %vm2181_vm13, %v3915_v47, 0.0  ;;  %v3923_v36 = vadd.f32 %v3750_v8, %v2169_v30 }
 0x376   : > { %v2238_v56 = vadd.f32 %v2237_v53, %v2236_v50  ;;  %v2243_v1 = vsel %vm2181_vm13, %v3926_v57, 0.0 }
 0x377   : > { %v2239_v58 = vsel %vm2181_vm13, %v3923_v36, 0.0 }
 0x378   : > { %v2240_v59 = vadd.f32 %v2239_v58, %v2238_v56 }
 0x37a   : > { %v2242_v33 = vadd.f32 %v2241_v11, %v2240_v59 }
 0x37c   : > { %v2244_v13 = vadd.f32 %v2243_v1, %v2242_v33 }
 0x37e   : > { %2245 = vadd.xlane.f32.xlu0 %v2244_v13 }
 0x40b   : > { %v2246_v14 = vpop.xlane.xlu0 %2245 }
 0x40c   : > { %v2247_v61 = vrot.slane %v2246_v14, 4 }
 0x40e   : > { %v2248_v60 = vadd.f32 %v2247_v61, %v2246_v14 }
 0x410   : > { %v2249_v17 = vrot.slane %v2248_v60, 2 }
 0x412   : > { %v2250_v62 = vadd.f32 %v2249_v17, %v2248_v60 }
 0x414   : > { %v2251_v8 = vrot.slane %v2250_v62, 1 }
 0x416   : > { %v2252_v3 = vadd.f32 %v2251_v8, %v2250_v62 }
 0x418   : > { %2632 = vpush %v2252_v3 }
 0x449   : > { %s2633_s30 = spop %2632 }
 0x44a   : > { %v2254_v2 = vstv %s2633_s30 }
 0x44b   : > { %v3934_v18 = vmul.f32 0.00048828125, %v2254_v2 }
 0x44d   : > { %v3938_v20 = vsub.f32 %v3758_v10, %v3934_v18  ;;  %v3942_v41 = vsub.f32 %v3754_v9, %v3934_v18  ;;  %v3946_v48 = vsub.f32 %v3764_v12, %v3934_v18  ;;  %v3950_v27 = vsub.f32 %v3772_v49, %v3934_v18 }
 0x44e   : > { %v3958_v10 = vsub.f32 %v3776_v0, %v3934_v18  ;;  %v3964_v12 = vsub.f32 %v3784_v16, %v3934_v18  ;;  %v3972_v26 = vsub.f32 %v3790_v34, %v3934_v18  ;;  %v3979_v16 = vsub.f32 %v3796_v19, %v3934_v18 }
 0x44f   : > { %v2289_v29 = vmul.f32 %v3938_v20, %v3938_v20  ;;  %v2290_v52 = vmul.f32 %v3942_v41, %v3942_v41  ;;  %v2291_v9 = vmul.f32 %v3946_v48, %v3946_v48  ;;  %v2292_v49 = vmul.f32 %v3950_v27, %v3950_v27 }
 0x450   : > { %v2293_v0 = vmul.f32 %v3958_v10, %v3958_v10  ;;  %v2294_v44 = vmul.f32 %v3964_v12, %v3964_v12  ;;  %v3986_v34 = vsub.f32 %v3800_v39, %v3934_v18  ;;  %v2295_v53 = vmul.f32 %v3972_v26, %v3972_v26 }
 0x451   : > { %v2321_v22 = vsel %vm2181_vm13, %v2289_v29, 0.0  ;;  %v2322_v31 = vsel %vm2181_vm13, %v2290_v52, 0.0  ;;  %v2324_v43 = vsel %vm2181_vm13, %v2291_v9, 0.0  ;;  %v2326_v50 = vsel %vm2181_vm13, %v2292_v49, 0.0 }
 0x452   : > { %v2323_v37 = vadd.f32 %v2322_v31, %v2321_v22  ;;  %v2328_v56 = vsel %vm2181_vm13, %v2293_v0, 0.0  ;;  %v3993_v19 = vsub.f32 %v3808_v42, %v3934_v18  ;;  %v2296_v59 = vmul.f32 %v3979_v16, %v3979_v16 }
 0x453   : > { %v2330_v11 = vsel %vm2181_vm13, %v2294_v44, 0.0  ;;  %v4000_v39 = vsub.f32 %v3814_v40, %v3934_v18  ;;  %v2297_v1 = vmul.f32 %v3986_v34, %v3986_v34  ;;  %v2332_v13 = vsel %vm2181_vm13, %v2295_v53, 0.0 }
 0x454   : > { %v2325_v38 = vadd.f32 %v2324_v43, %v2323_v37  ;;  %v4007_v42 = vsub.f32 %v3820_v35, %v3934_v18  ;;  %v2298_v61 = vmul.f32 %v3993_v19, %v3993_v19  ;;  %v2334_v60 = vsel %vm2181_vm13, %v2296_v59, 0.0 }
 0x455   : > { %v4014_v40 = vsub.f32 %v3824_v55, %v3934_v18  ;;  %v2299_v62 = vmul.f32 %v4000_v39, %v4000_v39  ;;  %v2336_v8 = vsel %vm2181_vm13, %v2297_v1, 0.0  ;;  %v4021_v35 = vsub.f32 %v3832_v46, %v3934_v18 }
 0x456   : > { %v2327_v30 = vadd.f32 %v2326_v50, %v2325_v38  ;;  %v2300_v2 = vmul.f32 %v4007_v42, %v4007_v42  ;;  %v2338_v29 = vsel %vm2181_vm13, %v2298_v61, 0.0  ;;  %v4028_v55 = vsub.f32 %v3838_v24, %v3934_v18 }
 0x457   : > { %v2301_v9 = vmul.f32 %v4014_v40, %v4014_v40  ;;  %v2340_v49 = vsel %vm2181_vm13, %v2299_v62, 0.0  ;;  %v4035_v46 = vsub.f32 %v3844_v25, %v3934_v18  ;;  %v2302_v31 = vmul.f32 %v4021_v35, %v4021_v35 }
 0x458   : > { %v2329_v58 = vadd.f32 %v2328_v56, %v2327_v30  ;;  %v2342_v37 = vsel %vm2181_vm13, %v2300_v2, 0.0  ;;  %v4042_v24 = vsub.f32 %v3847_v21, %v3934_v18  ;;  %v2303_v43 = vmul.f32 %v4028_v55, %v4028_v55 }
 0x459   : > { %v2344_v38 = vsel %vm2181_vm13, %v2301_v9, 0.0  ;;  %v4049_v25 = vsub.f32 %v3854_v23, %v3934_v18  ;;  %v2304_v50 = vmul.f32 %v4035_v46, %v4035_v46  ;;  %v2346_v30 = vsel %vm2181_vm13, %v2302_v31, 0.0 }
 0x45a   : > { %v2331_v33 = vadd.f32 %v2330_v11, %v2329_v58  ;;  %v4056_v21 = vsub.f32 %v3860_v28, %v3934_v18  ;;  %v2305_v56 = vmul.f32 %v4042_v24, %v4042_v24  ;;  %v2348_v58 = vsel %vm2181_vm13, %v2303_v43, 0.0 }
 0x45b   : > { %v4063_v23 = vsub.f32 %v3866_v45, %v3934_v18  ;;  %v2306_v11 = vmul.f32 %v4049_v25, %v4049_v25  ;;  %v4070_v28 = vsub.f32 %v3870_v54, %v3934_v18  ;;  %v4077_v45 = vsub.f32 %v3878_v15, %v3934_v18 }
 0x45c   : > { %v2333_v14 = vadd.f32 %v2332_v13, %v2331_v33  ;;  %v2350_v33 = vsel %vm2181_vm13, %v2304_v50, 0.0  ;;  %v2307_v13 = vmul.f32 %v4056_v21, %v4056_v21  ;;  %v4084_v54 = vsub.f32 %v3884_v5, %v3934_v18 }
 0x45d   : > { %v4091_v15 = vsub.f32 %v3890_v63, %v3934_v18  ;;  %v4098_v5 = vsub.f32 %v3893_v7, %v3934_v18  ;;  %v4105_v63 = vsub.f32 %v3900_v4, %v3934_v18  ;;  %v4112_v7 = vsub.f32 %v3905_v6, %v3934_v18 }
 0x45e   : > { %v2335_v17 = vadd.f32 %v2334_v60, %v2333_v14  ;;  %v2352_v14 = vsel %vm2181_vm13, %v2305_v56, 0.0  ;;  %v2308_v60 = vmul.f32 %v4063_v23, %v4063_v23  ;;  %v4119_v4 = vsub.f32 %v3910_v32, %v3934_v18 }
 0x45f   : > { %v4126_v6 = vsub.f32 %v3915_v47, %v3934_v18  ;;  %v4133_v32 = vsub.f32 %v3923_v36, %v3934_v18  ;;  %v4140_v47 = vsub.f32 %v3918_v51, %v3934_v18  ;;  %v2288_v36 = vsub.f32 %v3926_v57, %v3934_v18 }
 0x460   : > { %v2337_v3 = vadd.f32 %v2336_v8, %v2335_v17  ;;  %v2354_v17 = vsel %vm2181_vm13, %v2306_v11, 0.0  ;;  %v2309_v8 = vmul.f32 %v4070_v28, %v4070_v28 }
 0x462   : > { %v2339_v52 = vadd.f32 %v2338_v29, %v2337_v3  ;;  %v2356_v3 = vsel %vm2181_vm13, %v2307_v13, 0.0  ;;  %v2310_v29 = vmul.f32 %v4077_v45, %v4077_v45 }
 0x464   : > { %v2341_v22 = vadd.f32 %v2340_v49, %v2339_v52  ;;  %v2358_v52 = vsel %vm2181_vm13, %v2308_v60, 0.0  ;;  %v2311_v49 = vmul.f32 %v4084_v54, %v4084_v54 }
 0x466   : > { %v2343_v0 = vadd.f32 %v2342_v37, %v2341_v22  ;;  %v2360_v22 = vsel %vm2181_vm13, %v2309_v8, 0.0  ;;  %v2312_v37 = vmul.f32 %v4091_v15, %v4091_v15 }
 0x468   : > { %v2345_v44 = vadd.f32 %v2344_v38, %v2343_v0  ;;  %v2362_v0 = vsel %vm2181_vm13, %v2310_v29, 0.0  ;;  %v2313_v38 = vmul.f32 %v4098_v5, %v4098_v5  ;;  %v2320_v29 = vmul.f32 %v2288_v36, %v2288_v36 }
 0x46a   : > { %v2347_v53 = vadd.f32 %v2346_v30, %v2345_v44  ;;  %v2364_v44 = vsel %vm2181_vm13, %v2311_v49, 0.0  ;;  %v2314_v30 = vmul.f32 %v4105_v63, %v4105_v63  ;;  %v2382_v57 = vsel %vm2181_vm13, %v2320_v29, 0.0 }
 0x46c   : > { %v2349_v59 = vadd.f32 %v2348_v58, %v2347_v53  ;;  %v2366_v53 = vsel %vm2181_vm13, %v2312_v37, 0.0  ;;  %v2315_v58 = vmul.f32 %v4112_v7, %v4112_v7 }
 0x46e   : > { %v2351_v1 = vadd.f32 %v2350_v33, %v2349_v59  ;;  %v2368_v59 = vsel %vm2181_vm13, %v2313_v38, 0.0  ;;  %v2316_v33 = vmul.f32 %v4119_v4, %v4119_v4 }
 0x470   : > { %v2353_v61 = vadd.f32 %v2352_v14, %v2351_v1  ;;  %v2370_v1 = vsel %vm2181_vm13, %v2314_v30, 0.0  ;;  %v2317_v14 = vmul.f32 %v4126_v6, %v4126_v6 }
 0x472   : > { %v2355_v62 = vadd.f32 %v2354_v17, %v2353_v61  ;;  %v2372_v61 = vsel %vm2181_vm13, %v2315_v58, 0.0  ;;  %v2318_v17 = vmul.f32 %v4133_v32, %v4133_v32  ;;  %v2376_v51 = vsel %vm2181_vm13, %v2317_v14, 0.0 }
 0x474   : > { %v2357_v2 = vadd.f32 %v2356_v3, %v2355_v62  ;;  %v2374_v62 = vsel %vm2181_vm13, %v2316_v33, 0.0  ;;  %v2319_v3 = vmul.f32 %v4140_v47, %v4140_v47 }
 0x476   : > { %v2359_v9 = vadd.f32 %v2358_v52, %v2357_v2  ;;  %v2378_v52 = vsel %vm2181_vm13, %v2318_v17, 0.0  ;;  %v2380_v49 = vsel %vm2181_vm13, %v2319_v3, 0.0 }
 0x478   : > { %v2361_v31 = vadd.f32 %v2360_v22, %v2359_v9 }
 0x47a   : > { %v2363_v43 = vadd.f32 %v2362_v0, %v2361_v31 }
 0x47c   : > { %v2365_v50 = vadd.f32 %v2364_v44, %v2363_v43 }
 0x47e   : > { %v2367_v56 = vadd.f32 %v2366_v53, %v2365_v50 }
 0x480   : > { %v2369_v11 = vadd.f32 %v2368_v59, %v2367_v56 }
 0x482   : > { %v2371_v13 = vadd.f32 %v2370_v1, %v2369_v11 }
 0x484   : > { %v2373_v60 = vadd.f32 %v2372_v61, %v2371_v13 }
 0x486   : > { %v2375_v8 = vadd.f32 %v2374_v62, %v2373_v60 }
 0x488   : > { %v2377_v2 = vadd.f32 %v2376_v51, %v2375_v8 }
 0x48a   : > { %v2379_v9 = vadd.f32 %v2378_v52, %v2377_v2 }
 0x48c   : > { %v2381_v22 = vadd.f32 %v2380_v49, %v2379_v9 }
 0x48e   : > { %v2383_v18 = vadd.f32 %v2382_v57, %v2381_v22 }
 0x490   : > { %2384 = vadd.xlane.f32.xlu1 %v2383_v18 }
 0x51d   : > { %v2385_v31 = vpop.xlane.xlu1 %2384 }
 0x51e   : > { %v2386_v37 = vrot.slane %v2385_v31, 4 }
 0x520   : > { %v2387_v0 = vadd.f32 %v2386_v37, %v2385_v31 }
 0x522   : > { %v2388_v43 = vrot.slane %v2387_v0, 2 }
 0x524   : > { %v2389_v38 = vadd.f32 %v2388_v43, %v2387_v0 }
 0x526   : > { %v2390_v44 = vrot.slane %v2389_v38, 1 }
 0x528   : > { %v2391_v50 = vadd.f32 %v2390_v44, %v2389_v38 }
 0x52a   : > { %2634 = vpush %v2391_v50 }
 0x55b   : > { %s2635_s4 = spop %2634 }
 0x55c   : > { %v2393_v30 = vstv %s2635_s4 }
 0x55d   : > { %v2394_v53 = vmul.f32 0.00048828125, %v2393_v30 }
 0x55f   : > { %v2395_v56 = vadd.f32 1e-05, %v2394_v53 }
 0x561   : > { %2655 = vrsqrt.f32 %v2395_v56 }
 0x56b   : > { %v2656_v58 = vpop.eup %2655 }
 0x56c   : > { %v2397_v59 = vmul.f32 %v2656_v58, %v3938_v20  ;;  %v2398_v11 = vmul.f32 %v2656_v58, %v3942_v41  ;;  %v2399_v33 = vmul.f32 %v2656_v58, %v3946_v48  ;;  %v2400_v1 = vmul.f32 %v2656_v58, %v3950_v27 }
 0x56d   : > { %v2401_v13 = vmul.f32 %v2656_v58, %v3958_v10  ;;  %v2402_v14 = vmul.f32 %v2656_v58, %v3964_v12  ;;  %v2403_v61 = vmul.f32 %v2656_v58, %v3972_v26  ;;  %v2404_v60 = vmul.f32 %v2656_v58, %v3979_v16 }
 0x56e   : > { %v2405_v17 = vmul.f32 %v2656_v58, %v3986_v34  ;;  %v2406_v62 = vmul.f32 %v2656_v58, %v3993_v19  ;;  %v2407_v20 = vmul.f32 %v2656_v58, %v4000_v39  ;;  %v2408_v41 = vmul.f32 %v2656_v58, %v4007_v42 }
 0x56f   : > { %v2409_v48 = vmul.f32 %v2656_v58, %v4014_v40  ;;  %v2410_v27 = vmul.f32 %v2656_v58, %v4021_v35  ;;  %v2411_v10 = vmul.f32 %v2656_v58, %v4028_v55  ;;  %v2412_v12 = vmul.f32 %v2656_v58, %v4035_v46 }
 0x570   : > { %v2413_v26 = vmul.f32 %v2656_v58, %v4042_v24  ;;  %v2414_v16 = vmul.f32 %v2656_v58, %v4049_v25  ;;  %v2415_v34 = vmul.f32 %v2656_v58, %v4056_v21  ;;  %v2416_v19 = vmul.f32 %v2656_v58, %v4063_v23 }
 0x571   : > { %v4177_v39 = vmul.f32 %v2656_v58, %v4070_v28  ;;  %v4180_v42 = vmul.f32 %v2656_v58, %v4077_v45  ;;  %v4183_v40 = vmul.f32 %v2656_v58, %v4084_v54  ;;  %v4186_v35 = vmul.f32 %v2656_v58, %v4091_v15 }
 0x572   : > { %v4189_v55 = vmul.f32 %v2656_v58, %v4098_v5  ;;  %v4192_v46 = vmul.f32 %v2656_v58, %v4105_v63  ;;  %v4195_v24 = vmul.f32 %v2656_v58, %v4112_v7  ;;  %v4198_v25 = vmul.f32 %v2656_v58, %v4119_v4 }
 0x573   : > { %v4208_v21 = vmul.f32 %v2656_v58, %v4126_v6  ;;  %v4211_v23 = vmul.f32 %v2656_v58, %v4133_v32  ;;  %v4214_v28 = vmul.f32 %v2656_v58, %v4140_v47  ;;  %v4216_v45 = vmul.f32 %v2656_v58, %v2288_v36 }
 0x574   : > { %v2429_v54 = vmax.f32 %v2397_v59, 0.0  ;;  %v2430_v15 = vmax.f32 %v2398_v11, 0.0  ;;  %v2431_v5 = vmax.f32 %v2399_v33, 0.0  ;;  %v2432_v63 = vmax.f32 %v2400_v1, 0.0 }
 0x575   : > { %v2433_v7 = vmax.f32 %v2401_v13, 0.0  ;;  %v2434_v4 = vmax.f32 %v2402_v14, 0.0  ;;  %v2435_v6 = vmax.f32 %v2403_v61, 0.0  ;;  %v2436_v32 = vmax.f32 %v2404_v60, 0.0 }
 0x576   : > { %v2437_v8 = vmax.f32 %v2405_v17, 0.0  ;;  %v2438_v3 = vmax.f32 %v2406_v62, 0.0  ;;  %v2439_v47 = vmax.f32 %v2407_v20, 0.0  ;;  %v2440_v51 = vmax.f32 %v2408_v41, 0.0  ;;  %2461 = vst.msk [vmem:[%s4205_s7] sm:$0xff] %vm2181_vm13, %v2429_v54  ;;  %2462 = vst.msk [vmem:[%s4205_s7 + $0x8] sm:$0xff] %vm2181_vm13, %v2430_v15 }
 0x577   : > { %2463 = vst.msk [vmem:[%s4205_s7 + $0x10] sm:$0xff] %vm2181_vm13, %v2431_v5  ;;  %2464 = vst.msk [vmem:[%s4205_s7 + $0x18] sm:$0xff] %vm2181_vm13, %v2432_v63  ;;  %v2441_v36 = vmax.f32 %v2409_v48, 0.0  ;;  %v2442_v2 = vmax.f32 %v2410_v27, 0.0  ;;  %v2443_v29 = vmax.f32 %v2411_v10, 0.0  ;;  %v2444_v52 = vmax.f32 %v2412_v12, 0.0 }
 0x578   : > { %2465 = vst.msk [vmem:[%s4205_s7 + $0x20] sm:$0xff] %vm2181_vm13, %v2433_v7  ;;  %2466 = vst.msk [vmem:[%s4205_s7 + $0x28] sm:$0xff] %vm2181_vm13, %v2434_v4  ;;  %v2445_v9 = vmax.f32 %v2413_v26, 0.0  ;;  %v2446_v49 = vmax.f32 %v2414_v16, 0.0  ;;  %v2447_v22 = vmax.f32 %v2415_v34, 0.0  ;;  %v2448_v57 = vmax.f32 %v2416_v19, 0.0 }
 0x579   : > { %2467 = vst.msk [vmem:[%s4205_s7 + $0x30] sm:$0xff] %vm2181_vm13, %v2435_v6  ;;  %2468 = vst.msk [vmem:[%s4205_s7 + $0x38] sm:$0xff] %vm2181_vm13, %v2436_v32  ;;  %v2449_v18 = vmax.f32 %v4177_v39, 0.0  ;;  %v2450_v31 = vmax.f32 %v4180_v42, 0.0  ;;  %v2451_v37 = vmax.f32 %v4183_v40, 0.0  ;;  %v2452_v0 = vmax.f32 %v4186_v35, 0.0 }
 0x57a   : > { %2469 = vst.msk [vmem:[%s4205_s7 + $0x40] sm:$0xff] %vm2181_vm13, %v2437_v8  ;;  %2470 = vst.msk [vmem:[%s4205_s7 + $0x48] sm:$0xff] %vm2181_vm13, %v2438_v3  ;;  %v2453_v43 = vmax.f32 %v4189_v55, 0.0  ;;  %v2454_v38 = vmax.f32 %v4192_v46, 0.0  ;;  %v2455_v44 = vmax.f32 %v4195_v24, 0.0  ;;  %v2456_v50 = vmax.f32 %v4198_v25, 0.0 }
 0x57b   : > { %2471 = vst.msk [vmem:[%s4205_s7 + $0x50] sm:$0xff] %vm2181_vm13, %v2439_v47  ;;  %2472 = vst.msk [vmem:[%s4205_s7 + $0x58] sm:$0xff] %vm2181_vm13, %v2440_v51  ;;  %v2457_v30 = vmax.f32 %v4208_v21, 0.0  ;;  %v2458_v53 = vmax.f32 %v4211_v23, 0.0  ;;  %v2459_v56 = vmax.f32 %v4214_v28, 0.0  ;;  %v2460_v58 = vmax.f32 %v4216_v45, 0.0 }
 0x57c   : > { %2473 = vst.msk [vmem:[%s4205_s7 + $0x60] sm:$0xff] %vm2181_vm13, %v2441_v36  ;;  %2474 = vst.msk [vmem:[%s4205_s7 + $0x68] sm:$0xff] %vm2181_vm13, %v2442_v2 }
 0x57d   : > { %2475 = vst.msk [vmem:[%s4205_s7 + $0x70] sm:$0xff] %vm2181_vm13, %v2443_v29  ;;  %2476 = vst.msk [vmem:[%s4205_s7 + $0x78] sm:$0xff] %vm2181_vm13, %v2444_v52 }
 0x57e   : > { %2477 = vst.msk [vmem:[%s4205_s7 + $0x80] sm:$0xff] %vm2181_vm13, %v2445_v9  ;;  %2478 = vst.msk [vmem:[%s4205_s7 + $0x88] sm:$0xff] %vm2181_vm13, %v2446_v49 }
 0x57f   : > { %2479 = vst.msk [vmem:[%s4205_s7 + $0x90] sm:$0xff] %vm2181_vm13, %v2447_v22  ;;  %2480 = vst.msk [vmem:[%s4205_s7 + $0x98] sm:$0xff] %vm2181_vm13, %v2448_v57 }
 0x580   : > { %2481 = vst.msk [vmem:[%s4205_s7 + $0xa0] sm:$0xff] %vm2181_vm13, %v2449_v18  ;;  %2482 = vst.msk [vmem:[%s4205_s7 + $0xa8] sm:$0xff] %vm2181_vm13, %v2450_v31 }
 0x581   : > { %2483 = vst.msk [vmem:[%s4205_s7 + $0xb0] sm:$0xff] %vm2181_vm13, %v2451_v37  ;;  %2484 = vst.msk [vmem:[%s4205_s7 + $0xb8] sm:$0xff] %vm2181_vm13, %v2452_v0 }
 0x582   : > { %2485 = vst.msk [vmem:[%s4205_s7 + $0xc0] sm:$0xff] %vm2181_vm13, %v2453_v43  ;;  %2486 = vst.msk [vmem:[%s4205_s7 + $0xc8] sm:$0xff] %vm2181_vm13, %v2454_v38 }
 0x583   : > { %2487 = vst.msk [vmem:[%s4205_s7 + $0xd0] sm:$0xff] %vm2181_vm13, %v2455_v44  ;;  %2488 = vst.msk [vmem:[%s4205_s7 + $0xd8] sm:$0xff] %vm2181_vm13, %v2456_v50 }
 0x584   : > { %2489 = vst.msk [vmem:[%s4205_s7 + $0xe0] sm:$0xff] %vm2181_vm13, %v2457_v30  ;;  %2490 = vst.msk [vmem:[%s4205_s7 + $0xe8] sm:$0xff] %vm2181_vm13, %v2458_v53 }
 0x585   : > { %2491 = vst.msk [vmem:[%s4205_s7 + $0xf0] sm:$0xff] %vm2181_vm13, %v2459_v56  ;;  %2492 = vst.msk [vmem:[%s4205_s7 + $0xf8] sm:$0xff] %vm2181_vm13, %v2460_v58 }
 0x586 PF: > { %s13_s12 = sadd.s32 1, %s2663_s12  }
 0x587   : > { %p10_p4 = scmp.ge.s32.totalorder %s13_s12, 4  }
 0x589   :  { %12 = sbr.rel (!%p10_p4) target bundleno = 1 (0x1), region = 64 }

// kernel: iradon_map_forward.11
= control target key start
LH: loop header
LB: loop body
LE: loop exit
PB: predicated region body
PF: predicated region fallthrough
CT: control target
= control target key end

     0   :  { %s2469_s14 = smov 0   ;;  %s3642_s0 = inlined_call_operand.vmem [shape: f32[2,16,16,8], index: 0, kind: input, shape index: {}]   ;;  %s3643_s1 = inlined_call_operand.vmem [shape: bf16[72,1], index: 1, kind: input, shape index: {}]   ;;  %s3644_s2 = inlined_call_operand.<no memory space> [shape: f32[1,1], index: 2, kind: input, shape index: {}]   ;;  %s3645_s3 = inlined_call_operand.vmem [shape: f32[2,16,16,1], index: 3, kind: output, shape index: {}]  }
   0x1   :  { %v8_v0 = vstv %s3644_s2 }
   0x2   :  { %9 = vst [vmem:[#allocation4] sm:$0x1] %v8_v0 }
   0x3 LB: > { %s2297_s15 = sadd.s32 4294967295, %s2435_s14   ;;  %p2301_p0 = scmp.ge.s32.totalorder %s2435_s14, 1  ;;  %s2435_s14 = sphi %s2469_s14, %s15_s14  }
   0x4   : > { %p139_p1 = scmp.lt.s32.totalorder %s2435_s14, 3 }
   0x6   : > { %p140_p2 = pnand %p2301_p0, %p139_p1 }
   0x8   : > { %143 = sbr.rel (%p140_p2) target bundleno = 902 (0x386), region = 32 }
   0xf   : > { %vm206_vm0 = vcmask 64512   ;;  %p2479_p3 = scmp.lt.s32.totalorder %s2297_s15, 1  ;;  %vm209_vm1 = vcmask 58368   ;;  %v2437_v1 = vmov 0.0   ;;  %s2438_s20 = smov 8   ;;  %vm519_vm2 = vcmask 130112  }
  0x10   : > { %207 = vst.msk [vmem:[#allocation2] sm:$0xff] %vm206_vm0, %v2437_v1  ;;  %208 = vst.msk [vmem:[#allocation2 + $0x8] sm:$0xff] %vm206_vm0, %v2437_v1  ;;  %s2439_s21 = smov 16   ;;  %s2440_s22 = smov 24   ;;  %vm712_vm3 = vcmask 195712   ;;  %vm905_vm4 = vcmask 261312  }
  0x11   : > { %211 = vst.msk [vmem:[#allocation2 + $0x18] sm:$0xff] %vm206_vm0, %v2437_v1  ;;  %212 = vst.msk [vmem:[#allocation2 + $0x20] sm:$0xff] %vm206_vm0, %v2437_v1  ;;  %s3663_s15 = smov (!%p2479_p3, %s2297_s15), 1  ;;  %s2441_s23 = smov 32   ;;  %vm2044_vm5 = vcmask 1043456   ;;  %vm1098_vm6 = vcmask 326912  }
  0x12   : > { %214 = vst.msk [vmem:[#allocation2 + $0x30] sm:$0xff] %vm206_vm0, %v2437_v1  ;;  %215 = vst.msk [vmem:[#allocation2 + $0x38] sm:$0xff] %vm206_vm0, %v2437_v1  ;;  %s2330_s16 = sshll.u32 %s3663_s15, 8  ;;  %s2442_s24 = smov 40   ;;  %vm1291_vm7 = vcmask 392512   ;;  %vm1485_vm8 = vcmask 458112  }
  0x13   : > { %217 = vst.msk [vmem:[#allocation2 + $0x48] sm:$0xff] %vm206_vm0, %v2437_v1  ;;  %218 = vst.msk [vmem:[#allocation2 + $0x50] sm:$0xff] %vm206_vm0, %v2437_v1  ;;  %s2549_s19 = scalar_lea.vmem %s3642_s0, %s2330_s16  ;;  %s2443_s25 = smov 48   ;;  %vm1678_vm9 = vcmask 523712   ;;  %vm1871_vm10 = vcmask 589312   ;;  %vm1995_vm11 = vcmask 588800  }
  0x14   : > { %220 = vst.msk [vmem:[#allocation2 + $0x60] sm:$0xff] %vm206_vm0, %v2437_v1  ;;  %221 = vst.msk [vmem:[#allocation2 + $0x68] sm:$0xff] %vm206_vm0, %v2437_v1  ;;  %v174_v2 = vld [vmem:[%s2549_s19] sm:$0xff]  ;;  %v175_v3 = vld [vmem:[%s2549_s19 + $0x8] sm:$0xff]  ;;  %s2444_s26 = smov 56   ;;  %s2445_s6 = smov 64  }
  0x15   : > { %223 = vst.msk [vmem:[#allocation2 + $0x78] sm:$0xff] %vm206_vm0, %v2437_v1  ;;  %224 = vst.msk [vmem:[#allocation2 + $0x80] sm:$0xff] %vm206_vm0, %v2437_v1  ;;  %v176_v4 = vld [vmem:[%s2549_s19 + $0x10] sm:$0xff]  ;;  %v177_v5 = vld [vmem:[%s2549_s19 + $0x18] sm:$0xff]  ;;  %s3526_s13 = scalar_lea.vmem %s3645_s3, %s2330_s16  ;;  %vm2209_vm12 = vcmask 7168  }
  0x16   : > { %226 = vst.msk [vmem:[#allocation2 + $0x90] sm:$0xff] %vm206_vm0, %v2437_v1  ;;  %227 = vst.msk [vmem:[#allocation2 + $0x98] sm:$0xff] %vm206_vm0, %v2437_v1  ;;  %v178_v6 = vld [vmem:[%s2549_s19 + $0x20] sm:$0xff]  ;;  %v179_v7 = vld [vmem:[%s2549_s19 + $0x28] sm:$0xff] }
  0x17   : > { %229 = vst.msk [vmem:[#allocation2 + $0xa8] sm:$0xff] %vm206_vm0, %v2437_v1  ;;  %230 = vst.msk [vmem:[#allocation2 + $0xb0] sm:$0xff] %vm206_vm0, %v2437_v1  ;;  %v359_v8 = vld [vmem:[#allocation2 + $0x1] sm:$0xff]  ;;  %v180_v10 = vld [vmem:[%s2549_s19 + $0x30] sm:$0xff] }
  0x18   : > { %232 = vst.msk [vmem:[#allocation2 + $0xc0] sm:$0xff] %vm206_vm0, %v2437_v1  ;;  %233 = vst.msk [vmem:[#allocation2 + $0xc8] sm:$0xff] %vm206_vm0, %v2437_v1  ;;  %423 = vrot.lane.b32.xlu0 %v359_v8, %s2438_s20  ;;  %v181_v11 = vld [vmem:[%s2549_s19 + $0x38] sm:$0xff]  ;;  %v182_v12 = vld [vmem:[%s2549_s19 + $0x40] sm:$0xff] }
  0x19   : > { %235 = vst.msk [vmem:[#allocation2 + $0xd8] sm:$0xff] %vm206_vm0, %v2437_v1  ;;  %236 = vst.msk [vmem:[#allocation2 + $0xe0] sm:$0xff] %vm206_vm0, %v2437_v1  ;;  %v183_v13 = vld [vmem:[%s2549_s19 + $0x48] sm:$0xff]  ;;  %v184_v14 = vld [vmem:[%s2549_s19 + $0x50] sm:$0xff] }
  0x1a   : > { %238 = vst.msk [vmem:[#allocation2 + $0xf0] sm:$0xff] %vm206_vm0, %v2437_v1  ;;  %239 = vst.msk [vmem:[#allocation2 + $0xf8] sm:$0xff] %vm206_vm0, %v2437_v1  ;;  %v185_v15 = vld [vmem:[%s2549_s19 + $0x58] sm:$0xff]  ;;  %v186_v16 = vld [vmem:[%s2549_s19 + $0x60] sm:$0xff] }
  0x1b   : > { %241 = vst.msk [vmem:[#allocation2 + $0x108] sm:$0xff] %vm206_vm0, %v2437_v1  ;;  %242 = vst.msk [vmem:[#allocation2 + $0x110] sm:$0xff] %vm206_vm0, %v2437_v1  ;;  %v187_v17 = vld [vmem:[%s2549_s19 + $0x68] sm:$0xff]  ;;  %v188_v18 = vld [vmem:[%s2549_s19 + $0x70] sm:$0xff] }
  0x1c   : > { %244 = vst.msk [vmem:[#allocation2 + $0x120] sm:$0xff] %vm206_vm0, %v2437_v1  ;;  %245 = vst.msk [vmem:[#allocation2 + $0x128] sm:$0xff] %vm206_vm0, %v2437_v1  ;;  %v189_v19 = vld [vmem:[%s2549_s19 + $0x78] sm:$0xff]  ;;  %v190_v20 = vld [vmem:[%s2549_s19 + $0x80] sm:$0xff] }
  0x1d   : > { %247 = vst.msk [vmem:[#allocation2 + $0x138] sm:$0xff] %vm206_vm0, %v2437_v1  ;;  %248 = vst.msk [vmem:[#allocation2 + $0x140] sm:$0xff] %vm206_vm0, %v2437_v1  ;;  %v191_v21 = vld [vmem:[%s2549_s19 + $0x88] sm:$0xff]  ;;  %v192_v22 = vld [vmem:[%s2549_s19 + $0x90] sm:$0xff] }
  0x1e   : > { %250 = vst.msk [vmem:[#allocation2 + $0x150] sm:$0xff] %vm206_vm0, %v2437_v1  ;;  %251 = vst.msk [vmem:[#allocation2 + $0x158] sm:$0xff] %vm206_vm0, %v2437_v1  ;;  %v193_v23 = vld [vmem:[%s2549_s19 + $0x98] sm:$0xff]  ;;  %v194_v24 = vld [vmem:[%s2549_s19 + $0xa0] sm:$0xff] }
  0x1f   : > { %253 = vst.msk [vmem:[#allocation2 + $0x168] sm:$0xff] %vm206_vm0, %v2437_v1  ;;  %254 = vst.msk [vmem:[#allocation2 + $0x170] sm:$0xff] %vm206_vm0, %v2437_v1  ;;  %v195_v25 = vld [vmem:[%s2549_s19 + $0xa8] sm:$0xff]  ;;  %v196_v29 = vld [vmem:[%s2549_s19 + $0xb0] sm:$0xff] }
  0x20   : > { %256 = vst.msk [vmem:[#allocation2 + $0x180] sm:$0xff] %vm206_vm0, %v2437_v1  ;;  %257 = vst.msk [vmem:[#allocation2 + $0x188] sm:$0xff] %vm206_vm0, %v2437_v1  ;;  %v197_v30 = vld [vmem:[%s2549_s19 + $0xb8] sm:$0xff]  ;;  %v198_v34 = vld [vmem:[%s2549_s19 + $0xc0] sm:$0xff] }
  0x21   : > { %259 = vst.msk [vmem:[#allocation2 + $0x198] sm:$0xff] %vm206_vm0, %v2437_v1  ;;  %260 = vst.msk [vmem:[#allocation2 + $0x1a0] sm:$0xff] %vm206_vm0, %v2437_v1  ;;  %v199_v35 = vld [vmem:[%s2549_s19 + $0xc8] sm:$0xff]  ;;  %v200_v36 = vld [vmem:[%s2549_s19 + $0xd0] sm:$0xff] }
  0x22   : > { %210 = vst.msk [vmem:[#allocation2 + $0x10] sm:$0x3] %vm209_vm1, %v2437_v1  ;;  %213 = vst.msk [vmem:[#allocation2 + $0x28] sm:$0x3] %vm209_vm1, %v2437_v1  ;;  %v201_v37 = vld [vmem:[%s2549_s19 + $0xd8] sm:$0xff]  ;;  %v202_v38 = vld [vmem:[%s2549_s19 + $0xe0] sm:$0xff] }
  0x23   : > { %216 = vst.msk [vmem:[#allocation2 + $0x40] sm:$0x3] %vm209_vm1, %v2437_v1  ;;  %219 = vst.msk [vmem:[#allocation2 + $0x58] sm:$0x3] %vm209_vm1, %v2437_v1  ;;  %v203_v39 = vld [vmem:[%s2549_s19 + $0xe8] sm:$0xff]  ;;  %v295_v46 = vld [vmem:[#allocation2] sm:$0xff] }
  0x24   : > { %222 = vst.msk [vmem:[#allocation2 + $0x70] sm:$0x3] %vm209_vm1, %v2437_v1  ;;  %225 = vst.msk [vmem:[#allocation2 + $0x88] sm:$0x3] %vm209_vm1, %v2437_v1  ;;  %v296_v49 = vld [vmem:[#allocation2 + $0x8] sm:$0xff] }
  0x25   : > { %228 = vst.msk [vmem:[#allocation2 + $0xa0] sm:$0x3] %vm209_vm1, %v2437_v1  ;;  %231 = vst.msk [vmem:[#allocation2 + $0xb8] sm:$0x3] %vm209_vm1, %v2437_v1 }
  0x26   : > { %234 = vst.msk [vmem:[#allocation2 + $0xd0] sm:$0x3] %vm209_vm1, %v2437_v1  ;;  %237 = vst.msk [vmem:[#allocation2 + $0xe8] sm:$0x3] %vm209_vm1, %v2437_v1 }
  0x27   : > { %240 = vst.msk [vmem:[#allocation2 + $0x100] sm:$0x3] %vm209_vm1, %v2437_v1  ;;  %243 = vst.msk [vmem:[#allocation2 + $0x118] sm:$0x3] %vm209_vm1, %v2437_v1 }
  0x28   : > { %246 = vst.msk [vmem:[#allocation2 + $0x130] sm:$0x3] %vm209_vm1, %v2437_v1  ;;  %249 = vst.msk [vmem:[#allocation2 + $0x148] sm:$0x3] %vm209_vm1, %v2437_v1 }
  0x29   : > { %252 = vst.msk [vmem:[#allocation2 + $0x160] sm:$0x3] %vm209_vm1, %v2437_v1  ;;  %255 = vst.msk [vmem:[#allocation2 + $0x178] sm:$0x3] %vm209_vm1, %v2437_v1  ;;  %v360_v9 = vld [vmem:[#allocation2 + $0x9] sm:$0xff] }
  0x2a   : > { %258 = vst.msk [vmem:[#allocation2 + $0x190] sm:$0x3] %vm209_vm1, %v2437_v1  ;;  %261 = vst.msk [vmem:[#allocation2 + $0x1a8] sm:$0x3] %vm209_vm1, %v2437_v1  ;;  %425 = vrot.lane.b32.xlu0 %v360_v9, %s2438_s20 }
  0x2b   : > { %263 = vst.msk [vmem:[#allocation2 + $0x19] sm:$0xff] %vm206_vm0, %v174_v2  ;;  %264 = vst.msk [vmem:[#allocation2 + $0x21] sm:$0xff] %vm206_vm0, %v175_v3 }
  0x2c   : > { %265 = vst.msk [vmem:[#allocation2 + $0x31] sm:$0xff] %vm206_vm0, %v176_v4  ;;  %266 = vst.msk [vmem:[#allocation2 + $0x39] sm:$0xff] %vm206_vm0, %v177_v5 }
  0x2d   : > { %267 = vst.msk [vmem:[#allocation2 + $0x49] sm:$0xff] %vm206_vm0, %v178_v6  ;;  %268 = vst.msk [vmem:[#allocation2 + $0x51] sm:$0xff] %vm206_vm0, %v179_v7 }
  0x2e   : > { %269 = vst.msk [vmem:[#allocation2 + $0x61] sm:$0xff] %vm206_vm0, %v180_v10  ;;  %270 = vst.msk [vmem:[#allocation2 + $0x69] sm:$0xff] %vm206_vm0, %v181_v11 }
  0x2f   : > { %271 = vst.msk [vmem:[#allocation2 + $0x79] sm:$0xff] %vm206_vm0, %v182_v12  ;;  %272 = vst.msk [vmem:[#allocation2 + $0x81] sm:$0xff] %vm206_vm0, %v183_v13 }
  0x30   : > { %273 = vst.msk [vmem:[#allocation2 + $0x91] sm:$0xff] %vm206_vm0, %v184_v14  ;;  %274 = vst.msk [vmem:[#allocation2 + $0x99] sm:$0xff] %vm206_vm0, %v185_v15 }
  0x31   : > { %275 = vst.msk [vmem:[#allocation2 + $0xa9] sm:$0xff] %vm206_vm0, %v186_v16  ;;  %276 = vst.msk [vmem:[#allocation2 + $0xb1] sm:$0xff] %vm206_vm0, %v187_v17 }
  0x32   : > { %277 = vst.msk [vmem:[#allocation2 + $0xc1] sm:$0xff] %vm206_vm0, %v188_v18  ;;  %278 = vst.msk [vmem:[#allocation2 + $0xc9] sm:$0xff] %vm206_vm0, %v189_v19  ;;  %v2594_v26 = vld [vmem:[#allocation2 + $0x19] sm:$0xff]  ;;  %v2603_v28 = vld [vmem:[#allocation2 + $0x21] sm:$0xff] }
  0x33   : > { %279 = vst.msk [vmem:[#allocation2 + $0xd9] sm:$0xff] %vm206_vm0, %v190_v20  ;;  %280 = vst.msk [vmem:[#allocation2 + $0xe1] sm:$0xff] %vm206_vm0, %v191_v21  ;;  %v2596_v27 = vld [vmem:[#allocation2 + $0x31] sm:$0xff]  ;;  %427 = vrot.lane.b32.xlu1 %v2594_v26, %s2438_s20  ;;  %v2615_v32 = vld [vmem:[#allocation2 + $0x39] sm:$0xff] }
  0x34   : > { %281 = vst.msk [vmem:[#allocation2 + $0xf1] sm:$0xff] %vm206_vm0, %v192_v22  ;;  %282 = vst.msk [vmem:[#allocation2 + $0xf9] sm:$0xff] %vm206_vm0, %v193_v23  ;;  %431 = vrot.lane.b32.xlu0 %v2596_v27, %s2438_s20  ;;  %v2611_v31 = vld [vmem:[#allocation2 + $0x49] sm:$0xff]  ;;  %v2630_v40 = vld [vmem:[#allocation2 + $0x51] sm:$0xff] }
  0x35   : > { %283 = vst.msk [vmem:[#allocation2 + $0x109] sm:$0xff] %vm206_vm0, %v194_v24  ;;  %284 = vst.msk [vmem:[#allocation2 + $0x111] sm:$0xff] %vm206_vm0, %v195_v25  ;;  %v367_v33 = vld [vmem:[#allocation2 + $0x61] sm:$0xff]  ;;  %v368_v42 = vld [vmem:[#allocation2 + $0x69] sm:$0xff] }
  0x36   : > { %285 = vst.msk [vmem:[#allocation2 + $0x121] sm:$0xff] %vm206_vm0, %v196_v29  ;;  %286 = vst.msk [vmem:[#allocation2 + $0x129] sm:$0xff] %vm206_vm0, %v197_v30  ;;  %v369_v41 = vld [vmem:[#allocation2 + $0x79] sm:$0xff]  ;;  %v370_v44 = vld [vmem:[#allocation2 + $0x81] sm:$0xff] }
  0x37   : > { %429 = vrot.lane.b32.xlu1 %v2603_v28, %s2438_s20  ;;  %287 = vst.msk [vmem:[#allocation2 + $0x139] sm:$0xff] %vm206_vm0, %v198_v34  ;;  %288 = vst.msk [vmem:[#allocation2 + $0x141] sm:$0xff] %vm206_vm0, %v199_v35  ;;  %v371_v43 = vld [vmem:[#allocation2 + $0x91] sm:$0xff]  ;;  %v372_v48 = vld [vmem:[#allocation2 + $0x99] sm:$0xff] }
  0x38   : > { %435 = vrot.lane.b32.xlu0 %v2611_v31, %s2438_s20  ;;  %289 = vst.msk [vmem:[#allocation2 + $0x151] sm:$0xff] %vm206_vm0, %v200_v36  ;;  %290 = vst.msk [vmem:[#allocation2 + $0x159] sm:$0xff] %vm206_vm0, %v201_v37  ;;  %v373_v45 = vld [vmem:[#allocation2 + $0xa9] sm:$0xff]  ;;  %v2642_v47 = vld [vmem:[#allocation2 + $0x18] sm:$0xff] }
  0x39   : > { %291 = vst.msk [vmem:[#allocation2 + $0x169] sm:$0xff] %vm206_vm0, %v202_v38  ;;  %292 = vst.msk [vmem:[#allocation2 + $0x171] sm:$0xff] %vm206_vm0, %v203_v39  ;;  %v2649_v50 = vld [vmem:[#allocation2 + $0x20] sm:$0xff]  ;;  %v2653_v52 = vld [vmem:[#allocation2 + $0x30] sm:$0xff] }
  0x3a   : > { %327 = vst.msk [vmem:[#allocation3] sm:$0xff] %vm206_vm0, %v295_v46  ;;  %329 = vst.msk [vmem:[#allocation3 + $0x10] sm:$0xff] %vm206_vm0, %v2642_v47  ;;  %v375_v51 = vld [vmem:[#allocation2 + $0xc1] sm:$0xff]  ;;  %v2655_v53 = vld [vmem:[#allocation2 + $0x38] sm:$0xff] }
  0x3b   : > { %433 = vrot.lane.b32.xlu1 %v2615_v32, %s2438_s20  ;;  %328 = vst.msk [vmem:[#allocation3 + $0x8] sm:$0xff] %vm206_vm0, %v296_v49  ;;  %330 = vst.msk [vmem:[#allocation3 + $0x18] sm:$0xff] %vm206_vm0, %v2649_v50  ;;  %v374_v54 = vld [vmem:[#allocation2 + $0xb1] sm:$0xff]  ;;  %v2662_v55 = vld [vmem:[#allocation2 + $0x48] sm:$0xff] }
  0x3c   : > { %439 = vrot.lane.b32.xlu0 %v367_v33, %s2438_s20  ;;  %331 = vst.msk [vmem:[#allocation3 + $0x20] sm:$0xff] %vm206_vm0, %v2653_v52  ;;  %332 = vst.msk [vmem:[#allocation3 + $0x28] sm:$0xff] %vm206_vm0, %v2655_v53  ;;  %v2664_v56 = vld [vmem:[#allocation2 + $0x50] sm:$0xff]  ;;  %v2666_v57 = vld [vmem:[#allocation2 + $0xd9] sm:$0xff] }
  0x3d   : > { %333 = vst.msk [vmem:[#allocation3 + $0x30] sm:$0xff] %vm206_vm0, %v2662_v55  ;;  %334 = vst.msk [vmem:[#allocation3 + $0x38] sm:$0xff] %vm206_vm0, %v2664_v56  ;;  %v2672_v58 = vld [vmem:[#allocation2 + $0x60] sm:$0xff]  ;;  %v2674_v59 = vld [vmem:[#allocation2 + $0x68] sm:$0xff] }
  0x3e   : > { %v2676_v60 = vld [vmem:[#allocation2 + $0x78] sm:$0xff]  ;;  %335 = vst.msk [vmem:[#allocation3 + $0x40] sm:$0xff] %vm206_vm0, %v2672_v58  ;;  %336 = vst.msk [vmem:[#allocation3 + $0x48] sm:$0xff] %vm206_vm0, %v2674_v59  ;;  %v2685_v61 = vld [vmem:[#allocation2 + $0x80] sm:$0xff] }
  0x3f   : > { %437 = vrot.lane.b32.xlu1 %v2630_v40, %s2438_s20  ;;  %337 = vst.msk [vmem:[#allocation3 + $0x50] sm:$0xff] %vm206_vm0, %v2676_v60  ;;  %v2687_v62 = vld [vmem:[#allocation2 + $0x90] sm:$0xff]  ;;  %v2689_v63 = vld [vmem:[#allocation2 + $0x98] sm:$0xff]  ;;  %338 = vst.msk [vmem:[#allocation3 + $0x58] sm:$0xff] %vm206_vm0, %v2685_v61 }
  0x40   : > { %443 = vrot.lane.b32.xlu0 %v369_v41, %s2438_s20  ;;  %v376_v0 = vld [vmem:[#allocation2 + $0xc9] sm:$0xff]  ;;  %339 = vst.msk [vmem:[#allocation3 + $0x60] sm:$0xff] %vm206_vm0, %v2687_v62  ;;  %340 = vst.msk [vmem:[#allocation3 + $0x68] sm:$0xff] %vm206_vm0, %v2689_v63  ;;  %v2701_v3 = vld [vmem:[#allocation2 + $0xc0] sm:$0xff] }
  0x41   : > { %v2697_v1 = vld [vmem:[#allocation2 + $0xa8] sm:$0xff]  ;;  %v2699_v2 = vld [vmem:[#allocation2 + $0xb0] sm:$0xff]  ;;  %343 = vst.msk [vmem:[#allocation3 + $0x80] sm:$0xff] %vm206_vm0, %v2701_v3  ;;  %v2712_v5 = vld [vmem:[#allocation2 + $0xd8] sm:$0xff] }
  0x42   : > { %341 = vst.msk [vmem:[#allocation3 + $0x70] sm:$0xff] %vm206_vm0, %v2697_v1  ;;  %342 = vst.msk [vmem:[#allocation3 + $0x78] sm:$0xff] %vm206_vm0, %v2699_v2  ;;  %v2710_v4 = vld [vmem:[#allocation2 + $0xc8] sm:$0xff]  ;;  %v2714_v6 = vld [vmem:[#allocation2 + $0xe0] sm:$0xff] }
  0x43   : > { %441 = vrot.lane.b32.xlu1 %v368_v42, %s2438_s20  ;;  %344 = vst.msk [vmem:[#allocation3 + $0x88] sm:$0xff] %vm206_vm0, %v2710_v4  ;;  %345 = vst.msk [vmem:[#allocation3 + $0x90] sm:$0xff] %vm206_vm0, %v2712_v5  ;;  %v2722_v7 = vld [vmem:[#allocation2 + $0xf0] sm:$0xff]  ;;  %v2724_v8 = vld [vmem:[#allocation2 + $0xf8] sm:$0xff] }
  0x44   : > { %447 = vrot.lane.b32.xlu0 %v371_v43, %s2438_s20  ;;  %346 = vst.msk [vmem:[#allocation3 + $0x98] sm:$0xff] %vm206_vm0, %v2714_v6  ;;  %v2726_v9 = vld [vmem:[#allocation2 + $0x108] sm:$0xff]  ;;  %347 = vst.msk [vmem:[#allocation3 + $0xa0] sm:$0xff] %vm206_vm0, %v2722_v7  ;;  %v2736_v10 = vld [vmem:[#allocation2 + $0x110] sm:$0xff] }
  0x45   : > { %348 = vst.msk [vmem:[#allocation3 + $0xa8] sm:$0xff] %vm206_vm0, %v2724_v8  ;;  %349 = vst.msk [vmem:[#allocation3 + $0xb0] sm:$0xff] %vm206_vm0, %v2726_v9  ;;  %v2738_v11 = vld [vmem:[#allocation2 + $0xf1] sm:$0xff]  ;;  %v2743_v12 = vld [vmem:[#allocation2 + $0x120] sm:$0xff] }
  0x46   : > { %350 = vst.msk [vmem:[#allocation3 + $0xb8] sm:$0xff] %vm206_vm0, %v2736_v10  ;;  %v2745_v13 = vld [vmem:[#allocation2 + $0x128] sm:$0xff]  ;;  %351 = vst.msk [vmem:[#allocation3 + $0xc0] sm:$0xff] %vm206_vm0, %v2743_v12  ;;  %v2759_v16 = vld [vmem:[#allocation2 + $0x138] sm:$0xff] }
  0x47   : > { %445 = vrot.lane.b32.xlu1 %v370_v44, %s2438_s20  ;;  %v2747_v14 = vld [vmem:[#allocation2 + $0xe1] sm:$0xff]  ;;  %352 = vst.msk [vmem:[#allocation3 + $0xc8] sm:$0xff] %vm206_vm0, %v2745_v13  ;;  %v2755_v15 = vld [vmem:[#allocation2 + $0x109] sm:$0xff]  ;;  %v2763_v18 = vld [vmem:[#allocation2 + $0xf9] sm:$0xff] }
  0x48   : > { %451 = vrot.lane.b32.xlu0 %v373_v45, %s2438_s20  ;;  %v2761_v17 = vld [vmem:[#allocation2 + $0x140] sm:$0xff]  ;;  %353 = vst.msk [vmem:[#allocation3 + $0xd0] sm:$0xff] %vm206_vm0, %v2759_v16  ;;  %v2775_v20 = vld [vmem:[#allocation2 + $0x150] sm:$0xff]  ;;  %v2777_v21 = vld [vmem:[#allocation2 + $0x158] sm:$0xff] }
  0x49   : > { %354 = vst.msk [vmem:[#allocation3 + $0xd8] sm:$0xff] %vm206_vm0, %v2761_v17  ;;  %v2771_v19 = vld [vmem:[#allocation2 + $0x121] sm:$0xff]  ;;  %v2779_v22 = vld [vmem:[#allocation2 + $0x111] sm:$0xff]  ;;  %355 = vst.msk [vmem:[#allocation3 + $0xe0] sm:$0xff] %vm206_vm0, %v2775_v20 }
  0x4a   : > { %356 = vst.msk [vmem:[#allocation3 + $0xe8] sm:$0xff] %vm206_vm0, %v2777_v21  ;;  %v385_v23 = vld [vmem:[#allocation2 + $0x139] sm:$0xff]  ;;  %v2789_v24 = vld [vmem:[#allocation2 + $0x168] sm:$0xff]  ;;  %v2791_v25 = vld [vmem:[#allocation2 + $0x170] sm:$0xff] }
  0x4b   : > { %449 = vrot.lane.b32.xlu1 %v372_v48, %s2438_s20  ;;  %v2793_v29 = vld [vmem:[#allocation2 + $0x129] sm:$0xff]  ;;  %357 = vst.msk [vmem:[#allocation3 + $0xf0] sm:$0xff] %vm206_vm0, %v2789_v24  ;;  %358 = vst.msk [vmem:[#allocation3 + $0xf8] sm:$0xff] %vm206_vm0, %v2791_v25  ;;  %v387_v30 = vld [vmem:[#allocation2 + $0x151] sm:$0xff] }
  0x4c   : > { %455 = vrot.lane.b32.xlu0 %v375_v51, %s2438_s20  ;;  %3652 = vst [vmem:[#allocation5_spill] sm:$0xff] %v2793_v29  ;;  %v386_v33 = vld [vmem:[#allocation2 + $0x141] sm:$0xff]  ;;  %v389_v34 = vld [vmem:[#allocation2 + $0x169] sm:$0xff]  ;;  %v205_v36 = vld [vmem:[%s2549_s19 + $0xf8] sm:$0xff] }
  0x4d   : > { %v204_v35 = vld [vmem:[%s2549_s19 + $0xf0] sm:$0xff]  ;;  %294 = vst.msk [vmem:[#allocation2 + $0x189] sm:$0xff] %vm206_vm0, %v205_v36  ;;  %v388_v37 = vld [vmem:[#allocation2 + $0x159] sm:$0xff]  ;;  %v552_v38 = vld [vmem:[#allocation2 + $0x2] sm:$0xff] }
  0x4e   : > { %293 = vst.msk [vmem:[#allocation2 + $0x181] sm:$0xff] %vm206_vm0, %v204_v35  ;;  %v390_v39 = vld [vmem:[#allocation2 + $0x171] sm:$0xff]  ;;  %v2811_v41 = vld [vmem:[#allocation2 + $0x1a] sm:$0xff]  ;;  %v2819_v44 = vld [vmem:[#allocation2 + $0x22] sm:$0xff] }
  0x4f   : > { %453 = vrot.lane.b32.xlu1 %v374_v54, %s2438_s20  ;;  %v553_v42 = vld [vmem:[#allocation2 + $0xa] sm:$0xff]  ;;  %v2816_v43 = vld [vmem:[#allocation2 + $0x32] sm:$0xff]  ;;  %v2827_v46 = vld [vmem:[#allocation2 + $0x3a] sm:$0xff] }
  0x50   : > { %459 = vrot.lane.b32.xlu0 %v2666_v57, %s2438_s20  ;;  %v2823_v45 = vld [vmem:[#allocation2 + $0x4a] sm:$0xff]  ;;  %v2831_v48 = vld [vmem:[#allocation2 + $0x62] sm:$0xff]  ;;  %v2835_v49 = vld [vmem:[#allocation2 + $0x52] sm:$0xff] }
  0x51   : > { %3653 = vst [vmem:[#allocation6_spill] sm:$0xff] %v2831_v48  ;;  %v562_v51 = vld [vmem:[#allocation2 + $0x7a] sm:$0xff]  ;;  %v2841_v54 = vld [vmem:[#allocation2 + $0x6a] sm:$0xff]  ;;  %v567_v35 = vld [vmem:[#allocation2 + $0xb2] sm:$0xff] }
  0x52   : > { %3654 = vst [vmem:[#allocation7_spill] sm:$0xff] %v2841_v54  ;;  %v2851_v36 = vld [vmem:[#allocation2 + $0xda] sm:$0xff] }
  0x53   : > { %457 = vrot.lane.b32.xlu1 %v376_v0, %s2438_s20  ;;  %v564_v0 = vld [vmem:[#allocation2 + $0x92] sm:$0xff] }
  0x54   : > { %463 = vrot.lane.b32.xlu0 %v2738_v11, %s2438_s20 }
  0x57   : > { %461 = vrot.lane.b32.xlu1 %v2747_v14, %s2438_s20 }
  0x58   : > { %467 = vrot.lane.b32.xlu0 %v2755_v15, %s2438_s20 }
  0x5b   : > { %465 = vrot.lane.b32.xlu1 %v2763_v18, %s2438_s20 }
  0x5c   : > { %471 = vrot.lane.b32.xlu0 %v2771_v19, %s2438_s20 }
  0x5f   : > { %469 = vrot.lane.b32.xlu1 %v2779_v22, %s2438_s20 }
  0x60   : > { %475 = vrot.lane.b32.xlu0 %v385_v23, %s2438_s20  ;;  %v563_v23 = vld [vmem:[#allocation2 + $0x82] sm:$0xff] }
  0x63   : > { %473 = vrot.lane.b32.xlu1 %v2793_v29, %s2438_s20 }
  0x64   : > { %479 = vrot.lane.b32.xlu0 %v387_v30, %s2438_s20  ;;  %v566_v30 = vld [vmem:[#allocation2 + $0xaa] sm:$0xff] }
  0x67   : > { %477 = vrot.lane.b32.xlu1 %v386_v33, %s2438_s20  ;;  %v565_v33 = vld [vmem:[#allocation2 + $0x9a] sm:$0xff] }
  0x68   : > { %483 = vrot.lane.b32.xlu0 %v389_v34, %s2438_s20  ;;  %v568_v34 = vld [vmem:[#allocation2 + $0xc2] sm:$0xff] }
  0x6b   : > { %481 = vrot.lane.b32.xlu1 %v388_v37, %s2438_s20  ;;  %v569_v37 = vld [vmem:[#allocation2 + $0xca] sm:$0xff] }
  0x6c   : > { %616 = vrot.lane.b32.xlu0 %v552_v38, %s2439_s21  ;;  %v2856_v38 = vld [vmem:[#allocation2 + $0xf2] sm:$0xff] }
  0x6f   : > { %485 = vrot.lane.b32.xlu1 %v390_v39, %s2438_s20  ;;  %v2859_v39 = vld [vmem:[#allocation2 + $0xe2] sm:$0xff] }
  0x70   : > { %620 = vrot.lane.b32.xlu0 %v2811_v41, %s2439_s21 }
  0x73   : > { %618 = vrot.lane.b32.xlu1 %v553_v42, %s2439_s21  ;;  %v2863_v42 = vld [vmem:[#allocation2 + $0x10a] sm:$0xff] }
  0x74   : > { %624 = vrot.lane.b32.xlu0 %v2816_v43, %s2439_s21 }
  0x77   : > { %622 = vrot.lane.b32.xlu1 %v2819_v44, %s2439_s21 }
  0x78   : > { %628 = vrot.lane.b32.xlu0 %v2823_v45, %s2439_s21 }
  0x7b   : > { %626 = vrot.lane.b32.xlu1 %v2827_v46, %s2439_s21 }
  0x7c   : > { %632 = vrot.lane.b32.xlu0 %v2831_v48, %s2439_s21  ;;  %v582_v48 = vld [vmem:[#allocation2 + $0x16a] sm:$0xff] }
  0x7f   : > { %630 = vrot.lane.b32.xlu1 %v2835_v49, %s2439_s21 }
  0x80   : > { %636 = vrot.lane.b32.xlu0 %v562_v51, %s2439_s21  ;;  %v2867_v51 = vld [vmem:[#allocation2 + $0xfa] sm:$0xff] }
  0x83   : > { %634 = vrot.lane.b32.xlu1 %v2841_v54, %s2439_s21  ;;  %v579_v54 = vld [vmem:[#allocation2 + $0x142] sm:$0xff] }
  0x84   : > { %640 = vrot.lane.b32.xlu0 %v564_v0, %s2439_s21  ;;  %v2871_v0 = vld [vmem:[#allocation2 + $0x122] sm:$0xff] }
  0x85   : > { %3655 = vst [vmem:[#allocation8_spill] sm:$0xff] %v2871_v0 }
  0x87   : > { %638 = vrot.lane.b32.xlu1 %v563_v23, %s2439_s21  ;;  %v2875_v23 = vld [vmem:[#allocation2 + $0x112] sm:$0xff] }
  0x88   : > { %644 = vrot.lane.b32.xlu0 %v566_v30, %s2439_s21  ;;  %v578_v30 = vld [vmem:[#allocation2 + $0x13a] sm:$0xff] }
  0x8b   : > { %642 = vrot.lane.b32.xlu1 %v565_v33, %s2439_s21  ;;  %v424_v33 = vpop.permute.xlu0 %423 }
  0x8c   : > { %648 = vrot.lane.b32.xlu0 %v568_v34, %s2439_s21  ;;  %v2881_v34 = vld [vmem:[#allocation2 + $0x12a] sm:$0xff]  ;;  %520 = vst.msk [vmem:[#allocation3] sm:$0xff] %vm519_vm2, %v424_v33  ;;  %v581_v33 = vld [vmem:[#allocation2 + $0x15a] sm:$0xff] }
  0x8d   : > { %3656 = vst [vmem:[#allocation9_spill] sm:$0xff] %v2881_v34 }
  0x8f   : > { %646 = vrot.lane.b32.xlu1 %v567_v35, %s2439_s21  ;;  %v580_v35 = vld [vmem:[#allocation2 + $0x152] sm:$0xff] }
  0x90   : > { %652 = vrot.lane.b32.xlu0 %v2851_v36, %s2439_s21 }
  0x93   : > { %650 = vrot.lane.b32.xlu1 %v569_v37, %s2439_s21 }
  0x94   : > { %656 = vrot.lane.b32.xlu0 %v2856_v38, %s2439_s21 }
  0x97   : > { %654 = vrot.lane.b32.xlu1 %v2859_v39, %s2439_s21 }
  0x98   : > { %660 = vrot.lane.b32.xlu0 %v2863_v42, %s2439_s21 }
  0x9b   : > { %658 = vrot.lane.b32.xlu1 %v2867_v51, %s2439_s21 }
  0x9c   : > { %664 = vrot.lane.b32.xlu0 %v2871_v0, %s2439_s21  ;;  %v426_v37 = vpop.permute.xlu0 %425 }
  0x9d   : > { %521 = vst.msk [vmem:[#allocation3 + $0x8] sm:$0xff] %vm519_vm2, %v426_v37 }
  0x9f   : > { %662 = vrot.lane.b32.xlu1 %v2875_v23, %s2439_s21 }
  0xa0   : > { %668 = vrot.lane.b32.xlu0 %v578_v30, %s2439_s21 }
  0xa3   : > { %666 = vrot.lane.b32.xlu1 %v2881_v34, %s2439_s21  ;;  %v583_v34 = vld [vmem:[#allocation2 + $0x172] sm:$0xff] }
  0xa4   : > { %672 = vrot.lane.b32.xlu0 %v580_v35, %s2439_s21 }
  0xa5   : > { %v428_v0 = vpop.permute.xlu1 %427 }
  0xa6   : > { %522 = vst.msk [vmem:[#allocation3 + $0x10] sm:$0xff] %vm519_vm2, %v428_v0  ;;  %v432_v29 = vpop.permute.xlu0 %431 }
  0xa7   : > { %670 = vrot.lane.b32.xlu1 %v579_v54, %s2439_s21  ;;  %524 = vst.msk [vmem:[#allocation3 + $0x20] sm:$0xff] %vm519_vm2, %v432_v29 }
  0xa8   : > { %676 = vrot.lane.b32.xlu0 %v582_v48, %s2439_s21 }
  0xa9   : > { %v430_v30 = vpop.permute.xlu1 %429 }
  0xaa   : > { %523 = vst.msk [vmem:[#allocation3 + $0x18] sm:$0xff] %vm519_vm2, %v430_v30  ;;  %v436_v37 = vpop.permute.xlu0 %435 }
  0xab   : > { %674 = vrot.lane.b32.xlu1 %v581_v33, %s2439_s21  ;;  %526 = vst.msk [vmem:[#allocation3 + $0x30] sm:$0xff] %vm519_vm2, %v436_v37 }
  0xac   : > { %809 = vrot.lane.b32.xlu0 %v2642_v47, %s2440_s22 }
  0xad   : > { %v434_v35 = vpop.permute.xlu1 %433 }
  0xae   : > { %525 = vst.msk [vmem:[#allocation3 + $0x28] sm:$0xff] %vm519_vm2, %v434_v35  ;;  %v440_v29 = vpop.permute.xlu0 %439 }
  0xaf   : > { %678 = vrot.lane.b32.xlu1 %v583_v34, %s2439_s21  ;;  %528 = vst.msk [vmem:[#allocation3 + $0x40] sm:$0xff] %vm519_vm2, %v440_v29 }
  0xb0   : > { %813 = vrot.lane.b32.xlu0 %v2653_v52, %s2440_s22 }
  0xb1   : > { %v438_v48 = vpop.permute.xlu1 %437 }
  0xb2   : > { %527 = vst.msk [vmem:[#allocation3 + $0x38] sm:$0xff] %vm519_vm2, %v438_v48  ;;  %v444_v54 = vpop.permute.xlu0 %443 }
  0xb3   : > { %811 = vrot.lane.b32.xlu1 %v2649_v50, %s2440_s22  ;;  %530 = vst.msk [vmem:[#allocation3 + $0x50] sm:$0xff] %vm519_vm2, %v444_v54 }
  0xb4   : > { %817 = vrot.lane.b32.xlu0 %v2662_v55, %s2440_s22 }
  0xb5   : > { %v442_v47 = vpop.permute.xlu1 %441 }
  0xb6   : > { %529 = vst.msk [vmem:[#allocation3 + $0x48] sm:$0xff] %vm519_vm2, %v442_v47  ;;  %v448_v0 = vpop.permute.xlu0 %447 }
  0xb7   : > { %815 = vrot.lane.b32.xlu1 %v2655_v53, %s2440_s22  ;;  %532 = vst.msk [vmem:[#allocation3 + $0x60] sm:$0xff] %vm519_vm2, %v448_v0 }
  0xb8   : > { %821 = vrot.lane.b32.xlu0 %v2672_v58, %s2440_s22 }
  0xb9   : > { %v446_v34 = vpop.permute.xlu1 %445 }
  0xba   : > { %531 = vst.msk [vmem:[#allocation3 + $0x58] sm:$0xff] %vm519_vm2, %v446_v34  ;;  %v452_v50 = vpop.permute.xlu0 %451 }
  0xbb   : > { %819 = vrot.lane.b32.xlu1 %v2664_v56, %s2440_s22  ;;  %534 = vst.msk [vmem:[#allocation3 + $0x70] sm:$0xff] %vm519_vm2, %v452_v50 }
  0xbc   : > { %825 = vrot.lane.b32.xlu0 %v2676_v60, %s2440_s22 }
  0xbd   : > { %v450_v33 = vpop.permute.xlu1 %449 }
  0xbe   : > { %533 = vst.msk [vmem:[#allocation3 + $0x68] sm:$0xff] %vm519_vm2, %v450_v33  ;;  %v456_v30 = vpop.permute.xlu0 %455 }
  0xbf   : > { %823 = vrot.lane.b32.xlu1 %v2674_v59, %s2440_s22  ;;  %536 = vst.msk [vmem:[#allocation3 + $0x80] sm:$0xff] %vm519_vm2, %v456_v30 }
  0xc0   : > { %829 = vrot.lane.b32.xlu0 %v2687_v62, %s2440_s22 }
  0xc1   : > { %v454_v37 = vpop.permute.xlu1 %453 }
  0xc2   : > { %535 = vst.msk [vmem:[#allocation3 + $0x78] sm:$0xff] %vm519_vm2, %v454_v37  ;;  %v460_v35 = vpop.permute.xlu0 %459  ;;  %v775_v37 = vld [vmem:[#allocation2 + $0x180] sm:$0xff] }
  0xc3   : > { %827 = vrot.lane.b32.xlu1 %v2685_v61, %s2440_s22  ;;  %538 = vst.msk [vmem:[#allocation3 + $0x90] sm:$0xff] %vm519_vm2, %v460_v35 }
  0xc4   : > { %833 = vrot.lane.b32.xlu0 %v2697_v1, %s2440_s22 }
  0xc5   : > { %v458_v29 = vpop.permute.xlu1 %457 }
  0xc6   : > { %537 = vst.msk [vmem:[#allocation3 + $0x88] sm:$0xff] %vm519_vm2, %v458_v29  ;;  %v464_v48 = vpop.permute.xlu0 %463 }
  0xc7   : > { %831 = vrot.lane.b32.xlu1 %v2689_v63, %s2440_s22  ;;  %540 = vst.msk [vmem:[#allocation3 + $0xa0] sm:$0xff] %vm519_vm2, %v464_v48 }
  0xc8   : > { %837 = vrot.lane.b32.xlu0 %v2701_v3, %s2440_s22 }
  0xc9   : > { %v462_v62 = vpop.permute.xlu1 %461 }
  0xca   : > { %539 = vst.msk [vmem:[#allocation3 + $0x98] sm:$0xff] %vm519_vm2, %v462_v62  ;;  %v468_v54 = vpop.permute.xlu0 %467  ;;  %v776_v62 = vld [vmem:[#allocation2 + $0x188] sm:$0xff] }
  0xcb   : > { %835 = vrot.lane.b32.xlu1 %v2699_v2, %s2440_s22  ;;  %542 = vst.msk [vmem:[#allocation3 + $0xb0] sm:$0xff] %vm519_vm2, %v468_v54 }
  0xcc   : > { %841 = vrot.lane.b32.xlu0 %v2712_v5, %s2440_s22 }
  0xcd   : > { %v466_v1 = vpop.permute.xlu1 %465 }
  0xce   : > { %541 = vst.msk [vmem:[#allocation3 + $0xa8] sm:$0xff] %vm519_vm2, %v466_v1  ;;  %v472_v63 = vpop.permute.xlu0 %471 }
  0xcf   : > { %839 = vrot.lane.b32.xlu1 %v2710_v4, %s2440_s22  ;;  %544 = vst.msk [vmem:[#allocation3 + $0xc0] sm:$0xff] %vm519_vm2, %v472_v63 }
  0xd0   : > { %845 = vrot.lane.b32.xlu0 %v2722_v7, %s2440_s22 }
  0xd1   : > { %v470_v3 = vpop.permute.xlu1 %469 }
  0xd2   : > { %543 = vst.msk [vmem:[#allocation3 + $0xb8] sm:$0xff] %vm519_vm2, %v470_v3  ;;  %v476_v2 = vpop.permute.xlu0 %475 }
  0xd3   : > { %843 = vrot.lane.b32.xlu1 %v2714_v6, %s2440_s22  ;;  %546 = vst.msk [vmem:[#allocation3 + $0xd0] sm:$0xff] %vm519_vm2, %v476_v2 }
  0xd4   : > { %849 = vrot.lane.b32.xlu0 %v2726_v9, %s2440_s22 }
  0xd5   : > { %v474_v5 = vpop.permute.xlu1 %473 }
  0xd6   : > { %545 = vst.msk [vmem:[#allocation3 + $0xc8] sm:$0xff] %vm519_vm2, %v474_v5  ;;  %v480_v4 = vpop.permute.xlu0 %479 }
  0xd7   : > { %847 = vrot.lane.b32.xlu1 %v2724_v8, %s2440_s22  ;;  %548 = vst.msk [vmem:[#allocation3 + $0xe0] sm:$0xff] %vm519_vm2, %v480_v4 }
  0xd8   : > { %853 = vrot.lane.b32.xlu0 %v2743_v12, %s2440_s22 }
  0xd9   : > { %v478_v47 = vpop.permute.xlu1 %477 }
  0xda   : > { %547 = vst.msk [vmem:[#allocation3 + $0xd8] sm:$0xff] %vm519_vm2, %v478_v47  ;;  %v484_v6 = vpop.permute.xlu0 %483 }
  0xdb   : > { %851 = vrot.lane.b32.xlu1 %v2736_v10, %s2440_s22  ;;  %550 = vst.msk [vmem:[#allocation3 + $0xf0] sm:$0xff] %vm519_vm2, %v484_v6 }
  0xdc   : > { %857 = vrot.lane.b32.xlu0 %v2759_v16, %s2440_s22 }
  0xdd   : > { %v482_v0 = vpop.permute.xlu1 %481 }
  0xde   : > { %549 = vst.msk [vmem:[#allocation3 + $0xe8] sm:$0xff] %vm519_vm2, %v482_v0  ;;  %v617_v34 = vpop.permute.xlu0 %616 }
  0xdf   : > { %855 = vrot.lane.b32.xlu1 %v2745_v13, %s2440_s22  ;;  %713 = vst.msk [vmem:[#allocation3] sm:$0xff] %vm712_vm3, %v617_v34 }
  0xe0   : > { %861 = vrot.lane.b32.xlu0 %v2775_v20, %s2440_s22 }
  0xe1   : > { %v486_v50 = vpop.permute.xlu1 %485 }
  0xe2   : > { %551 = vst.msk [vmem:[#allocation3 + $0xf8] sm:$0xff] %vm519_vm2, %v486_v50  ;;  %v621_v33 = vpop.permute.xlu0 %620 }
  0xe3   : > { %859 = vrot.lane.b32.xlu1 %v2761_v17, %s2440_s22  ;;  %715 = vst.msk [vmem:[#allocation3 + $0x10] sm:$0xff] %vm712_vm3, %v621_v33 }
  0xe4   : > { %865 = vrot.lane.b32.xlu0 %v2789_v24, %s2440_s22 }
  0xe5   : > { %v619_v30 = vpop.permute.xlu1 %618 }
  0xe6   : > { %714 = vst.msk [vmem:[#allocation3 + $0x8] sm:$0xff] %vm712_vm3, %v619_v30  ;;  %v625_v35 = vpop.permute.xlu0 %624  ;;  %v2427_v30 = vld [vmem:[%s3643_s1 + $0x18] sm:$0xff]  }
  0xe7   : > { %863 = vrot.lane.b32.xlu1 %v2777_v21, %s2440_s22  ;;  %717 = vst.msk [vmem:[#allocation3 + $0x20] sm:$0xff] %vm712_vm3, %v625_v35 }
  0xe8   : > { %869 = vrot.lane.b32.xlu0 %v775_v37, %s2440_s22 }
  0xe9   : > { %v623_v29 = vpop.permute.xlu1 %622 }
  0xea   : > { %716 = vst.msk [vmem:[#allocation3 + $0x18] sm:$0xff] %vm712_vm3, %v623_v29  ;;  %v629_v48 = vpop.permute.xlu0 %628 }
  0xeb   : > { %867 = vrot.lane.b32.xlu1 %v2791_v25, %s2440_s22  ;;  %719 = vst.msk [vmem:[#allocation3 + $0x30] sm:$0xff] %vm712_vm3, %v629_v48 }
  0xec   : > { %1002 = vrot.lane.b32.xlu0 %v2594_v26, %s2441_s23 }
  0xed   : > { %v627_v24 = vpop.permute.xlu1 %626 }
  0xee   : > { %718 = vst.msk [vmem:[#allocation3 + $0x28] sm:$0xff] %vm712_vm3, %v627_v24  ;;  %v633_v54 = vpop.permute.xlu0 %632 }
  0xef   : > { %871 = vrot.lane.b32.xlu1 %v776_v62, %s2440_s22  ;;  %721 = vst.msk [vmem:[#allocation3 + $0x40] sm:$0xff] %vm712_vm3, %v633_v54  ;;  %v942_v62 = vld [vmem:[#allocation2 + $0x49] sm:$0xff] }
  0xf0   : > { %1006 = vrot.lane.b32.xlu0 %v2596_v27, %s2441_s23 }
  0xf1   : > { %v631_v1 = vpop.permute.xlu1 %630 }
  0xf2   : > { %720 = vst.msk [vmem:[#allocation3 + $0x38] sm:$0xff] %vm712_vm3, %v631_v1  ;;  %v637_v25 = vpop.permute.xlu0 %636  ;;  %v943_v1 = vld [vmem:[#allocation2 + $0x51] sm:$0xff] }
  0xf3   : > { %1004 = vrot.lane.b32.xlu1 %v2603_v28, %s2441_s23  ;;  %723 = vst.msk [vmem:[#allocation3 + $0x50] sm:$0xff] %vm712_vm3, %v637_v25 }
  0xf4   : > { %1036 = vrot.lane.b32.xlu0 %v2747_v14, %s2441_s23 }
  0xf5   : > { %v635_v26 = vpop.permute.xlu1 %634 }
  0xf6   : > { %722 = vst.msk [vmem:[#allocation3 + $0x48] sm:$0xff] %vm712_vm3, %v635_v26  ;;  %v641_v63 = vpop.permute.xlu0 %640  ;;  %v3132_v26 = vld [vmem:[#allocation2 + $0x61] sm:$0xff] }
  0xf7   : > { %1034 = vrot.lane.b32.xlu1 %v2666_v57, %s2441_s23  ;;  %725 = vst.msk [vmem:[#allocation3 + $0x60] sm:$0xff] %vm712_vm3, %v641_v63 }
  0xf8   : > { %1038 = vrot.lane.b32.xlu0 %v2738_v11, %s2441_s23 }
  0xf9   : > { %v639_v3 = vpop.permute.xlu1 %638 }
  0xfa   : > { %724 = vst.msk [vmem:[#allocation3 + $0x58] sm:$0xff] %vm712_vm3, %v639_v3  ;;  %v645_v28 = vpop.permute.xlu0 %644 }
  0xfb   : > { %1008 = vrot.lane.b32.xlu1 %v2615_v32, %s2441_s23  ;;  %727 = vst.msk [vmem:[#allocation3 + $0x70] sm:$0xff] %vm712_vm3, %v645_v28 }
  0xfc   : > { %1195 = vrot.lane.b32.xlu0 %v2811_v41, %s2442_s24 }
  0xfd   : > { %v643_v14 = vpop.permute.xlu1 %642 }
  0xfe   : > { %726 = vst.msk [vmem:[#allocation3 + $0x68] sm:$0xff] %vm712_vm3, %v643_v14  ;;  %v649_v57 = vpop.permute.xlu0 %648 }
  0xff   : > { %1040 = vrot.lane.b32.xlu1 %v2763_v18, %s2441_s23  ;;  %729 = vst.msk [vmem:[#allocation3 + $0x80] sm:$0xff] %vm712_vm3, %v649_v57 }
 0x100   : > { %1227 = vrot.lane.b32.xlu0 %v2851_v36, %s2442_s24 }
 0x101   : > { %v647_v2 = vpop.permute.xlu1 %646 }
 0x102   : > { %728 = vst.msk [vmem:[#allocation3 + $0x78] sm:$0xff] %vm712_vm3, %v647_v2  ;;  %v653_v5 = vpop.permute.xlu0 %652 }
 0x103   : > { %1197 = vrot.lane.b32.xlu1 %v2819_v44, %s2442_s24  ;;  %731 = vst.msk [vmem:[#allocation3 + $0x90] sm:$0xff] %vm712_vm3, %v653_v5 }
 0x104   : > { %1199 = vrot.lane.b32.xlu0 %v2816_v43, %s2442_s24 }
 0x105   : > { %v651_v41 = vpop.permute.xlu1 %650 }
 0x106   : > { %730 = vst.msk [vmem:[#allocation3 + $0x88] sm:$0xff] %vm712_vm3, %v651_v41  ;;  %v657_v4 = vpop.permute.xlu0 %656 }
 0x107   : > { %1229 = vrot.lane.b32.xlu1 %v2859_v39, %s2442_s24  ;;  %733 = vst.msk [vmem:[#allocation3 + $0xa0] sm:$0xff] %vm712_vm3, %v657_v4  ;;  %v3658_v4 = vld [vmem:[#allocation6_spill] sm:$0xff] }
 0x108   : > { %1231 = vrot.lane.b32.xlu0 %v2856_v38, %s2442_s24 }
 0x109   : > { %v655_v36 = vpop.permute.xlu1 %654 }
 0x10a   : > { %732 = vst.msk [vmem:[#allocation3 + $0x98] sm:$0xff] %vm712_vm3, %v655_v36  ;;  %v661_v44 = vpop.permute.xlu0 %660 }
 0x10b   : > { %1201 = vrot.lane.b32.xlu1 %v2827_v46, %s2442_s24  ;;  %735 = vst.msk [vmem:[#allocation3 + $0xb0] sm:$0xff] %vm712_vm3, %v661_v44  ;;  %v3659_v44 = vld [vmem:[#allocation8_spill] sm:$0xff] }
 0x10c   : > { %1389 = vrot.lane.b32.xlu0 %v2653_v52, %s2443_s25 }
 0x10d   : > { %v659_v47 = vpop.permute.xlu1 %658 }
 0x10e   : > { %734 = vst.msk [vmem:[#allocation3 + $0xa8] sm:$0xff] %vm712_vm3, %v659_v47  ;;  %v665_v39 = vpop.permute.xlu0 %664 }
 0x10f   : > { %1233 = vrot.lane.b32.xlu1 %v2867_v51, %s2442_s24  ;;  %737 = vst.msk [vmem:[#allocation3 + $0xc0] sm:$0xff] %vm712_vm3, %v665_v39 }
 0x110   : > { %1421 = vrot.lane.b32.xlu0 %v2722_v7, %s2443_s25 }
 0x111   : > { %v663_v6 = vpop.permute.xlu1 %662 }
 0x112   : > { %736 = vst.msk [vmem:[#allocation3 + $0xb8] sm:$0xff] %vm712_vm3, %v663_v6  ;;  %v669_v0 = vpop.permute.xlu0 %668 }
 0x113   : > { %1391 = vrot.lane.b32.xlu1 %v2655_v53, %s2443_s25  ;;  %739 = vst.msk [vmem:[#allocation3 + $0xd0] sm:$0xff] %vm712_vm3, %v669_v0 }
 0x114   : > { %1393 = vrot.lane.b32.xlu0 %v2662_v55, %s2443_s25 }
 0x115   : > { %v667_v52 = vpop.permute.xlu1 %666 }
 0x116   : > { %738 = vst.msk [vmem:[#allocation3 + $0xc8] sm:$0xff] %vm712_vm3, %v667_v52  ;;  %v673_v34 = vpop.permute.xlu0 %672 }
 0x117   : > { %1423 = vrot.lane.b32.xlu1 %v2724_v8, %s2443_s25  ;;  %741 = vst.msk [vmem:[#allocation3 + $0xe0] sm:$0xff] %vm712_vm3, %v673_v34 }
 0x118   : > { %1425 = vrot.lane.b32.xlu0 %v2726_v9, %s2443_s25 }
 0x119   : > { %v671_v7 = vpop.permute.xlu1 %670 }
 0x11a   : > { %740 = vst.msk [vmem:[#allocation3 + $0xd8] sm:$0xff] %vm712_vm3, %v671_v7  ;;  %v677_v53 = vpop.permute.xlu0 %676 }
 0x11b   : > { %1395 = vrot.lane.b32.xlu1 %v2664_v56, %s2443_s25  ;;  %743 = vst.msk [vmem:[#allocation3 + $0xf0] sm:$0xff] %vm712_vm3, %v677_v53  ;;  %v2424_v56 = vld [vmem:[%s3643_s1] sm:$0xff]  }
 0x11c   : > { %1582 = vrot.lane.b32.xlu0 %v2596_v27, %s2444_s26  ;;  %2353 = vmatprep.subr.bf16.mxu0 %v2424_v56 }
 0x11d   : > { %v675_v55 = vpop.permute.xlu1 %674  ;;  %2395 = vmatprep.subr.bf16.mxu1 %v2424_v56  ;;  %2354 = vmatpush3.bf16.msra.mxu0 %v2424_v56 }
 0x11e   : > { %742 = vst.msk [vmem:[#allocation3 + $0xe8] sm:$0xff] %vm712_vm3, %v675_v55  ;;  %v810_v8 = vpop.permute.xlu0 %809  ;;  %2400 = vmatpush3.bf16.msra.mxu1 %v2424_v56  ;;  %v1539_v55 = vld [vmem:[#allocation2 + $0x129] sm:$0xff]  ;;  %v1525_v56 = vld [vmem:[#allocation2 + $0x81] sm:$0xff] }
 0x11f   : > { %1427 = vrot.lane.b32.xlu1 %v2736_v10, %s2443_s25  ;;  %906 = vst.msk [vmem:[#allocation3] sm:$0xff] %vm905_vm4, %v810_v8 }
 0x120   : > { %1614 = vrot.lane.b32.xlu0 %v2738_v11, %s2444_s26  ;;  %v2425_v11 = vld [vmem:[%s3643_s1 + $0x8] sm:$0xff]  }
 0x121   : > { %v679_v9 = vpop.permute.xlu1 %678  ;;  %2355 = vmatprep.subr.bf16.mxu0 %v2425_v11  ;;  %2396 = vmatprep.subr.bf16.mxu1 %v2425_v11 }
 0x122   : > { %744 = vst.msk [vmem:[#allocation3 + $0xf8] sm:$0xff] %vm712_vm3, %v679_v9  ;;  %v814_v27 = vpop.permute.xlu0 %813  ;;  %2356 = vmatpush3.bf16.msra.mxu0 %v2425_v11  ;;  %2401 = vmatpush3.bf16.msra.mxu1 %v2425_v11 }
 0x123   : > { %1584 = vrot.lane.b32.xlu1 %v2615_v32, %s2444_s26  ;;  %908 = vst.msk [vmem:[#allocation3 + $0x10] sm:$0xff] %vm905_vm4, %v814_v27 }
 0x124   : > { %1586 = vrot.lane.b32.xlu0 %v2611_v31, %s2444_s26  ;;  %v2426_v31 = vld [vmem:[%s3643_s1 + $0x10] sm:$0xff]  }
 0x125   : > { %v812_v10 = vpop.permute.xlu1 %811  ;;  %2357 = vmatprep.subr.bf16.mxu0 %v2426_v31  ;;  %2397 = vmatprep.subr.bf16.mxu1 %v2426_v31 }
 0x126   : > { %907 = vst.msk [vmem:[#allocation3 + $0x8] sm:$0xff] %vm905_vm4, %v812_v10  ;;  %v818_v32 = vpop.permute.xlu0 %817  ;;  %2358 = vmatpush3.bf16.msra.mxu0 %v2426_v31  ;;  %2402 = vmatpush3.bf16.msra.mxu1 %v2426_v31  ;;  %v1715_v10 = vld [vmem:[#allocation2 + $0x62] sm:$0xff] }
 0x127   : > { %1616 = vrot.lane.b32.xlu1 %v2763_v18, %s2444_s26  ;;  %910 = vst.msk [vmem:[#allocation3 + $0x20] sm:$0xff] %vm905_vm4, %v818_v32  ;;  %2359 = vmatprep.subr.bf16.mxu0 %v2427_v30  ;;  %v1541_v32 = vld [vmem:[#allocation2 + $0x141] sm:$0xff] }
 0x128   : > { %1618 = vrot.lane.b32.xlu0 %v2755_v15, %s2444_s26  ;;  %2398 = vmatprep.subr.bf16.mxu1 %v2427_v30  ;;  %v1731_v31 = vld [vmem:[#allocation2 + $0x122] sm:$0xff] }
 0x129   : > { %v816_v50 = vpop.permute.xlu1 %815 }
 0x12a   : > { %909 = vst.msk [vmem:[#allocation3 + $0x18] sm:$0xff] %vm905_vm4, %v816_v50  ;;  %v822_v18 = vpop.permute.xlu0 %821  ;;  %2360 = vmatpush3.bf16.msra.mxu0 %v2427_v30  ;;  %2403 = vmatpush3.bf16.msra.mxu1 %v2427_v30 }
 0x12b   : > { %1588 = vrot.lane.b32.xlu1 %v2630_v40, %s2444_s26  ;;  %912 = vst.msk [vmem:[#allocation3 + $0x30] sm:$0xff] %vm905_vm4, %v822_v18 }
 0x12c   : > { %1775 = vrot.lane.b32.xlu0 %v2816_v43, %s2445_s6  ;;  %v2428_v43 = vld [vmem:[%s3643_s1 + $0x20] ss:$0 sps:$4 sm:$0xff]  }
 0x12d   : > { %v820_v33 = vpop.permute.xlu1 %819  ;;  %2405 = vmatprep.subr.msk.bf16.mxu0 %vm2044_vm5, %v2428_v43  ;;  %v2046_v29 = vsel %vm2044_vm5, %v2428_v43, 0  ;;  %2406 = vmatprep.subr.msk.bf16.mxu1 %vm2044_vm5, %v2428_v43  ;;  %v1732_v43 = vld [vmem:[#allocation2 + $0x12a] sm:$0xff] }
 0x12e   : > { %911 = vst.msk [vmem:[#allocation3 + $0x28] sm:$0xff] %vm905_vm4, %v820_v33  ;;  %v826_v40 = vpop.permute.xlu0 %825  ;;  %2362 = vmatpush3.bf16.msra.mxu0 %v2046_v29  ;;  %2404 = vmatpush3.bf16.msra.mxu1 %v2046_v29  ;;  %v1716_v33 = vld [vmem:[#allocation2 + $0x6a] sm:$0xff]  ;;  %v1733_v29 = vld [vmem:[#allocation2 + $0x13a] sm:$0xff] }
 0x12f   : > { %1620 = vrot.lane.b32.xlu1 %v2779_v22, %s2444_s26  ;;  %914 = vst.msk [vmem:[#allocation3 + $0x40] sm:$0xff] %vm905_vm4, %v826_v40  ;;  %v1717_v40 = vld [vmem:[#allocation2 + $0x7a] sm:$0xff] }
 0x130   : > { %1807 = vrot.lane.b32.xlu0 %v2856_v38, %s2445_s6 }
 0x131   : > { %v824_v37 = vpop.permute.xlu1 %823 }
 0x132   : > { %913 = vst.msk [vmem:[#allocation3 + $0x38] sm:$0xff] %vm905_vm4, %v824_v37  ;;  %v830_v35 = vpop.permute.xlu0 %829 }
 0x133   : > { %1777 = vrot.lane.b32.xlu1 %v2827_v46, %s2445_s6  ;;  %916 = vst.msk [vmem:[#allocation3 + $0x50] sm:$0xff] %vm905_vm4, %v830_v35 }
 0x134   : > { %1779 = vrot.lane.b32.xlu0 %v2823_v45, %s2445_s6 }
 0x135   : > { %v828_v48 = vpop.permute.xlu1 %827 }
 0x136   : > { %915 = vst.msk [vmem:[#allocation3 + $0x48] sm:$0xff] %vm905_vm4, %v828_v48  ;;  %v834_v38 = vpop.permute.xlu0 %833 }
 0x137   : > { %1809 = vrot.lane.b32.xlu1 %v2867_v51, %s2445_s6  ;;  %918 = vst.msk [vmem:[#allocation3 + $0x60] sm:$0xff] %vm905_vm4, %v834_v38  ;;  %v1718_v38 = vld [vmem:[#allocation2 + $0x82] sm:$0xff] }
 0x138   : > { %1811 = vrot.lane.b32.xlu0 %v2863_v42, %s2445_s6 }
 0x139   : > { %v832_v46 = vpop.permute.xlu1 %831 }
 0x13a   : > { %917 = vst.msk [vmem:[#allocation3 + $0x58] sm:$0xff] %vm905_vm4, %v832_v46  ;;  %v838_v24 = vpop.permute.xlu0 %837 }
 0x13b   : > { %1781 = vrot.lane.b32.xlu1 %v2835_v49, %s2445_s6  ;;  %920 = vst.msk [vmem:[#allocation3 + $0x70] sm:$0xff] %vm905_vm4, %v838_v24  ;;  %v1734_v24 = vld [vmem:[#allocation2 + $0x142] sm:$0xff] }
 0x13c   : > { %1010 = vrot.lane.b32.xlu0 %v942_v62, %s2441_s23 }
 0x13d   : > { %v836_v54 = vpop.permute.xlu1 %835 }
 0x13e   : > { %919 = vst.msk [vmem:[#allocation3 + $0x68] sm:$0xff] %vm905_vm4, %v836_v54  ;;  %v842_v51 = vpop.permute.xlu0 %841 }
 0x13f   : > { %1813 = vrot.lane.b32.xlu1 %v2875_v23, %s2445_s6  ;;  %922 = vst.msk [vmem:[#allocation3 + $0x80] sm:$0xff] %vm905_vm4, %v842_v51 }
 0x140   : > { %1042 = vrot.lane.b32.xlu0 %v2755_v15, %s2441_s23  ;;  %v3141_v15 = vld [vmem:[#allocation2 + $0x69] sm:$0xff] }
 0x141   : > { %v840_v25 = vpop.permute.xlu1 %839 }
 0x142   : > { %921 = vst.msk [vmem:[#allocation3 + $0x78] sm:$0xff] %vm905_vm4, %v840_v25  ;;  %v846_v63 = vpop.permute.xlu0 %845  ;;  %v3239_v25 = vld [vmem:[#allocation2 + $0x91] sm:$0xff] }
 0x143   : > { %1012 = vrot.lane.b32.xlu1 %v943_v1, %s2441_s23  ;;  %924 = vst.msk [vmem:[#allocation3 + $0x90] sm:$0xff] %vm905_vm4, %v846_v63 }
 0x144   : > { %1014 = vrot.lane.b32.xlu0 %v3132_v26, %s2441_s23 }
 0x145   : > { %v844_v3 = vpop.permute.xlu1 %843 }
 0x146   : > { %923 = vst.msk [vmem:[#allocation3 + $0x88] sm:$0xff] %vm905_vm4, %v844_v3  ;;  %v850_v28 = vpop.permute.xlu0 %849  ;;  %v3246_v3 = vld [vmem:[#allocation2 + $0x151] sm:$0xff] }
 0x147   : > { %1044 = vrot.lane.b32.xlu1 %v2779_v22, %s2441_s23  ;;  %926 = vst.msk [vmem:[#allocation3 + $0xa0] sm:$0xff] %vm905_vm4, %v850_v28  ;;  %v3657_v22 = vld [vmem:[#allocation5_spill] sm:$0xff] }
 0x148   : > { %1046 = vrot.lane.b32.xlu0 %v2771_v19, %s2441_s23 }
 0x149   : > { %v848_v14 = vpop.permute.xlu1 %847 }
 0x14a   : > { %925 = vst.msk [vmem:[#allocation3 + $0x98] sm:$0xff] %vm905_vm4, %v848_v14  ;;  %v854_v57 = vpop.permute.xlu0 %853 }
 0x14b   : > { %1016 = vrot.lane.b32.xlu1 %v3141_v15, %s2441_s23  ;;  %928 = vst.msk [vmem:[#allocation3 + $0xb0] sm:$0xff] %vm905_vm4, %v854_v57 }
 0x14c   : > { %1203 = vrot.lane.b32.xlu0 %v2823_v45, %s2442_s24 }
 0x14d   : > { %v852_v2 = vpop.permute.xlu1 %851 }
 0x14e   : > { %927 = vst.msk [vmem:[#allocation3 + $0xa8] sm:$0xff] %vm905_vm4, %v852_v2  ;;  %v858_v5 = vpop.permute.xlu0 %857  ;;  %v3257_v2 = vld [vmem:[#allocation2 + $0x159] sm:$0xff] }
 0x14f   : > { %1048 = vrot.lane.b32.xlu1 %v3657_v22, %s2441_s23  ;;  %930 = vst.msk [vmem:[#allocation3 + $0xc0] sm:$0xff] %vm905_vm4, %v858_v5 }
 0x150   : > { %1235 = vrot.lane.b32.xlu0 %v2863_v42, %s2442_s24 }
 0x151   : > { %v856_v19 = vpop.permute.xlu1 %855 }
 0x152   : > { %929 = vst.msk [vmem:[#allocation3 + $0xb8] sm:$0xff] %vm905_vm4, %v856_v19  ;;  %v862_v41 = vpop.permute.xlu0 %861 }
 0x153   : > { %1205 = vrot.lane.b32.xlu1 %v2835_v49, %s2442_s24  ;;  %932 = vst.msk [vmem:[#allocation3 + $0xd0] sm:$0xff] %vm905_vm4, %v862_v41  ;;  %v3660_v49 = vld [vmem:[#allocation7_spill] sm:$0xff]  ;;  %v3267_v41 = vld [vmem:[#allocation2 + $0x92] sm:$0xff] }
 0x154   : > { %1207 = vrot.lane.b32.xlu0 %v3658_v4, %s2442_s24 }
 0x155   : > { %v860_v45 = vpop.permute.xlu1 %859 }
 0x156   : > { %931 = vst.msk [vmem:[#allocation3 + $0xc8] sm:$0xff] %vm905_vm4, %v860_v45  ;;  %v866_v36 = vpop.permute.xlu0 %865 }
 0x157   : > { %1237 = vrot.lane.b32.xlu1 %v2875_v23, %s2442_s24  ;;  %934 = vst.msk [vmem:[#allocation3 + $0xe0] sm:$0xff] %vm905_vm4, %v866_v36  ;;  %v3661_v23 = vld [vmem:[#allocation9_spill] sm:$0xff] }
 0x158   : > { %1239 = vrot.lane.b32.xlu0 %v3659_v44, %s2442_s24  ;;  %v3274_v36 = vld [vmem:[#allocation2 + $0x152] sm:$0xff]  ;;  %v3277_v44 = vld [vmem:[#allocation2 + $0x9a] sm:$0xff] }
 0x159   : > { %v864_v42 = vpop.permute.xlu1 %863 }
 0x15a   : > { %933 = vst.msk [vmem:[#allocation3 + $0xd8] sm:$0xff] %vm905_vm4, %v864_v42  ;;  %v870_v47 = vpop.permute.xlu0 %869 }
 0x15b   : > { %1209 = vrot.lane.b32.xlu1 %v3660_v49, %s2442_s24  ;;  %936 = vst.msk [vmem:[#allocation3 + $0xf0] sm:$0xff] %vm905_vm4, %v870_v47  ;;  %v1333_v47 = vld [vmem:[#allocation2 + $0x90] sm:$0xff] }
 0x15c   : > { %1397 = vrot.lane.b32.xlu0 %v2672_v58, %s2443_s25 }
 0x15d   : > { %v868_v39 = vpop.permute.xlu1 %867 }
 0x15e   : > { %935 = vst.msk [vmem:[#allocation3 + $0xe8] sm:$0xff] %vm905_vm4, %v868_v39  ;;  %v1003_v6 = vpop.permute.xlu0 %1002 }
 0x15f   : > { %1241 = vrot.lane.b32.xlu1 %v3661_v23, %s2442_s24  ;;  %1099 = vst.msk [vmem:[#allocation3] sm:$0xff] %vm1098_vm6, %v1003_v6  ;;  %v3285_v6 = vld [vmem:[#allocation2 + $0x15a] sm:$0xff] }
 0x160   : > { %1429 = vrot.lane.b32.xlu0 %v2743_v12, %s2443_s25 }
 0x161   : > { %v872_v0 = vpop.permute.xlu1 %871 }
 0x162   : > { %937 = vst.msk [vmem:[#allocation3 + $0xf8] sm:$0xff] %vm905_vm4, %v872_v0  ;;  %v1007_v52 = vpop.permute.xlu0 %1006 }
 0x163   : > { %1399 = vrot.lane.b32.xlu1 %v2674_v59, %s2443_s25  ;;  %1101 = vst.msk [vmem:[#allocation3 + $0x10] sm:$0xff] %vm1098_vm6, %v1007_v52 }
 0x164   : > { %1401 = vrot.lane.b32.xlu0 %v2676_v60, %s2443_s25 }
 0x165   : > { %v1005_v58 = vpop.permute.xlu1 %1004 }
 0x166   : > { %1100 = vst.msk [vmem:[#allocation3 + $0x8] sm:$0xff] %vm1098_vm6, %v1005_v58  ;;  %v1037_v34 = vpop.permute.xlu0 %1036 }
 0x167   : > { %1431 = vrot.lane.b32.xlu1 %v2745_v13, %s2443_s25  ;;  %1116 = vst.msk [vmem:[#allocation3 + $0x88] sm:$0xff] %vm1098_vm6, %v1037_v34  ;;  %v1538_v13 = vld [vmem:[#allocation2 + $0x121] sm:$0xff] }
 0x168   : > { %1433 = vrot.lane.b32.xlu0 %v2759_v16, %s2443_s25 }
 0x169   : > { %v1035_v12 = vpop.permute.xlu1 %1034 }
 0x16a   : > { %1115 = vst.msk [vmem:[#allocation3 + $0x80] sm:$0xff] %vm1098_vm6, %v1035_v12  ;;  %v1039_v59 = vpop.permute.xlu0 %1038 }
 0x16b   : > { %1403 = vrot.lane.b32.xlu1 %v2685_v61, %s2443_s25  ;;  %1117 = vst.msk [vmem:[#allocation3 + $0x90] sm:$0xff] %vm1098_vm6, %v1039_v59  ;;  %v1524_v61 = vld [vmem:[#allocation2 + $0x79] sm:$0xff] }
 0x16c   : > { %1590 = vrot.lane.b32.xlu0 %v3132_v26, %s2444_s26  ;;  %v1334_v59 = vld [vmem:[#allocation2 + $0x98] sm:$0xff] }
 0x16d   : > { %v1009_v60 = vpop.permute.xlu1 %1008 }
 0x16e   : > { %1102 = vst.msk [vmem:[#allocation3 + $0x18] sm:$0xff] %vm1098_vm6, %v1009_v60  ;;  %v1196_v16 = vpop.permute.xlu0 %1195 }
 0x16f   : > { %1435 = vrot.lane.b32.xlu1 %v2761_v17, %s2443_s25  ;;  %1292 = vst.msk [vmem:[#allocation3] sm:$0xff] %vm1291_vm7, %v1196_v16  ;;  %v1540_v17 = vld [vmem:[#allocation2 + $0x139] sm:$0xff] }
 0x170   : > { %1622 = vrot.lane.b32.xlu0 %v1538_v13, %s2444_s26 }
 0x171   : > { %v1041_v7 = vpop.permute.xlu1 %1040 }
 0x172   : > { %1118 = vst.msk [vmem:[#allocation3 + $0x98] sm:$0xff] %vm1098_vm6, %v1041_v7  ;;  %v1228_v53 = vpop.permute.xlu0 %1227  ;;  %v1335_v7 = vld [vmem:[#allocation2 + $0xa8] sm:$0xff] }
 0x173   : > { %1592 = vrot.lane.b32.xlu1 %v3141_v15, %s2444_s26  ;;  %1308 = vst.msk [vmem:[#allocation3 + $0x80] sm:$0xff] %vm1291_vm7, %v1228_v53  ;;  %v3249_v15 = vld [vmem:[#allocation2 + $0x99] sm:$0xff] }
 0x174   : > { %1594 = vrot.lane.b32.xlu0 %v1524_v61, %s2444_s26 }
 0x175   : > { %v1198_v8 = vpop.permute.xlu1 %1197 }
 0x176   : > { %1293 = vst.msk [vmem:[#allocation3 + $0x8] sm:$0xff] %vm1291_vm7, %v1198_v8  ;;  %v1200_v9 = vpop.permute.xlu0 %1199 }
 0x177   : > { %1624 = vrot.lane.b32.xlu1 %v1539_v55, %s2444_s26  ;;  %1294 = vst.msk [vmem:[#allocation3 + $0x10] sm:$0xff] %vm1291_vm7, %v1200_v9 }
 0x178   : > { %1626 = vrot.lane.b32.xlu0 %v1540_v17, %s2444_s26 }
 0x179   : > { %v1230_v27 = vpop.permute.xlu1 %1229 }
 0x17a   : > { %1309 = vst.msk [vmem:[#allocation3 + $0x88] sm:$0xff] %vm1291_vm7, %v1230_v27  ;;  %v1232_v11 = vpop.permute.xlu0 %1231  ;;  %v1336_v27 = vld [vmem:[#allocation2 + $0xb0] sm:$0xff] }
 0x17b   : > { %1596 = vrot.lane.b32.xlu1 %v1525_v56, %s2444_s26  ;;  %1310 = vst.msk [vmem:[#allocation3 + $0x90] sm:$0xff] %vm1291_vm7, %v1232_v11 }
 0x17c   : > { %1783 = vrot.lane.b32.xlu0 %v1715_v10, %s2445_s6 }
 0x17d   : > { %v1202_v50 = vpop.permute.xlu1 %1201 }
 0x17e   : > { %1295 = vst.msk [vmem:[#allocation3 + $0x18] sm:$0xff] %vm1291_vm7, %v1202_v50  ;;  %v1390_v18 = vpop.permute.xlu0 %1389 }
 0x17f   : > { %1628 = vrot.lane.b32.xlu1 %v1541_v32, %s2444_s26  ;;  %1486 = vst.msk [vmem:[#allocation3] sm:$0xff] %vm1485_vm8, %v1390_v18 }
 0x180   : > { %1815 = vrot.lane.b32.xlu0 %v1731_v31, %s2445_s6 }
 0x181   : > { %v1234_v30 = vpop.permute.xlu1 %1233 }
 0x182   : > { %1311 = vst.msk [vmem:[#allocation3 + $0x98] sm:$0xff] %vm1291_vm7, %v1234_v30  ;;  %v1422_v37 = vpop.permute.xlu0 %1421  ;;  %v1528_v30 = vld [vmem:[#allocation2 + $0xa9] sm:$0xff] }
 0x183   : > { %1785 = vrot.lane.b32.xlu1 %v1716_v33, %s2445_s6  ;;  %1502 = vst.msk [vmem:[#allocation3 + $0x80] sm:$0xff] %vm1485_vm8, %v1422_v37 }
 0x184   : > { %1787 = vrot.lane.b32.xlu0 %v1717_v40, %s2445_s6 }
 0x185   : > { %v1392_v35 = vpop.permute.xlu1 %1391 }
 0x186   : > { %1487 = vst.msk [vmem:[#allocation3 + $0x8] sm:$0xff] %vm1485_vm8, %v1392_v35  ;;  %v1394_v48 = vpop.permute.xlu0 %1393 }
 0x187   : > { %1817 = vrot.lane.b32.xlu1 %v1732_v43, %s2445_s6  ;;  %1488 = vst.msk [vmem:[#allocation3 + $0x10] sm:$0xff] %vm1485_vm8, %v1394_v48  ;;  %v1544_v43 = vld [vmem:[#allocation2 + $0x169] sm:$0xff] }
 0x188   : > { %1819 = vrot.lane.b32.xlu0 %v1733_v29, %s2445_s6 }
 0x189   : > { %v1424_v46 = vpop.permute.xlu1 %1423 }
 0x18a   : > { %1503 = vst.msk [vmem:[#allocation3 + $0x88] sm:$0xff] %vm1485_vm8, %v1424_v46  ;;  %v1426_v62 = vpop.permute.xlu0 %1425  ;;  %v1545_v46 = vld [vmem:[#allocation2 + $0x171] sm:$0xff] }
 0x18b   : > { %1789 = vrot.lane.b32.xlu1 %v1718_v38, %s2445_s6  ;;  %1504 = vst.msk [vmem:[#allocation3 + $0x90] sm:$0xff] %vm1485_vm8, %v1426_v62 }
 0x18c   : > { %1018 = vrot.lane.b32.xlu0 %v1524_v61, %s2441_s23 }
 0x18d   : > { %v1396_v54 = vpop.permute.xlu1 %1395 }
 0x18e   : > { %1489 = vst.msk [vmem:[#allocation3 + $0x18] sm:$0xff] %vm1485_vm8, %v1396_v54  ;;  %v1583_v51 = vpop.permute.xlu0 %1582 }
 0x18f   : > { %1821 = vrot.lane.b32.xlu1 %v1734_v24, %s2445_s6  ;;  %1679 = vst.msk [vmem:[#allocation3] sm:$0xff] %vm1678_vm9, %v1583_v51  ;;  %v1721_v51 = vld [vmem:[#allocation2 + $0xaa] sm:$0xff] }
 0x190   : > { %1050 = vrot.lane.b32.xlu0 %v1540_v17, %s2441_s23 }
 0x191   : > { %v1428_v1 = vpop.permute.xlu1 %1427 }
 0x192   : > { %1505 = vst.msk [vmem:[#allocation3 + $0x98] sm:$0xff] %vm1485_vm8, %v1428_v1  ;;  %v1615_v26 = vpop.permute.xlu0 %1614 }
 0x193   : > { %1020 = vrot.lane.b32.xlu1 %v1525_v56, %s2441_s23  ;;  %1695 = vst.msk [vmem:[#allocation3 + $0x80] sm:$0xff] %vm1678_vm9, %v1615_v26  ;;  %v1737_v26 = vld [vmem:[#allocation2 + $0x16a] sm:$0xff] }
 0x194   : > { %1022 = vrot.lane.b32.xlu0 %v3239_v25, %s2441_s23 }
 0x195   : > { %v1585_v63 = vpop.permute.xlu1 %1584 }
 0x196   : > { %1680 = vst.msk [vmem:[#allocation3 + $0x8] sm:$0xff] %vm1678_vm9, %v1585_v63  ;;  %v1587_v28 = vpop.permute.xlu0 %1586 }
 0x197   : > { %1052 = vrot.lane.b32.xlu1 %v1541_v32, %s2441_s23  ;;  %1681 = vst.msk [vmem:[#allocation3 + $0x10] sm:$0xff] %vm1678_vm9, %v1587_v28 }
 0x198   : > { %1054 = vrot.lane.b32.xlu0 %v3246_v3, %s2441_s23 }
 0x199   : > { %v1617_v14 = vpop.permute.xlu1 %1616 }
 0x19a   : > { %1696 = vst.msk [vmem:[#allocation3 + $0x88] sm:$0xff] %vm1678_vm9, %v1617_v14  ;;  %v1619_v57 = vpop.permute.xlu0 %1618  ;;  %v1738_v14 = vld [vmem:[#allocation2 + $0x172] sm:$0xff] }
 0x19b   : > { %1024 = vrot.lane.b32.xlu1 %v3249_v15, %s2441_s23  ;;  %1697 = vst.msk [vmem:[#allocation3 + $0x90] sm:$0xff] %vm1678_vm9, %v1619_v57 }
 0x19c   : > { %1211 = vrot.lane.b32.xlu0 %v1717_v40, %s2442_s24 }
 0x19d   : > { %v1589_v22 = vpop.permute.xlu1 %1588 }
 0x19e   : > { %1682 = vst.msk [vmem:[#allocation3 + $0x18] sm:$0xff] %vm1678_vm9, %v1589_v22  ;;  %v1776_v5 = vpop.permute.xlu0 %1775 }
 0x19f   : > { %1056 = vrot.lane.b32.xlu1 %v3257_v2, %s2441_s23  ;;  %1872 = vst.msk [vmem:[#allocation3] sm:$0xff] %vm1871_vm10, %v1776_v5  ;;  %v3357_v5 = vld [vmem:[#allocation2 + $0xc1] sm:$0xff] }
 0x1a0   : > { %1243 = vrot.lane.b32.xlu0 %v1733_v29, %s2442_s24  ;;  %v1529_v29 = vld [vmem:[#allocation2 + $0xb1] sm:$0xff] }
 0x1a1   : > { %v1621_v19 = vpop.permute.xlu1 %1620 }
 0x1a2   : > { %1698 = vst.msk [vmem:[#allocation3 + $0x98] sm:$0xff] %vm1678_vm9, %v1621_v19  ;;  %v1808_v45 = vpop.permute.xlu0 %1807 }
 0x1a3   : > { %1213 = vrot.lane.b32.xlu1 %v1718_v38, %s2442_s24  ;;  %1888 = vst.msk [vmem:[#allocation3 + $0x80] sm:$0xff] %vm1871_vm10, %v1808_v45  ;;  %v3364_v45 = vld [vmem:[#allocation2 + $0x181] sm:$0xff] }
 0x1a4   : > { %1215 = vrot.lane.b32.xlu0 %v3267_v41, %s2442_s24 }
 0x1a5   : > { %v1778_v4 = vpop.permute.xlu1 %1777 }
 0x1a6   : > { %1873 = vst.msk [vmem:[#allocation3 + $0x8] sm:$0xff] %vm1871_vm10, %v1778_v4  ;;  %v1780_v42 = vpop.permute.xlu0 %1779  ;;  %v1904_v39 = vld [vmem:[#allocation3] sm:$0xff] }
 0x1a7   : > { %1245 = vrot.lane.b32.xlu1 %v1734_v24, %s2442_s24  ;;  %1874 = vst.msk [vmem:[#allocation3 + $0x10] sm:$0xff] %vm1871_vm10, %v1780_v42 }
 0x1a8   : > { %1247 = vrot.lane.b32.xlu0 %v3274_v36, %s2442_s24 }
 0x1a9   : > { %v1810_v49 = vpop.permute.xlu1 %1809 }
 0x1aa   : > { %1889 = vst.msk [vmem:[#allocation3 + $0x88] sm:$0xff] %vm1871_vm10, %v1810_v49  ;;  %v1812_v23 = vpop.permute.xlu0 %1811  ;;  %v1920_v34 = vld [vmem:[#allocation3 + $0x80] sm:$0xff] }
 0x1ab   : > { %1217 = vrot.lane.b32.xlu1 %v3277_v44, %s2442_s24  ;;  %1890 = vst.msk [vmem:[#allocation3 + $0x90] sm:$0xff] %vm1871_vm10, %v1812_v23  ;;  %v3375_v49 = vld [vmem:[#allocation2 + $0x189] sm:$0xff] }
 0x1ac   : > { %1405 = vrot.lane.b32.xlu0 %v1333_v47, %s2443_s25 }
 0x1ad   : > { %v1782_v0 = vpop.permute.xlu1 %1781  ;;  %v1905_v52 = vld [vmem:[#allocation3 + $0x8] sm:$0xff] }
 0x1ae   : > { %1875 = vst.msk [vmem:[#allocation3 + $0x18] sm:$0xff] %vm1871_vm10, %v1782_v0  ;;  %v1936_v58 = vpack.c.bf16 %v1905_v52, %v1904_v39  ;;  %v1011_v12 = vpop.permute.xlu0 %1010  ;;  %v1906_v61 = vld [vmem:[#allocation3 + $0x10] sm:$0xff] }
 0x1af   : > { %1249 = vrot.lane.b32.xlu1 %v3285_v6, %s2442_s24  ;;  %1103 = vst.msk [vmem:[#allocation3 + $0x20] sm:$0xff] %vm1098_vm6, %v1011_v12  ;;  %v3395_v12 = vld [vmem:[#allocation2 + $0xca] sm:$0xff] }
 0x1b0   : > { %2363 = vmatprep.mubr.msk.bf16.mxu0 %vm1995_vm11, %v1936_v58  ;;  %1437 = vrot.lane.b32.xlu0 %v2775_v20, %s2443_s25  ;;  %v1351_v20 = vld [vmem:[#allocation2 + $0x168] sm:$0xff] }
 0x1b1   : > { %v1814_v60 = vpop.permute.xlu1 %1813  ;;  %v1921_v13 = vld [vmem:[#allocation3 + $0x88] sm:$0xff]  ;;  %v3392_v58 = vld [vmem:[#allocation2 + $0x182] sm:$0xff] }
 0x1b2   : > { %1891 = vst.msk [vmem:[#allocation3 + $0x98] sm:$0xff] %vm1871_vm10, %v1814_v60  ;;  %v1944_v16 = vpack.c.bf16 %v1921_v13, %v1920_v34  ;;  %v1043_v53 = vpop.permute.xlu0 %1042  ;;  %v1922_v9 = vld [vmem:[#allocation3 + $0x90] sm:$0xff] }
 0x1b3   : > { %1407 = vrot.lane.b32.xlu1 %v1334_v59, %s2443_s25  ;;  %1119 = vst.msk [vmem:[#allocation3 + $0xa0] sm:$0xff] %vm1098_vm6, %v1043_v53  ;;  %v1337_v60 = vld [vmem:[#allocation2 + $0xc0] sm:$0xff] }
 0x1b4   : > { %2379 = vmatprep.mubr.msk.bf16.mxu1 %vm1995_vm11, %v1944_v16  ;;  %1409 = vrot.lane.b32.xlu0 %v1335_v7, %s2443_s25  ;;  %v3403_v7 = vld [vmem:[#allocation2 + $0x18a] sm:$0xff] }
 0x1b5   : > { %v1013_v55 = vpop.permute.xlu1 %1012  ;;  %v1907_v8 = vld [vmem:[#allocation3 + $0x18] sm:$0xff] }
 0x1b6   : > { %1104 = vst.msk [vmem:[#allocation3 + $0x28] sm:$0xff] %vm1098_vm6, %v1013_v55  ;;  %v1937_v17 = vpack.c.bf16 %v1907_v8, %v1906_v61  ;;  %v1015_v56 = vpop.permute.xlu0 %1014  ;;  %v1353_v8 = vld [vmem:[#allocation2 + $0x180] sm:$0xff] }
 0x1b7   : > { %1439 = vrot.lane.b32.xlu1 %v2777_v21, %s2443_s25  ;;  %1105 = vst.msk [vmem:[#allocation3 + $0x30] sm:$0xff] %vm1098_vm6, %v1015_v56  ;;  %v1352_v21 = vld [vmem:[#allocation2 + $0x170] sm:$0xff] }
 0x1b8   : > { %2364 = vmatmul.mubr.msk.bf16.vlgmr.msra.gmra.mrb[0].mxu0 %vm1995_vm11, %v1937_v17  ;;  %1441 = vrot.lane.b32.xlu0 %v1351_v20, %s2443_s25 }
 0x1b9   : > { %v1045_v10 = vpop.permute.xlu1 %1044  ;;  %v1923_v11 = vld [vmem:[#allocation3 + $0x98] sm:$0xff] }
 0x1ba   : > { %1120 = vst.msk [vmem:[#allocation3 + $0xa8] sm:$0xff] %vm1098_vm6, %v1045_v10  ;;  %v1945_v32 = vpack.c.bf16 %v1923_v11, %v1922_v9  ;;  %v1047_v50 = vpop.permute.xlu0 %1046  ;;  %v1338_v9 = vld [vmem:[#allocation2 + $0xc8] sm:$0xff]  ;;  %v1339_v11 = vld [vmem:[#allocation2 + $0xd8] sm:$0xff] }
 0x1bb   : > { %1411 = vrot.lane.b32.xlu1 %v1336_v27, %s2443_s25  ;;  %1121 = vst.msk [vmem:[#allocation3 + $0xb0] sm:$0xff] %vm1098_vm6, %v1047_v50 }
 0x1bc   : > { %2380 = vmatmul.mubr.msk.bf16.vlgmr.msra.gmra.mrb[0].mxu1 %vm1995_vm11, %v1945_v32  ;;  %1598 = vrot.lane.b32.xlu0 %v3239_v25, %s2444_s26 }
 0x1bd   : > { %v1017_v31 = vpop.permute.xlu1 %1016 }
 0x1be   : > { %1106 = vst.msk [vmem:[#allocation3 + $0x38] sm:$0xff] %vm1098_vm6, %v1017_v31  ;;  %v1204_v18 = vpop.permute.xlu0 %1203 }
 0x1bf   : > { %1443 = vrot.lane.b32.xlu1 %v1352_v21, %s2443_s25  ;;  %1296 = vst.msk [vmem:[#allocation3 + $0x20] sm:$0xff] %vm1291_vm7, %v1204_v18  ;;  %v1354_v21 = vld [vmem:[#allocation2 + $0x188] sm:$0xff] }
 0x1c0   : > { %1630 = vrot.lane.b32.xlu0 %v3246_v3, %s2444_s26  ;;  %v1722_v3 = vld [vmem:[#allocation2 + $0xb2] sm:$0xff] }
 0x1c1   : > { %v1049_v33 = vpop.permute.xlu1 %1048 }
 0x1c2   : > { %1122 = vst.msk [vmem:[#allocation3 + $0xb8] sm:$0xff] %vm1098_vm6, %v1049_v33  ;;  %v1236_v40 = vpop.permute.xlu0 %1235 }
 0x1c3   : > { %1600 = vrot.lane.b32.xlu1 %v3249_v15, %s2444_s26  ;;  %1312 = vst.msk [vmem:[#allocation3 + $0xa0] sm:$0xff] %vm1291_vm7, %v1236_v40 }
 0x1c4   : > { %1602 = vrot.lane.b32.xlu0 %v1528_v30, %s2444_s26 }
 0x1c5   : > { %v1206_v37 = vpop.permute.xlu1 %1205 }
 0x1c6   : > { %1297 = vst.msk [vmem:[#allocation3 + $0x28] sm:$0xff] %vm1291_vm7, %v1206_v37  ;;  %v1208_v35 = vpop.permute.xlu0 %1207 }
 0x1c7   : > { %1632 = vrot.lane.b32.xlu1 %v3257_v2, %s2444_s26  ;;  %1298 = vst.msk [vmem:[#allocation3 + $0x30] sm:$0xff] %vm1291_vm7, %v1208_v35 }
 0x1c8   : > { %1634 = vrot.lane.b32.xlu0 %v1544_v43, %s2444_s26 }
 0x1c9   : > { %v1238_v48 = vpop.permute.xlu1 %1237 }
 0x1ca   : > { %1313 = vst.msk [vmem:[#allocation3 + $0xa8] sm:$0xff] %vm1291_vm7, %v1238_v48  ;;  %v1240_v38 = vpop.permute.xlu0 %1239 }
 0x1cb   : > { %1604 = vrot.lane.b32.xlu1 %v1529_v29, %s2444_s26  ;;  %1314 = vst.msk [vmem:[#allocation3 + $0xb0] sm:$0xff] %vm1291_vm7, %v1240_v38 }
 0x1cc   : > { %1791 = vrot.lane.b32.xlu0 %v3267_v41, %s2445_s6 }
 0x1cd   : > { %v1210_v62 = vpop.permute.xlu1 %1209 }
 0x1ce   : > { %1299 = vst.msk [vmem:[#allocation3 + $0x38] sm:$0xff] %vm1291_vm7, %v1210_v62  ;;  %v1398_v24 = vpop.permute.xlu0 %1397 }
 0x1cf   : > { %1636 = vrot.lane.b32.xlu1 %v1545_v46, %s2444_s26  ;;  %1490 = vst.msk [vmem:[#allocation3 + $0x20] sm:$0xff] %vm1485_vm8, %v1398_v24 }
 0x1d0   : > { %1823 = vrot.lane.b32.xlu0 %v3274_v36, %s2445_s6  ;;  %v3367_v36 = vld [vmem:[#allocation2 + $0xc9] sm:$0xff] }
 0x1d1   : > { %v1242_v54 = vpop.permute.xlu1 %1241 }
 0x1d2   : > { %1315 = vst.msk [vmem:[#allocation3 + $0xb8] sm:$0xff] %vm1291_vm7, %v1242_v54  ;;  %v1430_v1 = vpop.permute.xlu0 %1429 }
 0x1d3   : > { %1793 = vrot.lane.b32.xlu1 %v3277_v44, %s2445_s6  ;;  %1506 = vst.msk [vmem:[#allocation3 + $0xa0] sm:$0xff] %vm1485_vm8, %v1430_v1 }
 0x1d4   : > { %1795 = vrot.lane.b32.xlu0 %v1721_v51, %s2445_s6 }
 0x1d5   : > { %v1400_v25 = vpop.permute.xlu1 %1399 }
 0x1d6   : > { %1491 = vst.msk [vmem:[#allocation3 + $0x28] sm:$0xff] %vm1485_vm8, %v1400_v25  ;;  %v1402_v63 = vpop.permute.xlu0 %1401 }
 0x1d7   : > { %1825 = vrot.lane.b32.xlu1 %v3285_v6, %s2445_s6  ;;  %1492 = vst.msk [vmem:[#allocation3 + $0x30] sm:$0xff] %vm1485_vm8, %v1402_v63  ;;  %v3385_v6 = vld [vmem:[#allocation2 + $0xc2] sm:$0xff] }
 0x1d8   : > { %1827 = vrot.lane.b32.xlu0 %v1737_v26, %s2445_s6 }
 0x1d9   : > { %v1432_v28 = vpop.permute.xlu1 %1431 }
 0x1da   : > { %1507 = vst.msk [vmem:[#allocation3 + $0xa8] sm:$0xff] %vm1485_vm8, %v1432_v28  ;;  %v1434_v15 = vpop.permute.xlu0 %1433 }
 0x1db   : > { %1797 = vrot.lane.b32.xlu1 %v1722_v3, %s2445_s6  ;;  %1508 = vst.msk [vmem:[#allocation3 + $0xb0] sm:$0xff] %vm1485_vm8, %v1434_v15 }
 0x1dc   : > { %1026 = vrot.lane.b32.xlu0 %v1528_v30, %s2441_s23  ;;  %v1355_v30 = vld [vmem:[#allocation2 + $0x198] sm:$0xff] }
 0x1dd   : > { %v1404_v57 = vpop.permute.xlu1 %1403 }
 0x1de   : > { %1493 = vst.msk [vmem:[#allocation3 + $0x38] sm:$0xff] %vm1485_vm8, %v1404_v57  ;;  %v1591_v2 = vpop.permute.xlu0 %1590 }
 0x1df   : > { %1829 = vrot.lane.b32.xlu1 %v1738_v14, %s2445_s6  ;;  %1683 = vst.msk [vmem:[#allocation3 + $0x20] sm:$0xff] %vm1678_vm9, %v1591_v2 }
 0x1e0   : > { %1058 = vrot.lane.b32.xlu0 %v1544_v43, %s2441_s23  ;;  %v1340_v43 = vld [vmem:[#allocation2 + $0xe0] sm:$0xff] }
 0x1e1   : > { %v1436_v22 = vpop.permute.xlu1 %1435 }
 0x1e2   : > { %1509 = vst.msk [vmem:[#allocation3 + $0xb8] sm:$0xff] %vm1485_vm8, %v1436_v22  ;;  %v1623_v19 = vpop.permute.xlu0 %1622 }
 0x1e3   : > { %1028 = vrot.lane.b32.xlu1 %v1529_v29, %s2441_s23  ;;  %1699 = vst.msk [vmem:[#allocation3 + $0xa0] sm:$0xff] %vm1678_vm9, %v1623_v19 }
 0x1e4   : > { %1030 = vrot.lane.b32.xlu0 %v3357_v5, %s2441_s23 }
 0x1e5   : > { %v1593_v41 = vpop.permute.xlu1 %1592 }
 0x1e6   : > { %1684 = vst.msk [vmem:[#allocation3 + $0x28] sm:$0xff] %vm1678_vm9, %v1593_v41  ;;  %v1595_v4 = vpop.permute.xlu0 %1594 }
 0x1e7   : > { %1060 = vrot.lane.b32.xlu1 %v1545_v46, %s2441_s23  ;;  %1685 = vst.msk [vmem:[#allocation3 + $0x30] sm:$0xff] %vm1678_vm9, %v1595_v4  ;;  %v1356_v46 = vld [vmem:[#allocation2 + $0x1a0] sm:$0xff] }
 0x1e8   : > { %1062 = vrot.lane.b32.xlu0 %v3364_v45, %s2441_s23 }
 0x1e9   : > { %v1625_v42 = vpop.permute.xlu1 %1624 }
 0x1ea   : > { %1700 = vst.msk [vmem:[#allocation3 + $0xa8] sm:$0xff] %vm1678_vm9, %v1625_v42  ;;  %v1627_v44 = vpop.permute.xlu0 %1626 }
 0x1eb   : > { %1032 = vrot.lane.b32.xlu1 %v3367_v36, %s2441_s23  ;;  %1701 = vst.msk [vmem:[#allocation3 + $0xb0] sm:$0xff] %vm1678_vm9, %v1627_v44 }
 0x1ec   : > { %1219 = vrot.lane.b32.xlu0 %v1721_v51, %s2442_s24  ;;  %v1532_v51 = vld [vmem:[#allocation2 + $0xd9] sm:$0xff] }
 0x1ed   : > { %v1597_v47 = vpop.permute.xlu1 %1596 }
 0x1ee   : > { %1686 = vst.msk [vmem:[#allocation3 + $0x38] sm:$0xff] %vm1678_vm9, %v1597_v47  ;;  %v1784_v39 = vpop.permute.xlu0 %1783 }
 0x1ef   : > { %1064 = vrot.lane.b32.xlu1 %v3375_v49, %s2441_s23  ;;  %1876 = vst.msk [vmem:[#allocation3 + $0x20] sm:$0xff] %vm1871_vm10, %v1784_v39 }
 0x1f0   : > { %1251 = vrot.lane.b32.xlu0 %v1737_v26, %s2442_s24  ;;  %v1548_v26 = vld [vmem:[#allocation2 + $0x199] sm:$0xff] }
 0x1f1   : > { %v1629_v23 = vpop.permute.xlu1 %1628 }
 0x1f2   : > { %1702 = vst.msk [vmem:[#allocation3 + $0xb8] sm:$0xff] %vm1678_vm9, %v1629_v23  ;;  %v1816_v0 = vpop.permute.xlu0 %1815 }
 0x1f3   : > { %1221 = vrot.lane.b32.xlu1 %v1722_v3, %s2442_s24  ;;  %1892 = vst.msk [vmem:[#allocation3 + $0xa0] sm:$0xff] %vm1871_vm10, %v1816_v0  ;;  %v1533_v3 = vld [vmem:[#allocation2 + $0xe1] sm:$0xff] }
 0x1f4   : > { %1223 = vrot.lane.b32.xlu0 %v3385_v6, %s2442_s24 }
 0x1f5   : > { %v1786_v52 = vpop.permute.xlu1 %1785 }
 0x1f6   : > { %1877 = vst.msk [vmem:[#allocation3 + $0x28] sm:$0xff] %vm1871_vm10, %v1786_v52  ;;  %v1788_v34 = vpop.permute.xlu0 %1787  ;;  %v1908_v13 = vld [vmem:[#allocation3 + $0x20] sm:$0xff] }
 0x1f7   : > { %1253 = vrot.lane.b32.xlu1 %v1738_v14, %s2442_s24  ;;  %1878 = vst.msk [vmem:[#allocation3 + $0x30] sm:$0xff] %vm1871_vm10, %v1788_v34  ;;  %v1549_v14 = vld [vmem:[#allocation2 + $0x1a1] sm:$0xff] }
 0x1f8   : > { %1255 = vrot.lane.b32.xlu0 %v3392_v58, %s2442_s24 }
 0x1f9   : > { %v1818_v59 = vpop.permute.xlu1 %1817 }
 0x1fa   : > { %1893 = vst.msk [vmem:[#allocation3 + $0xa8] sm:$0xff] %vm1871_vm10, %v1818_v59  ;;  %v1820_v16 = vpop.permute.xlu0 %1819  ;;  %v1924_v17 = vld [vmem:[#allocation3 + $0xa0] sm:$0xff] }
 0x1fb   : > { %1225 = vrot.lane.b32.xlu1 %v3395_v12, %s2442_s24  ;;  %1894 = vst.msk [vmem:[#allocation3 + $0xb0] sm:$0xff] %vm1871_vm10, %v1820_v16 }
 0x1fc   : > { %1413 = vrot.lane.b32.xlu0 %v1337_v60, %s2443_s25 }
 0x1fd   : > { %v1790_v61 = vpop.permute.xlu1 %1789  ;;  %v1909_v53 = vld [vmem:[#allocation3 + $0x28] sm:$0xff] }
 0x1fe   : > { %1879 = vst.msk [vmem:[#allocation3 + $0x38] sm:$0xff] %vm1871_vm10, %v1790_v61  ;;  %v1938_v55 = vpack.c.bf16 %v1909_v53, %v1908_v13  ;;  %v1019_v20 = vpop.permute.xlu0 %1018  ;;  %v1910_v32 = vld [vmem:[#allocation3 + $0x30] sm:$0xff] }
 0x1ff   : > { %1257 = vrot.lane.b32.xlu1 %v3403_v7, %s2442_s24  ;;  %1107 = vst.msk [vmem:[#allocation3 + $0x40] sm:$0xff] %vm1098_vm6, %v1019_v20 }
 0x200   : > { %2367 = vmatprep.mubr.msk.bf16.mxu0 %vm1995_vm11, %v1938_v55  ;;  %1445 = vrot.lane.b32.xlu0 %v1353_v8, %s2443_s25 }
 0x201   : > { %v1822_v56 = vpop.permute.xlu1 %1821  ;;  %v1925_v27 = vld [vmem:[#allocation3 + $0xa8] sm:$0xff] }
 0x202   : > { %1895 = vst.msk [vmem:[#allocation3 + $0xb8] sm:$0xff] %vm1871_vm10, %v1822_v56  ;;  %v1946_v10 = vpack.c.bf16 %v1925_v27, %v1924_v17  ;;  %v1051_v50 = vpop.permute.xlu0 %1050  ;;  %v1926_v40 = vld [vmem:[#allocation3 + $0xb0] sm:$0xff] }
 0x203   : > { %1415 = vrot.lane.b32.xlu1 %v1338_v9, %s2443_s25  ;;  %1123 = vst.msk [vmem:[#allocation3 + $0xc0] sm:$0xff] %vm1098_vm6, %v1051_v50 }
 0x204   : > { %2383 = vmatprep.mubr.msk.bf16.mxu1 %vm1995_vm11, %v1946_v10  ;;  %1417 = vrot.lane.b32.xlu0 %v1339_v11, %s2443_s25 }
 0x205   : > { %v1021_v31 = vpop.permute.xlu1 %1020  ;;  %v1911_v18 = vld [vmem:[#allocation3 + $0x38] sm:$0xff] }
 0x206   : > { %1108 = vst.msk [vmem:[#allocation3 + $0x48] sm:$0xff] %vm1098_vm6, %v1021_v31  ;;  %v1939_v33 = vpack.c.bf16 %v1911_v18, %v1910_v32  ;;  %v1023_v37 = vpop.permute.xlu0 %1022 }
 0x207   : > { %1447 = vrot.lane.b32.xlu1 %v1354_v21, %s2443_s25  ;;  %1109 = vst.msk [vmem:[#allocation3 + $0x50] sm:$0xff] %vm1098_vm6, %v1023_v37 }
 0x208   : > { %2368 = vmatmul.mubr.msk.bf16.gmra.mrb[4].mxu0 %vm1995_vm11, %v1939_v33  ;;  %1449 = vrot.lane.b32.xlu0 %v1355_v30, %s2443_s25 }
 0x209   : > { %v1053_v35 = vpop.permute.xlu1 %1052  ;;  %v1927_v29 = vld [vmem:[#allocation3 + $0xb8] sm:$0xff] }
 0x20a   : > { %1124 = vst.msk [vmem:[#allocation3 + $0xc8] sm:$0xff] %vm1098_vm6, %v1053_v35  ;;  %v1947_v48 = vpack.c.bf16 %v1927_v29, %v1926_v40  ;;  %v1055_v38 = vpop.permute.xlu0 %1054 }
 0x20b   : > { %1419 = vrot.lane.b32.xlu1 %v1340_v43, %s2443_s25  ;;  %1125 = vst.msk [vmem:[#allocation3 + $0xd0] sm:$0xff] %vm1098_vm6, %v1055_v38 }
 0x20c   : > { %2384 = vmatmul.mubr.msk.bf16.gmra.mrb[4].mxu1 %vm1995_vm11, %v1947_v48  ;;  %1606 = vrot.lane.b32.xlu0 %v3357_v5, %s2444_s26  ;;  %v1725_v5 = vld [vmem:[#allocation2 + $0xda] sm:$0xff] }
 0x20d   : > { %v1025_v62 = vpop.permute.xlu1 %1024 }
 0x20e   : > { %1110 = vst.msk [vmem:[#allocation3 + $0x58] sm:$0xff] %vm1098_vm6, %v1025_v62  ;;  %v1212_v24 = vpop.permute.xlu0 %1211 }
 0x20f   : > { %1451 = vrot.lane.b32.xlu1 %v1356_v46, %s2443_s25  ;;  %1300 = vst.msk [vmem:[#allocation3 + $0x40] sm:$0xff] %vm1291_vm7, %v1212_v24 }
 0x210   : > { %1638 = vrot.lane.b32.xlu0 %v3364_v45, %s2444_s26  ;;  %v1741_v45 = vld [vmem:[#allocation2 + $0x19a] sm:$0xff] }
 0x211   : > { %v1057_v54 = vpop.permute.xlu1 %1056 }
 0x212   : > { %1126 = vst.msk [vmem:[#allocation3 + $0xd8] sm:$0xff] %vm1098_vm6, %v1057_v54  ;;  %v1244_v1 = vpop.permute.xlu0 %1243 }
 0x213   : > { %1608 = vrot.lane.b32.xlu1 %v3367_v36, %s2444_s26  ;;  %1316 = vst.msk [vmem:[#allocation3 + $0xc0] sm:$0xff] %vm1291_vm7, %v1244_v1  ;;  %v1726_v36 = vld [vmem:[#allocation2 + $0xe2] sm:$0xff] }
 0x214   : > { %1610 = vrot.lane.b32.xlu0 %v1532_v51, %s2444_s26 }
 0x215   : > { %v1214_v25 = vpop.permute.xlu1 %1213 }
 0x216   : > { %1301 = vst.msk [vmem:[#allocation3 + $0x48] sm:$0xff] %vm1291_vm7, %v1214_v25  ;;  %v1216_v63 = vpop.permute.xlu0 %1215 }
 0x217   : > { %1640 = vrot.lane.b32.xlu1 %v3375_v49, %s2444_s26  ;;  %1302 = vst.msk [vmem:[#allocation3 + $0x50] sm:$0xff] %vm1291_vm7, %v1216_v63  ;;  %v1742_v49 = vld [vmem:[#allocation2 + $0x1a2] sm:$0xff] }
 0x218   : > { %1642 = vrot.lane.b32.xlu0 %v1548_v26, %s2444_s26 }
 0x219   : > { %v1246_v28 = vpop.permute.xlu1 %1245 }
 0x21a   : > { %1317 = vst.msk [vmem:[#allocation3 + $0xc8] sm:$0xff] %vm1291_vm7, %v1246_v28  ;;  %v1248_v15 = vpop.permute.xlu0 %1247 }
 0x21b   : > { %1612 = vrot.lane.b32.xlu1 %v1533_v3, %s2444_s26  ;;  %1318 = vst.msk [vmem:[#allocation3 + $0xd0] sm:$0xff] %vm1291_vm7, %v1248_v15 }
 0x21c   : > { %1799 = vrot.lane.b32.xlu0 %v3385_v6, %s2445_s6 }
 0x21d   : > { %v1218_v57 = vpop.permute.xlu1 %1217 }
 0x21e   : > { %1303 = vst.msk [vmem:[#allocation3 + $0x58] sm:$0xff] %vm1291_vm7, %v1218_v57  ;;  %v1406_v2 = vpop.permute.xlu0 %1405 }
 0x21f   : > { %1644 = vrot.lane.b32.xlu1 %v1549_v14, %s2444_s26  ;;  %1494 = vst.msk [vmem:[#allocation3 + $0x40] sm:$0xff] %vm1485_vm8, %v1406_v2 }
 0x220   : > { %1831 = vrot.lane.b32.xlu0 %v3392_v58, %s2445_s6 }
 0x221   : > { %v1250_v22 = vpop.permute.xlu1 %1249 }
 0x222   : > { %1319 = vst.msk [vmem:[#allocation3 + $0xd8] sm:$0xff] %vm1291_vm7, %v1250_v22  ;;  %v1438_v19 = vpop.permute.xlu0 %1437 }
 0x223   : > { %1801 = vrot.lane.b32.xlu1 %v3395_v12, %s2445_s6  ;;  %1510 = vst.msk [vmem:[#allocation3 + $0xc0] sm:$0xff] %vm1485_vm8, %v1438_v19 }
 0x224   : > { %1803 = vrot.lane.b32.xlu0 %v1725_v5, %s2445_s6 }
 0x225   : > { %v1408_v41 = vpop.permute.xlu1 %1407 }
 0x226   : > { %1495 = vst.msk [vmem:[#allocation3 + $0x48] sm:$0xff] %vm1485_vm8, %v1408_v41  ;;  %v1410_v4 = vpop.permute.xlu0 %1409 }
 0x227   : > { %1833 = vrot.lane.b32.xlu1 %v3403_v7, %s2445_s6  ;;  %1496 = vst.msk [vmem:[#allocation3 + $0x50] sm:$0xff] %vm1485_vm8, %v1410_v4  ;;  %v3518_v4 = vld [vmem:[#allocation4] ss:$0 sm:$0xff] }
 0x228   : > { %1835 = vrot.lane.b32.xlu0 %v1741_v45, %s2445_s6 }
 0x229   : > { %v1440_v42 = vpop.permute.xlu1 %1439 }
 0x22a   : > { %1511 = vst.msk [vmem:[#allocation3 + $0xc8] sm:$0xff] %vm1485_vm8, %v1440_v42  ;;  %v1442_v44 = vpop.permute.xlu0 %1441 }
 0x22b   : > { %1805 = vrot.lane.b32.xlu1 %v1726_v36, %s2445_s6  ;;  %1512 = vst.msk [vmem:[#allocation3 + $0xd0] sm:$0xff] %vm1485_vm8, %v1442_v44 }
 0x22d   : > { %v1412_v47 = vpop.permute.xlu1 %1411 }
 0x22e   : > { %1497 = vst.msk [vmem:[#allocation3 + $0x58] sm:$0xff] %vm1485_vm8, %v1412_v47  ;;  %v1599_v39 = vpop.permute.xlu0 %1598 }
 0x22f   : > { %1837 = vrot.lane.b32.xlu1 %v1742_v49, %s2445_s6  ;;  %1687 = vst.msk [vmem:[#allocation3 + $0x40] sm:$0xff] %vm1678_vm9, %v1599_v39 }
 0x231   : > { %v1444_v23 = vpop.permute.xlu1 %1443 }
 0x232   : > { %1513 = vst.msk [vmem:[#allocation3 + $0xd8] sm:$0xff] %vm1485_vm8, %v1444_v23  ;;  %v1631_v6 = vpop.permute.xlu0 %1630 }
 0x233   : > { %1703 = vst.msk [vmem:[#allocation3 + $0xc0] sm:$0xff] %vm1678_vm9, %v1631_v6 }
 0x235   : > { %v1601_v0 = vpop.permute.xlu1 %1600 }
 0x236   : > { %1688 = vst.msk [vmem:[#allocation3 + $0x48] sm:$0xff] %vm1678_vm9, %v1601_v0  ;;  %v1603_v52 = vpop.permute.xlu0 %1602 }
 0x237   : > { %1689 = vst.msk [vmem:[#allocation3 + $0x50] sm:$0xff] %vm1678_vm9, %v1603_v52 }
 0x239   : > { %v1633_v58 = vpop.permute.xlu1 %1632 }
 0x23a   : > { %1704 = vst.msk [vmem:[#allocation3 + $0xc8] sm:$0xff] %vm1678_vm9, %v1633_v58  ;;  %v1635_v34 = vpop.permute.xlu0 %1634 }
 0x23b   : > { %1705 = vst.msk [vmem:[#allocation3 + $0xd0] sm:$0xff] %vm1678_vm9, %v1635_v34 }
 0x23d   : > { %v1605_v12 = vpop.permute.xlu1 %1604 }
 0x23e   : > { %1690 = vst.msk [vmem:[#allocation3 + $0x58] sm:$0xff] %vm1678_vm9, %v1605_v12  ;;  %v1792_v59 = vpop.permute.xlu0 %1791 }
 0x23f   : > { %1880 = vst.msk [vmem:[#allocation3 + $0x40] sm:$0xff] %vm1871_vm10, %v1792_v59 }
 0x241   : > { %v1637_v60 = vpop.permute.xlu1 %1636 }
 0x242   : > { %1706 = vst.msk [vmem:[#allocation3 + $0xd8] sm:$0xff] %vm1678_vm9, %v1637_v60  ;;  %v1824_v13 = vpop.permute.xlu0 %1823 }
 0x243   : > { %1896 = vst.msk [vmem:[#allocation3 + $0xc0] sm:$0xff] %vm1871_vm10, %v1824_v13 }
 0x245   : > { %v1794_v16 = vpop.permute.xlu1 %1793 }
 0x246   : > { %1881 = vst.msk [vmem:[#allocation3 + $0x48] sm:$0xff] %vm1871_vm10, %v1794_v16  ;;  %v1796_v7 = vpop.permute.xlu0 %1795  ;;  %v1912_v53 = vld [vmem:[#allocation3 + $0x40] sm:$0xff] }
 0x247   : > { %1882 = vst.msk [vmem:[#allocation3 + $0x50] sm:$0xff] %vm1871_vm10, %v1796_v7 }
 0x249   : > { %v1826_v61 = vpop.permute.xlu1 %1825 }
 0x24a   : > { %1897 = vst.msk [vmem:[#allocation3 + $0xc8] sm:$0xff] %vm1871_vm10, %v1826_v61  ;;  %v1828_v55 = vpop.permute.xlu0 %1827  ;;  %v1928_v9 = vld [vmem:[#allocation3 + $0xc0] sm:$0xff] }
 0x24b   : > { %1898 = vst.msk [vmem:[#allocation3 + $0xd0] sm:$0xff] %vm1871_vm10, %v1828_v55 }
 0x24d   : > { %v1798_v8 = vpop.permute.xlu1 %1797  ;;  %v1913_v17 = vld [vmem:[#allocation3 + $0x48] sm:$0xff] }
 0x24e   : > { %1883 = vst.msk [vmem:[#allocation3 + $0x58] sm:$0xff] %vm1871_vm10, %v1798_v8  ;;  %v1940_v20 = vpack.c.bf16 %v1913_v17, %v1912_v53  ;;  %v1027_v56 = vpop.permute.xlu0 %1026  ;;  %v1914_v32 = vld [vmem:[#allocation3 + $0x50] sm:$0xff] }
 0x24f   : > { %1111 = vst.msk [vmem:[#allocation3 + $0x60] sm:$0xff] %vm1098_vm6, %v1027_v56 }
 0x250   : > { %2371 = vmatprep.mubr.msk.bf16.mxu0 %vm1995_vm11, %v1940_v20 }
 0x251   : > { %v1830_v27 = vpop.permute.xlu1 %1829  ;;  %v1929_v10 = vld [vmem:[#allocation3 + $0xc8] sm:$0xff] }
 0x252   : > { %1899 = vst.msk [vmem:[#allocation3 + $0xd8] sm:$0xff] %vm1871_vm10, %v1830_v27  ;;  %v1948_v11 = vpack.c.bf16 %v1929_v10, %v1928_v9  ;;  %v1059_v50 = vpop.permute.xlu0 %1058  ;;  %v1930_v33 = vld [vmem:[#allocation3 + $0xd0] sm:$0xff] }
 0x253   : > { %1127 = vst.msk [vmem:[#allocation3 + $0xe0] sm:$0xff] %vm1098_vm6, %v1059_v50 }
 0x254   : > { %2387 = vmatprep.mubr.msk.bf16.mxu1 %vm1995_vm11, %v1948_v11 }
 0x255   : > { %v1029_v21 = vpop.permute.xlu1 %1028  ;;  %v1915_v31 = vld [vmem:[#allocation3 + $0x58] sm:$0xff] }
 0x256   : > { %1112 = vst.msk [vmem:[#allocation3 + $0x68] sm:$0xff] %vm1098_vm6, %v1029_v21  ;;  %v1941_v18 = vpack.c.bf16 %v1915_v31, %v1914_v32  ;;  %v1031_v30 = vpop.permute.xlu0 %1030 }
 0x257   : > { %1113 = vst.msk [vmem:[#allocation3 + $0x70] sm:$0xff] %vm1098_vm6, %v1031_v30 }
 0x258   : > { %2372 = vmatmul.mubr.msk.bf16.gmra.mrb[8].mxu0 %vm1995_vm11, %v1941_v18 }
 0x259   : > { %v1061_v40 = vpop.permute.xlu1 %1060  ;;  %v1931_v37 = vld [vmem:[#allocation3 + $0xd8] sm:$0xff] }
 0x25a   : > { %1128 = vst.msk [vmem:[#allocation3 + $0xe8] sm:$0xff] %vm1098_vm6, %v1061_v40  ;;  %v1949_v43 = vpack.c.bf16 %v1931_v37, %v1930_v33  ;;  %v1063_v35 = vpop.permute.xlu0 %1062 }
 0x25b   : > { %1129 = vst.msk [vmem:[#allocation3 + $0xf0] sm:$0xff] %vm1098_vm6, %v1063_v35 }
 0x25c   : > { %2388 = vmatmul.mubr.msk.bf16.gmra.mrb[8].mxu1 %vm1995_vm11, %v1949_v43 }
 0x25d   : > { %v1033_v29 = vpop.permute.xlu1 %1032 }
 0x25e   : > { %1114 = vst.msk [vmem:[#allocation3 + $0x78] sm:$0xff] %vm1098_vm6, %v1033_v29  ;;  %v1220_v48 = vpop.permute.xlu0 %1219 }
 0x25f   : > { %1304 = vst.msk [vmem:[#allocation3 + $0x60] sm:$0xff] %vm1291_vm7, %v1220_v48 }
 0x261   : > { %v1065_v38 = vpop.permute.xlu1 %1064 }
 0x262   : > { %1130 = vst.msk [vmem:[#allocation3 + $0xf8] sm:$0xff] %vm1098_vm6, %v1065_v38  ;;  %v1252_v46 = vpop.permute.xlu0 %1251 }
 0x263   : > { %1320 = vst.msk [vmem:[#allocation3 + $0xe0] sm:$0xff] %vm1291_vm7, %v1252_v46 }
 0x265   : > { %v1222_v62 = vpop.permute.xlu1 %1221 }
 0x266   : > { %1305 = vst.msk [vmem:[#allocation3 + $0x68] sm:$0xff] %vm1291_vm7, %v1222_v62  ;;  %v1224_v24 = vpop.permute.xlu0 %1223 }
 0x267   : > { %1306 = vst.msk [vmem:[#allocation3 + $0x70] sm:$0xff] %vm1291_vm7, %v1224_v24 }
 0x269   : > { %v1254_v54 = vpop.permute.xlu1 %1253 }
 0x26a   : > { %1321 = vst.msk [vmem:[#allocation3 + $0xe8] sm:$0xff] %vm1291_vm7, %v1254_v54  ;;  %v1256_v51 = vpop.permute.xlu0 %1255 }
 0x26b   : > { %1322 = vst.msk [vmem:[#allocation3 + $0xf0] sm:$0xff] %vm1291_vm7, %v1256_v51 }
 0x26d   : > { %v1226_v1 = vpop.permute.xlu1 %1225 }
 0x26e   : > { %1307 = vst.msk [vmem:[#allocation3 + $0x78] sm:$0xff] %vm1291_vm7, %v1226_v1  ;;  %v1414_v25 = vpop.permute.xlu0 %1413 }
 0x26f   : > { %1498 = vst.msk [vmem:[#allocation3 + $0x60] sm:$0xff] %vm1485_vm8, %v1414_v25 }
 0x271   : > { %v1258_v26 = vpop.permute.xlu1 %1257 }
 0x272   : > { %1323 = vst.msk [vmem:[#allocation3 + $0xf8] sm:$0xff] %vm1291_vm7, %v1258_v26  ;;  %v1446_v63 = vpop.permute.xlu0 %1445 }
 0x273   : > { %1514 = vst.msk [vmem:[#allocation3 + $0xe0] sm:$0xff] %vm1485_vm8, %v1446_v63 }
 0x275   : > { %v1416_v3 = vpop.permute.xlu1 %1415 }
 0x276   : > { %1499 = vst.msk [vmem:[#allocation3 + $0x68] sm:$0xff] %vm1485_vm8, %v1416_v3  ;;  %v1418_v28 = vpop.permute.xlu0 %1417 }
 0x277   : > { %1500 = vst.msk [vmem:[#allocation3 + $0x70] sm:$0xff] %vm1485_vm8, %v1418_v28 }
 0x279   : > { %v1448_v15 = vpop.permute.xlu1 %1447 }
 0x27a   : > { %1515 = vst.msk [vmem:[#allocation3 + $0xe8] sm:$0xff] %vm1485_vm8, %v1448_v15  ;;  %v1450_v14 = vpop.permute.xlu0 %1449 }
 0x27b   : > { %1516 = vst.msk [vmem:[#allocation3 + $0xf0] sm:$0xff] %vm1485_vm8, %v1450_v14 }
 0x27d   : > { %v1420_v57 = vpop.permute.xlu1 %1419 }
 0x27e   : > { %1501 = vst.msk [vmem:[#allocation3 + $0x78] sm:$0xff] %vm1485_vm8, %v1420_v57  ;;  %v1607_v2 = vpop.permute.xlu0 %1606 }
 0x27f   : > { %1691 = vst.msk [vmem:[#allocation3 + $0x60] sm:$0xff] %vm1678_vm9, %v1607_v2 }
 0x281   : > { %v1452_v22 = vpop.permute.xlu1 %1451 }
 0x282   : > { %1517 = vst.msk [vmem:[#allocation3 + $0xf8] sm:$0xff] %vm1485_vm8, %v1452_v22  ;;  %v1639_v5 = vpop.permute.xlu0 %1638 }
 0x283   : > { %1707 = vst.msk [vmem:[#allocation3 + $0xe0] sm:$0xff] %vm1678_vm9, %v1639_v5 }
 0x285   : > { %v1609_v19 = vpop.permute.xlu1 %1608 }
 0x286   : > { %1692 = vst.msk [vmem:[#allocation3 + $0x68] sm:$0xff] %vm1678_vm9, %v1609_v19  ;;  %v1611_v41 = vpop.permute.xlu0 %1610 }
 0x287   : > { %1693 = vst.msk [vmem:[#allocation3 + $0x70] sm:$0xff] %vm1678_vm9, %v1611_v41 }
 0x289   : > { %v1641_v45 = vpop.permute.xlu1 %1640 }
 0x28a   : > { %1708 = vst.msk [vmem:[#allocation3 + $0xe8] sm:$0xff] %vm1678_vm9, %v1641_v45  ;;  %v1643_v42 = vpop.permute.xlu0 %1642 }
 0x28b   : > { %v2365_v36 = vpop.f32.mrb[0].mxu0  ;;  %1709 = vst.msk [vmem:[#allocation3 + $0xf0] sm:$0xff] %vm1678_vm9, %v1643_v42 }
 0x28c   : > { %v2091_v44 = vadd.f32 %v2365_v36, %v3518_v4  ;;  %v2082_v49 = vpop.f32.mrb[1].mxu0 }
 0x28d   : > { %v2083_v47 = vadd.f32 %v3518_v4, %v2082_v49  ;;  %v1613_v39 = vpop.permute.xlu1 %1612  ;;  %v2366_v23 = vpop.f32.mrb[2].mxu0 }
 0x28e   : > { %2212 = vst.msk [vmem:[%s3526_s13 + $0x10] sm:$0xff] %vm2209_vm12, %v2091_v44  ;;  %v2094_v6 = vadd.f32 %v2366_v23, %v3518_v4  ;;  %v2085_v0 = vpop.f32.mrb[3].mxu0  ;;  %v1800_v34 = vpop.permute.xlu0 %1799 }
 0x28f   : > { %1694 = vst.msk [vmem:[#allocation3 + $0x78] sm:$0xff] %vm1678_vm9, %v1613_v39  ;;  %v2086_v52 = vadd.f32 %v3518_v4, %v2085_v0  ;;  %v2381_v58 = vpop.f32.mrb[0].mxu1 }
 0x290   : > { %2210 = vst.msk [vmem:[%s3526_s13] sm:$0xff] %vm2209_vm12, %v2083_v47  ;;  %2213 = vst.msk [vmem:[%s3526_s13 + $0x18] sm:$0xff] %vm2209_vm12, %v2094_v6  ;;  %v2155_v12 = vadd.f32 %v2381_v58, %v3518_v4  ;;  %v2146_v59 = vpop.f32.mrb[1].mxu1 }
 0x291   : > { %1884 = vst.msk [vmem:[#allocation3 + $0x60] sm:$0xff] %vm1871_vm10, %v1800_v34  ;;  %v2147_v60 = vadd.f32 %v3518_v4, %v2146_v59  ;;  %v2382_v13 = vpop.f32.mrb[2].mxu1  ;;  %v1645_v16 = vpop.permute.xlu1 %1644 }
 0x292   : > { %2211 = vst.msk [vmem:[%s3526_s13 + $0x8] sm:$0xff] %vm2209_vm12, %v2086_v52  ;;  %2228 = vst.msk [vmem:[%s3526_s13 + $0x90] sm:$0xff] %vm2209_vm12, %v2155_v12  ;;  %v2158_v7 = vadd.f32 %v2382_v13, %v3518_v4  ;;  %v2149_v61 = vpop.f32.mrb[3].mxu1  ;;  %v1832_v55 = vpop.permute.xlu0 %1831 }
 0x293   : > { %1710 = vst.msk [vmem:[#allocation3 + $0xf8] sm:$0xff] %vm1678_vm9, %v1645_v16  ;;  %v2150_v53 = vadd.f32 %v3518_v4, %v2149_v61 }
 0x294   : > { %2226 = vst.msk [vmem:[%s3526_s13 + $0x80] sm:$0xff] %vm2209_vm12, %v2147_v60  ;;  %2229 = vst.msk [vmem:[%s3526_s13 + $0x98] sm:$0xff] %vm2209_vm12, %v2158_v7 }
 0x295   : > { %1900 = vst.msk [vmem:[#allocation3 + $0xe0] sm:$0xff] %vm1871_vm10, %v1832_v55  ;;  %v1802_v8 = vpop.permute.xlu1 %1801 }
 0x296   : > { %2227 = vst.msk [vmem:[%s3526_s13 + $0x88] sm:$0xff] %vm2209_vm12, %v2150_v53  ;;  %v1804_v17 = vpop.permute.xlu0 %1803 }
 0x297   : > { %1885 = vst.msk [vmem:[#allocation3 + $0x68] sm:$0xff] %vm1871_vm10, %v1802_v8  ;;  %1886 = vst.msk [vmem:[#allocation3 + $0x70] sm:$0xff] %vm1871_vm10, %v1804_v17 }
 0x298   : > { %v1916_v9 = vld [vmem:[#allocation3 + $0x60] sm:$0xff] }
 0x299   : > { %v1834_v20 = vpop.permute.xlu1 %1833 }
 0x29a   : > { %1901 = vst.msk [vmem:[#allocation3 + $0xe8] sm:$0xff] %vm1871_vm10, %v1834_v20  ;;  %v1836_v56 = vpop.permute.xlu0 %1835 }
 0x29b   : > { %1902 = vst.msk [vmem:[#allocation3 + $0xf0] sm:$0xff] %vm1871_vm10, %v1836_v56 }
 0x29c   : > { %v1932_v32 = vld [vmem:[#allocation3 + $0xe0] sm:$0xff] }
 0x29d   : > { %v1806_v27 = vpop.permute.xlu1 %1805 }
 0x29e   : > { %v1917_v10 = vld [vmem:[#allocation3 + $0x68] sm:$0xff]  ;;  %1887 = vst.msk [vmem:[#allocation3 + $0x78] sm:$0xff] %vm1871_vm10, %v1806_v27  ;;  %v1918_v18 = vld [vmem:[#allocation3 + $0x70] sm:$0xff] }
 0x29f   : > { %v1942_v11 = vpack.c.bf16 %v1917_v10, %v1916_v9 }
 0x2a1   : > { %2375 = vmatprep.mubr.msk.bf16.mxu0 %vm1995_vm11, %v1942_v11  ;;  %v1838_v50 = vpop.permute.xlu1 %1837  ;;  %v1933_v21 = vld [vmem:[#allocation3 + $0xe8] sm:$0xff] }
 0x2a2   : > { %1903 = vst.msk [vmem:[#allocation3 + $0xf8] sm:$0xff] %vm1871_vm10, %v1838_v50  ;;  %v1950_v31 = vpack.c.bf16 %v1933_v21, %v1932_v32  ;;  %v1934_v40 = vld [vmem:[#allocation3 + $0xf0] sm:$0xff] }
 0x2a4   : > { %2391 = vmatprep.mubr.msk.bf16.mxu1 %vm1995_vm11, %v1950_v31 }
 0x2a5   : > { %v1919_v33 = vld [vmem:[#allocation3 + $0x78] sm:$0xff] }
 0x2a6   : > { %v1943_v30 = vpack.c.bf16 %v1919_v33, %v1918_v18 }
 0x2a8   : > { %2376 = vmatmul.mubr.msk.bf16.gmra.mrb[12].mxu0 %vm1995_vm11, %v1943_v30 }
 0x2a9   : > { %v1935_v37 = vld [vmem:[#allocation3 + $0xf8] sm:$0xff] }
 0x2aa   : > { %v1951_v43 = vpack.c.bf16 %v1935_v37, %v1934_v40 }
 0x2ac   : > { %2392 = vmatmul.mubr.msk.bf16.gmra.mrb[12].mxu1 %vm1995_vm11, %v1951_v43 }
 0x2db   : > { %v2369_v35 = vpop.f32.mrb[4].mxu0 }
 0x2dc   : > { %v2107_v29 = vadd.f32 %v2369_v35, %v3518_v4  ;;  %v2098_v48 = vpop.f32.mrb[5].mxu0 }
 0x2dd   : > { %v2099_v38 = vadd.f32 %v3518_v4, %v2098_v48  ;;  %v2370_v46 = vpop.f32.mrb[6].mxu0 }
 0x2de   : > { %2216 = vst.msk [vmem:[%s3526_s13 + $0x30] sm:$0xff] %vm2209_vm12, %v2107_v29  ;;  %v2110_v62 = vadd.f32 %v2370_v46, %v3518_v4  ;;  %v2101_v24 = vpop.f32.mrb[7].mxu0 }
 0x2df   : > { %2214 = vst.msk [vmem:[%s3526_s13 + $0x20] sm:$0xff] %vm2209_vm12, %v2099_v38  ;;  %v2102_v54 = vadd.f32 %v3518_v4, %v2101_v24  ;;  %v2385_v51 = vpop.f32.mrb[4].mxu1 }
 0x2e0   : > { %2217 = vst.msk [vmem:[%s3526_s13 + $0x38] sm:$0xff] %vm2209_vm12, %v2110_v62  ;;  %v2171_v1 = vadd.f32 %v2385_v51, %v3518_v4  ;;  %v2162_v25 = vpop.f32.mrb[5].mxu1 }
 0x2e1   : > { %2215 = vst.msk [vmem:[%s3526_s13 + $0x28] sm:$0xff] %vm2209_vm12, %v2102_v54  ;;  %v2163_v26 = vadd.f32 %v3518_v4, %v2162_v25  ;;  %v2386_v63 = vpop.f32.mrb[6].mxu1 }
 0x2e2   : > { %2232 = vst.msk [vmem:[%s3526_s13 + $0xb0] sm:$0xff] %vm2209_vm12, %v2171_v1  ;;  %v2174_v3 = vadd.f32 %v2386_v63, %v3518_v4  ;;  %v2165_v28 = vpop.f32.mrb[7].mxu1 }
 0x2e3   : > { %2230 = vst.msk [vmem:[%s3526_s13 + $0xa0] sm:$0xff] %vm2209_vm12, %v2163_v26  ;;  %v2166_v15 = vadd.f32 %v3518_v4, %v2165_v28 }
 0x2e4   : > { %2233 = vst.msk [vmem:[%s3526_s13 + $0xb8] sm:$0xff] %vm2209_vm12, %v2174_v3 }
 0x2e5   : > { %2231 = vst.msk [vmem:[%s3526_s13 + $0xa8] sm:$0xff] %vm2209_vm12, %v2166_v15 }
 0x32b   : > { %v2373_v14 = vpop.f32.mrb[8].mxu0 }
 0x32c   : > { %v2123_v57 = vadd.f32 %v2373_v14, %v3518_v4  ;;  %v2114_v2 = vpop.f32.mrb[9].mxu0 }
 0x32d   : > { %v2115_v22 = vadd.f32 %v3518_v4, %v2114_v2  ;;  %v2374_v5 = vpop.f32.mrb[10].mxu0 }
 0x32e   : > { %2220 = vst.msk [vmem:[%s3526_s13 + $0x50] sm:$0xff] %vm2209_vm12, %v2123_v57  ;;  %v2126_v19 = vadd.f32 %v2374_v5, %v3518_v4  ;;  %v2117_v41 = vpop.f32.mrb[11].mxu0 }
 0x32f   : > { %2218 = vst.msk [vmem:[%s3526_s13 + $0x40] sm:$0xff] %vm2209_vm12, %v2115_v22  ;;  %v2118_v45 = vadd.f32 %v3518_v4, %v2117_v41  ;;  %v2389_v36 = vpop.f32.mrb[8].mxu1 }
 0x330   : > { %2221 = vst.msk [vmem:[%s3526_s13 + $0x58] sm:$0xff] %vm2209_vm12, %v2126_v19  ;;  %v2187_v42 = vadd.f32 %v2389_v36, %v3518_v4  ;;  %v2178_v44 = vpop.f32.mrb[9].mxu1 }
 0x331   : > { %2219 = vst.msk [vmem:[%s3526_s13 + $0x48] sm:$0xff] %vm2209_vm12, %v2118_v45  ;;  %v2179_v49 = vadd.f32 %v3518_v4, %v2178_v44  ;;  %v2390_v47 = vpop.f32.mrb[10].mxu1 }
 0x332   : > { %2236 = vst.msk [vmem:[%s3526_s13 + $0xd0] sm:$0xff] %vm2209_vm12, %v2187_v42  ;;  %v2190_v39 = vadd.f32 %v2390_v47, %v3518_v4  ;;  %v2181_v23 = vpop.f32.mrb[11].mxu1 }
 0x333   : > { %2234 = vst.msk [vmem:[%s3526_s13 + $0xc0] sm:$0xff] %vm2209_vm12, %v2179_v49  ;;  %v2182_v6 = vadd.f32 %v3518_v4, %v2181_v23 }
 0x334   : > { %2237 = vst.msk [vmem:[%s3526_s13 + $0xd8] sm:$0xff] %vm2209_vm12, %v2190_v39 }
 0x335   : > { %2235 = vst.msk [vmem:[%s3526_s13 + $0xc8] sm:$0xff] %vm2209_vm12, %v2182_v6 }
 0x37b   : > { %v2377_v0 = vpop.f32.mrb[12].mxu0 }
 0x37c   : > { %v2139_v52 = vadd.f32 %v2377_v0, %v3518_v4  ;;  %v2130_v58 = vpop.f32.mrb[13].mxu0 }
 0x37d   : > { %v2131_v34 = vadd.f32 %v3518_v4, %v2130_v58  ;;  %v2378_v12 = vpop.f32.mrb[14].mxu0 }
 0x37e   : > { %2224 = vst.msk [vmem:[%s3526_s13 + $0x70] sm:$0xff] %vm2209_vm12, %v2139_v52  ;;  %v2142_v59 = vadd.f32 %v2378_v12, %v3518_v4  ;;  %v2133_v60 = vpop.f32.mrb[15].mxu0 }
 0x37f   : > { %2222 = vst.msk [vmem:[%s3526_s13 + $0x60] sm:$0xff] %vm2209_vm12, %v2131_v34  ;;  %v2134_v13 = vadd.f32 %v3518_v4, %v2133_v60  ;;  %v2393_v16 = vpop.f32.mrb[12].mxu1 }
 0x380   : > { %2225 = vst.msk [vmem:[%s3526_s13 + $0x78] sm:$0xff] %vm2209_vm12, %v2142_v59  ;;  %v2203_v7 = vadd.f32 %v2393_v16, %v3518_v4  ;;  %v2194_v61 = vpop.f32.mrb[13].mxu1 }
 0x381   : > { %2223 = vst.msk [vmem:[%s3526_s13 + $0x68] sm:$0xff] %vm2209_vm12, %v2134_v13  ;;  %v2195_v53 = vadd.f32 %v3518_v4, %v2194_v61  ;;  %v2394_v55 = vpop.f32.mrb[14].mxu1 }
 0x382   : > { %2240 = vst.msk [vmem:[%s3526_s13 + $0xf0] sm:$0xff] %vm2209_vm12, %v2203_v7  ;;  %v2206_v8 = vadd.f32 %v2394_v55, %v3518_v4  ;;  %v2197_v17 = vpop.f32.mrb[15].mxu1 }
 0x383   : > { %2238 = vst.msk [vmem:[%s3526_s13 + $0xe0] sm:$0xff] %vm2209_vm12, %v2195_v53  ;;  %v2198_v20 = vadd.f32 %v3518_v4, %v2197_v17 }
 0x384   : > { %2241 = vst.msk [vmem:[%s3526_s13 + $0xf8] sm:$0xff] %vm2209_vm12, %v2206_v8 }
 0x385   : > { %2239 = vst.msk [vmem:[%s3526_s13 + $0xe8] sm:$0xff] %vm2209_vm12, %v2198_v20 }
 0x386 PF: > { %s15_s14 = sadd.s32 1, %s2435_s14  }
 0x387   : > { %p12_p4 = scmp.ge.s32.totalorder %s15_s14, 4  }
 0x389   :  { %14 = sbr.rel (!%p12_p4) target bundleno = 3 (0x3), region = 64 }

// kernel: iradon_map_forward.9
= control target key start
LH: loop header
LB: loop body
LE: loop exit
PB: predicated region body
PF: predicated region fallthrough
CT: control target
= control target key end

     0   :  { %s4692_s18 = smov 0   ;;  %s7334_s0 = inlined_call_operand.vmem [shape: f32[2,16,16,8], index: 0, kind: input, shape index: {}]   ;;  %s7335_s1 = inlined_call_operand.vmem [shape: bf16[72,8], index: 1, kind: input, shape index: {}]   ;;  %s7336_s2 = inlined_call_operand.vmem [shape: f32[1,8], index: 2, kind: input, shape index: {}]   ;;  %s7337_s3 = inlined_call_operand.vmem [shape: bf16[72,8], index: 3, kind: input, shape index: {}]   ;;  %s7338_s4 = inlined_call_operand.vmem [shape: f32[1,8], index: 4, kind: input, shape index: {}]   ;;  %s7339_s5 = inlined_call_operand.vmem [shape: f32[2,16,16,8], index: 5, kind: output, shape index: {}]  }
   0x1 LB: > { %s4433_s19 = sadd.s32 4294967295, %s4651_s18   ;;  %p4437_p0 = scmp.ge.s32.totalorder %s4651_s18, 1  ;;  %s4651_s18 = sphi %s4692_s18, %s15_s18  }
   0x2   : > { %p187_p1 = scmp.lt.s32.totalorder %s4651_s18, 3 }
   0x4   : > { %p188_p2 = pnand %p4437_p0, %p187_p1 }
   0x6   : > { %191 = sbr.rel (%p188_p2) target bundleno = 1707 (0x6ab), region = 40 }
   0xd   : > { %vm258_vm0 = vcmask 64512   ;;  %p4702_p3 = scmp.lt.s32.totalorder %s4433_s19, 1  ;;  %vm261_vm1 = vcmask 58368   ;;  %v7340_v0 = vmov 0.0   ;;  %s4654_s25 = smov 8   ;;  %vm571_vm2 = vcmask 130112  }
   0xe   : > { %259 = vst.msk [vmem:[#allocation2] sm:$0xff] %vm258_vm0, %v7340_v0  ;;  %260 = vst.msk [vmem:[#allocation2 + $0x8] sm:$0xff] %vm258_vm0, %v7340_v0  ;;  %s4655_s26 = smov 16   ;;  %s4656_s27 = smov 24   ;;  %vm764_vm3 = vcmask 195712   ;;  %vm957_vm4 = vcmask 261312  }
   0xf   : > { %263 = vst.msk [vmem:[#allocation2 + $0x18] sm:$0xff] %vm258_vm0, %v7340_v0  ;;  %264 = vst.msk [vmem:[#allocation2 + $0x20] sm:$0xff] %vm258_vm0, %v7340_v0  ;;  %s7547_s19 = smov (!%p4702_p3, %s4433_s19), 1  ;;  %s4657_s28 = smov 32   ;;  %vm1150_vm5 = vcmask 326912   ;;  %vm1343_vm6 = vcmask 392512  }
  0x10   : > { %266 = vst.msk [vmem:[#allocation2 + $0x30] sm:$0xff] %vm258_vm0, %v7340_v0  ;;  %267 = vst.msk [vmem:[#allocation2 + $0x38] sm:$0xff] %vm258_vm0, %v7340_v0  ;;  %s4488_s21 = sshll.u32 %s7547_s19, 8  ;;  %s4658_s29 = smov 40   ;;  %vm2096_vm7 = vcmask 1043456   ;;  %vm1537_vm8 = vcmask 458112  }
  0x11   : > { %269 = vst.msk [vmem:[#allocation2 + $0x48] sm:$0xff] %vm258_vm0, %v7340_v0  ;;  %270 = vst.msk [vmem:[#allocation2 + $0x50] sm:$0xff] %vm258_vm0, %v7340_v0  ;;  %s4826_s24 = scalar_lea.vmem %s7334_s0, %s4488_s21  ;;  %s4659_s30 = smov 48   ;;  %vm1730_vm9 = vcmask 523712   ;;  %vm1923_vm10 = vcmask 589312   ;;  %vm2047_vm11 = vcmask 588800  }
  0x12   : > { %272 = vst.msk [vmem:[#allocation2 + $0x60] sm:$0xff] %vm258_vm0, %v7340_v0  ;;  %273 = vst.msk [vmem:[#allocation2 + $0x68] sm:$0xff] %vm258_vm0, %v7340_v0  ;;  %v4829_v1 = vld [vmem:[%s4826_s24] sm:$0xff]  ;;  %v4832_v2 = vld [vmem:[%s4826_s24 + $0x8] sm:$0xff]  ;;  %s4660_s10 = smov 56   ;;  %s4661_s15 = smov 64  }
  0x13   : > { %275 = vst.msk [vmem:[#allocation2 + $0x78] sm:$0xff] %vm258_vm0, %v7340_v0  ;;  %276 = vst.msk [vmem:[#allocation2 + $0x80] sm:$0xff] %vm258_vm0, %v7340_v0  ;;  %v4835_v3 = vld [vmem:[%s4826_s24 + $0x10] sm:$0xff]  ;;  %v4844_v4 = vld [vmem:[%s4826_s24 + $0x18] sm:$0xff] }
  0x14   : > { %278 = vst.msk [vmem:[#allocation2 + $0x90] sm:$0xff] %vm258_vm0, %v7340_v0  ;;  %279 = vst.msk [vmem:[#allocation2 + $0x98] sm:$0xff] %vm258_vm0, %v7340_v0  ;;  %v4847_v5 = vld [vmem:[%s4826_s24 + $0x20] sm:$0xff]  ;;  %v4850_v6 = vld [vmem:[%s4826_s24 + $0x28] sm:$0xff] }
  0x15   : > { %281 = vst.msk [vmem:[#allocation2 + $0xa8] sm:$0xff] %vm258_vm0, %v7340_v0  ;;  %282 = vst.msk [vmem:[#allocation2 + $0xb0] sm:$0xff] %vm258_vm0, %v7340_v0  ;;  %v411_v7 = vld [vmem:[#allocation2 + $0x1] sm:$0xff]  ;;  %v4859_v9 = vld [vmem:[%s4826_s24 + $0x30] sm:$0xff] }
  0x16   : > { %284 = vst.msk [vmem:[#allocation2 + $0xc0] sm:$0xff] %vm258_vm0, %v7340_v0  ;;  %285 = vst.msk [vmem:[#allocation2 + $0xc8] sm:$0xff] %vm258_vm0, %v7340_v0  ;;  %475 = vrot.lane.b32.xlu0 %v411_v7, %s4654_s25  ;;  %v4865_v10 = vld [vmem:[%s4826_s24 + $0x38] sm:$0xff]  ;;  %v4868_v11 = vld [vmem:[%s4826_s24 + $0x40] sm:$0xff] }
  0x17   : > { %287 = vst.msk [vmem:[#allocation2 + $0xd8] sm:$0xff] %vm258_vm0, %v7340_v0  ;;  %288 = vst.msk [vmem:[#allocation2 + $0xe0] sm:$0xff] %vm258_vm0, %v7340_v0  ;;  %v4871_v12 = vld [vmem:[%s4826_s24 + $0x48] sm:$0xff]  ;;  %v4880_v13 = vld [vmem:[%s4826_s24 + $0x50] sm:$0xff] }
  0x18   : > { %290 = vst.msk [vmem:[#allocation2 + $0xf0] sm:$0xff] %vm258_vm0, %v7340_v0  ;;  %291 = vst.msk [vmem:[#allocation2 + $0xf8] sm:$0xff] %vm258_vm0, %v7340_v0  ;;  %v4883_v14 = vld [vmem:[%s4826_s24 + $0x58] sm:$0xff]  ;;  %v4886_v15 = vld [vmem:[%s4826_s24 + $0x60] sm:$0xff] }
  0x19   : > { %293 = vst.msk [vmem:[#allocation2 + $0x108] sm:$0xff] %vm258_vm0, %v7340_v0  ;;  %294 = vst.msk [vmem:[#allocation2 + $0x110] sm:$0xff] %vm258_vm0, %v7340_v0  ;;  %v4895_v16 = vld [vmem:[%s4826_s24 + $0x68] sm:$0xff]  ;;  %v4898_v17 = vld [vmem:[%s4826_s24 + $0x70] sm:$0xff] }
  0x1a   : > { %296 = vst.msk [vmem:[#allocation2 + $0x120] sm:$0xff] %vm258_vm0, %v7340_v0  ;;  %297 = vst.msk [vmem:[#allocation2 + $0x128] sm:$0xff] %vm258_vm0, %v7340_v0  ;;  %v4901_v18 = vld [vmem:[%s4826_s24 + $0x78] sm:$0xff]  ;;  %v4910_v19 = vld [vmem:[%s4826_s24 + $0x80] sm:$0xff] }
  0x1b   : > { %299 = vst.msk [vmem:[#allocation2 + $0x138] sm:$0xff] %vm258_vm0, %v7340_v0  ;;  %300 = vst.msk [vmem:[#allocation2 + $0x140] sm:$0xff] %vm258_vm0, %v7340_v0  ;;  %v4913_v20 = vld [vmem:[%s4826_s24 + $0x88] sm:$0xff]  ;;  %v4916_v21 = vld [vmem:[%s4826_s24 + $0x90] sm:$0xff] }
  0x1c   : > { %302 = vst.msk [vmem:[#allocation2 + $0x150] sm:$0xff] %vm258_vm0, %v7340_v0  ;;  %303 = vst.msk [vmem:[#allocation2 + $0x158] sm:$0xff] %vm258_vm0, %v7340_v0  ;;  %v4926_v22 = vld [vmem:[%s4826_s24 + $0x98] sm:$0xff]  ;;  %v4929_v23 = vld [vmem:[%s4826_s24 + $0xa0] sm:$0xff] }
  0x1d   : > { %305 = vst.msk [vmem:[#allocation2 + $0x168] sm:$0xff] %vm258_vm0, %v7340_v0  ;;  %306 = vst.msk [vmem:[#allocation2 + $0x170] sm:$0xff] %vm258_vm0, %v7340_v0  ;;  %v4932_v24 = vld [vmem:[%s4826_s24 + $0xa8] sm:$0xff]  ;;  %v4949_v28 = vld [vmem:[%s4826_s24 + $0xb0] sm:$0xff] }
  0x1e   : > { %308 = vst.msk [vmem:[#allocation2 + $0x180] sm:$0xff] %vm258_vm0, %v7340_v0  ;;  %309 = vst.msk [vmem:[#allocation2 + $0x188] sm:$0xff] %vm258_vm0, %v7340_v0  ;;  %v4952_v29 = vld [vmem:[%s4826_s24 + $0xb8] sm:$0xff]  ;;  %v4971_v33 = vld [vmem:[%s4826_s24 + $0xc0] sm:$0xff] }
  0x1f   : > { %311 = vst.msk [vmem:[#allocation2 + $0x198] sm:$0xff] %vm258_vm0, %v7340_v0  ;;  %312 = vst.msk [vmem:[#allocation2 + $0x1a0] sm:$0xff] %vm258_vm0, %v7340_v0  ;;  %v4974_v34 = vld [vmem:[%s4826_s24 + $0xc8] sm:$0xff]  ;;  %v4977_v35 = vld [vmem:[%s4826_s24 + $0xd0] sm:$0xff] }
  0x20   : > { %262 = vst.msk [vmem:[#allocation2 + $0x10] sm:$0x3] %vm261_vm1, %v7340_v0  ;;  %265 = vst.msk [vmem:[#allocation2 + $0x28] sm:$0x3] %vm261_vm1, %v7340_v0  ;;  %v4988_v36 = vld [vmem:[%s4826_s24 + $0xd8] sm:$0xff]  ;;  %v4991_v37 = vld [vmem:[%s4826_s24 + $0xe0] sm:$0xff] }
  0x21   : > { %268 = vst.msk [vmem:[#allocation2 + $0x40] sm:$0x3] %vm261_vm1, %v7340_v0  ;;  %271 = vst.msk [vmem:[#allocation2 + $0x58] sm:$0x3] %vm261_vm1, %v7340_v0  ;;  %v4994_v38 = vld [vmem:[%s4826_s24 + $0xe8] sm:$0xff]  ;;  %v347_v49 = vld [vmem:[#allocation2] sm:$0xff] }
  0x22   : > { %274 = vst.msk [vmem:[#allocation2 + $0x70] sm:$0x3] %vm261_vm1, %v7340_v0  ;;  %277 = vst.msk [vmem:[#allocation2 + $0x88] sm:$0x3] %vm261_vm1, %v7340_v0  ;;  %v5032_v47 = vld [vmem:[#allocation2 + $0x2] sm:$0xff] }
  0x23   : > { %280 = vst.msk [vmem:[#allocation2 + $0xa0] sm:$0x3] %vm261_vm1, %v7340_v0  ;;  %283 = vst.msk [vmem:[#allocation2 + $0xb8] sm:$0x3] %vm261_vm1, %v7340_v0  ;;  %v348_v52 = vld [vmem:[#allocation2 + $0x8] sm:$0xff] }
  0x24   : > { %286 = vst.msk [vmem:[#allocation2 + $0xd0] sm:$0x3] %vm261_vm1, %v7340_v0  ;;  %289 = vst.msk [vmem:[#allocation2 + $0xe8] sm:$0x3] %vm261_vm1, %v7340_v0 }
  0x25   : > { %292 = vst.msk [vmem:[#allocation2 + $0x100] sm:$0x3] %vm261_vm1, %v7340_v0  ;;  %295 = vst.msk [vmem:[#allocation2 + $0x118] sm:$0x3] %vm261_vm1, %v7340_v0 }
  0x26   : > { %298 = vst.msk [vmem:[#allocation2 + $0x130] sm:$0x3] %vm261_vm1, %v7340_v0  ;;  %301 = vst.msk [vmem:[#allocation2 + $0x148] sm:$0x3] %vm261_vm1, %v7340_v0 }
  0x27   : > { %304 = vst.msk [vmem:[#allocation2 + $0x160] sm:$0x3] %vm261_vm1, %v7340_v0  ;;  %307 = vst.msk [vmem:[#allocation2 + $0x178] sm:$0x3] %vm261_vm1, %v7340_v0  ;;  %v412_v8 = vld [vmem:[#allocation2 + $0x9] sm:$0xff] }
  0x28   : > { %310 = vst.msk [vmem:[#allocation2 + $0x190] sm:$0x3] %vm261_vm1, %v7340_v0  ;;  %313 = vst.msk [vmem:[#allocation2 + $0x1a8] sm:$0x3] %vm261_vm1, %v7340_v0  ;;  %477 = vrot.lane.b32.xlu0 %v412_v8, %s4654_s25  ;;  %v5006_v40 = vld [vmem:[#allocation2 + $0xa] sm:$0xff] }
  0x29   : > { %7407 = vst [vmem:[#allocation4_spill] sm:$0xff] %v4829_v1  ;;  %7408 = vst [vmem:[#allocation5_spill] sm:$0xff] %v4832_v2 }
  0x2a   : > { %7409 = vst [vmem:[#allocation6_spill] sm:$0xff] %v4835_v3  ;;  %315 = vst.msk [vmem:[#allocation2 + $0x19] sm:$0xff] %vm258_vm0, %v4829_v1  ;;  %v5231_v1 = vld [vmem:[%s4826_s24 + $0xf0] sm:$0xff] }
  0x2b   : > { %316 = vst.msk [vmem:[#allocation2 + $0x21] sm:$0xff] %vm258_vm0, %v4832_v2  ;;  %317 = vst.msk [vmem:[#allocation2 + $0x31] sm:$0xff] %vm258_vm0, %v4835_v3  ;;  %v5234_v3 = vld [vmem:[%s4826_s24 + $0xf8] sm:$0xff] }
  0x2c   : > { %7410 = vst [vmem:[#allocation7_spill] sm:$0xff] %v4844_v4  ;;  %7411 = vst [vmem:[#allocation8_spill] sm:$0xff] %v4847_v5 }
  0x2d   : > { %7412 = vst [vmem:[#allocation9_spill] sm:$0xff] %v4850_v6  ;;  %318 = vst.msk [vmem:[#allocation2 + $0x39] sm:$0xff] %vm258_vm0, %v4844_v4 }
  0x2e   : > { %319 = vst.msk [vmem:[#allocation2 + $0x49] sm:$0xff] %vm258_vm0, %v4847_v5  ;;  %320 = vst.msk [vmem:[#allocation2 + $0x51] sm:$0xff] %vm258_vm0, %v4850_v6 }
  0x2f   : > { %7413 = vst [vmem:[#allocation10_spill] sm:$0xff] %v4859_v9  ;;  %321 = vst.msk [vmem:[#allocation2 + $0x61] sm:$0xff] %vm258_vm0, %v4859_v9 }
  0x30   : > { %7414 = vst [vmem:[#allocation11_spill] sm:$0xff] %v4865_v10  ;;  %7415 = vst [vmem:[#allocation12_spill] sm:$0xff] %v4868_v11 }
  0x31   : > { %7416 = vst [vmem:[#allocation13_spill] sm:$0xff] %v4871_v12  ;;  %322 = vst.msk [vmem:[#allocation2 + $0x69] sm:$0xff] %vm258_vm0, %v4865_v10  ;;  %v4934_v25 = vld [vmem:[#allocation2 + $0x19] sm:$0xff] }
  0x32   : > { %323 = vst.msk [vmem:[#allocation2 + $0x79] sm:$0xff] %vm258_vm0, %v4868_v11  ;;  %324 = vst.msk [vmem:[#allocation2 + $0x81] sm:$0xff] %vm258_vm0, %v4871_v12  ;;  %v4936_v26 = vld [vmem:[#allocation2 + $0x31] sm:$0xff]  ;;  %479 = vrot.lane.b32.xlu1 %v4934_v25, %s4654_s25  ;;  %v4946_v27 = vld [vmem:[#allocation2 + $0x21] sm:$0xff] }
  0x33   : > { %7417 = vst [vmem:[#allocation14_spill] sm:$0xff] %v4880_v13  ;;  %7418 = vst [vmem:[#allocation15_spill] sm:$0xff] %v4883_v14  ;;  %483 = vrot.lane.b32.xlu0 %v4936_v26, %s4654_s25  ;;  %v5008_v41 = vld [vmem:[#allocation2 + $0x22] sm:$0xff]  ;;  %v5036_v48 = vld [vmem:[#allocation2 + $0x1a] sm:$0xff] }
  0x34   : > { %7419 = vst [vmem:[#allocation16_spill] sm:$0xff] %v4886_v15  ;;  %325 = vst.msk [vmem:[#allocation2 + $0x91] sm:$0xff] %vm258_vm0, %v4880_v13  ;;  %v4964_v31 = vld [vmem:[#allocation2 + $0x39] sm:$0xff]  ;;  %v5060_v55 = vld [vmem:[#allocation2 + $0x30] sm:$0xff] }
  0x35   : > { %326 = vst.msk [vmem:[#allocation2 + $0x99] sm:$0xff] %vm258_vm0, %v4883_v14  ;;  %327 = vst.msk [vmem:[#allocation2 + $0xa9] sm:$0xff] %vm258_vm0, %v4886_v15  ;;  %v4960_v30 = vld [vmem:[#allocation2 + $0x49] sm:$0xff]  ;;  %v4996_v39 = vld [vmem:[#allocation2 + $0x51] sm:$0xff] }
  0x36   : > { %7420 = vst [vmem:[#allocation17_spill] sm:$0xff] %v4895_v16  ;;  %7421 = vst [vmem:[#allocation18_spill] sm:$0xff] %v4898_v17  ;;  %481 = vrot.lane.b32.xlu1 %v4946_v27, %s4654_s25  ;;  %v4968_v32 = vld [vmem:[#allocation2 + $0x61] sm:$0xff]  ;;  %v5038_v50 = vld [vmem:[#allocation2 + $0x18] sm:$0xff] }
  0x37   : > { %7422 = vst [vmem:[#allocation19_spill] sm:$0xff] %v4901_v18  ;;  %328 = vst.msk [vmem:[#allocation2 + $0xb1] sm:$0xff] %vm258_vm0, %v4895_v16  ;;  %487 = vrot.lane.b32.xlu0 %v4960_v30, %s4654_s25  ;;  %v5054_v53 = vld [vmem:[#allocation2 + $0x20] sm:$0xff]  ;;  %v5062_v56 = vld [vmem:[#allocation2 + $0x38] sm:$0xff] }
  0x38   : > { %329 = vst.msk [vmem:[#allocation2 + $0xc1] sm:$0xff] %vm258_vm0, %v4898_v17  ;;  %330 = vst.msk [vmem:[#allocation2 + $0xc9] sm:$0xff] %vm258_vm0, %v4901_v18  ;;  %v5018_v43 = vld [vmem:[#allocation2 + $0x69] sm:$0xff]  ;;  %v5084_v61 = vld [vmem:[#allocation2 + $0x60] sm:$0xff] }
  0x39   : > { %7423 = vst [vmem:[#allocation20_spill] sm:$0xff] %v4910_v19  ;;  %7424 = vst [vmem:[#allocation21_spill] sm:$0xff] %v4913_v20  ;;  %v5010_v42 = vld [vmem:[#allocation2 + $0x79] sm:$0xff]  ;;  %v5026_v45 = vld [vmem:[#allocation2 + $0x81] sm:$0xff] }
  0x3a   : > { %7425 = vst [vmem:[#allocation22_spill] sm:$0xff] %v4916_v21  ;;  %331 = vst.msk [vmem:[#allocation2 + $0xd9] sm:$0xff] %vm258_vm0, %v4910_v19  ;;  %485 = vrot.lane.b32.xlu1 %v4964_v31, %s4654_s25  ;;  %v5074_v58 = vld [vmem:[#allocation2 + $0x48] sm:$0xff]  ;;  %v5076_v59 = vld [vmem:[#allocation2 + $0x50] sm:$0xff] }
  0x3b   : > { %332 = vst.msk [vmem:[#allocation2 + $0xe1] sm:$0xff] %vm258_vm0, %v4913_v20  ;;  %333 = vst.msk [vmem:[#allocation2 + $0xf1] sm:$0xff] %vm258_vm0, %v4916_v21  ;;  %491 = vrot.lane.b32.xlu0 %v4968_v32, %s4654_s25  ;;  %v5022_v44 = vld [vmem:[#allocation2 + $0x91] sm:$0xff]  ;;  %v5086_v62 = vld [vmem:[#allocation2 + $0x68] sm:$0xff] }
  0x3c   : > { %7426 = vst [vmem:[#allocation23_spill] sm:$0xff] %v4926_v22  ;;  %7427 = vst [vmem:[#allocation24_spill] sm:$0xff] %v4929_v23  ;;  %v5030_v46 = vld [vmem:[#allocation2 + $0xa9] sm:$0xff]  ;;  %v5040_v51 = vld [vmem:[#allocation2 + $0x99] sm:$0xff] }
  0x3d   : > { %7428 = vst [vmem:[#allocation25_spill] sm:$0xff] %v4932_v24  ;;  %334 = vst.msk [vmem:[#allocation2 + $0xf9] sm:$0xff] %vm258_vm0, %v4926_v22  ;;  %v5088_v63 = vld [vmem:[#allocation2 + $0x78] sm:$0xff]  ;;  %v5098_v7 = vld [vmem:[#allocation2 + $0x80] sm:$0xff] }
  0x3e   : > { %335 = vst.msk [vmem:[#allocation2 + $0x109] sm:$0xff] %vm258_vm0, %v4929_v23  ;;  %336 = vst.msk [vmem:[#allocation2 + $0x111] sm:$0xff] %vm258_vm0, %v4932_v24  ;;  %489 = vrot.lane.b32.xlu1 %v4996_v39, %s4654_s25  ;;  %v5068_v57 = vld [vmem:[#allocation2 + $0xb1] sm:$0xff] }
  0x3f   : > { %7429 = vst [vmem:[#allocation26_spill] sm:$0xff] %v4949_v28  ;;  %7430 = vst [vmem:[#allocation27_spill] sm:$0xff] %v4952_v29  ;;  %495 = vrot.lane.b32.xlu0 %v5010_v42, %s4654_s25  ;;  %v5056_v54 = vld [vmem:[#allocation2 + $0xc1] sm:$0xff]  ;;  %v5100_v8 = vld [vmem:[#allocation2 + $0x90] sm:$0xff] }
  0x40   : > { %337 = vst.msk [vmem:[#allocation2 + $0x121] sm:$0xff] %vm258_vm0, %v4949_v28  ;;  %338 = vst.msk [vmem:[#allocation2 + $0x129] sm:$0xff] %vm258_vm0, %v4952_v29 }
  0x41   : > { %7431 = vst [vmem:[#allocation28_spill] sm:$0xff] %v4971_v33  ;;  %7432 = vst [vmem:[#allocation29_spill] sm:$0xff] %v4974_v34  ;;  %v5078_v60 = vld [vmem:[#allocation2 + $0xd9] sm:$0xff] }
  0x42   : > { %7433 = vst [vmem:[#allocation30_spill] sm:$0xff] %v4977_v35  ;;  %339 = vst.msk [vmem:[#allocation2 + $0x139] sm:$0xff] %vm258_vm0, %v4971_v33  ;;  %493 = vrot.lane.b32.xlu1 %v5018_v43, %s4654_s25  ;;  %v5130_v33 = vld [vmem:[#allocation2 + $0xe0] sm:$0xff]  ;;  %v5140_v24 = vld [vmem:[#allocation2 + $0xf0] sm:$0xff] }
  0x43   : > { %340 = vst.msk [vmem:[#allocation2 + $0x141] sm:$0xff] %vm258_vm0, %v4974_v34  ;;  %341 = vst.msk [vmem:[#allocation2 + $0x151] sm:$0xff] %vm258_vm0, %v4977_v35  ;;  %499 = vrot.lane.b32.xlu0 %v5022_v44, %s4654_s25  ;;  %v5126_v34 = vld [vmem:[#allocation2 + $0xc8] sm:$0xff]  ;;  %v5132_v35 = vld [vmem:[#allocation2 + $0xf1] sm:$0xff] }
  0x44   : > { %7434 = vst [vmem:[#allocation31_spill] sm:$0xff] %v4988_v36  ;;  %7435 = vst [vmem:[#allocation32_spill] sm:$0xff] %v4991_v37  ;;  %v5142_v29 = vld [vmem:[#allocation2 + $0xf8] sm:$0xff]  ;;  %v5164_v19 = vld [vmem:[#allocation2 + $0xe1] sm:$0xff] }
  0x45   : > { %7436 = vst [vmem:[#allocation33_spill] sm:$0xff] %v4994_v38  ;;  %342 = vst.msk [vmem:[#allocation2 + $0x159] sm:$0xff] %vm258_vm0, %v4988_v36  ;;  %v5128_v36 = vld [vmem:[#allocation2 + $0xd8] sm:$0xff]  ;;  %v5144_v23 = vld [vmem:[#allocation2 + $0x108] sm:$0xff] }
  0x46   : > { %343 = vst.msk [vmem:[#allocation2 + $0x169] sm:$0xff] %vm258_vm0, %v4991_v37  ;;  %344 = vst.msk [vmem:[#allocation2 + $0x171] sm:$0xff] %vm258_vm0, %v4994_v38  ;;  %497 = vrot.lane.b32.xlu1 %v5026_v45, %s4654_s25  ;;  %v5114_v38 = vld [vmem:[#allocation2 + $0xb0] sm:$0xff]  ;;  %v5116_v37 = vld [vmem:[#allocation2 + $0xc0] sm:$0xff] }
  0x47   : > { %7437 = vst [vmem:[#allocation34_spill] sm:$0xff] %v5008_v41  ;;  %2295 = vst.msk [vmem:[#allocation2 + $0x10] sm:$0x3] %vm261_vm1, %v7340_v0  ;;  %503 = vrot.lane.b32.xlu0 %v5030_v46, %s4654_s25  ;;  %v5154_v28 = vld [vmem:[#allocation2 + $0x110] sm:$0xff]  ;;  %v5160_v20 = vld [vmem:[#allocation2 + $0x120] sm:$0xff] }
  0x48   : > { %2298 = vst.msk [vmem:[#allocation2 + $0x28] sm:$0x3] %vm261_vm1, %v7340_v0  ;;  %7438 = vst [vmem:[#allocation35_spill] sm:$0xff] %v5036_v48  ;;  %v5162_v22 = vld [vmem:[#allocation2 + $0x128] sm:$0xff]  ;;  %v5180_v15 = vld [vmem:[#allocation2 + $0xf9] sm:$0xff] }
  0x49   : > { %379 = vst.msk [vmem:[#allocation3] sm:$0xff] %vm258_vm0, %v347_v49  ;;  %2293 = vst.msk [vmem:[#allocation2] sm:$0xff] %vm258_vm0, %v7340_v0  ;;  %v5102_v49 = vld [vmem:[#allocation2 + $0x98] sm:$0xff]  ;;  %v5172_v21 = vld [vmem:[#allocation2 + $0x109] sm:$0xff] }
  0x4a   : > { %381 = vst.msk [vmem:[#allocation3 + $0x10] sm:$0xff] %vm258_vm0, %v5038_v50  ;;  %2296 = vst.msk [vmem:[#allocation2 + $0x18] sm:$0xff] %vm258_vm0, %v7340_v0  ;;  %501 = vrot.lane.b32.xlu1 %v5040_v51, %s4654_s25  ;;  %v5176_v16 = vld [vmem:[#allocation2 + $0x138] sm:$0xff]  ;;  %v5178_v18 = vld [vmem:[#allocation2 + $0x140] sm:$0xff] }
  0x4b   : > { %380 = vst.msk [vmem:[#allocation3 + $0x8] sm:$0xff] %vm258_vm0, %v348_v52  ;;  %2294 = vst.msk [vmem:[#allocation2 + $0x8] sm:$0xff] %vm258_vm0, %v7340_v0  ;;  %507 = vrot.lane.b32.xlu0 %v5056_v54, %s4654_s25  ;;  %v5104_v52 = vld [vmem:[#allocation2 + $0xc9] sm:$0xff]  ;;  %v5188_v17 = vld [vmem:[#allocation2 + $0x121] sm:$0xff] }
  0x4c   : > { %382 = vst.msk [vmem:[#allocation3 + $0x18] sm:$0xff] %vm258_vm0, %v5054_v53  ;;  %2297 = vst.msk [vmem:[#allocation2 + $0x20] sm:$0xff] %vm258_vm0, %v7340_v0  ;;  %v5112_v0 = vld [vmem:[#allocation2 + $0xa8] sm:$0xff]  ;;  %v5192_v12 = vld [vmem:[#allocation2 + $0x150] sm:$0xff] }
  0x4d   : > { %383 = vst.msk [vmem:[#allocation3 + $0x20] sm:$0xff] %vm258_vm0, %v5060_v55  ;;  %384 = vst.msk [vmem:[#allocation3 + $0x28] sm:$0xff] %vm258_vm0, %v5062_v56  ;;  %v5194_v14 = vld [vmem:[#allocation2 + $0x158] sm:$0xff]  ;;  %v5208_v6 = vld [vmem:[#allocation2 + $0x168] sm:$0xff] }
  0x4e   : > { %385 = vst.msk [vmem:[#allocation3 + $0x30] sm:$0xff] %vm258_vm0, %v5074_v58  ;;  %386 = vst.msk [vmem:[#allocation3 + $0x38] sm:$0xff] %vm258_vm0, %v5076_v59  ;;  %505 = vrot.lane.b32.xlu1 %v5068_v57, %s4654_s25  ;;  %v5196_v11 = vld [vmem:[#allocation2 + $0x111] sm:$0xff]  ;;  %v5204_v13 = vld [vmem:[#allocation2 + $0x139] sm:$0xff] }
  0x4f   : > { %387 = vst.msk [vmem:[#allocation3 + $0x40] sm:$0xff] %vm258_vm0, %v5084_v61  ;;  %388 = vst.msk [vmem:[#allocation3 + $0x48] sm:$0xff] %vm258_vm0, %v5086_v62  ;;  %511 = vrot.lane.b32.xlu0 %v5078_v60, %s4654_s25  ;;  %v5210_v10 = vld [vmem:[#allocation2 + $0x170] sm:$0xff]  ;;  %v5224_v2 = vld [vmem:[#allocation2 + $0x141] sm:$0xff] }
  0x50   : > { %389 = vst.msk [vmem:[#allocation3 + $0x50] sm:$0xff] %vm258_vm0, %v5088_v63  ;;  %390 = vst.msk [vmem:[#allocation3 + $0x58] sm:$0xff] %vm258_vm0, %v5098_v7  ;;  %v5212_v5 = vld [vmem:[#allocation2 + $0x129] sm:$0xff]  ;;  %v5220_v9 = vld [vmem:[#allocation2 + $0x151] sm:$0xff] }
  0x51   : > { %391 = vst.msk [vmem:[#allocation3 + $0x60] sm:$0xff] %vm258_vm0, %v5100_v8  ;;  %392 = vst.msk [vmem:[#allocation3 + $0x68] sm:$0xff] %vm258_vm0, %v5102_v49  ;;  %v5228_v4 = vld [vmem:[#allocation2 + $0x169] sm:$0xff] }
  0x52   : > { %393 = vst.msk [vmem:[#allocation3 + $0x70] sm:$0xff] %vm258_vm0, %v5112_v0  ;;  %394 = vst.msk [vmem:[#allocation3 + $0x78] sm:$0xff] %vm258_vm0, %v5114_v38  ;;  %509 = vrot.lane.b32.xlu1 %v5104_v52, %s4654_s25 }
  0x53   : > { %395 = vst.msk [vmem:[#allocation3 + $0x80] sm:$0xff] %vm258_vm0, %v5116_v37  ;;  %396 = vst.msk [vmem:[#allocation3 + $0x88] sm:$0xff] %vm258_vm0, %v5126_v34  ;;  %515 = vrot.lane.b32.xlu0 %v5132_v35, %s4654_s25 }
  0x54   : > { %397 = vst.msk [vmem:[#allocation3 + $0x90] sm:$0xff] %vm258_vm0, %v5128_v36  ;;  %398 = vst.msk [vmem:[#allocation3 + $0x98] sm:$0xff] %vm258_vm0, %v5130_v33 }
  0x55   : > { %399 = vst.msk [vmem:[#allocation3 + $0xa0] sm:$0xff] %vm258_vm0, %v5140_v24  ;;  %400 = vst.msk [vmem:[#allocation3 + $0xa8] sm:$0xff] %vm258_vm0, %v5142_v29 }
  0x56   : > { %401 = vst.msk [vmem:[#allocation3 + $0xb0] sm:$0xff] %vm258_vm0, %v5144_v23  ;;  %402 = vst.msk [vmem:[#allocation3 + $0xb8] sm:$0xff] %vm258_vm0, %v5154_v28  ;;  %513 = vrot.lane.b32.xlu1 %v5164_v19, %s4654_s25 }
  0x57   : > { %403 = vst.msk [vmem:[#allocation3 + $0xc0] sm:$0xff] %vm258_vm0, %v5160_v20  ;;  %404 = vst.msk [vmem:[#allocation3 + $0xc8] sm:$0xff] %vm258_vm0, %v5162_v22  ;;  %519 = vrot.lane.b32.xlu0 %v5172_v21, %s4654_s25 }
  0x58   : > { %405 = vst.msk [vmem:[#allocation3 + $0xd0] sm:$0xff] %vm258_vm0, %v5176_v16  ;;  %406 = vst.msk [vmem:[#allocation3 + $0xd8] sm:$0xff] %vm258_vm0, %v5178_v18 }
  0x59   : > { %407 = vst.msk [vmem:[#allocation3 + $0xe0] sm:$0xff] %vm258_vm0, %v5192_v12  ;;  %408 = vst.msk [vmem:[#allocation3 + $0xe8] sm:$0xff] %vm258_vm0, %v5194_v14 }
  0x5a   : > { %517 = vrot.lane.b32.xlu1 %v5180_v15, %s4654_s25  ;;  %7439 = vst [vmem:[#allocation36_spill] sm:$0xff] %v5212_v5  ;;  %409 = vst.msk [vmem:[#allocation3 + $0xf0] sm:$0xff] %vm258_vm0, %v5208_v6 }
  0x5b   : > { %523 = vrot.lane.b32.xlu0 %v5188_v17, %s4654_s25  ;;  %410 = vst.msk [vmem:[#allocation3 + $0xf8] sm:$0xff] %vm258_vm0, %v5210_v10  ;;  %7440 = vst [vmem:[#allocation37_spill] sm:$0xff] %v5220_v9 }
  0x5c   : > { %7441 = vst [vmem:[#allocation38_spill] sm:$0xff] %v5231_v1  ;;  %7442 = vst [vmem:[#allocation39_spill] sm:$0xff] %v5234_v3 }
  0x5d   : > { %345 = vst.msk [vmem:[#allocation2 + $0x181] sm:$0xff] %vm258_vm0, %v5231_v1  ;;  %346 = vst.msk [vmem:[#allocation2 + $0x189] sm:$0xff] %vm258_vm0, %v5234_v3  ;;  %v5256_v3 = vld [vmem:[#allocation2 + $0x32] sm:$0xff]  ;;  %v5262_v1 = vld [vmem:[#allocation2 + $0x4a] sm:$0xff] }
  0x5e   : > { %521 = vrot.lane.b32.xlu1 %v5196_v11, %s4654_s25  ;;  %7445 = vst [vmem:[#allocation42_spill] sm:$0xff] %v5256_v3  ;;  %7446 = vst [vmem:[#allocation43_spill] sm:$0xff] %v5262_v1 }
  0x5f   : > { %527 = vrot.lane.b32.xlu0 %v5204_v13, %s4654_s25 }
  0x62   : > { %525 = vrot.lane.b32.xlu1 %v5212_v5, %s4654_s25  ;;  %v5242_v5 = vld [vmem:[#allocation2 + $0x159] sm:$0xff] }
  0x63   : > { %531 = vrot.lane.b32.xlu0 %v5220_v9, %s4654_s25  ;;  %7443 = vst [vmem:[#allocation40_spill] sm:$0xff] %v5242_v5  ;;  %v5248_v9 = vld [vmem:[#allocation2 + $0x171] sm:$0xff] }
  0x64   : > { %7444 = vst [vmem:[#allocation41_spill] sm:$0xff] %v5248_v9 }
  0x66   : > { %529 = vrot.lane.b32.xlu1 %v5224_v2, %s4654_s25 }
  0x67   : > { %535 = vrot.lane.b32.xlu0 %v5228_v4, %s4654_s25 }
  0x6a   : > { %533 = vrot.lane.b32.xlu1 %v5242_v5, %s4654_s25 }
  0x6b   : > { %668 = vrot.lane.b32.xlu0 %v5032_v47, %s4655_s26  ;;  %v5266_v47 = vld [vmem:[#allocation2 + $0x3a] sm:$0xff] }
  0x6c   : > { %7447 = vst [vmem:[#allocation44_spill] sm:$0xff] %v5266_v47 }
  0x6e   : > { %537 = vrot.lane.b32.xlu1 %v5248_v9, %s4654_s25  ;;  %v5270_v9 = vld [vmem:[#allocation2 + $0x62] sm:$0xff] }
  0x6f   : > { %672 = vrot.lane.b32.xlu0 %v5036_v48, %s4655_s26  ;;  %7448 = vst [vmem:[#allocation45_spill] sm:$0xff] %v5270_v9  ;;  %v5274_v48 = vld [vmem:[#allocation2 + $0x52] sm:$0xff] }
  0x70   : > { %7449 = vst [vmem:[#allocation46_spill] sm:$0xff] %v5274_v48 }
  0x72   : > { %670 = vrot.lane.b32.xlu1 %v5006_v40, %s4655_s26  ;;  %v5278_v40 = vld [vmem:[#allocation2 + $0x7a] sm:$0xff] }
  0x73   : > { %676 = vrot.lane.b32.xlu0 %v5256_v3, %s4655_s26  ;;  %7450 = vst [vmem:[#allocation47_spill] sm:$0xff] %v5278_v40  ;;  %v5346_v3 = vld [vmem:[#allocation2 + $0x12a] sm:$0xff] }
  0x74   : > { %7467 = vst [vmem:[#allocation64_spill] sm:$0xff] %v5346_v3 }
  0x76   : > { %674 = vrot.lane.b32.xlu1 %v5008_v41, %s4655_s26  ;;  %v5282_v41 = vld [vmem:[#allocation2 + $0x6a] sm:$0xff] }
  0x77   : > { %680 = vrot.lane.b32.xlu0 %v5262_v1, %s4655_s26  ;;  %7451 = vst [vmem:[#allocation48_spill] sm:$0xff] %v5282_v41  ;;  %v5286_v1 = vld [vmem:[#allocation2 + $0x92] sm:$0xff] }
  0x78   : > { %7452 = vst [vmem:[#allocation49_spill] sm:$0xff] %v5286_v1 }
  0x7a   : > { %678 = vrot.lane.b32.xlu1 %v5266_v47, %s4655_s26  ;;  %v5290_v47 = vld [vmem:[#allocation2 + $0x82] sm:$0xff] }
  0x7b   : > { %684 = vrot.lane.b32.xlu0 %v5270_v9, %s4655_s26  ;;  %7453 = vst [vmem:[#allocation50_spill] sm:$0xff] %v5290_v47  ;;  %v5294_v9 = vld [vmem:[#allocation2 + $0xaa] sm:$0xff] }
  0x7c   : > { %7454 = vst [vmem:[#allocation51_spill] sm:$0xff] %v5294_v9 }
  0x7e   : > { %682 = vrot.lane.b32.xlu1 %v5274_v48, %s4655_s26  ;;  %v5298_v48 = vld [vmem:[#allocation2 + $0x9a] sm:$0xff] }
  0x7f   : > { %688 = vrot.lane.b32.xlu0 %v5278_v40, %s4655_s26  ;;  %7455 = vst [vmem:[#allocation52_spill] sm:$0xff] %v5298_v48  ;;  %v5302_v40 = vld [vmem:[#allocation2 + $0xc2] sm:$0xff] }
  0x80   : > { %7456 = vst [vmem:[#allocation53_spill] sm:$0xff] %v5302_v40 }
  0x82   : > { %686 = vrot.lane.b32.xlu1 %v5282_v41, %s4655_s26  ;;  %v5306_v41 = vld [vmem:[#allocation2 + $0xb2] sm:$0xff] }
  0x83   : > { %692 = vrot.lane.b32.xlu0 %v5286_v1, %s4655_s26  ;;  %7457 = vst [vmem:[#allocation54_spill] sm:$0xff] %v5306_v41  ;;  %v5310_v1 = vld [vmem:[#allocation2 + $0xda] sm:$0xff] }
  0x84   : > { %7458 = vst [vmem:[#allocation55_spill] sm:$0xff] %v5310_v1 }
  0x86   : > { %690 = vrot.lane.b32.xlu1 %v5290_v47, %s4655_s26  ;;  %v5314_v47 = vld [vmem:[#allocation2 + $0xca] sm:$0xff] }
  0x87   : > { %696 = vrot.lane.b32.xlu0 %v5294_v9, %s4655_s26  ;;  %7459 = vst [vmem:[#allocation56_spill] sm:$0xff] %v5314_v47  ;;  %v5318_v9 = vld [vmem:[#allocation2 + $0xf2] sm:$0xff] }
  0x88   : > { %7460 = vst [vmem:[#allocation57_spill] sm:$0xff] %v5318_v9 }
  0x8a   : > { %694 = vrot.lane.b32.xlu1 %v5298_v48, %s4655_s26  ;;  %v5322_v48 = vld [vmem:[#allocation2 + $0xe2] sm:$0xff] }
  0x8b   : > { %700 = vrot.lane.b32.xlu0 %v5302_v40, %s4655_s26  ;;  %7461 = vst [vmem:[#allocation58_spill] sm:$0xff] %v5322_v48  ;;  %v5326_v40 = vld [vmem:[#allocation2 + $0x10a] sm:$0xff] }
  0x8c   : > { %7462 = vst [vmem:[#allocation59_spill] sm:$0xff] %v5326_v40 }
  0x8e   : > { %698 = vrot.lane.b32.xlu1 %v5306_v41, %s4655_s26  ;;  %v5330_v41 = vld [vmem:[#allocation2 + $0xfa] sm:$0xff] }
  0x8f   : > { %704 = vrot.lane.b32.xlu0 %v5310_v1, %s4655_s26  ;;  %7463 = vst [vmem:[#allocation60_spill] sm:$0xff] %v5330_v41  ;;  %v5334_v1 = vld [vmem:[#allocation2 + $0x122] sm:$0xff] }
  0x90   : > { %7464 = vst [vmem:[#allocation61_spill] sm:$0xff] %v5334_v1 }
  0x92   : > { %702 = vrot.lane.b32.xlu1 %v5314_v47, %s4655_s26  ;;  %v5338_v47 = vld [vmem:[#allocation2 + $0x112] sm:$0xff] }
  0x93   : > { %708 = vrot.lane.b32.xlu0 %v5318_v9, %s4655_s26  ;;  %7465 = vst [vmem:[#allocation62_spill] sm:$0xff] %v5338_v47  ;;  %v5342_v9 = vld [vmem:[#allocation2 + $0x13a] sm:$0xff] }
  0x94   : > { %7466 = vst [vmem:[#allocation63_spill] sm:$0xff] %v5342_v9 }
  0x96   : > { %706 = vrot.lane.b32.xlu1 %v5322_v48, %s4655_s26  ;;  %v476_v48 = vpop.permute.xlu0 %475 }
  0x97   : > { %712 = vrot.lane.b32.xlu0 %v5326_v40, %s4655_s26  ;;  %572 = vst.msk [vmem:[#allocation3] sm:$0xff] %vm571_vm2, %v476_v48  ;;  %v5355_v40 = vld [vmem:[#allocation2 + $0x142] sm:$0xff]  ;;  %v5361_v48 = vld [vmem:[#allocation2 + $0x16a] sm:$0xff] }
  0x98   : > { %7468 = vst [vmem:[#allocation65_spill] sm:$0xff] %v5355_v40 }
  0x9a   : > { %710 = vrot.lane.b32.xlu1 %v5330_v41, %s4655_s26  ;;  %v5351_v41 = vld [vmem:[#allocation2 + $0x152] sm:$0xff] }
  0x9b   : > { %716 = vrot.lane.b32.xlu0 %v5334_v1, %s4655_s26  ;;  %v478_v1 = vpop.permute.xlu0 %477 }
  0x9c   : > { %573 = vst.msk [vmem:[#allocation3 + $0x8] sm:$0xff] %vm571_vm2, %v478_v1 }
  0x9e   : > { %714 = vrot.lane.b32.xlu1 %v5338_v47, %s4655_s26  ;;  %v5365_v47 = vld [vmem:[#allocation2 + $0x15a] sm:$0xff] }
  0x9f   : > { %720 = vrot.lane.b32.xlu0 %v5342_v9, %s4655_s26 }
  0xa2   : > { %718 = vrot.lane.b32.xlu1 %v5346_v3, %s4655_s26 }
  0xa3   : > { %724 = vrot.lane.b32.xlu0 %v5351_v41, %s4655_s26 }
  0xa4   : > { %v480_v5 = vpop.permute.xlu1 %479 }
  0xa5   : > { %574 = vst.msk [vmem:[#allocation3 + $0x10] sm:$0xff] %vm571_vm2, %v480_v5  ;;  %v484_v9 = vpop.permute.xlu0 %483  ;;  %v5373_v5 = vld [vmem:[#allocation2 + $0x172] sm:$0xff] }
  0xa6   : > { %722 = vrot.lane.b32.xlu1 %v5355_v40, %s4655_s26  ;;  %576 = vst.msk [vmem:[#allocation3 + $0x20] sm:$0xff] %vm571_vm2, %v484_v9 }
  0xa7   : > { %728 = vrot.lane.b32.xlu0 %v5361_v48, %s4655_s26 }
  0xa8   : > { %v482_v3 = vpop.permute.xlu1 %481 }
  0xa9   : > { %575 = vst.msk [vmem:[#allocation3 + $0x18] sm:$0xff] %vm571_vm2, %v482_v3  ;;  %v488_v1 = vpop.permute.xlu0 %487 }
  0xaa   : > { %726 = vrot.lane.b32.xlu1 %v5365_v47, %s4655_s26  ;;  %578 = vst.msk [vmem:[#allocation3 + $0x30] sm:$0xff] %vm571_vm2, %v488_v1 }
  0xab   : > { %861 = vrot.lane.b32.xlu0 %v5038_v50, %s4656_s27 }
  0xac   : > { %v486_v40 = vpop.permute.xlu1 %485 }
  0xad   : > { %577 = vst.msk [vmem:[#allocation3 + $0x28] sm:$0xff] %vm571_vm2, %v486_v40  ;;  %v492_v9 = vpop.permute.xlu0 %491 }
  0xae   : > { %730 = vrot.lane.b32.xlu1 %v5373_v5, %s4655_s26  ;;  %580 = vst.msk [vmem:[#allocation3 + $0x40] sm:$0xff] %vm571_vm2, %v492_v9 }
  0xaf   : > { %865 = vrot.lane.b32.xlu0 %v5060_v55, %s4656_s27 }
  0xb0   : > { %v490_v3 = vpop.permute.xlu1 %489 }
  0xb1   : > { %579 = vst.msk [vmem:[#allocation3 + $0x38] sm:$0xff] %vm571_vm2, %v490_v3  ;;  %v496_v1 = vpop.permute.xlu0 %495 }
  0xb2   : > { %863 = vrot.lane.b32.xlu1 %v5054_v53, %s4656_s27  ;;  %582 = vst.msk [vmem:[#allocation3 + $0x50] sm:$0xff] %vm571_vm2, %v496_v1 }
  0xb3   : > { %869 = vrot.lane.b32.xlu0 %v5074_v58, %s4656_s27 }
  0xb4   : > { %v494_v50 = vpop.permute.xlu1 %493 }
  0xb5   : > { %581 = vst.msk [vmem:[#allocation3 + $0x48] sm:$0xff] %vm571_vm2, %v494_v50  ;;  %v500_v40 = vpop.permute.xlu0 %499 }
  0xb6   : > { %867 = vrot.lane.b32.xlu1 %v5062_v56, %s4656_s27  ;;  %584 = vst.msk [vmem:[#allocation3 + $0x60] sm:$0xff] %vm571_vm2, %v500_v40 }
  0xb7   : > { %873 = vrot.lane.b32.xlu0 %v5084_v61, %s4656_s27 }
  0xb8   : > { %v498_v9 = vpop.permute.xlu1 %497 }
  0xb9   : > { %583 = vst.msk [vmem:[#allocation3 + $0x58] sm:$0xff] %vm571_vm2, %v498_v9  ;;  %v504_v53 = vpop.permute.xlu0 %503 }
  0xba   : > { %871 = vrot.lane.b32.xlu1 %v5076_v59, %s4656_s27  ;;  %586 = vst.msk [vmem:[#allocation3 + $0x70] sm:$0xff] %vm571_vm2, %v504_v53 }
  0xbb   : > { %877 = vrot.lane.b32.xlu0 %v5088_v63, %s4656_s27 }
  0xbc   : > { %v502_v3 = vpop.permute.xlu1 %501 }
  0xbd   : > { %585 = vst.msk [vmem:[#allocation3 + $0x68] sm:$0xff] %vm571_vm2, %v502_v3  ;;  %v508_v1 = vpop.permute.xlu0 %507 }
  0xbe   : > { %875 = vrot.lane.b32.xlu1 %v5086_v62, %s4656_s27  ;;  %588 = vst.msk [vmem:[#allocation3 + $0x80] sm:$0xff] %vm571_vm2, %v508_v1 }
  0xbf   : > { %881 = vrot.lane.b32.xlu0 %v5100_v8, %s4656_s27 }
  0xc0   : > { %v506_v50 = vpop.permute.xlu1 %505 }
  0xc1   : > { %587 = vst.msk [vmem:[#allocation3 + $0x78] sm:$0xff] %vm571_vm2, %v506_v50  ;;  %v512_v40 = vpop.permute.xlu0 %511 }
  0xc2   : > { %879 = vrot.lane.b32.xlu1 %v5098_v7, %s4656_s27  ;;  %590 = vst.msk [vmem:[#allocation3 + $0x90] sm:$0xff] %vm571_vm2, %v512_v40 }
  0xc3   : > { %885 = vrot.lane.b32.xlu0 %v5112_v0, %s4656_s27 }
  0xc4   : > { %v510_v9 = vpop.permute.xlu1 %509 }
  0xc5   : > { %589 = vst.msk [vmem:[#allocation3 + $0x88] sm:$0xff] %vm571_vm2, %v510_v9  ;;  %v516_v53 = vpop.permute.xlu0 %515 }
  0xc6   : > { %883 = vrot.lane.b32.xlu1 %v5102_v49, %s4656_s27  ;;  %592 = vst.msk [vmem:[#allocation3 + $0xa0] sm:$0xff] %vm571_vm2, %v516_v53 }
  0xc7   : > { %889 = vrot.lane.b32.xlu0 %v5116_v37, %s4656_s27 }
  0xc8   : > { %v514_v3 = vpop.permute.xlu1 %513 }
  0xc9   : > { %591 = vst.msk [vmem:[#allocation3 + $0x98] sm:$0xff] %vm571_vm2, %v514_v3  ;;  %v520_v1 = vpop.permute.xlu0 %519 }
  0xca   : > { %887 = vrot.lane.b32.xlu1 %v5114_v38, %s4656_s27  ;;  %594 = vst.msk [vmem:[#allocation3 + $0xb0] sm:$0xff] %vm571_vm2, %v520_v1 }
  0xcb   : > { %893 = vrot.lane.b32.xlu0 %v5128_v36, %s4656_s27 }
  0xcc   : > { %v518_v50 = vpop.permute.xlu1 %517 }
  0xcd   : > { %593 = vst.msk [vmem:[#allocation3 + $0xa8] sm:$0xff] %vm571_vm2, %v518_v50  ;;  %v524_v40 = vpop.permute.xlu0 %523 }
  0xce   : > { %891 = vrot.lane.b32.xlu1 %v5126_v34, %s4656_s27  ;;  %596 = vst.msk [vmem:[#allocation3 + $0xc0] sm:$0xff] %vm571_vm2, %v524_v40 }
  0xcf   : > { %897 = vrot.lane.b32.xlu0 %v5140_v24, %s4656_s27 }
  0xd0   : > { %v522_v9 = vpop.permute.xlu1 %521 }
  0xd1   : > { %595 = vst.msk [vmem:[#allocation3 + $0xb8] sm:$0xff] %vm571_vm2, %v522_v9  ;;  %v528_v53 = vpop.permute.xlu0 %527 }
  0xd2   : > { %895 = vrot.lane.b32.xlu1 %v5130_v33, %s4656_s27  ;;  %598 = vst.msk [vmem:[#allocation3 + $0xd0] sm:$0xff] %vm571_vm2, %v528_v53 }
  0xd3   : > { %901 = vrot.lane.b32.xlu0 %v5144_v23, %s4656_s27 }
  0xd4   : > { %v526_v3 = vpop.permute.xlu1 %525 }
  0xd5   : > { %597 = vst.msk [vmem:[#allocation3 + $0xc8] sm:$0xff] %vm571_vm2, %v526_v3  ;;  %v532_v1 = vpop.permute.xlu0 %531 }
  0xd6   : > { %899 = vrot.lane.b32.xlu1 %v5142_v29, %s4656_s27  ;;  %600 = vst.msk [vmem:[#allocation3 + $0xe0] sm:$0xff] %vm571_vm2, %v532_v1 }
  0xd7   : > { %905 = vrot.lane.b32.xlu0 %v5160_v20, %s4656_s27 }
  0xd8   : > { %v530_v50 = vpop.permute.xlu1 %529 }
  0xd9   : > { %599 = vst.msk [vmem:[#allocation3 + $0xd8] sm:$0xff] %vm571_vm2, %v530_v50  ;;  %v536_v40 = vpop.permute.xlu0 %535 }
  0xda   : > { %903 = vrot.lane.b32.xlu1 %v5154_v28, %s4656_s27  ;;  %602 = vst.msk [vmem:[#allocation3 + $0xf0] sm:$0xff] %vm571_vm2, %v536_v40  ;;  %v827_v40 = vld [vmem:[#allocation2 + $0x180] sm:$0xff] }
  0xdb   : > { %909 = vrot.lane.b32.xlu0 %v5176_v16, %s4656_s27 }
  0xdc   : > { %v534_v9 = vpop.permute.xlu1 %533 }
  0xdd   : > { %601 = vst.msk [vmem:[#allocation3 + $0xe8] sm:$0xff] %vm571_vm2, %v534_v9  ;;  %v669_v53 = vpop.permute.xlu0 %668 }
  0xde   : > { %907 = vrot.lane.b32.xlu1 %v5162_v22, %s4656_s27  ;;  %765 = vst.msk [vmem:[#allocation3] sm:$0xff] %vm764_vm3, %v669_v53 }
  0xdf   : > { %913 = vrot.lane.b32.xlu0 %v5192_v12, %s4656_s27 }
  0xe0   : > { %v538_v3 = vpop.permute.xlu1 %537 }
  0xe1   : > { %603 = vst.msk [vmem:[#allocation3 + $0xf8] sm:$0xff] %vm571_vm2, %v538_v3  ;;  %v673_v1 = vpop.permute.xlu0 %672 }
  0xe2   : > { %911 = vrot.lane.b32.xlu1 %v5178_v18, %s4656_s27  ;;  %767 = vst.msk [vmem:[#allocation3 + $0x10] sm:$0xff] %vm764_vm3, %v673_v1  ;;  %v828_v1 = vld [vmem:[#allocation2 + $0x188] sm:$0xff] }
  0xe3   : > { %917 = vrot.lane.b32.xlu0 %v5208_v6, %s4656_s27 }
  0xe4   : > { %v671_v50 = vpop.permute.xlu1 %670 }
  0xe5   : > { %766 = vst.msk [vmem:[#allocation3 + $0x8] sm:$0xff] %vm764_vm3, %v671_v50  ;;  %v677_v9 = vpop.permute.xlu0 %676 }
  0xe6   : > { %915 = vrot.lane.b32.xlu1 %v5194_v14, %s4656_s27  ;;  %769 = vst.msk [vmem:[#allocation3 + $0x20] sm:$0xff] %vm764_vm3, %v677_v9 }
  0xe7   : > { %921 = vrot.lane.b32.xlu0 %v827_v40, %s4656_s27 }
  0xe8   : > { %v675_v53 = vpop.permute.xlu1 %674 }
  0xe9   : > { %768 = vst.msk [vmem:[#allocation3 + $0x18] sm:$0xff] %vm764_vm3, %v675_v53  ;;  %v681_v3 = vpop.permute.xlu0 %680 }
  0xea   : > { %919 = vrot.lane.b32.xlu1 %v5210_v10, %s4656_s27  ;;  %771 = vst.msk [vmem:[#allocation3 + $0x30] sm:$0xff] %vm764_vm3, %v681_v3  ;;  %v7470_v3 = vld [vmem:[#allocation37_spill] sm:$0xff] }
  0xeb   : > { %1054 = vrot.lane.b32.xlu0 %v4934_v25, %s4657_s28 }
  0xec   : > { %v679_v6 = vpop.permute.xlu1 %678 }
  0xed   : > { %770 = vst.msk [vmem:[#allocation3 + $0x28] sm:$0xff] %vm764_vm3, %v679_v6  ;;  %v685_v50 = vpop.permute.xlu0 %684  ;;  %v7471_v6 = vld [vmem:[#allocation40_spill] sm:$0xff] }
  0xee   : > { %923 = vrot.lane.b32.xlu1 %v828_v1, %s4656_s27  ;;  %773 = vst.msk [vmem:[#allocation3 + $0x40] sm:$0xff] %vm764_vm3, %v685_v50  ;;  %v1020_v1 = vld [vmem:[#allocation2 + $0x181] sm:$0xff] }
  0xef   : > { %1058 = vrot.lane.b32.xlu0 %v4936_v26, %s4657_s28 }
  0xf0   : > { %v683_v40 = vpop.permute.xlu1 %682 }
  0xf1   : > { %772 = vst.msk [vmem:[#allocation3 + $0x38] sm:$0xff] %vm764_vm3, %v683_v40  ;;  %v689_v10 = vpop.permute.xlu0 %688 }
  0xf2   : > { %1056 = vrot.lane.b32.xlu1 %v4946_v27, %s4657_s28  ;;  %775 = vst.msk [vmem:[#allocation3 + $0x50] sm:$0xff] %vm764_vm3, %v689_v10 }
  0xf3   : > { %1062 = vrot.lane.b32.xlu0 %v4960_v30, %s4657_s28 }
  0xf4   : > { %v687_v25 = vpop.permute.xlu1 %686 }
  0xf5   : > { %774 = vst.msk [vmem:[#allocation3 + $0x48] sm:$0xff] %vm764_vm3, %v687_v25  ;;  %v693_v9 = vpop.permute.xlu0 %692  ;;  %v1021_v25 = vld [vmem:[#allocation2 + $0x189] sm:$0xff] }
  0xf6   : > { %1060 = vrot.lane.b32.xlu1 %v4964_v31, %s4657_s28  ;;  %777 = vst.msk [vmem:[#allocation3 + $0x60] sm:$0xff] %vm764_vm3, %v693_v9  ;;  %v7473_v9 = vld [vmem:[#allocation35_spill] sm:$0xff] }
  0xf7   : > { %1066 = vrot.lane.b32.xlu0 %v4968_v32, %s4657_s28 }
  0xf8   : > { %v691_v26 = vpop.permute.xlu1 %690 }
  0xf9   : > { %776 = vst.msk [vmem:[#allocation3 + $0x58] sm:$0xff] %vm764_vm3, %v691_v26  ;;  %v697_v27 = vpop.permute.xlu0 %696  ;;  %v5567_v26 = vld [vmem:[#allocation2 + $0x31] sm:$0xff] }
  0xfa   : > { %1064 = vrot.lane.b32.xlu1 %v4996_v39, %s4657_s28  ;;  %779 = vst.msk [vmem:[#allocation3 + $0x70] sm:$0xff] %vm764_vm3, %v697_v27  ;;  %v5570_v27 = vld [vmem:[#allocation2 + $0x39] sm:$0xff] }
  0xfb   : > { %1070 = vrot.lane.b32.xlu0 %v5010_v42, %s4657_s28 }
  0xfc   : > { %v695_v30 = vpop.permute.xlu1 %694 }
  0xfd   : > { %778 = vst.msk [vmem:[#allocation3 + $0x68] sm:$0xff] %vm764_vm3, %v695_v30  ;;  %v701_v31 = vpop.permute.xlu0 %700  ;;  %v5572_v30 = vld [vmem:[#allocation2 + $0x32] sm:$0xff] }
  0xfe   : > { %1068 = vrot.lane.b32.xlu1 %v5018_v43, %s4657_s28  ;;  %781 = vst.msk [vmem:[#allocation3 + $0x80] sm:$0xff] %vm764_vm3, %v701_v31  ;;  %v5574_v31 = vld [vmem:[#allocation2 + $0x3a] sm:$0xff] }
  0xff   : > { %1074 = vrot.lane.b32.xlu0 %v5022_v44, %s4657_s28 }
 0x100   : > { %v699_v32 = vpop.permute.xlu1 %698 }
 0x101   : > { %780 = vst.msk [vmem:[#allocation3 + $0x78] sm:$0xff] %vm764_vm3, %v699_v32  ;;  %v705_v39 = vpop.permute.xlu0 %704 }
 0x102   : > { %1072 = vrot.lane.b32.xlu1 %v5026_v45, %s4657_s28  ;;  %783 = vst.msk [vmem:[#allocation3 + $0x90] sm:$0xff] %vm764_vm3, %v705_v39  ;;  %v7474_v39 = vmov 0.0  }
 0x103   : > { %1078 = vrot.lane.b32.xlu0 %v5030_v46, %s4657_s28  ;;  %2299 = vst.msk [vmem:[#allocation2 + $0x30] sm:$0xff] %vm258_vm0, %v7474_v39  ;;  %2300 = vst.msk [vmem:[#allocation2 + $0x38] sm:$0xff] %vm258_vm0, %v7474_v39 }
 0x104   : > { %v703_v42 = vpop.permute.xlu1 %702  ;;  %2301 = vst.msk [vmem:[#allocation2 + $0x40] sm:$0x3] %vm261_vm1, %v7474_v39 }
 0x105   : > { %782 = vst.msk [vmem:[#allocation3 + $0x88] sm:$0xff] %vm764_vm3, %v703_v42  ;;  %v709_v43 = vpop.permute.xlu0 %708 }
 0x106   : > { %1076 = vrot.lane.b32.xlu1 %v5040_v51, %s4657_s28  ;;  %785 = vst.msk [vmem:[#allocation3 + $0xa0] sm:$0xff] %vm764_vm3, %v709_v43  ;;  %v7475_v43 = vld [vmem:[#allocation42_spill] sm:$0xff] }
 0x107   : > { %1082 = vrot.lane.b32.xlu0 %v5056_v54, %s4657_s28 }
 0x108   : > { %v707_v44 = vpop.permute.xlu1 %706 }
 0x109   : > { %784 = vst.msk [vmem:[#allocation3 + $0x98] sm:$0xff] %vm764_vm3, %v707_v44  ;;  %v713_v45 = vpop.permute.xlu0 %712  ;;  %v5586_v44 = vld [vmem:[#allocation2 + $0x49] sm:$0xff] }
 0x10a   : > { %1080 = vrot.lane.b32.xlu1 %v5068_v57, %s4657_s28  ;;  %787 = vst.msk [vmem:[#allocation3 + $0xb0] sm:$0xff] %vm764_vm3, %v713_v45  ;;  %v5589_v45 = vld [vmem:[#allocation2 + $0x51] sm:$0xff] }
 0x10b   : > { %1086 = vrot.lane.b32.xlu0 %v5078_v60, %s4657_s28 }
 0x10c   : > { %v711_v46 = vpop.permute.xlu1 %710 }
 0x10d   : > { %786 = vst.msk [vmem:[#allocation3 + $0xa8] sm:$0xff] %vm764_vm3, %v711_v46  ;;  %v717_v51 = vpop.permute.xlu0 %716  ;;  %v5591_v46 = vld [vmem:[#allocation2 + $0x4a] sm:$0xff] }
 0x10e   : > { %1084 = vrot.lane.b32.xlu1 %v5104_v52, %s4657_s28  ;;  %789 = vst.msk [vmem:[#allocation3 + $0xc0] sm:$0xff] %vm764_vm3, %v717_v51  ;;  %v5593_v51 = vld [vmem:[#allocation2 + $0x52] sm:$0xff] }
 0x10f   : > { %1090 = vrot.lane.b32.xlu0 %v5132_v35, %s4657_s28  ;;  %2302 = vst.msk [vmem:[#allocation2 + $0x48] sm:$0xff] %vm258_vm0, %v7474_v39  ;;  %2303 = vst.msk [vmem:[#allocation2 + $0x50] sm:$0xff] %vm258_vm0, %v7474_v39 }
 0x110   : > { %v715_v54 = vpop.permute.xlu1 %714  ;;  %2304 = vst.msk [vmem:[#allocation2 + $0x58] sm:$0x3] %vm261_vm1, %v7474_v39 }
 0x111   : > { %788 = vst.msk [vmem:[#allocation3 + $0xb8] sm:$0xff] %vm764_vm3, %v715_v54  ;;  %v721_v57 = vpop.permute.xlu0 %720  ;;  %v7476_v54 = vld [vmem:[#allocation34_spill] sm:$0xff] }
 0x112   : > { %1088 = vrot.lane.b32.xlu1 %v5164_v19, %s4657_s28  ;;  %791 = vst.msk [vmem:[#allocation3 + $0xd0] sm:$0xff] %vm764_vm3, %v721_v57 }
 0x113   : > { %1094 = vrot.lane.b32.xlu0 %v5172_v21, %s4657_s28 }
 0x114   : > { %v719_v60 = vpop.permute.xlu1 %718 }
 0x115   : > { %790 = vst.msk [vmem:[#allocation3 + $0xc8] sm:$0xff] %vm764_vm3, %v719_v60  ;;  %v725_v52 = vpop.permute.xlu0 %724 }
 0x116   : > { %1092 = vrot.lane.b32.xlu1 %v5180_v15, %s4657_s28  ;;  %793 = vst.msk [vmem:[#allocation3 + $0xe0] sm:$0xff] %vm764_vm3, %v725_v52  ;;  %v7469_v15 = vld [vmem:[#allocation36_spill] sm:$0xff]  ;;  %v7477_v52 = vld [vmem:[#allocation43_spill] sm:$0xff] }
 0x117   : > { %1098 = vrot.lane.b32.xlu0 %v5188_v17, %s4657_s28 }
 0x118   : > { %v723_v35 = vpop.permute.xlu1 %722 }
 0x119   : > { %792 = vst.msk [vmem:[#allocation3 + $0xd8] sm:$0xff] %vm764_vm3, %v723_v35  ;;  %v729_v19 = vpop.permute.xlu0 %728  ;;  %v7478_v35 = vld [vmem:[#allocation44_spill] sm:$0xff] }
 0x11a   : > { %1096 = vrot.lane.b32.xlu1 %v5196_v11, %s4657_s28  ;;  %795 = vst.msk [vmem:[#allocation3 + $0xf0] sm:$0xff] %vm764_vm3, %v729_v19 }
 0x11b   : > { %1102 = vrot.lane.b32.xlu0 %v5204_v13, %s4657_s28 }
 0x11c   : > { %v727_v21 = vpop.permute.xlu1 %726 }
 0x11d   : > { %794 = vst.msk [vmem:[#allocation3 + $0xe8] sm:$0xff] %vm764_vm3, %v727_v21  ;;  %v862_v53 = vpop.permute.xlu0 %861 }
 0x11e   : > { %1100 = vrot.lane.b32.xlu1 %v7469_v15, %s4657_s28  ;;  %958 = vst.msk [vmem:[#allocation3] sm:$0xff] %vm957_vm4, %v862_v53  ;;  %v7479_v15 = vld [vmem:[#allocation45_spill] sm:$0xff]  ;;  %v7480_v53 = vld [vmem:[#allocation46_spill] sm:$0xff] }
 0x11f   : > { %1106 = vrot.lane.b32.xlu0 %v7470_v3, %s4657_s28 }
 0x120   : > { %v731_v17 = vpop.permute.xlu1 %730 }
 0x121   : > { %796 = vst.msk [vmem:[#allocation3 + $0xf8] sm:$0xff] %vm764_vm3, %v731_v17  ;;  %v866_v11 = vpop.permute.xlu0 %865 }
 0x122   : > { %1104 = vrot.lane.b32.xlu1 %v5224_v2, %s4657_s28  ;;  %960 = vst.msk [vmem:[#allocation3 + $0x10] sm:$0xff] %vm957_vm4, %v866_v11  ;;  %v7472_v2 = vld [vmem:[#allocation41_spill] sm:$0xff]  ;;  %v7481_v11 = vld [vmem:[#allocation47_spill] sm:$0xff] }
 0x123   : > { %1110 = vrot.lane.b32.xlu0 %v5228_v4, %s4657_s28 }
 0x124   : > { %v864_v13 = vpop.permute.xlu1 %863 }
 0x125   : > { %959 = vst.msk [vmem:[#allocation3 + $0x8] sm:$0xff] %vm957_vm4, %v864_v13  ;;  %v870_v50 = vpop.permute.xlu0 %869  ;;  %v5618_v13 = vld [vmem:[#allocation2 + $0x61] sm:$0xff] }
 0x126   : > { %1108 = vrot.lane.b32.xlu1 %v7471_v6, %s4657_s28  ;;  %962 = vst.msk [vmem:[#allocation3 + $0x20] sm:$0xff] %vm957_vm4, %v870_v50  ;;  %v5623_v6 = vld [vmem:[#allocation2 + $0x62] sm:$0xff]  ;;  %v5625_v50 = vld [vmem:[#allocation2 + $0x6a] sm:$0xff] }
 0x127   : > { %1114 = vrot.lane.b32.xlu0 %v1020_v1, %s4657_s28  ;;  %v5621_v1 = vld [vmem:[#allocation2 + $0x69] sm:$0xff]  ;;  %2305 = vst.msk [vmem:[#allocation2 + $0x60] sm:$0xff] %vm258_vm0, %v7474_v39 }
 0x128   : > { %v868_v40 = vpop.permute.xlu1 %867  ;;  %2307 = vst.msk [vmem:[#allocation2 + $0x70] sm:$0x3] %vm261_vm1, %v7474_v39 }
 0x129   : > { %961 = vst.msk [vmem:[#allocation3 + $0x18] sm:$0xff] %vm957_vm4, %v868_v40  ;;  %v874_v10 = vpop.permute.xlu0 %873  ;;  %v7482_v40 = vld [vmem:[#allocation48_spill] sm:$0xff] }
 0x12a   : > { %1112 = vrot.lane.b32.xlu1 %v7472_v2, %s4657_s28  ;;  %964 = vst.msk [vmem:[#allocation3 + $0x30] sm:$0xff] %vm957_vm4, %v874_v10 }
 0x12b   : > { %1247 = vrot.lane.b32.xlu0 %v7473_v9, %s4658_s29  ;;  %2306 = vst.msk [vmem:[#allocation2 + $0x68] sm:$0xff] %vm258_vm0, %v7474_v39  ;;  %v5641_v9 = vld [vmem:[#allocation2 + $0x81] sm:$0xff] }
 0x12c   : > { %v872_v4 = vpop.permute.xlu1 %871 }
 0x12d   : > { %963 = vst.msk [vmem:[#allocation3 + $0x28] sm:$0xff] %vm957_vm4, %v872_v4  ;;  %v878_v32 = vpop.permute.xlu0 %877  ;;  %v5638_v4 = vld [vmem:[#allocation2 + $0x79] sm:$0xff] }
 0x12e   : > { %1116 = vrot.lane.b32.xlu1 %v1021_v25, %s4657_s28  ;;  %966 = vst.msk [vmem:[#allocation3 + $0x40] sm:$0xff] %vm957_vm4, %v878_v32  ;;  %v7483_v25 = vld [vmem:[#allocation49_spill] sm:$0xff] }
 0x12f   : > { %1251 = vrot.lane.b32.xlu0 %v7475_v43, %s4658_s29  ;;  %v5643_v32 = vld [vmem:[#allocation2 + $0x7a] sm:$0xff] }
 0x130   : > { %v876_v42 = vpop.permute.xlu1 %875  ;;  %v7484_v43 = vld [vmem:[#allocation50_spill] sm:$0xff]  ;;  %2308 = vst.msk [vmem:[#allocation2 + $0x78] sm:$0xff] %vm258_vm0, %v7474_v39 }
 0x131   : > { %965 = vst.msk [vmem:[#allocation3 + $0x38] sm:$0xff] %vm957_vm4, %v876_v42  ;;  %v882_v57 = vpop.permute.xlu0 %881  ;;  %v5645_v42 = vld [vmem:[#allocation2 + $0x82] sm:$0xff] }
 0x132   : > { %1249 = vrot.lane.b32.xlu1 %v7476_v54, %s4658_s29  ;;  %968 = vst.msk [vmem:[#allocation3 + $0x50] sm:$0xff] %vm957_vm4, %v882_v57 }
 0x133   : > { %1255 = vrot.lane.b32.xlu0 %v7477_v52, %s4658_s29  ;;  %2310 = vst.msk [vmem:[#allocation2 + $0x88] sm:$0x3] %vm261_vm1, %v7474_v39  ;;  %v7486_v52 = vld [vmem:[#allocation52_spill] sm:$0xff] }
 0x134   : > { %v880_v60 = vpop.permute.xlu1 %879  ;;  %2309 = vst.msk [vmem:[#allocation2 + $0x80] sm:$0xff] %vm258_vm0, %v7474_v39 }
 0x135   : > { %967 = vst.msk [vmem:[#allocation3 + $0x48] sm:$0xff] %vm957_vm4, %v880_v60  ;;  %v886_v19 = vpop.permute.xlu0 %885  ;;  %v7485_v60 = vld [vmem:[#allocation51_spill] sm:$0xff] }
 0x136   : > { %1253 = vrot.lane.b32.xlu1 %v7478_v35, %s4658_s29  ;;  %970 = vst.msk [vmem:[#allocation3 + $0x60] sm:$0xff] %vm957_vm4, %v886_v19 }
 0x137   : > { %1259 = vrot.lane.b32.xlu0 %v7479_v15, %s4658_s29  ;;  %v7488_v15 = vld [vmem:[#allocation54_spill] sm:$0xff] }
 0x138   : > { %v884_v21 = vpop.permute.xlu1 %883 }
 0x139   : > { %969 = vst.msk [vmem:[#allocation3 + $0x58] sm:$0xff] %vm957_vm4, %v884_v21  ;;  %v890_v17 = vpop.permute.xlu0 %889  ;;  %v7487_v21 = vld [vmem:[#allocation53_spill] sm:$0xff] }
 0x13a   : > { %1257 = vrot.lane.b32.xlu1 %v7480_v53, %s4658_s29  ;;  %972 = vst.msk [vmem:[#allocation3 + $0x70] sm:$0xff] %vm957_vm4, %v890_v17 }
 0x13b   : > { %1263 = vrot.lane.b32.xlu0 %v7481_v11, %s4658_s29  ;;  %v5670_v11 = vld [vmem:[#allocation2 + $0x91] sm:$0xff] }
 0x13c   : > { %v888_v3 = vpop.permute.xlu1 %887 }
 0x13d   : > { %971 = vst.msk [vmem:[#allocation3 + $0x68] sm:$0xff] %vm957_vm4, %v888_v3  ;;  %v894_v2 = vpop.permute.xlu0 %893  ;;  %v7489_v3 = vld [vmem:[#allocation55_spill] sm:$0xff] }
 0x13e   : > { %1261 = vrot.lane.b32.xlu1 %v7482_v40, %s4658_s29  ;;  %974 = vst.msk [vmem:[#allocation3 + $0x80] sm:$0xff] %vm957_vm4, %v894_v2  ;;  %v5673_v40 = vld [vmem:[#allocation2 + $0x99] sm:$0xff] }
 0x13f   : > { %1267 = vrot.lane.b32.xlu0 %v7483_v25, %s4658_s29  ;;  %v5675_v2 = vld [vmem:[#allocation2 + $0x92] sm:$0xff] }
 0x140   : > { %v892_v10 = vpop.permute.xlu1 %891  ;;  %v7490_v25 = vld [vmem:[#allocation56_spill] sm:$0xff]  ;;  %2311 = vst.msk [vmem:[#allocation2 + $0x90] sm:$0xff] %vm258_vm0, %v7474_v39 }
 0x141   : > { %973 = vst.msk [vmem:[#allocation3 + $0x78] sm:$0xff] %vm957_vm4, %v892_v10  ;;  %v898_v54 = vpop.permute.xlu0 %897  ;;  %v5677_v10 = vld [vmem:[#allocation2 + $0x9a] sm:$0xff] }
 0x142   : > { %1265 = vrot.lane.b32.xlu1 %v7484_v43, %s4658_s29  ;;  %976 = vst.msk [vmem:[#allocation3 + $0x90] sm:$0xff] %vm957_vm4, %v898_v54 }
 0x143   : > { %1271 = vrot.lane.b32.xlu0 %v7485_v60, %s4658_s29  ;;  %2313 = vst.msk [vmem:[#allocation2 + $0xa0] sm:$0x3] %vm261_vm1, %v7474_v39  ;;  %v5690_v60 = vld [vmem:[#allocation2 + $0xa9] sm:$0xff] }
 0x144   : > { %v896_v57 = vpop.permute.xlu1 %895  ;;  %2312 = vst.msk [vmem:[#allocation2 + $0x98] sm:$0xff] %vm258_vm0, %v7474_v39 }
 0x145   : > { %975 = vst.msk [vmem:[#allocation3 + $0x88] sm:$0xff] %vm957_vm4, %v896_v57  ;;  %v902_v35 = vpop.permute.xlu0 %901  ;;  %v7491_v57 = vld [vmem:[#allocation57_spill] sm:$0xff] }
 0x146   : > { %1269 = vrot.lane.b32.xlu1 %v7486_v52, %s4658_s29  ;;  %978 = vst.msk [vmem:[#allocation3 + $0xa0] sm:$0xff] %vm957_vm4, %v902_v35  ;;  %v5693_v52 = vld [vmem:[#allocation2 + $0xb1] sm:$0xff] }
 0x147   : > { %1275 = vrot.lane.b32.xlu0 %v7487_v21, %s4658_s29  ;;  %v5695_v35 = vld [vmem:[#allocation2 + $0xaa] sm:$0xff]  ;;  %v7492_v21 = vld [vmem:[#allocation58_spill] sm:$0xff] }
 0x148   : > { %v900_v19 = vpop.permute.xlu1 %899  ;;  %2314 = vst.msk [vmem:[#allocation2 + $0xa8] sm:$0xff] %vm258_vm0, %v7474_v39 }
 0x149   : > { %977 = vst.msk [vmem:[#allocation3 + $0x98] sm:$0xff] %vm957_vm4, %v900_v19  ;;  %v906_v53 = vpop.permute.xlu0 %905  ;;  %v5697_v19 = vld [vmem:[#allocation2 + $0xb2] sm:$0xff] }
 0x14a   : > { %1273 = vrot.lane.b32.xlu1 %v7488_v15, %s4658_s29  ;;  %980 = vst.msk [vmem:[#allocation3 + $0xb0] sm:$0xff] %vm957_vm4, %v906_v53 }
 0x14b   : > { %1279 = vrot.lane.b32.xlu0 %v7489_v3, %s4658_s29  ;;  %2316 = vst.msk [vmem:[#allocation2 + $0xb8] sm:$0x3] %vm261_vm1, %v7474_v39  ;;  %v7494_v3 = vld [vmem:[#allocation60_spill] sm:$0xff] }
 0x14c   : > { %v904_v17 = vpop.permute.xlu1 %903  ;;  %2315 = vst.msk [vmem:[#allocation2 + $0xb0] sm:$0xff] %vm258_vm0, %v7474_v39 }
 0x14d   : > { %979 = vst.msk [vmem:[#allocation3 + $0xa8] sm:$0xff] %vm957_vm4, %v904_v17  ;;  %v910_v43 = vpop.permute.xlu0 %909  ;;  %v7493_v17 = vld [vmem:[#allocation59_spill] sm:$0xff] }
 0x14e   : > { %1277 = vrot.lane.b32.xlu1 %v7490_v25, %s4658_s29  ;;  %982 = vst.msk [vmem:[#allocation3 + $0xc0] sm:$0xff] %vm957_vm4, %v910_v43 }
 0x14f   : > { %1283 = vrot.lane.b32.xlu0 %v7491_v57, %s4658_s29  ;;  %v7496_v57 = vld [vmem:[#allocation62_spill] sm:$0xff] }
 0x150   : > { %v908_v54 = vpop.permute.xlu1 %907 }
 0x151   : > { %981 = vst.msk [vmem:[#allocation3 + $0xb8] sm:$0xff] %vm957_vm4, %v908_v54  ;;  %v914_v15 = vpop.permute.xlu0 %913  ;;  %v7495_v54 = vld [vmem:[#allocation61_spill] sm:$0xff] }
 0x152   : > { %1281 = vrot.lane.b32.xlu1 %v7492_v21, %s4658_s29  ;;  %984 = vst.msk [vmem:[#allocation3 + $0xd0] sm:$0xff] %vm957_vm4, %v914_v15 }
 0x153   : > { %1287 = vrot.lane.b32.xlu0 %v7493_v17, %s4658_s29  ;;  %v5722_v17 = vld [vmem:[#allocation2 + $0xc1] sm:$0xff] }
 0x154   : > { %v912_v53 = vpop.permute.xlu1 %911 }
 0x155   : > { %983 = vst.msk [vmem:[#allocation3 + $0xc8] sm:$0xff] %vm957_vm4, %v912_v53  ;;  %v918_v25 = vpop.permute.xlu0 %917  ;;  %v7497_v53 = vld [vmem:[#allocation63_spill] sm:$0xff] }
 0x156   : > { %1285 = vrot.lane.b32.xlu1 %v7494_v3, %s4658_s29  ;;  %986 = vst.msk [vmem:[#allocation3 + $0xe0] sm:$0xff] %vm957_vm4, %v918_v25  ;;  %v5725_v3 = vld [vmem:[#allocation2 + $0xc9] sm:$0xff] }
 0x157   : > { %1291 = vrot.lane.b32.xlu0 %v7495_v54, %s4658_s29  ;;  %7498 = vst [vmem:[#allocation36_spill] sm:$0xff] %v5725_v3  ;;  %v5727_v25 = vld [vmem:[#allocation2 + $0xc2] sm:$0xff]  ;;  %v7501_v54 = vld [vmem:[#allocation64_spill] sm:$0xff] }
 0x158   : > { %v916_v43 = vpop.permute.xlu1 %915  ;;  %7499 = vst [vmem:[#allocation37_spill] sm:$0xff] %v5727_v25  ;;  %2317 = vst.msk [vmem:[#allocation2 + $0xc0] sm:$0xff] %vm258_vm0, %v7474_v39  ;;  %v7502_v25 = vld [vmem:[#allocation65_spill] sm:$0xff] }
 0x159   : > { %985 = vst.msk [vmem:[#allocation3 + $0xd8] sm:$0xff] %vm957_vm4, %v916_v43  ;;  %v922_v21 = vpop.permute.xlu0 %921  ;;  %v5729_v43 = vld [vmem:[#allocation2 + $0xca] sm:$0xff] }
 0x15a   : > { %1289 = vrot.lane.b32.xlu1 %v7496_v57, %s4658_s29  ;;  %988 = vst.msk [vmem:[#allocation3 + $0xf0] sm:$0xff] %vm957_vm4, %v922_v21  ;;  %7500 = vst [vmem:[#allocation40_spill] sm:$0xff] %v5729_v43  ;;  %v5749_v43 = vld [vmem:[#allocation2 + $0xe2] sm:$0xff] }
 0x15b   : > { %1295 = vrot.lane.b32.xlu0 %v7497_v53, %s4658_s29  ;;  %2319 = vst.msk [vmem:[#allocation2 + $0xd0] sm:$0x3] %vm261_vm1, %v7474_v39  ;;  %v5745_v53 = vld [vmem:[#allocation2 + $0xe1] sm:$0xff] }
 0x15c   : > { %v920_v15 = vpop.permute.xlu1 %919  ;;  %2318 = vst.msk [vmem:[#allocation2 + $0xc8] sm:$0xff] %vm258_vm0, %v7474_v39 }
 0x15d   : > { %987 = vst.msk [vmem:[#allocation3 + $0xe8] sm:$0xff] %vm957_vm4, %v920_v15  ;;  %v1055_v57 = vpop.permute.xlu0 %1054  ;;  %v5742_v15 = vld [vmem:[#allocation2 + $0xd9] sm:$0xff] }
 0x15e   : > { %1293 = vrot.lane.b32.xlu1 %v7501_v54, %s4658_s29  ;;  %1151 = vst.msk [vmem:[#allocation3] sm:$0xff] %vm1150_vm5, %v1055_v57  ;;  %v5747_v54 = vld [vmem:[#allocation2 + $0xda] sm:$0xff]  ;;  %v5763_v57 = vld [vmem:[#allocation2 + $0x182] sm:$0xff] }
 0x15f   : > { %1299 = vrot.lane.b32.xlu0 %v5351_v41, %s4658_s29  ;;  %2320 = vst.msk [vmem:[#allocation2 + $0xd8] sm:$0xff] %vm258_vm0, %v7474_v39  ;;  %2321 = vst.msk [vmem:[#allocation2 + $0xe0] sm:$0xff] %vm258_vm0, %v7474_v39 }
 0x160   : > { %v924_v21 = vpop.permute.xlu1 %923  ;;  %2322 = vst.msk [vmem:[#allocation2 + $0xe8] sm:$0x3] %vm261_vm1, %v7474_v39  ;;  %7503 = vst [vmem:[#allocation41_spill] sm:$0xff] %v5763_v57 }
 0x161   : > { %989 = vst.msk [vmem:[#allocation3 + $0xf8] sm:$0xff] %vm957_vm4, %v924_v21  ;;  %v1059_v3 = vpop.permute.xlu0 %1058 }
 0x162   : > { %1297 = vrot.lane.b32.xlu1 %v7502_v25, %s4658_s29  ;;  %1153 = vst.msk [vmem:[#allocation3 + $0x10] sm:$0xff] %vm1150_vm5, %v1059_v3  ;;  %v5773_v3 = vld [vmem:[#allocation2 + $0x18a] sm:$0xff] }
 0x163   : > { %1303 = vrot.lane.b32.xlu0 %v5361_v48, %s4658_s29  ;;  %7504 = vst [vmem:[#allocation35_spill] sm:$0xff] %v5773_v3 }
 0x164   : > { %v1057_v41 = vpop.permute.xlu1 %1056 }
 0x165   : > { %1152 = vst.msk [vmem:[#allocation3 + $0x8] sm:$0xff] %vm1150_vm5, %v1057_v41  ;;  %v1063_v25 = vpop.permute.xlu0 %1062 }
 0x166   : > { %1301 = vrot.lane.b32.xlu1 %v5365_v47, %s4658_s29  ;;  %1155 = vst.msk [vmem:[#allocation3 + $0x20] sm:$0xff] %vm1150_vm5, %v1063_v25  ;;  %v5778_v47 = vld [vmem:[#allocation2 + $0xf1] sm:$0xff]  ;;  %v5781_v25 = vld [vmem:[#allocation2 + $0xf9] sm:$0xff] }
 0x167   : > { %1307 = vrot.lane.b32.xlu0 %v5763_v57, %s4658_s29  ;;  %v5785_v57 = vld [vmem:[#allocation2 + $0xfa] sm:$0xff] }
 0x168   : > { %v1061_v21 = vpop.permute.xlu1 %1060  ;;  %7506 = vst [vmem:[#allocation34_spill] sm:$0xff] %v5785_v57  ;;  %2325 = vst.msk [vmem:[#allocation2 + $0x100] sm:$0x3] %vm261_vm1, %v7474_v39  ;;  %v5805_v57 = vld [vmem:[#allocation2 + $0x112] sm:$0xff] }
 0x169   : > { %1154 = vst.msk [vmem:[#allocation3 + $0x18] sm:$0xff] %vm1150_vm5, %v1061_v21  ;;  %v1067_v48 = vpop.permute.xlu0 %1066  ;;  %v5783_v21 = vld [vmem:[#allocation2 + $0xf2] sm:$0xff] }
 0x16a   : > { %1305 = vrot.lane.b32.xlu1 %v5373_v5, %s4658_s29  ;;  %1157 = vst.msk [vmem:[#allocation3 + $0x30] sm:$0xff] %vm1150_vm5, %v1067_v48  ;;  %7505 = vst [vmem:[#allocation42_spill] sm:$0xff] %v5783_v21  ;;  %v5798_v48 = vld [vmem:[#allocation2 + $0x109] sm:$0xff] }
 0x16b   : > { %1441 = vrot.lane.b32.xlu0 %v5060_v55, %s4659_s30  ;;  %2323 = vst.msk [vmem:[#allocation2 + $0xf0] sm:$0xff] %vm258_vm0, %v7474_v39  ;;  %2324 = vst.msk [vmem:[#allocation2 + $0xf8] sm:$0xff] %vm258_vm0, %v7474_v39 }
 0x16c   : > { %v1065_v41 = vpop.permute.xlu1 %1064 }
 0x16d   : > { %1156 = vst.msk [vmem:[#allocation3 + $0x28] sm:$0xff] %vm1150_vm5, %v1065_v41  ;;  %v1071_v5 = vpop.permute.xlu0 %1070  ;;  %v5801_v41 = vld [vmem:[#allocation2 + $0x111] sm:$0xff] }
 0x16e   : > { %1309 = vrot.lane.b32.xlu1 %v5773_v3, %s4658_s29  ;;  %1159 = vst.msk [vmem:[#allocation3 + $0x40] sm:$0xff] %vm1150_vm5, %v1071_v5  ;;  %v5803_v3 = vld [vmem:[#allocation2 + $0x10a] sm:$0xff] }
 0x16f   : > { %1445 = vrot.lane.b32.xlu0 %v5074_v58, %s4659_s30  ;;  %2326 = vst.msk [vmem:[#allocation2 + $0x108] sm:$0xff] %vm258_vm0, %v7474_v39  ;;  %2327 = vst.msk [vmem:[#allocation2 + $0x110] sm:$0xff] %vm258_vm0, %v7474_v39 }
 0x170   : > { %v1069_v55 = vpop.permute.xlu1 %1068  ;;  %2328 = vst.msk [vmem:[#allocation2 + $0x118] sm:$0x3] %vm261_vm1, %v7474_v39 }
 0x171   : > { %1158 = vst.msk [vmem:[#allocation3 + $0x38] sm:$0xff] %vm1150_vm5, %v1069_v55  ;;  %v1075_v21 = vpop.permute.xlu0 %1074  ;;  %v5833_v55 = vld [vmem:[#allocation2 + $0x129] sm:$0xff] }
 0x172   : > { %1443 = vrot.lane.b32.xlu1 %v5062_v56, %s4659_s30  ;;  %1161 = vst.msk [vmem:[#allocation3 + $0x50] sm:$0xff] %vm1150_vm5, %v1075_v21 }
 0x173   : > { %1449 = vrot.lane.b32.xlu0 %v5084_v61, %s4659_s30 }
 0x174   : > { %v1073_v58 = vpop.permute.xlu1 %1072 }
 0x175   : > { %1160 = vst.msk [vmem:[#allocation3 + $0x48] sm:$0xff] %vm1150_vm5, %v1073_v58  ;;  %v1079_v56 = vpop.permute.xlu0 %1078  ;;  %v5835_v58 = vld [vmem:[#allocation2 + $0x122] sm:$0xff] }
 0x176   : > { %1447 = vrot.lane.b32.xlu1 %v5076_v59, %s4659_s30  ;;  %1163 = vst.msk [vmem:[#allocation3 + $0x60] sm:$0xff] %vm1150_vm5, %v1079_v56  ;;  %v5830_v59 = vld [vmem:[#allocation2 + $0x121] sm:$0xff]  ;;  %v5850_v56 = vld [vmem:[#allocation2 + $0x139] sm:$0xff] }
 0x177   : > { %1453 = vrot.lane.b32.xlu0 %v5088_v63, %s4659_s30  ;;  %v5837_v63 = vld [vmem:[#allocation2 + $0x12a] sm:$0xff]  ;;  %2329 = vst.msk [vmem:[#allocation2 + $0x120] sm:$0xff] %vm258_vm0, %v7474_v39 }
 0x178   : > { %v1077_v5 = vpop.permute.xlu1 %1076  ;;  %2331 = vst.msk [vmem:[#allocation2 + $0x130] sm:$0x3] %vm261_vm1, %v7474_v39 }
 0x179   : > { %1162 = vst.msk [vmem:[#allocation3 + $0x58] sm:$0xff] %vm1150_vm5, %v1077_v5  ;;  %v1083_v21 = vpop.permute.xlu0 %1082  ;;  %v5855_v5 = vld [vmem:[#allocation2 + $0x13a] sm:$0xff] }
 0x17a   : > { %1451 = vrot.lane.b32.xlu1 %v5086_v62, %s4659_s30  ;;  %1165 = vst.msk [vmem:[#allocation3 + $0x70] sm:$0xff] %vm1150_vm5, %v1083_v21  ;;  %v5857_v21 = vld [vmem:[#allocation2 + $0x142] sm:$0xff] }
 0x17b   : > { %1457 = vrot.lane.b32.xlu0 %v5100_v8, %s4659_s30  ;;  %2330 = vst.msk [vmem:[#allocation2 + $0x128] sm:$0xff] %vm258_vm0, %v7474_v39  ;;  %2332 = vst.msk [vmem:[#allocation2 + $0x138] sm:$0xff] %vm258_vm0, %v7474_v39 }
 0x17c   : > { %v1081_v61 = vpop.permute.xlu1 %1080 }
 0x17d   : > { %1164 = vst.msk [vmem:[#allocation3 + $0x68] sm:$0xff] %vm1150_vm5, %v1081_v61  ;;  %v1087_v62 = vpop.permute.xlu0 %1086 }
 0x17e   : > { %1455 = vrot.lane.b32.xlu1 %v5098_v7, %s4659_s30  ;;  %1167 = vst.msk [vmem:[#allocation3 + $0x80] sm:$0xff] %vm1150_vm5, %v1087_v62  ;;  %v5853_v7 = vld [vmem:[#allocation2 + $0x141] sm:$0xff] }
 0x17f   : > { %1461 = vrot.lane.b32.xlu0 %v5112_v0, %s4659_s30  ;;  %2334 = vst.msk [vmem:[#allocation2 + $0x148] sm:$0x3] %vm261_vm1, %v7474_v39 }
 0x180   : > { %v1085_v8 = vpop.permute.xlu1 %1084  ;;  %2333 = vst.msk [vmem:[#allocation2 + $0x140] sm:$0xff] %vm258_vm0, %v7474_v39 }
 0x181   : > { %1166 = vst.msk [vmem:[#allocation3 + $0x78] sm:$0xff] %vm1150_vm5, %v1085_v8  ;;  %v1091_v61 = vpop.permute.xlu0 %1090 }
 0x182   : > { %1459 = vrot.lane.b32.xlu1 %v5102_v49, %s4659_s30  ;;  %1169 = vst.msk [vmem:[#allocation3 + $0x90] sm:$0xff] %vm1150_vm5, %v1091_v61  ;;  %v5891_v61 = vld [vmem:[#allocation2 + $0x159] sm:$0xff] }
 0x183   : > { %1465 = vrot.lane.b32.xlu0 %v5116_v37, %s4659_s30 }
 0x184   : > { %v1089_v0 = vpop.permute.xlu1 %1088 }
 0x185   : > { %1168 = vst.msk [vmem:[#allocation3 + $0x88] sm:$0xff] %vm1150_vm5, %v1089_v0  ;;  %v1095_v49 = vpop.permute.xlu0 %1094  ;;  %v5893_v0 = vld [vmem:[#allocation2 + $0x152] sm:$0xff] }
 0x186   : > { %1463 = vrot.lane.b32.xlu1 %v5114_v38, %s4659_s30  ;;  %1171 = vst.msk [vmem:[#allocation3 + $0xa0] sm:$0xff] %vm1150_vm5, %v1095_v49  ;;  %v5908_v49 = vld [vmem:[#allocation2 + $0x168] sm:$0xff] }
 0x187   : > { %1469 = vrot.lane.b32.xlu0 %v5128_v36, %s4659_s30 }
 0x188   : > { %v1093_v62 = vpop.permute.xlu1 %1092 }
 0x189   : > { %1170 = vst.msk [vmem:[#allocation3 + $0x98] sm:$0xff] %vm1150_vm5, %v1093_v62  ;;  %v1099_v8 = vpop.permute.xlu0 %1098  ;;  %v5910_v62 = vld [vmem:[#allocation2 + $0x170] sm:$0xff] }
 0x18a   : > { %1467 = vrot.lane.b32.xlu1 %v5126_v34, %s4659_s30  ;;  %1173 = vst.msk [vmem:[#allocation3 + $0xb0] sm:$0xff] %vm1150_vm5, %v1099_v8  ;;  %v5888_v34 = vld [vmem:[#allocation2 + $0x151] sm:$0xff] }
 0x18b   : > { %1473 = vrot.lane.b32.xlu0 %v5140_v24, %s4659_s30  ;;  %v5895_v24 = vld [vmem:[#allocation2 + $0x15a] sm:$0xff]  ;;  %2335 = vst.msk [vmem:[#allocation2 + $0x150] sm:$0xff] %vm258_vm0, %v7474_v39  ;;  %v5915_v8 = vld [vmem:[#allocation2 + $0x171] sm:$0xff] }
 0x18c   : > { %v1097_v37 = vpop.permute.xlu1 %1096  ;;  %2337 = vst.msk [vmem:[#allocation2 + $0x160] sm:$0x3] %vm261_vm1, %v7474_v39 }
 0x18d   : > { %1172 = vst.msk [vmem:[#allocation3 + $0xa8] sm:$0xff] %vm1150_vm5, %v1097_v37  ;;  %v1103_v38 = vpop.permute.xlu0 %1102  ;;  %v5917_v37 = vld [vmem:[#allocation2 + $0x16a] sm:$0xff] }
 0x18e   : > { %1471 = vrot.lane.b32.xlu1 %v5130_v33, %s4659_s30  ;;  %1175 = vst.msk [vmem:[#allocation3 + $0xc0] sm:$0xff] %vm1150_vm5, %v1103_v38  ;;  %v5919_v38 = vld [vmem:[#allocation2 + $0x172] sm:$0xff] }
 0x18f   : > { %1477 = vrot.lane.b32.xlu0 %v5144_v23, %s4659_s30  ;;  %2336 = vst.msk [vmem:[#allocation2 + $0x158] sm:$0xff] %vm258_vm0, %v7474_v39 }
 0x190   : > { %v1101_v36 = vpop.permute.xlu1 %1100  ;;  %2340 = vst.msk [vmem:[#allocation2 + $0x178] sm:$0x3] %vm261_vm1, %v7474_v39 }
 0x191   : > { %1174 = vst.msk [vmem:[#allocation3 + $0xb8] sm:$0xff] %vm1150_vm5, %v1101_v36  ;;  %v1107_v33 = vpop.permute.xlu0 %1106 }
 0x192   : > { %1475 = vrot.lane.b32.xlu1 %v5142_v29, %s4659_s30  ;;  %1177 = vst.msk [vmem:[#allocation3 + $0xd0] sm:$0xff] %vm1150_vm5, %v1107_v33  ;;  %v5912_v29 = vld [vmem:[#allocation2 + $0x169] sm:$0xff] }
 0x193   : > { %1481 = vrot.lane.b32.xlu0 %v5160_v20, %s4659_s30  ;;  %2338 = vst.msk [vmem:[#allocation2 + $0x168] sm:$0xff] %vm258_vm0, %v7474_v39  ;;  %2339 = vst.msk [vmem:[#allocation2 + $0x170] sm:$0xff] %vm258_vm0, %v7474_v39 }
 0x194   : > { %v1105_v23 = vpop.permute.xlu1 %1104 }
 0x195   : > { %1176 = vst.msk [vmem:[#allocation3 + $0xc8] sm:$0xff] %vm1150_vm5, %v1105_v23  ;;  %v1111_v36 = vpop.permute.xlu0 %1110 }
 0x196   : > { %1479 = vrot.lane.b32.xlu1 %v5154_v28, %s4659_s30  ;;  %1179 = vst.msk [vmem:[#allocation3 + $0xe0] sm:$0xff] %vm1150_vm5, %v1111_v36  ;;  %v4635_v28 = vld [vmem:[%s7335_s1] sm:$0xff]  }
 0x197   : > { %1485 = vrot.lane.b32.xlu0 %v5176_v16, %s4659_s30  ;;  %4532 = vmatprep.subr.bf16.mxu0 %v4635_v28  ;;  %v4636_v16 = vld [vmem:[%s7335_s1 + $0x8] sm:$0xff]  }
 0x198   : > { %v1109_v20 = vpop.permute.xlu1 %1108  ;;  %4533 = vmatpush3.bf16.msra.mxu0 %v4635_v28  ;;  %v5955_v28 = vld [vmem:[#allocation2 + $0x181] sm:$0xff] }
 0x199   : > { %1178 = vst.msk [vmem:[#allocation3 + $0xd8] sm:$0xff] %vm1150_vm5, %v1109_v20  ;;  %v1115_v33 = vpop.permute.xlu0 %1114  ;;  %4534 = vmatprep.subr.bf16.mxu0 %v4636_v16  ;;  %v5952_v20 = vld [vmem:[#allocation2 + $0x188] sm:$0xff] }
 0x19a   : > { %1483 = vrot.lane.b32.xlu1 %v5162_v22, %s4659_s30  ;;  %1181 = vst.msk [vmem:[#allocation3 + $0xf0] sm:$0xff] %vm1150_vm5, %v1115_v33  ;;  %v5957_v33 = vld [vmem:[#allocation2 + $0x189] sm:$0xff] }
 0x19b   : > { %1489 = vrot.lane.b32.xlu0 %v5192_v12, %s4659_s30  ;;  %v5950_v12 = vld [vmem:[#allocation2 + $0x180] sm:$0xff]  ;;  %2343 = vst.msk [vmem:[#allocation2 + $0x190] sm:$0x3] %vm261_vm1, %v7474_v39 }
 0x19c   : > { %v1113_v23 = vpop.permute.xlu1 %1112  ;;  %4535 = vmatpush3.bf16.msra.mxu0 %v4636_v16  ;;  %2341 = vst.msk [vmem:[#allocation2 + $0x180] sm:$0xff] %vm258_vm0, %v7474_v39  ;;  %2342 = vst.msk [vmem:[#allocation2 + $0x188] sm:$0xff] %vm258_vm0, %v7474_v39 }
 0x19d   : > { %1180 = vst.msk [vmem:[#allocation3 + $0xe8] sm:$0xff] %vm1150_vm5, %v1113_v23  ;;  %v1248_v22 = vpop.permute.xlu0 %1247 }
 0x19e   : > { %1487 = vrot.lane.b32.xlu1 %v5178_v18, %s4659_s30  ;;  %1344 = vst.msk [vmem:[#allocation3] sm:$0xff] %vm1343_vm6, %v1248_v22  ;;  %v4637_v18 = vld [vmem:[%s7335_s1 + $0x10] sm:$0xff]  }
 0x19f   : > { %1634 = vrot.lane.b32.xlu0 %v5567_v26, %s4660_s10  ;;  %4536 = vmatprep.subr.bf16.mxu0 %v4637_v18 }
 0x1a0   : > { %v1117_v36 = vpop.permute.xlu1 %1116  ;;  %4537 = vmatpush3.bf16.msra.mxu0 %v4637_v18 }
 0x1a1   : > { %1182 = vst.msk [vmem:[#allocation3 + $0xf8] sm:$0xff] %vm1150_vm5, %v1117_v36  ;;  %v1252_v23 = vpop.permute.xlu0 %1251 }
 0x1a2   : > { %1491 = vrot.lane.b32.xlu1 %v5194_v14, %s4659_s30  ;;  %1346 = vst.msk [vmem:[#allocation3 + $0x10] sm:$0xff] %vm1343_vm6, %v1252_v23  ;;  %v4638_v14 = vld [vmem:[%s7335_s1 + $0x18] sm:$0xff]   ;;  %v5995_v23 = vld [vmem:[#allocation2 + $0x1a0] sm:$0xff] }
 0x1a3   : > { %1638 = vrot.lane.b32.xlu0 %v5586_v44, %s4660_s10  ;;  %4538 = vmatprep.subr.bf16.mxu0 %v4638_v14  ;;  %v4639_v44 = vld [vmem:[%s7335_s1 + $0x20] ss:$0 sps:$4 sm:$0xff]  }
 0x1a4   : > { %v1250_v26 = vpop.permute.xlu1 %1249  ;;  %4539 = vmatpush3.bf16.msra.mxu0 %v4638_v14  ;;  %v2098_v36 = vsel %vm2096_vm7, %v4639_v44, 0  ;;  %v6002_v14 = vld [vmem:[#allocation2 + $0x19a] sm:$0xff] }
 0x1a5   : > { %1345 = vst.msk [vmem:[#allocation3 + $0x8] sm:$0xff] %vm1343_vm6, %v1250_v26  ;;  %v1256_v16 = vpop.permute.xlu0 %1255  ;;  %4616 = vmatprep.subr.msk.bf16.mxu0 %vm2096_vm7, %v4639_v44  ;;  %v5997_v26 = vld [vmem:[#allocation2 + $0x199] sm:$0xff] }
 0x1a6   : > { %1636 = vrot.lane.b32.xlu1 %v5570_v27, %s4660_s10  ;;  %1348 = vst.msk [vmem:[#allocation3 + $0x20] sm:$0xff] %vm1343_vm6, %v1256_v16  ;;  %v6004_v16 = vld [vmem:[#allocation2 + $0x1a2] sm:$0xff] }
 0x1a7   : > { %1827 = vrot.lane.b32.xlu0 %v5572_v30, %s4661_s15  ;;  %v5993_v30 = vld [vmem:[#allocation2 + $0x198] sm:$0xff] }
 0x1a8   : > { %v1254_v22 = vpop.permute.xlu1 %1253  ;;  %4541 = vmatpush3.bf16.msra.mxu0 %v2098_v36  ;;  %2344 = vst.msk [vmem:[#allocation2 + $0x198] sm:$0xff] %vm258_vm0, %v7474_v39  ;;  %v7508_v36 = vld [vmem:[#allocation37_spill] sm:$0xff] }
 0x1a9   : > { %1347 = vst.msk [vmem:[#allocation3 + $0x18] sm:$0xff] %vm1343_vm6, %v1254_v22  ;;  %v1260_v27 = vpop.permute.xlu0 %1259 }
 0x1aa   : > { %1640 = vrot.lane.b32.xlu1 %v5589_v45, %s4660_s10  ;;  %1350 = vst.msk [vmem:[#allocation3 + $0x30] sm:$0xff] %vm1343_vm6, %v1260_v27  ;;  %v6000_v45 = vld [vmem:[#allocation2 + $0x1a1] sm:$0xff] }
 0x1ab   : > { %1831 = vrot.lane.b32.xlu0 %v5591_v46, %s4661_s15  ;;  %2345 = vst.msk [vmem:[#allocation2 + $0x1a0] sm:$0xff] %vm258_vm0, %v7474_v39 }
 0x1ac   : > { %v1258_v18 = vpop.permute.xlu1 %1257  ;;  %2346 = vst.msk [vmem:[#allocation2 + $0x1a8] sm:$0x3] %vm261_vm1, %v7474_v39 }
 0x1ad   : > { %1349 = vst.msk [vmem:[#allocation3 + $0x28] sm:$0xff] %vm1343_vm6, %v1258_v18  ;;  %v1264_v22 = vpop.permute.xlu0 %1263  ;;  %v7509_v18 = vld [vmem:[#allocation40_spill] sm:$0xff] }
 0x1ae   : > { %1829 = vrot.lane.b32.xlu1 %v5574_v31, %s4661_s15  ;;  %1352 = vst.msk [vmem:[#allocation3 + $0x40] sm:$0xff] %vm1343_vm6, %v1264_v22 }
 0x1af   : > { %1642 = vrot.lane.b32.xlu0 %v5618_v13, %s4660_s10 }
 0x1b0   : > { %v1262_v46 = vpop.permute.xlu1 %1261 }
 0x1b1   : > { %1351 = vst.msk [vmem:[#allocation3 + $0x38] sm:$0xff] %vm1343_vm6, %v1262_v46  ;;  %v1268_v31 = vpop.permute.xlu0 %1267 }
 0x1b2   : > { %1833 = vrot.lane.b32.xlu1 %v5593_v51, %s4661_s15  ;;  %1354 = vst.msk [vmem:[#allocation3 + $0x50] sm:$0xff] %vm1343_vm6, %v1268_v31 }
 0x1b3   : > { %1646 = vrot.lane.b32.xlu0 %v5638_v4, %s4660_s10 }
 0x1b4   : > { %v1266_v44 = vpop.permute.xlu1 %1265 }
 0x1b5   : > { %1353 = vst.msk [vmem:[#allocation3 + $0x48] sm:$0xff] %vm1343_vm6, %v1266_v44  ;;  %v1272_v39 = vpop.permute.xlu0 %1271  ;;  %v7510_v44 = vld [vmem:[#allocation42_spill] sm:$0xff] }
 0x1b6   : > { %1644 = vrot.lane.b32.xlu1 %v5621_v1, %s4660_s10  ;;  %1356 = vst.msk [vmem:[#allocation3 + $0x60] sm:$0xff] %vm1343_vm6, %v1272_v39 }
 0x1b7   : > { %1835 = vrot.lane.b32.xlu0 %v5623_v6, %s4661_s15 }
 0x1b8   : > { %v1270_v13 = vpop.permute.xlu1 %1269 }
 0x1b9   : > { %1355 = vst.msk [vmem:[#allocation3 + $0x58] sm:$0xff] %vm1343_vm6, %v1270_v13  ;;  %v1276_v51 = vpop.permute.xlu0 %1275 }
 0x1ba   : > { %1648 = vrot.lane.b32.xlu1 %v5641_v9, %s4660_s10  ;;  %1358 = vst.msk [vmem:[#allocation3 + $0x70] sm:$0xff] %vm1343_vm6, %v1276_v51 }
 0x1bb   : > { %1839 = vrot.lane.b32.xlu0 %v5643_v32, %s4661_s15 }
 0x1bc   : > { %v1274_v4 = vpop.permute.xlu1 %1273 }
 0x1bd   : > { %1357 = vst.msk [vmem:[#allocation3 + $0x68] sm:$0xff] %vm1343_vm6, %v1274_v4  ;;  %v1280_v1 = vpop.permute.xlu0 %1279  ;;  %v7512_v4 = vld [vmem:[#allocation41_spill] sm:$0xff] }
 0x1be   : > { %1837 = vrot.lane.b32.xlu1 %v5625_v50, %s4661_s15  ;;  %1360 = vst.msk [vmem:[#allocation3 + $0x80] sm:$0xff] %vm1343_vm6, %v1280_v1 }
 0x1bf   : > { %1650 = vrot.lane.b32.xlu0 %v5670_v11, %s4660_s10 }
 0x1c0   : > { %v1278_v6 = vpop.permute.xlu1 %1277 }
 0x1c1   : > { %1359 = vst.msk [vmem:[#allocation3 + $0x78] sm:$0xff] %vm1343_vm6, %v1278_v6  ;;  %v1284_v9 = vpop.permute.xlu0 %1283 }
 0x1c2   : > { %1841 = vrot.lane.b32.xlu1 %v5645_v42, %s4661_s15  ;;  %1362 = vst.msk [vmem:[#allocation3 + $0x90] sm:$0xff] %vm1343_vm6, %v1284_v9  ;;  %v7513_v9 = vld [vmem:[#allocation35_spill] sm:$0xff] }
 0x1c3   : > { %1654 = vrot.lane.b32.xlu0 %v5690_v60, %s4660_s10 }
 0x1c4   : > { %v1282_v32 = vpop.permute.xlu1 %1281 }
 0x1c5   : > { %1361 = vst.msk [vmem:[#allocation3 + $0x88] sm:$0xff] %vm1343_vm6, %v1282_v32  ;;  %v1288_v50 = vpop.permute.xlu0 %1287 }
 0x1c6   : > { %1652 = vrot.lane.b32.xlu1 %v5673_v40, %s4660_s10  ;;  %1364 = vst.msk [vmem:[#allocation3 + $0xa0] sm:$0xff] %vm1343_vm6, %v1288_v50 }
 0x1c7   : > { %1843 = vrot.lane.b32.xlu0 %v5675_v2, %s4661_s15 }
 0x1c8   : > { %v1286_v11 = vpop.permute.xlu1 %1285 }
 0x1c9   : > { %1363 = vst.msk [vmem:[#allocation3 + $0x98] sm:$0xff] %vm1343_vm6, %v1286_v11  ;;  %v1292_v42 = vpop.permute.xlu0 %1291 }
 0x1ca   : > { %1656 = vrot.lane.b32.xlu1 %v5693_v52, %s4660_s10  ;;  %1366 = vst.msk [vmem:[#allocation3 + $0xb0] sm:$0xff] %vm1343_vm6, %v1292_v42 }
 0x1cb   : > { %1847 = vrot.lane.b32.xlu0 %v5695_v35, %s4661_s15 }
 0x1cc   : > { %v1290_v60 = vpop.permute.xlu1 %1289 }
 0x1cd   : > { %1365 = vst.msk [vmem:[#allocation3 + $0xa8] sm:$0xff] %vm1343_vm6, %v1290_v60  ;;  %v1296_v40 = vpop.permute.xlu0 %1295 }
 0x1ce   : > { %1845 = vrot.lane.b32.xlu1 %v5677_v10, %s4661_s15  ;;  %1368 = vst.msk [vmem:[#allocation3 + $0xc0] sm:$0xff] %vm1343_vm6, %v1296_v40  ;;  %v7507_v10 = vld [vmem:[#allocation36_spill] sm:$0xff] }
 0x1cf   : > { %1658 = vrot.lane.b32.xlu0 %v5722_v17, %s4660_s10 }
 0x1d0   : > { %v1294_v2 = vpop.permute.xlu1 %1293 }
 0x1d1   : > { %1367 = vst.msk [vmem:[#allocation3 + $0xb8] sm:$0xff] %vm1343_vm6, %v1294_v2  ;;  %v1300_v52 = vpop.permute.xlu0 %1299 }
 0x1d2   : > { %1849 = vrot.lane.b32.xlu1 %v5697_v19, %s4661_s15  ;;  %1370 = vst.msk [vmem:[#allocation3 + $0xd0] sm:$0xff] %vm1343_vm6, %v1300_v52 }
 0x1d3   : > { %1662 = vrot.lane.b32.xlu0 %v5742_v15, %s4660_s10 }
 0x1d4   : > { %v1298_v35 = vpop.permute.xlu1 %1297 }
 0x1d5   : > { %1369 = vst.msk [vmem:[#allocation3 + $0xc8] sm:$0xff] %vm1343_vm6, %v1298_v35  ;;  %v1304_v27 = vpop.permute.xlu0 %1303 }
 0x1d6   : > { %1660 = vrot.lane.b32.xlu1 %v7507_v10, %s4660_s10  ;;  %1372 = vst.msk [vmem:[#allocation3 + $0xe0] sm:$0xff] %vm1343_vm6, %v1304_v27 }
 0x1d7   : > { %1851 = vrot.lane.b32.xlu0 %v7508_v36, %s4661_s15 }
 0x1d8   : > { %v1302_v17 = vpop.permute.xlu1 %1301 }
 0x1d9   : > { %1371 = vst.msk [vmem:[#allocation3 + $0xd8] sm:$0xff] %vm1343_vm6, %v1302_v17  ;;  %v1308_v19 = vpop.permute.xlu0 %1307 }
 0x1da   : > { %1664 = vrot.lane.b32.xlu1 %v5745_v53, %s4660_s10  ;;  %1374 = vst.msk [vmem:[#allocation3 + $0xf0] sm:$0xff] %vm1343_vm6, %v1308_v19 }
 0x1db   : > { %1855 = vrot.lane.b32.xlu0 %v5747_v54, %s4661_s15 }
 0x1dc   : > { %v1306_v15 = vpop.permute.xlu1 %1305 }
 0x1dd   : > { %1373 = vst.msk [vmem:[#allocation3 + $0xe8] sm:$0xff] %vm1343_vm6, %v1306_v15  ;;  %v1442_v22 = vpop.permute.xlu0 %1441 }
 0x1de   : > { %1853 = vrot.lane.b32.xlu1 %v7509_v18, %s4661_s15  ;;  %1538 = vst.msk [vmem:[#allocation3] sm:$0xff] %vm1537_vm8, %v1442_v22 }
 0x1df   : > { %1666 = vrot.lane.b32.xlu0 %v5778_v47, %s4660_s10 }
 0x1e0   : > { %v1310_v46 = vpop.permute.xlu1 %1309 }
 0x1e1   : > { %1375 = vst.msk [vmem:[#allocation3 + $0xf8] sm:$0xff] %vm1343_vm6, %v1310_v46  ;;  %v1446_v53 = vpop.permute.xlu0 %1445 }
 0x1e2   : > { %1857 = vrot.lane.b32.xlu1 %v5749_v43, %s4661_s15  ;;  %1540 = vst.msk [vmem:[#allocation3 + $0x10] sm:$0xff] %vm1537_vm8, %v1446_v53 }
 0x1e3   : > { %1670 = vrot.lane.b32.xlu0 %v5798_v48, %s4660_s10 }
 0x1e4   : > { %v1444_v54 = vpop.permute.xlu1 %1443 }
 0x1e5   : > { %1539 = vst.msk [vmem:[#allocation3 + $0x8] sm:$0xff] %vm1537_vm8, %v1444_v54  ;;  %v1450_v31 = vpop.permute.xlu0 %1449 }
 0x1e6   : > { %1668 = vrot.lane.b32.xlu1 %v5781_v25, %s4660_s10  ;;  %1542 = vst.msk [vmem:[#allocation3 + $0x20] sm:$0xff] %vm1537_vm8, %v1450_v31  ;;  %v7511_v25 = vld [vmem:[#allocation34_spill] sm:$0xff] }
 0x1e7   : > { %1859 = vrot.lane.b32.xlu0 %v7510_v44, %s4661_s15 }
 0x1e8   : > { %v1448_v47 = vpop.permute.xlu1 %1447 }
 0x1e9   : > { %1541 = vst.msk [vmem:[#allocation3 + $0x18] sm:$0xff] %vm1537_vm8, %v1448_v47  ;;  %v1454_v43 = vpop.permute.xlu0 %1453 }
 0x1ea   : > { %1672 = vrot.lane.b32.xlu1 %v5801_v41, %s4660_s10  ;;  %1544 = vst.msk [vmem:[#allocation3 + $0x30] sm:$0xff] %vm1537_vm8, %v1454_v43 }
 0x1eb   : > { %1863 = vrot.lane.b32.xlu0 %v5803_v3, %s4661_s15 }
 0x1ec   : > { %v1452_v48 = vpop.permute.xlu1 %1451 }
 0x1ed   : > { %1543 = vst.msk [vmem:[#allocation3 + $0x28] sm:$0xff] %vm1537_vm8, %v1452_v48  ;;  %v1458_v39 = vpop.permute.xlu0 %1457 }
 0x1ee   : > { %1861 = vrot.lane.b32.xlu1 %v7511_v25, %s4661_s15  ;;  %1546 = vst.msk [vmem:[#allocation3 + $0x40] sm:$0xff] %vm1537_vm8, %v1458_v39 }
 0x1ef   : > { %1674 = vrot.lane.b32.xlu0 %v5830_v59, %s4660_s10 }
 0x1f0   : > { %v1456_v13 = vpop.permute.xlu1 %1455 }
 0x1f1   : > { %1545 = vst.msk [vmem:[#allocation3 + $0x38] sm:$0xff] %vm1537_vm8, %v1456_v13  ;;  %v1462_v41 = vpop.permute.xlu0 %1461 }
 0x1f2   : > { %1865 = vrot.lane.b32.xlu1 %v5805_v57, %s4661_s15  ;;  %1548 = vst.msk [vmem:[#allocation3 + $0x50] sm:$0xff] %vm1537_vm8, %v1462_v41 }
 0x1f3   : > { %1678 = vrot.lane.b32.xlu0 %v5850_v56, %s4660_s10 }
 0x1f4   : > { %v1460_v3 = vpop.permute.xlu1 %1459 }
 0x1f5   : > { %1547 = vst.msk [vmem:[#allocation3 + $0x48] sm:$0xff] %vm1537_vm8, %v1460_v3  ;;  %v1466_v51 = vpop.permute.xlu0 %1465 }
 0x1f6   : > { %1676 = vrot.lane.b32.xlu1 %v5833_v55, %s4660_s10  ;;  %1550 = vst.msk [vmem:[#allocation3 + $0x60] sm:$0xff] %vm1537_vm8, %v1466_v51 }
 0x1f7   : > { %1867 = vrot.lane.b32.xlu0 %v5835_v58, %s4661_s15 }
 0x1f8   : > { %v1464_v59 = vpop.permute.xlu1 %1463 }
 0x1f9   : > { %1549 = vst.msk [vmem:[#allocation3 + $0x58] sm:$0xff] %vm1537_vm8, %v1464_v59  ;;  %v1470_v57 = vpop.permute.xlu0 %1469 }
 0x1fa   : > { %1680 = vrot.lane.b32.xlu1 %v5853_v7, %s4660_s10  ;;  %1552 = vst.msk [vmem:[#allocation3 + $0x70] sm:$0xff] %vm1537_vm8, %v1470_v57 }
 0x1fb   : > { %1871 = vrot.lane.b32.xlu0 %v5855_v5, %s4661_s15 }
 0x1fc   : > { %v1468_v56 = vpop.permute.xlu1 %1467 }
 0x1fd   : > { %1551 = vst.msk [vmem:[#allocation3 + $0x68] sm:$0xff] %vm1537_vm8, %v1468_v56  ;;  %v1474_v55 = vpop.permute.xlu0 %1473 }
 0x1fe   : > { %1869 = vrot.lane.b32.xlu1 %v5837_v63, %s4661_s15  ;;  %1554 = vst.msk [vmem:[#allocation3 + $0x80] sm:$0xff] %vm1537_vm8, %v1474_v55 }
 0x1ff   : > { %1493 = vrot.lane.b32.xlu0 %v5908_v49, %s4659_s30 }
 0x200   : > { %v1472_v58 = vpop.permute.xlu1 %1471 }
 0x201   : > { %1553 = vst.msk [vmem:[#allocation3 + $0x78] sm:$0xff] %vm1537_vm8, %v1472_v58  ;;  %v1478_v7 = vpop.permute.xlu0 %1477 }
 0x202   : > { %1873 = vrot.lane.b32.xlu1 %v5857_v21, %s4661_s15  ;;  %1556 = vst.msk [vmem:[#allocation3 + $0x90] sm:$0xff] %vm1537_vm8, %v1478_v7 }
 0x203   : > { %1682 = vrot.lane.b32.xlu0 %v5888_v34, %s4660_s10 }
 0x204   : > { %v1476_v5 = vpop.permute.xlu1 %1475 }
 0x205   : > { %1555 = vst.msk [vmem:[#allocation3 + $0x88] sm:$0xff] %vm1537_vm8, %v1476_v5  ;;  %v1482_v63 = vpop.permute.xlu0 %1481 }
 0x206   : > { %1495 = vrot.lane.b32.xlu1 %v5910_v62, %s4659_s30  ;;  %1558 = vst.msk [vmem:[#allocation3 + $0xa0] sm:$0xff] %vm1537_vm8, %v1482_v63 }
 0x207   : > { %1686 = vrot.lane.b32.xlu0 %v5912_v29, %s4660_s10 }
 0x208   : > { %v1480_v49 = vpop.permute.xlu1 %1479 }
 0x209   : > { %1557 = vst.msk [vmem:[#allocation3 + $0x98] sm:$0xff] %vm1537_vm8, %v1480_v49  ;;  %v1486_v21 = vpop.permute.xlu0 %1485 }
 0x20a   : > { %1684 = vrot.lane.b32.xlu1 %v5891_v61, %s4660_s10  ;;  %1560 = vst.msk [vmem:[#allocation3 + $0xb0] sm:$0xff] %vm1537_vm8, %v1486_v21 }
 0x20b   : > { %1875 = vrot.lane.b32.xlu0 %v5893_v0, %s4661_s15 }
 0x20c   : > { %v1484_v34 = vpop.permute.xlu1 %1483 }
 0x20d   : > { %1559 = vst.msk [vmem:[#allocation3 + $0xa8] sm:$0xff] %vm1537_vm8, %v1484_v34  ;;  %v1490_v62 = vpop.permute.xlu0 %1489 }
 0x20e   : > { %1688 = vrot.lane.b32.xlu1 %v5915_v8, %s4660_s10  ;;  %1562 = vst.msk [vmem:[#allocation3 + $0xc0] sm:$0xff] %vm1537_vm8, %v1490_v62 }
 0x20f   : > { %1879 = vrot.lane.b32.xlu0 %v5917_v37, %s4661_s15 }
 0x210   : > { %v1488_v29 = vpop.permute.xlu1 %1487 }
 0x211   : > { %1561 = vst.msk [vmem:[#allocation3 + $0xb8] sm:$0xff] %vm1537_vm8, %v1488_v29  ;;  %v1635_v61 = vpop.permute.xlu0 %1634 }
 0x212   : > { %1877 = vrot.lane.b32.xlu1 %v5895_v24, %s4661_s15  ;;  %1731 = vst.msk [vmem:[#allocation3] sm:$0xff] %vm1730_vm9, %v1635_v61 }
 0x213   : > { %1497 = vrot.lane.b32.xlu0 %v5950_v12, %s4659_s30 }
 0x214   : > { %v1492_v0 = vpop.permute.xlu1 %1491 }
 0x215   : > { %1563 = vst.msk [vmem:[#allocation3 + $0xc8] sm:$0xff] %vm1537_vm8, %v1492_v0  ;;  %v1639_v8 = vpop.permute.xlu0 %1638 }
 0x216   : > { %1881 = vrot.lane.b32.xlu1 %v5919_v38, %s4661_s15  ;;  %1733 = vst.msk [vmem:[#allocation3 + $0x10] sm:$0xff] %vm1730_vm9, %v1639_v8 }
 0x217   : > { %1501 = vrot.lane.b32.xlu0 %v5993_v30, %s4659_s30 }
 0x218   : > { %v1637_v37 = vpop.permute.xlu1 %1636 }
 0x219   : > { %1732 = vst.msk [vmem:[#allocation3 + $0x8] sm:$0xff] %vm1730_vm9, %v1637_v37  ;;  %v1828_v24 = vpop.permute.xlu0 %1827 }
 0x21a   : > { %1499 = vrot.lane.b32.xlu1 %v5952_v20, %s4659_s30  ;;  %1924 = vst.msk [vmem:[#allocation3] sm:$0xff] %vm1923_vm10, %v1828_v24 }
 0x21b   : > { %1690 = vrot.lane.b32.xlu0 %v5955_v28, %s4660_s10 }
 0x21c   : > { %v1641_v12 = vpop.permute.xlu1 %1640 }
 0x21d   : > { %1734 = vst.msk [vmem:[#allocation3 + $0x18] sm:$0xff] %vm1730_vm9, %v1641_v12  ;;  %v1832_v38 = vpop.permute.xlu0 %1831 }
 0x21e   : > { %1503 = vrot.lane.b32.xlu1 %v5995_v23, %s4659_s30  ;;  %1926 = vst.msk [vmem:[#allocation3 + $0x10] sm:$0xff] %vm1923_vm10, %v1832_v38 }
 0x21f   : > { %1694 = vrot.lane.b32.xlu0 %v5997_v26, %s4660_s10 }
 0x220   : > { %v1830_v30 = vpop.permute.xlu1 %1829 }
 0x221   : > { %1925 = vst.msk [vmem:[#allocation3 + $0x8] sm:$0xff] %vm1923_vm10, %v1830_v30  ;;  %v1643_v20 = vpop.permute.xlu0 %1642  ;;  %v1956_v23 = vld [vmem:[#allocation3] sm:$0xff] }
 0x222   : > { %1692 = vrot.lane.b32.xlu1 %v5957_v33, %s4660_s10  ;;  %1735 = vst.msk [vmem:[#allocation3 + $0x20] sm:$0xff] %vm1730_vm9, %v1643_v20 }
 0x223   : > { %1883 = vrot.lane.b32.xlu0 %v7512_v4, %s4661_s15 }
 0x224   : > { %v1834_v28 = vpop.permute.xlu1 %1833 }
 0x225   : > { %1927 = vst.msk [vmem:[#allocation3 + $0x18] sm:$0xff] %vm1923_vm10, %v1834_v28  ;;  %v1647_v1 = vpop.permute.xlu0 %1646  ;;  %v1958_v32 = vld [vmem:[#allocation3 + $0x10] sm:$0xff] }
 0x226   : > { %1696 = vrot.lane.b32.xlu1 %v6000_v45, %s4660_s10  ;;  %1737 = vst.msk [vmem:[#allocation3 + $0x30] sm:$0xff] %vm1730_vm9, %v1647_v1 }
 0x227   : > { %1887 = vrot.lane.b32.xlu0 %v6002_v14, %s4661_s15 }
 0x228   : > { %v1645_v26 = vpop.permute.xlu1 %1644  ;;  %v1957_v6 = vld [vmem:[#allocation3 + $0x8] sm:$0xff] }
 0x229   : > { %1736 = vst.msk [vmem:[#allocation3 + $0x28] sm:$0xff] %vm1730_vm9, %v1645_v26  ;;  %v1988_v33 = vpack.c.bf16 %v1957_v6, %v1956_v23  ;;  %v1836_v50 = vpop.permute.xlu0 %1835 }
 0x22a   : > { %1885 = vrot.lane.b32.xlu1 %v7513_v9, %s4661_s15  ;;  %1928 = vst.msk [vmem:[#allocation3 + $0x20] sm:$0xff] %vm1923_vm10, %v1836_v50 }
 0x22b   : > { %4542 = vmatprep.mubr.msk.bf16.mxu0 %vm2047_vm11, %v1988_v33 }
 0x22c   : > { %v1649_v45 = vpop.permute.xlu1 %1648  ;;  %v1959_v11 = vld [vmem:[#allocation3 + $0x18] sm:$0xff] }
 0x22d   : > { %1738 = vst.msk [vmem:[#allocation3 + $0x38] sm:$0xff] %vm1730_vm9, %v1649_v45  ;;  %v1989_v42 = vpack.c.bf16 %v1959_v11, %v1958_v32  ;;  %v1840_v14 = vpop.permute.xlu0 %1839 }
 0x22e   : > { %1889 = vrot.lane.b32.xlu1 %v6004_v16, %s4661_s15  ;;  %1930 = vst.msk [vmem:[#allocation3 + $0x30] sm:$0xff] %vm1923_vm10, %v1840_v14 }
 0x22f   : > { %4543 = vmatmul.mubr.msk.bf16.vlgmr.msra.gmra.mrb[0].mxu0 %vm2047_vm11, %v1989_v42 }
 0x230   : > { %v1838_v60 = vpop.permute.xlu1 %1837 }
 0x231   : > { %1929 = vst.msk [vmem:[#allocation3 + $0x28] sm:$0xff] %vm1923_vm10, %v1838_v60  ;;  %v1651_v40 = vpop.permute.xlu0 %1650  ;;  %v1960_v52 = vld [vmem:[#allocation3 + $0x20] sm:$0xff] }
 0x232   : > { %1739 = vst.msk [vmem:[#allocation3 + $0x40] sm:$0xff] %vm1730_vm9, %v1651_v40 }
 0x234   : > { %v1842_v2 = vpop.permute.xlu1 %1841 }
 0x235   : > { %1931 = vst.msk [vmem:[#allocation3 + $0x38] sm:$0xff] %vm1923_vm10, %v1842_v2  ;;  %v1655_v35 = vpop.permute.xlu0 %1654  ;;  %v1962_v17 = vld [vmem:[#allocation3 + $0x30] sm:$0xff] }
 0x236   : > { %1741 = vst.msk [vmem:[#allocation3 + $0x50] sm:$0xff] %vm1730_vm9, %v1655_v35 }
 0x238   : > { %v1653_v10 = vpop.permute.xlu1 %1652  ;;  %v1961_v16 = vld [vmem:[#allocation3 + $0x28] sm:$0xff] }
 0x239   : > { %1740 = vst.msk [vmem:[#allocation3 + $0x48] sm:$0xff] %vm1730_vm9, %v1653_v10  ;;  %v1990_v27 = vpack.c.bf16 %v1961_v16, %v1960_v52  ;;  %v1844_v36 = vpop.permute.xlu0 %1843 }
 0x23a   : > { %1932 = vst.msk [vmem:[#allocation3 + $0x40] sm:$0xff] %vm1923_vm10, %v1844_v36 }
 0x23b   : > { %4546 = vmatprep.mubr.msk.bf16.mxu0 %vm2047_vm11, %v1990_v27 }
 0x23c   : > { %v1657_v19 = vpop.permute.xlu1 %1656  ;;  %v1963_v15 = vld [vmem:[#allocation3 + $0x38] sm:$0xff] }
 0x23d   : > { %1742 = vst.msk [vmem:[#allocation3 + $0x58] sm:$0xff] %vm1730_vm9, %v1657_v19  ;;  %v1991_v18 = vpack.c.bf16 %v1963_v15, %v1962_v17  ;;  %v1848_v22 = vpop.permute.xlu0 %1847 }
 0x23e   : > { %1934 = vst.msk [vmem:[#allocation3 + $0x50] sm:$0xff] %vm1923_vm10, %v1848_v22  ;;  %v2443_v22 = vld [vmem:[#allocation2 + $0x1] sm:$0xff] }
 0x23f   : > { %4547 = vmatmul.mubr.msk.bf16.gmra.mrb[4].mxu0 %vm2047_vm11, %v1991_v18  ;;  %2507 = vrot.lane.b32.xlu0 %v2443_v22, %s4654_s25 }
 0x240   : > { %v1846_v46 = vpop.permute.xlu1 %1845 }
 0x241   : > { %1933 = vst.msk [vmem:[#allocation3 + $0x48] sm:$0xff] %vm1923_vm10, %v1846_v46  ;;  %v1659_v53 = vpop.permute.xlu0 %1658  ;;  %v1964_v31 = vld [vmem:[#allocation3 + $0x40] sm:$0xff] }
 0x242   : > { %1743 = vst.msk [vmem:[#allocation3 + $0x60] sm:$0xff] %vm1730_vm9, %v1659_v53  ;;  %v2444_v46 = vld [vmem:[#allocation2 + $0x9] sm:$0xff] }
 0x243   : > { %2509 = vrot.lane.b32.xlu1 %v2444_v46, %s4654_s25 }
 0x244   : > { %v1850_v54 = vpop.permute.xlu1 %1849 }
 0x245   : > { %1935 = vst.msk [vmem:[#allocation3 + $0x58] sm:$0xff] %vm1923_vm10, %v1850_v54  ;;  %v1663_v47 = vpop.permute.xlu0 %1662  ;;  %v1966_v25 = vld [vmem:[#allocation3 + $0x50] sm:$0xff] }
 0x246   : > { %1745 = vst.msk [vmem:[#allocation3 + $0x70] sm:$0xff] %vm1730_vm9, %v1663_v47 }
 0x248   : > { %v1661_v44 = vpop.permute.xlu1 %1660  ;;  %v1965_v43 = vld [vmem:[#allocation3 + $0x48] sm:$0xff] }
 0x249   : > { %1744 = vst.msk [vmem:[#allocation3 + $0x68] sm:$0xff] %vm1730_vm9, %v1661_v44  ;;  %v1992_v48 = vpack.c.bf16 %v1965_v43, %v1964_v31  ;;  %v1852_v39 = vpop.permute.xlu0 %1851 }
 0x24a   : > { %1936 = vst.msk [vmem:[#allocation3 + $0x60] sm:$0xff] %vm1923_vm10, %v1852_v39 }
 0x24b   : > { %4550 = vmatprep.mubr.msk.bf16.mxu0 %vm2047_vm11, %v1992_v48 }
 0x24c   : > { %v1665_v13 = vpop.permute.xlu1 %1664  ;;  %v1967_v41 = vld [vmem:[#allocation3 + $0x58] sm:$0xff] }
 0x24d   : > { %1746 = vst.msk [vmem:[#allocation3 + $0x78] sm:$0xff] %vm1730_vm9, %v1665_v13  ;;  %v1993_v3 = vpack.c.bf16 %v1967_v41, %v1966_v25  ;;  %v1856_v51 = vpop.permute.xlu0 %1855 }
 0x24e   : > { %1938 = vst.msk [vmem:[#allocation3 + $0x70] sm:$0xff] %vm1923_vm10, %v1856_v51 }
 0x24f   : > { %4551 = vmatmul.mubr.msk.bf16.gmra.mrb[8].mxu0 %vm2047_vm11, %v1993_v3 }
 0x250   : > { %v1854_v59 = vpop.permute.xlu1 %1853 }
 0x251   : > { %1937 = vst.msk [vmem:[#allocation3 + $0x68] sm:$0xff] %vm1923_vm10, %v1854_v59  ;;  %v1667_v57 = vpop.permute.xlu0 %1666  ;;  %v1968_v55 = vld [vmem:[#allocation3 + $0x60] sm:$0xff] }
 0x252   : > { %1747 = vst.msk [vmem:[#allocation3 + $0x80] sm:$0xff] %vm1730_vm9, %v1667_v57 }
 0x254   : > { %v1858_v56 = vpop.permute.xlu1 %1857 }
 0x255   : > { %1939 = vst.msk [vmem:[#allocation3 + $0x78] sm:$0xff] %vm1923_vm10, %v1858_v56  ;;  %v1671_v58 = vpop.permute.xlu0 %1670  ;;  %v1970_v49 = vld [vmem:[#allocation3 + $0x70] sm:$0xff] }
 0x256   : > { %1749 = vst.msk [vmem:[#allocation3 + $0x90] sm:$0xff] %vm1730_vm9, %v1671_v58 }
 0x258   : > { %v1669_v7 = vpop.permute.xlu1 %1668  ;;  %v1969_v5 = vld [vmem:[#allocation3 + $0x68] sm:$0xff] }
 0x259   : > { %1748 = vst.msk [vmem:[#allocation3 + $0x88] sm:$0xff] %vm1730_vm9, %v1669_v7  ;;  %v1994_v63 = vpack.c.bf16 %v1969_v5, %v1968_v55  ;;  %v1860_v21 = vpop.permute.xlu0 %1859 }
 0x25a   : > { %1940 = vst.msk [vmem:[#allocation3 + $0x80] sm:$0xff] %vm1923_vm10, %v1860_v21 }
 0x25b   : > { %4554 = vmatprep.mubr.msk.bf16.mxu0 %vm2047_vm11, %v1994_v63 }
 0x25c   : > { %v1673_v34 = vpop.permute.xlu1 %1672  ;;  %v1971_v62 = vld [vmem:[#allocation3 + $0x78] sm:$0xff] }
 0x25d   : > { %1750 = vst.msk [vmem:[#allocation3 + $0x98] sm:$0xff] %vm1730_vm9, %v1673_v34  ;;  %v1995_v29 = vpack.c.bf16 %v1971_v62, %v1970_v49  ;;  %v1864_v61 = vpop.permute.xlu0 %1863  ;;  %v2379_v49 = vld [vmem:[#allocation2] sm:$0xff] }
 0x25e   : > { %1942 = vst.msk [vmem:[#allocation3 + $0x90] sm:$0xff] %vm1923_vm10, %v1864_v61  ;;  %v6284_v34 = vld [vmem:[%s7336_s2] ss:$0 sm:$0xff] }
 0x25f   : > { %4555 = vmatmul.mubr.msk.bf16.gmra.mrb[12].mxu0 %vm2047_vm11, %v1995_v29  ;;  %2411 = vst.msk [vmem:[#allocation3] sm:$0xff] %vm258_vm0, %v2379_v49 }
 0x260   : > { %v1862_v0 = vpop.permute.xlu1 %1861 }
 0x261   : > { %1941 = vst.msk [vmem:[#allocation3 + $0x88] sm:$0xff] %vm1923_vm10, %v1862_v0  ;;  %v1675_v8 = vpop.permute.xlu0 %1674  ;;  %v1972_v24 = vld [vmem:[#allocation3 + $0x80] sm:$0xff] }
 0x262   : > { %1751 = vst.msk [vmem:[#allocation3 + $0xa0] sm:$0xff] %vm1730_vm9, %v1675_v8 }
 0x264   : > { %v1866_v37 = vpop.permute.xlu1 %1865 }
 0x265   : > { %1943 = vst.msk [vmem:[#allocation3 + $0x98] sm:$0xff] %vm1923_vm10, %v1866_v37  ;;  %v1679_v12 = vpop.permute.xlu0 %1678  ;;  %v1974_v28 = vld [vmem:[#allocation3 + $0x90] sm:$0xff]  ;;  %v2380_v37 = vld [vmem:[#allocation2 + $0x8] sm:$0xff] }
 0x266   : > { %1753 = vst.msk [vmem:[#allocation3 + $0xb0] sm:$0xff] %vm1730_vm9, %v1679_v12 }
 0x267   : > { %2412 = vst.msk [vmem:[#allocation3 + $0x8] sm:$0xff] %vm258_vm0, %v2380_v37 }
 0x268   : > { %v1677_v38 = vpop.permute.xlu1 %1676  ;;  %v1973_v30 = vld [vmem:[#allocation3 + $0x88] sm:$0xff] }
 0x269   : > { %1752 = vst.msk [vmem:[#allocation3 + $0xa8] sm:$0xff] %vm1730_vm9, %v1677_v38  ;;  %v1996_v20 = vpack.c.bf16 %v1973_v30, %v1972_v24  ;;  %v1868_v4 = vpop.permute.xlu0 %1867 }
 0x26a   : > { %1944 = vst.msk [vmem:[#allocation3 + $0xa0] sm:$0xff] %vm1923_vm10, %v1868_v4 }
 0x26b   : > { %4558 = vmatprep.mubr.msk.bf16.mxu0 %vm2047_vm11, %v1996_v20 }
 0x26c   : > { %v1681_v23 = vpop.permute.xlu1 %1680  ;;  %v1975_v1 = vld [vmem:[#allocation3 + $0x98] sm:$0xff] }
 0x26d   : > { %1754 = vst.msk [vmem:[#allocation3 + $0xb8] sm:$0xff] %vm1730_vm9, %v1681_v23  ;;  %v1997_v26 = vpack.c.bf16 %v1975_v1, %v1974_v28  ;;  %v1872_v6 = vpop.permute.xlu0 %1871 }
 0x26e   : > { %1946 = vst.msk [vmem:[#allocation3 + $0xb0] sm:$0xff] %vm1923_vm10, %v1872_v6 }
 0x26f   : > { %4559 = vmatmul.mubr.msk.bf16.gmra.mrb[16].mxu0 %vm2047_vm11, %v1997_v26 }
 0x270   : > { %v1870_v33 = vpop.permute.xlu1 %1869 }
 0x271   : > { %1945 = vst.msk [vmem:[#allocation3 + $0xa8] sm:$0xff] %vm1923_vm10, %v1870_v33  ;;  %v1494_v9 = vpop.permute.xlu0 %1493  ;;  %v1976_v50 = vld [vmem:[#allocation3 + $0xa0] sm:$0xff] }
 0x272   : > { %1564 = vst.msk [vmem:[#allocation3 + $0xd0] sm:$0xff] %vm1537_vm8, %v1494_v9 }
 0x274   : > { %v1874_v32 = vpop.permute.xlu1 %1873 }
 0x275   : > { %1947 = vst.msk [vmem:[#allocation3 + $0xb8] sm:$0xff] %vm1923_vm10, %v1874_v32  ;;  %v1683_v45 = vpop.permute.xlu0 %1682  ;;  %v1978_v60 = vld [vmem:[#allocation3 + $0xb0] sm:$0xff] }
 0x276   : > { %1755 = vst.msk [vmem:[#allocation3 + $0xc0] sm:$0xff] %vm1730_vm9, %v1683_v45 }
 0x278   : > { %v1496_v11 = vpop.permute.xlu1 %1495  ;;  %v1977_v42 = vld [vmem:[#allocation3 + $0xa8] sm:$0xff] }
 0x279   : > { %1565 = vst.msk [vmem:[#allocation3 + $0xd8] sm:$0xff] %vm1537_vm8, %v1496_v11  ;;  %v1998_v14 = vpack.c.bf16 %v1977_v42, %v1976_v50  ;;  %v1687_v40 = vpop.permute.xlu0 %1686 }
 0x27a   : > { %1757 = vst.msk [vmem:[#allocation3 + $0xd0] sm:$0xff] %vm1730_vm9, %v1687_v40 }
 0x27b   : > { %4562 = vmatprep.mubr.msk.bf16.mxu0 %vm2047_vm11, %v1998_v14 }
 0x27c   : > { %v1685_v2 = vpop.permute.xlu1 %1684  ;;  %v1979_v52 = vld [vmem:[#allocation3 + $0xb8] sm:$0xff] }
 0x27d   : > { %1756 = vst.msk [vmem:[#allocation3 + $0xc8] sm:$0xff] %vm1730_vm9, %v1685_v2  ;;  %v1999_v35 = vpack.c.bf16 %v1979_v52, %v1978_v60  ;;  %v1876_v10 = vpop.permute.xlu0 %1875 }
 0x27e   : > { %1948 = vst.msk [vmem:[#allocation3 + $0xc0] sm:$0xff] %vm1923_vm10, %v1876_v10 }
 0x27f   : > { %4563 = vmatmul.mubr.msk.bf16.gmra.mrb[20].mxu0 %vm2047_vm11, %v1999_v35 }
 0x280   : > { %v1689_v16 = vpop.permute.xlu1 %1688 }
 0x281   : > { %1758 = vst.msk [vmem:[#allocation3 + $0xd8] sm:$0xff] %vm1730_vm9, %v1689_v16  ;;  %v1880_v27 = vpop.permute.xlu0 %1879 }
 0x282   : > { %1950 = vst.msk [vmem:[#allocation3 + $0xd0] sm:$0xff] %vm1923_vm10, %v1880_v27 }
 0x284   : > { %v1878_v17 = vpop.permute.xlu1 %1877 }
 0x285   : > { %1949 = vst.msk [vmem:[#allocation3 + $0xc8] sm:$0xff] %vm1923_vm10, %v1878_v17  ;;  %v1498_v36 = vpop.permute.xlu0 %1497  ;;  %v1980_v15 = vld [vmem:[#allocation3 + $0xc0] sm:$0xff] }
 0x286   : > { %1566 = vst.msk [vmem:[#allocation3 + $0xe0] sm:$0xff] %vm1537_vm8, %v1498_v36 }
 0x288   : > { %v1882_v19 = vpop.permute.xlu1 %1881 }
 0x289   : > { %1951 = vst.msk [vmem:[#allocation3 + $0xd8] sm:$0xff] %vm1923_vm10, %v1882_v19  ;;  %v1502_v18 = vpop.permute.xlu0 %1501  ;;  %v1982_v47 = vld [vmem:[#allocation3 + $0xd0] sm:$0xff] }
 0x28a   : > { %1568 = vst.msk [vmem:[#allocation3 + $0xf0] sm:$0xff] %vm1537_vm8, %v1502_v18 }
 0x28c   : > { %v1500_v53 = vpop.permute.xlu1 %1499  ;;  %v1981_v54 = vld [vmem:[#allocation3 + $0xc8] sm:$0xff] }
 0x28d   : > { %1567 = vst.msk [vmem:[#allocation3 + $0xe8] sm:$0xff] %vm1537_vm8, %v1500_v53  ;;  %v2000_v31 = vpack.c.bf16 %v1981_v54, %v1980_v15  ;;  %v1691_v44 = vpop.permute.xlu0 %1690 }
 0x28e   : > { %1759 = vst.msk [vmem:[#allocation3 + $0xe0] sm:$0xff] %vm1730_vm9, %v1691_v44 }
 0x28f   : > { %4566 = vmatprep.mubr.msk.bf16.mxu0 %vm2047_vm11, %v2000_v31 }
 0x290   : > { %v1504_v43 = vpop.permute.xlu1 %1503  ;;  %v1983_v48 = vld [vmem:[#allocation3 + $0xd8] sm:$0xff] }
 0x291   : > { %1569 = vst.msk [vmem:[#allocation3 + $0xf8] sm:$0xff] %vm1537_vm8, %v1504_v43  ;;  %v2001_v25 = vpack.c.bf16 %v1983_v48, %v1982_v47  ;;  %v1695_v39 = vpop.permute.xlu0 %1694 }
 0x292   : > { %1761 = vst.msk [vmem:[#allocation3 + $0xf0] sm:$0xff] %vm1730_vm9, %v1695_v39 }
 0x293   : > { %4567 = vmatmul.mubr.msk.bf16.gmra.mrb[24].mxu0 %vm2047_vm11, %v2001_v25 }
 0x294   : > { %v1693_v13 = vpop.permute.xlu1 %1692 }
 0x295   : > { %1760 = vst.msk [vmem:[#allocation3 + $0xe8] sm:$0xff] %vm1730_vm9, %v1693_v13  ;;  %v1884_v41 = vpop.permute.xlu0 %1883 }
 0x296   : > { %1952 = vst.msk [vmem:[#allocation3 + $0xe0] sm:$0xff] %vm1923_vm10, %v1884_v41 }
 0x298   : > { %v1697_v3 = vpop.permute.xlu1 %1696 }
 0x299   : > { %1762 = vst.msk [vmem:[#allocation3 + $0xf8] sm:$0xff] %vm1730_vm9, %v1697_v3  ;;  %v1888_v51 = vpop.permute.xlu0 %1887 }
 0x29a   : > { %1954 = vst.msk [vmem:[#allocation3 + $0xf0] sm:$0xff] %vm1923_vm10, %v1888_v51 }
 0x29c   : > { %v1886_v59 = vpop.permute.xlu1 %1885 }
 0x29d   : > { %1953 = vst.msk [vmem:[#allocation3 + $0xe8] sm:$0xff] %vm1923_vm10, %v1886_v59  ;;  %v1984_v56 = vld [vmem:[#allocation3 + $0xe0] sm:$0xff] }
 0x2a0   : > { %v1890_v57 = vpop.permute.xlu1 %1889 }
 0x2a1   : > { %1955 = vst.msk [vmem:[#allocation3 + $0xf8] sm:$0xff] %vm1923_vm10, %v1890_v57  ;;  %v1986_v7 = vld [vmem:[#allocation3 + $0xf0] sm:$0xff] }
 0x2a4   : > { %v1985_v55 = vld [vmem:[#allocation3 + $0xe8] sm:$0xff] }
 0x2a5   : > { %v2002_v58 = vpack.c.bf16 %v1985_v55, %v1984_v56 }
 0x2a7   : > { %4570 = vmatprep.mubr.msk.bf16.mxu0 %vm2047_vm11, %v2002_v58 }
 0x2a8   : > { %v1987_v5 = vld [vmem:[#allocation3 + $0xf8] sm:$0xff] }
 0x2a9   : > { %v2003_v63 = vpack.c.bf16 %v1987_v5, %v1986_v7 }
 0x2ab   : > { %4571 = vmatmul.mubr.msk.bf16.gmra.mrb[28].mxu0 %vm2047_vm11, %v2003_v63 }
 0x2b1   : > { %v2508_v21 = vpop.permute.xlu0 %2507 }
 0x2b2   : > { %2603 = vst.msk [vmem:[#allocation3] sm:$0xff] %vm571_vm2, %v2508_v21 }
 0x2b5   : > { %v2510_v30 = vpop.permute.xlu1 %2509 }
 0x2b6   : > { %2604 = vst.msk [vmem:[#allocation3 + $0x8] sm:$0xff] %vm571_vm2, %v2510_v30 }
 0x302   : > { %v4544_v62 = vpop.f32.mrb[0].mxu0 }
 0x303   : > { %v2143_v29 = vadd.f32 %v4544_v62, %v6284_v34  ;;  %v2134_v61 = vpop.f32.mrb[1].mxu0 }
 0x304   : > { %v2135_v0 = vadd.f32 %v6284_v34, %v2134_v61  ;;  %v4545_v8 = vpop.f32.mrb[2].mxu0 }
 0x305   : > { %v2263_v24 = vmax.f32 %v2143_v29, 0.0  ;;  %v2146_v12 = vadd.f32 %v4545_v8, %v6284_v34  ;;  %v2137_v38 = vpop.f32.mrb[3].mxu0 }
 0x306   : > { %v2261_v20 = vmax.f32 %v2135_v0, 0.0  ;;  %v2138_v28 = vadd.f32 %v6284_v34, %v2137_v38 }
 0x307   : > { %2349 = vst.msk [vmem:[#allocation2 + $0x31] sm:$0xff] %vm258_vm0, %v2263_v24  ;;  %v2264_v4 = vmax.f32 %v2146_v12, 0.0 }
 0x308   : > { %2347 = vst.msk [vmem:[#allocation2 + $0x19] sm:$0xff] %vm258_vm0, %v2261_v20  ;;  %v2262_v23 = vmax.f32 %v2138_v28, 0.0 }
 0x309   : > { %2350 = vst.msk [vmem:[#allocation2 + $0x39] sm:$0xff] %vm258_vm0, %v2264_v4 }
 0x30a   : > { %2348 = vst.msk [vmem:[#allocation2 + $0x21] sm:$0xff] %vm258_vm0, %v2262_v23 }
 0x30e   : > { %v6296_v1 = vld [vmem:[#allocation2 + $0x30] sm:$0xff] }
 0x30f   : > { %v6298_v26 = vld [vmem:[#allocation2 + $0x19] sm:$0xff]  ;;  %2415 = vst.msk [vmem:[#allocation3 + $0x20] sm:$0xff] %vm258_vm0, %v6296_v1  ;;  %v6321_v42 = vld [vmem:[#allocation2 + $0x31] sm:$0xff] }
 0x310   : > { %v6300_v6 = vld [vmem:[#allocation2 + $0x18] sm:$0xff]  ;;  %2511 = vrot.lane.b32.xlu0 %v6298_v26, %s4654_s25 }
 0x311   : > { %2413 = vst.msk [vmem:[#allocation3 + $0x10] sm:$0xff] %vm258_vm0, %v6300_v6  ;;  %v6308_v33 = vld [vmem:[#allocation2 + $0x38] sm:$0xff]  ;;  %v6310_v9 = vld [vmem:[#allocation2 + $0x21] sm:$0xff] }
 0x312   : > { %v6312_v32 = vld [vmem:[#allocation2 + $0x20] sm:$0xff]  ;;  %2416 = vst.msk [vmem:[#allocation3 + $0x28] sm:$0xff] %vm258_vm0, %v6308_v33  ;;  %v4548_v50 = vpop.f32.mrb[4].mxu0  ;;  %2513 = vrot.lane.b32.xlu1 %v6310_v9, %s4654_s25 }
 0x313   : > { %2414 = vst.msk [vmem:[#allocation3 + $0x18] sm:$0xff] %vm258_vm0, %v6312_v32  ;;  %v2159_v45 = vadd.f32 %v4548_v50, %v6284_v34  ;;  %v2150_v11 = vpop.f32.mrb[5].mxu0  ;;  %v6327_v35 = vld [vmem:[#allocation2 + $0x39] sm:$0xff] }
 0x314   : > { %v2151_v14 = vadd.f32 %v6284_v34, %v2150_v11  ;;  %v4549_v60 = vpop.f32.mrb[6].mxu0  ;;  %2515 = vrot.lane.b32.xlu0 %v6321_v42, %s4654_s25 }
 0x315   : > { %v2267_v40 = vmax.f32 %v2159_v45, 0.0  ;;  %v2162_v2 = vadd.f32 %v4549_v60, %v6284_v34  ;;  %v2153_v52 = vpop.f32.mrb[7].mxu0 }
 0x316   : > { %v2265_v10 = vmax.f32 %v2151_v14, 0.0  ;;  %v2154_v16 = vadd.f32 %v6284_v34, %v2153_v52  ;;  %2517 = vrot.lane.b32.xlu1 %v6327_v35, %s4654_s25 }
 0x317   : > { %2353 = vst.msk [vmem:[#allocation2 + $0x61] sm:$0xff] %vm258_vm0, %v2267_v40  ;;  %v2268_v27 = vmax.f32 %v2162_v2, 0.0 }
 0x318   : > { %2351 = vst.msk [vmem:[#allocation2 + $0x49] sm:$0xff] %vm258_vm0, %v2265_v10  ;;  %v2266_v17 = vmax.f32 %v2154_v16, 0.0 }
 0x319   : > { %2354 = vst.msk [vmem:[#allocation2 + $0x69] sm:$0xff] %vm258_vm0, %v2268_v27 }
 0x31a   : > { %2352 = vst.msk [vmem:[#allocation2 + $0x51] sm:$0xff] %vm258_vm0, %v2266_v17 }
 0x31e   : > { %v6336_v36 = vld [vmem:[#allocation2 + $0x60] sm:$0xff] }
 0x31f   : > { %v6338_v19 = vld [vmem:[#allocation2 + $0x49] sm:$0xff]  ;;  %2419 = vst.msk [vmem:[#allocation3 + $0x40] sm:$0xff] %vm258_vm0, %v6336_v36  ;;  %v6361_v47 = vld [vmem:[#allocation2 + $0x61] sm:$0xff] }
 0x320   : > { %v6340_v15 = vld [vmem:[#allocation2 + $0x48] sm:$0xff]  ;;  %2519 = vrot.lane.b32.xlu0 %v6338_v19, %s4654_s25 }
 0x321   : > { %2417 = vst.msk [vmem:[#allocation3 + $0x30] sm:$0xff] %vm258_vm0, %v6340_v15  ;;  %v6348_v18 = vld [vmem:[#allocation2 + $0x68] sm:$0xff]  ;;  %v6350_v22 = vld [vmem:[#allocation2 + $0x51] sm:$0xff] }
 0x322   : > { %v6352_v46 = vld [vmem:[#allocation2 + $0x50] sm:$0xff]  ;;  %2420 = vst.msk [vmem:[#allocation3 + $0x48] sm:$0xff] %vm258_vm0, %v6348_v18  ;;  %v4552_v53 = vpop.f32.mrb[8].mxu0  ;;  %2521 = vrot.lane.b32.xlu1 %v6350_v22, %s4654_s25 }
 0x323   : > { %2418 = vst.msk [vmem:[#allocation3 + $0x38] sm:$0xff] %vm258_vm0, %v6352_v46  ;;  %v2175_v54 = vadd.f32 %v4552_v53, %v6284_v34  ;;  %v2166_v31 = vpop.f32.mrb[9].mxu0  ;;  %v6367_v13 = vld [vmem:[#allocation2 + $0x69] sm:$0xff] }
 0x324   : > { %v2167_v44 = vadd.f32 %v6284_v34, %v2166_v31  ;;  %v4553_v43 = vpop.f32.mrb[10].mxu0  ;;  %2523 = vrot.lane.b32.xlu0 %v6361_v47, %s4654_s25 }
 0x325   : > { %v2271_v48 = vmax.f32 %v2175_v54, 0.0  ;;  %v2178_v25 = vadd.f32 %v4553_v43, %v6284_v34  ;;  %v2169_v39 = vpop.f32.mrb[11].mxu0 }
 0x326   : > { %v2269_v41 = vmax.f32 %v2167_v44, 0.0  ;;  %v2170_v3 = vadd.f32 %v6284_v34, %v2169_v39  ;;  %2525 = vrot.lane.b32.xlu1 %v6367_v13, %s4654_s25 }
 0x327   : > { %2357 = vst.msk [vmem:[#allocation2 + $0x91] sm:$0xff] %vm258_vm0, %v2271_v48  ;;  %v2272_v51 = vmax.f32 %v2178_v25, 0.0 }
 0x328   : > { %2355 = vst.msk [vmem:[#allocation2 + $0x79] sm:$0xff] %vm258_vm0, %v2269_v41  ;;  %v2270_v59 = vmax.f32 %v2170_v3, 0.0 }
 0x329   : > { %2358 = vst.msk [vmem:[#allocation2 + $0x99] sm:$0xff] %vm258_vm0, %v2272_v51 }
 0x32a   : > { %2356 = vst.msk [vmem:[#allocation2 + $0x81] sm:$0xff] %vm258_vm0, %v2270_v59 }
 0x32e   : > { %v6376_v57 = vld [vmem:[#allocation2 + $0x90] sm:$0xff] }
 0x32f   : > { %v6378_v56 = vld [vmem:[#allocation2 + $0x79] sm:$0xff]  ;;  %2423 = vst.msk [vmem:[#allocation3 + $0x60] sm:$0xff] %vm258_vm0, %v6376_v57  ;;  %v6401_v62 = vld [vmem:[#allocation2 + $0x91] sm:$0xff] }
 0x330   : > { %v6380_v55 = vld [vmem:[#allocation2 + $0x78] sm:$0xff]  ;;  %2527 = vrot.lane.b32.xlu0 %v6378_v56, %s4654_s25 }
 0x331   : > { %2421 = vst.msk [vmem:[#allocation3 + $0x50] sm:$0xff] %vm258_vm0, %v6380_v55  ;;  %v6388_v58 = vld [vmem:[#allocation2 + $0x98] sm:$0xff]  ;;  %v6390_v7 = vld [vmem:[#allocation2 + $0x81] sm:$0xff] }
 0x332   : > { %v6392_v5 = vld [vmem:[#allocation2 + $0x80] sm:$0xff]  ;;  %2424 = vst.msk [vmem:[#allocation3 + $0x68] sm:$0xff] %vm258_vm0, %v6388_v58  ;;  %v4556_v63 = vpop.f32.mrb[12].mxu0  ;;  %2529 = vrot.lane.b32.xlu1 %v6390_v7, %s4654_s25 }
 0x333   : > { %2422 = vst.msk [vmem:[#allocation3 + $0x58] sm:$0xff] %vm258_vm0, %v6392_v5  ;;  %v2191_v49 = vadd.f32 %v4556_v63, %v6284_v34  ;;  %v2182_v21 = vpop.f32.mrb[13].mxu0  ;;  %v6407_v24 = vld [vmem:[#allocation2 + $0x99] sm:$0xff] }
 0x334   : > { %v2183_v29 = vadd.f32 %v6284_v34, %v2182_v21  ;;  %v4557_v61 = vpop.f32.mrb[14].mxu0  ;;  %2531 = vrot.lane.b32.xlu0 %v6401_v62, %s4654_s25 }
 0x335   : > { %v2275_v0 = vmax.f32 %v2191_v49, 0.0  ;;  %v2194_v8 = vadd.f32 %v4557_v61, %v6284_v34  ;;  %v2185_v37 = vpop.f32.mrb[15].mxu0 }
 0x336   : > { %v2273_v12 = vmax.f32 %v2183_v29, 0.0  ;;  %v2186_v38 = vadd.f32 %v6284_v34, %v2185_v37  ;;  %2533 = vrot.lane.b32.xlu1 %v6407_v24, %s4654_s25 }
 0x337   : > { %2361 = vst.msk [vmem:[#allocation2 + $0xc1] sm:$0xff] %vm258_vm0, %v2275_v0  ;;  %v2276_v30 = vmax.f32 %v2194_v8, 0.0 }
 0x338   : > { %2359 = vst.msk [vmem:[#allocation2 + $0xa9] sm:$0xff] %vm258_vm0, %v2273_v12  ;;  %v2274_v20 = vmax.f32 %v2186_v38, 0.0 }
 0x339   : > { %2362 = vst.msk [vmem:[#allocation2 + $0xc9] sm:$0xff] %vm258_vm0, %v2276_v30 }
 0x33a   : > { %2360 = vst.msk [vmem:[#allocation2 + $0xb1] sm:$0xff] %vm258_vm0, %v2274_v20 }
 0x33e   : > { %v6416_v28 = vld [vmem:[#allocation2 + $0xc0] sm:$0xff] }
 0x33f   : > { %v2457_v4 = vld [vmem:[#allocation2 + $0xa9] sm:$0xff]  ;;  %2427 = vst.msk [vmem:[#allocation3 + $0x80] sm:$0xff] %vm258_vm0, %v6416_v28  ;;  %v2459_v2 = vld [vmem:[#allocation2 + $0xc1] sm:$0xff] }
 0x340   : > { %v6418_v23 = vld [vmem:[#allocation2 + $0xa8] sm:$0xff]  ;;  %2535 = vrot.lane.b32.xlu0 %v2457_v4, %s4654_s25 }
 0x341   : > { %2425 = vst.msk [vmem:[#allocation3 + $0x70] sm:$0xff] %vm258_vm0, %v6418_v23  ;;  %v2458_v50 = vld [vmem:[#allocation2 + $0xb1] sm:$0xff]  ;;  %v6428_v14 = vld [vmem:[#allocation2 + $0xc8] sm:$0xff] }
 0x342   : > { %v4560_v45 = vpop.f32.mrb[16].mxu0  ;;  %2537 = vrot.lane.b32.xlu1 %v2458_v50, %s4654_s25  ;;  %v6426_v11 = vld [vmem:[#allocation2 + $0xb0] sm:$0xff]  ;;  %2428 = vst.msk [vmem:[#allocation3 + $0x88] sm:$0xff] %vm258_vm0, %v6428_v14 }
 0x343   : > { %v2207_v60 = vadd.f32 %v4560_v45, %v6284_v34  ;;  %v2198_v40 = vpop.f32.mrb[17].mxu0  ;;  %2426 = vst.msk [vmem:[#allocation3 + $0x78] sm:$0xff] %vm258_vm0, %v6426_v11  ;;  %v2460_v53 = vld [vmem:[#allocation2 + $0xc9] sm:$0xff] }
 0x344   : > { %v2199_v52 = vadd.f32 %v6284_v34, %v2198_v40  ;;  %v4561_v10 = vpop.f32.mrb[18].mxu0  ;;  %2539 = vrot.lane.b32.xlu0 %v2459_v2, %s4654_s25 }
 0x345   : > { %v2279_v16 = vmax.f32 %v2207_v60, 0.0  ;;  %v2210_v27 = vadd.f32 %v4561_v10, %v6284_v34  ;;  %v2201_v17 = vpop.f32.mrb[19].mxu0 }
 0x346   : > { %v2277_v54 = vmax.f32 %v2199_v52, 0.0  ;;  %v2202_v31 = vadd.f32 %v6284_v34, %v2201_v17  ;;  %2541 = vrot.lane.b32.xlu1 %v2460_v53, %s4654_s25 }
 0x347   : > { %2365 = vst.msk [vmem:[#allocation2 + $0xf1] sm:$0xff] %vm258_vm0, %v2279_v16  ;;  %v2280_v44 = vmax.f32 %v2210_v27, 0.0 }
 0x348   : > { %2363 = vst.msk [vmem:[#allocation2 + $0xd9] sm:$0xff] %vm258_vm0, %v2277_v54  ;;  %v2278_v43 = vmax.f32 %v2202_v31, 0.0 }
 0x349   : > { %2366 = vst.msk [vmem:[#allocation2 + $0xf9] sm:$0xff] %vm258_vm0, %v2280_v44 }
 0x34a   : > { %2364 = vst.msk [vmem:[#allocation2 + $0xe1] sm:$0xff] %vm258_vm0, %v2278_v43 }
 0x34e   : > { %v6444_v48 = vld [vmem:[#allocation2 + $0xf0] sm:$0xff] }
 0x34f   : > { %v2461_v25 = vld [vmem:[#allocation2 + $0xd9] sm:$0xff]  ;;  %2431 = vst.msk [vmem:[#allocation3 + $0xa0] sm:$0xff] %vm258_vm0, %v6444_v48  ;;  %v2463_v21 = vld [vmem:[#allocation2 + $0xf1] sm:$0xff] }
 0x350   : > { %v6446_v39 = vld [vmem:[#allocation2 + $0xd8] sm:$0xff]  ;;  %2543 = vrot.lane.b32.xlu0 %v2461_v25, %s4654_s25 }
 0x351   : > { %2429 = vst.msk [vmem:[#allocation3 + $0x90] sm:$0xff] %vm258_vm0, %v6446_v39  ;;  %v2462_v41 = vld [vmem:[#allocation2 + $0xe1] sm:$0xff]  ;;  %v6456_v59 = vld [vmem:[#allocation2 + $0xf8] sm:$0xff] }
 0x352   : > { %v4564_v3 = vpop.f32.mrb[20].mxu0  ;;  %2545 = vrot.lane.b32.xlu1 %v2462_v41, %s4654_s25  ;;  %v6454_v51 = vld [vmem:[#allocation2 + $0xe0] sm:$0xff]  ;;  %2432 = vst.msk [vmem:[#allocation3 + $0xa8] sm:$0xff] %vm258_vm0, %v6456_v59 }
 0x353   : > { %v2223_v63 = vadd.f32 %v4564_v3, %v6284_v34  ;;  %v2214_v49 = vpop.f32.mrb[21].mxu0  ;;  %2430 = vst.msk [vmem:[#allocation3 + $0x98] sm:$0xff] %vm258_vm0, %v6454_v51  ;;  %v2464_v12 = vld [vmem:[#allocation2 + $0xf9] sm:$0xff] }
 0x354   : > { %v2215_v29 = vadd.f32 %v6284_v34, %v2214_v49  ;;  %v4565_v61 = vpop.f32.mrb[22].mxu0  ;;  %2547 = vrot.lane.b32.xlu0 %v2463_v21, %s4654_s25 }
 0x355   : > { %v2283_v0 = vmax.f32 %v2223_v63, 0.0  ;;  %v2226_v8 = vadd.f32 %v4565_v61, %v6284_v34  ;;  %v2217_v37 = vpop.f32.mrb[23].mxu0 }
 0x356   : > { %v2281_v38 = vmax.f32 %v2215_v29, 0.0  ;;  %v2218_v30 = vadd.f32 %v6284_v34, %v2217_v37  ;;  %2549 = vrot.lane.b32.xlu1 %v2464_v12, %s4654_s25 }
 0x357   : > { %2369 = vst.msk [vmem:[#allocation2 + $0x121] sm:$0xff] %vm258_vm0, %v2283_v0  ;;  %v2284_v20 = vmax.f32 %v2226_v8, 0.0 }
 0x358   : > { %2367 = vst.msk [vmem:[#allocation2 + $0x109] sm:$0xff] %vm258_vm0, %v2281_v38  ;;  %v2282_v4 = vmax.f32 %v2218_v30, 0.0 }
 0x359   : > { %2370 = vst.msk [vmem:[#allocation2 + $0x129] sm:$0xff] %vm258_vm0, %v2284_v20 }
 0x35a   : > { %2368 = vst.msk [vmem:[#allocation2 + $0x111] sm:$0xff] %vm258_vm0, %v2282_v4 }
 0x35e   : > { %v6472_v50 = vld [vmem:[#allocation2 + $0x120] sm:$0xff] }
 0x35f   : > { %v2465_v45 = vld [vmem:[#allocation2 + $0x109] sm:$0xff]  ;;  %2435 = vst.msk [vmem:[#allocation3 + $0xc0] sm:$0xff] %vm258_vm0, %v6472_v50  ;;  %v2467_v10 = vld [vmem:[#allocation2 + $0x121] sm:$0xff] }
 0x360   : > { %v6474_v60 = vld [vmem:[#allocation2 + $0x108] sm:$0xff]  ;;  %2551 = vrot.lane.b32.xlu0 %v2465_v45, %s4654_s25 }
 0x361   : > { %2433 = vst.msk [vmem:[#allocation3 + $0xb0] sm:$0xff] %vm258_vm0, %v6474_v60  ;;  %v2466_v40 = vld [vmem:[#allocation2 + $0x111] sm:$0xff]  ;;  %v6484_v52 = vld [vmem:[#allocation2 + $0x128] sm:$0xff] }
 0x362   : > { %2553 = vrot.lane.b32.xlu1 %v2466_v40, %s4654_s25  ;;  %v6482_v2 = vld [vmem:[#allocation2 + $0x110] sm:$0xff]  ;;  %2436 = vst.msk [vmem:[#allocation3 + $0xc8] sm:$0xff] %vm258_vm0, %v6484_v52 }
 0x363   : > { %2434 = vst.msk [vmem:[#allocation3 + $0xb8] sm:$0xff] %vm258_vm0, %v6482_v2  ;;  %v2468_v16 = vld [vmem:[#allocation2 + $0x129] sm:$0xff] }
 0x364   : > { %2555 = vrot.lane.b32.xlu0 %v2467_v10, %s4654_s25 }
 0x366   : > { %v4568_v27 = vpop.f32.mrb[24].mxu0  ;;  %2557 = vrot.lane.b32.xlu1 %v2468_v16, %s4654_s25 }
 0x367   : > { %v2239_v17 = vadd.f32 %v4568_v27, %v6284_v34  ;;  %v2230_v53 = vpop.f32.mrb[25].mxu0 }
 0x368   : > { %v2231_v54 = vadd.f32 %v6284_v34, %v2230_v53  ;;  %v4569_v31 = vpop.f32.mrb[26].mxu0 }
 0x369   : > { %v2287_v44 = vmax.f32 %v2239_v17, 0.0  ;;  %v2242_v43 = vadd.f32 %v4569_v31, %v6284_v34  ;;  %v2233_v25 = vpop.f32.mrb[27].mxu0 }
 0x36a   : > { %v2285_v41 = vmax.f32 %v2231_v54, 0.0  ;;  %v2234_v3 = vadd.f32 %v6284_v34, %v2233_v25 }
 0x36b   : > { %2373 = vst.msk [vmem:[#allocation2 + $0x151] sm:$0xff] %vm258_vm0, %v2287_v44  ;;  %v2288_v63 = vmax.f32 %v2242_v43, 0.0 }
 0x36c   : > { %2371 = vst.msk [vmem:[#allocation2 + $0x139] sm:$0xff] %vm258_vm0, %v2285_v41  ;;  %v2286_v49 = vmax.f32 %v2234_v3, 0.0 }
 0x36d   : > { %2374 = vst.msk [vmem:[#allocation2 + $0x159] sm:$0xff] %vm258_vm0, %v2288_v63 }
 0x36e   : > { %2372 = vst.msk [vmem:[#allocation2 + $0x141] sm:$0xff] %vm258_vm0, %v2286_v49  ;;  %v2635_v49 = vld [vmem:[#allocation2 + $0x2] sm:$0xff] }
 0x372   : > { %v2407_v21 = vld [vmem:[#allocation2 + $0x150] sm:$0xff] }
 0x373   : > { %v2469_v29 = vld [vmem:[#allocation2 + $0x139] sm:$0xff]  ;;  %2439 = vst.msk [vmem:[#allocation3 + $0xe0] sm:$0xff] %vm258_vm0, %v2407_v21  ;;  %v2471_v12 = vld [vmem:[#allocation2 + $0x151] sm:$0xff] }
 0x374   : > { %v2405_v61 = vld [vmem:[#allocation2 + $0x138] sm:$0xff]  ;;  %2559 = vrot.lane.b32.xlu0 %v2469_v29, %s4654_s25  ;;  %v2636_v29 = vld [vmem:[#allocation2 + $0xa] sm:$0xff] }
 0x375   : > { %2437 = vst.msk [vmem:[#allocation3 + $0xd0] sm:$0xff] %vm258_vm0, %v2405_v61  ;;  %v2470_v0 = vld [vmem:[#allocation2 + $0x141] sm:$0xff]  ;;  %v2408_v37 = vld [vmem:[#allocation2 + $0x158] sm:$0xff] }
 0x376   : > { %2561 = vrot.lane.b32.xlu1 %v2470_v0, %s4654_s25  ;;  %v2406_v8 = vld [vmem:[#allocation2 + $0x140] sm:$0xff]  ;;  %2440 = vst.msk [vmem:[#allocation3 + $0xe8] sm:$0xff] %vm258_vm0, %v2408_v37 }
 0x377   : > { %2438 = vst.msk [vmem:[#allocation3 + $0xd8] sm:$0xff] %vm258_vm0, %v2406_v8  ;;  %v2472_v38 = vld [vmem:[#allocation2 + $0x159] sm:$0xff]  ;;  %v6532_v37 = vld [vmem:[#allocation2 + $0x22] sm:$0xff] }
 0x378   : > { %2563 = vrot.lane.b32.xlu0 %v2471_v12, %s4654_s25  ;;  %v6527_v0 = vld [vmem:[#allocation2 + $0x1a] sm:$0xff] }
 0x37a   : > { %2565 = vrot.lane.b32.xlu1 %v2472_v38, %s4654_s25  ;;  %v6537_v38 = vld [vmem:[#allocation2 + $0x32] sm:$0xff] }
 0x37e   : > { %v4572_v30 = vpop.f32.mrb[28].mxu0 }
 0x37f   : > { %v2255_v20 = vadd.f32 %v4572_v30, %v6284_v34  ;;  %v2246_v4 = vpop.f32.mrb[29].mxu0 }
 0x380   : > { %v2247_v45 = vadd.f32 %v6284_v34, %v2246_v4  ;;  %v4573_v40 = vpop.f32.mrb[30].mxu0  ;;  %v6546_v4 = vld [vmem:[#allocation2 + $0x4a] sm:$0xff] }
 0x381   : > { %v2291_v10 = vmax.f32 %v2255_v20, 0.0  ;;  %v2258_v16 = vadd.f32 %v4573_v40, %v6284_v34  ;;  %v2249_v27 = vpop.f32.mrb[31].mxu0  ;;  %v6542_v20 = vld [vmem:[#allocation2 + $0x3a] sm:$0xff]  ;;  %v6554_v40 = vld [vmem:[#allocation2 + $0x62] sm:$0xff] }
 0x382   : > { %v2289_v17 = vmax.f32 %v2247_v45, 0.0  ;;  %v2250_v53 = vadd.f32 %v6284_v34, %v2249_v27  ;;  %v2512_v54 = vpop.permute.xlu0 %2511  ;;  %v6550_v45 = vld [vmem:[#allocation2 + $0x52] sm:$0xff]  ;;  %v6563_v27 = vld [vmem:[#allocation2 + $0x7a] sm:$0xff] }
 0x383   : > { %2377 = vst.msk [vmem:[#allocation2 + $0x181] sm:$0xff] %vm258_vm0, %v2291_v10  ;;  %v2292_v31 = vmax.f32 %v2258_v16, 0.0  ;;  %v6558_v10 = vld [vmem:[#allocation2 + $0x6a] sm:$0xff] }
 0x384   : > { %2605 = vst.msk [vmem:[#allocation3 + $0x10] sm:$0xff] %vm571_vm2, %v2512_v54  ;;  %v2290_v44 = vmax.f32 %v2250_v53, 0.0  ;;  %v2514_v43 = vpop.permute.xlu1 %2513  ;;  %v6568_v53 = vld [vmem:[#allocation2 + $0x82] sm:$0xff] }
 0x385   : > { %2375 = vst.msk [vmem:[#allocation2 + $0x169] sm:$0xff] %vm258_vm0, %v2289_v17  ;;  %2378 = vst.msk [vmem:[#allocation2 + $0x189] sm:$0xff] %vm258_vm0, %v2292_v31  ;;  %v6573_v31 = vld [vmem:[#allocation2 + $0x92] sm:$0xff] }
 0x386   : > { %2606 = vst.msk [vmem:[#allocation3 + $0x18] sm:$0xff] %vm571_vm2, %v2514_v43  ;;  %v2516_v25 = vpop.permute.xlu0 %2515  ;;  %v6578_v43 = vld [vmem:[#allocation2 + $0x9a] sm:$0xff] }
 0x387   : > { %2376 = vst.msk [vmem:[#allocation2 + $0x171] sm:$0xff] %vm258_vm0, %v2290_v44 }
 0x388   : > { %2607 = vst.msk [vmem:[#allocation3 + $0x20] sm:$0xff] %vm571_vm2, %v2516_v25  ;;  %v2518_v34 = vpop.permute.xlu1 %2517  ;;  %v6582_v25 = vld [vmem:[#allocation2 + $0xaa] sm:$0xff] }
 0x389   : > { %2608 = vst.msk [vmem:[#allocation3 + $0x28] sm:$0xff] %vm571_vm2, %v2518_v34  ;;  %v6586_v34 = vld [vmem:[#allocation2 + $0xb2] sm:$0xff] }
 0x38c   : > { %v2473_v41 = vld [vmem:[#allocation2 + $0x169] sm:$0xff] }
 0x38d   : > { %v2409_v3 = vld [vmem:[#allocation2 + $0x168] sm:$0xff]  ;;  %2567 = vrot.lane.b32.xlu0 %v2473_v41, %s4654_s25 }
 0x38e   : > { %2441 = vst.msk [vmem:[#allocation3 + $0xf0] sm:$0xff] %vm258_vm0, %v2409_v3  ;;  %v2474_v63 = vld [vmem:[#allocation2 + $0x171] sm:$0xff]  ;;  %v6590_v41 = vld [vmem:[#allocation2 + $0xc2] sm:$0xff] }
 0x38f   : > { %2569 = vrot.lane.b32.xlu1 %v2474_v63, %s4654_s25  ;;  %v2410_v21 = vld [vmem:[#allocation2 + $0x170] sm:$0xff] }
 0x390   : > { %2442 = vst.msk [vmem:[#allocation3 + $0xf8] sm:$0xff] %vm258_vm0, %v2410_v21  ;;  %v6594_v3 = vld [vmem:[#allocation2 + $0xca] sm:$0xff] }
 0x391   : > { %2699 = vrot.lane.b32.xlu0 %v2635_v49, %s4655_s26  ;;  %v6599_v49 = vld [vmem:[#allocation2 + $0xda] sm:$0xff] }
 0x392   : > { %v2520_v61 = vpop.permute.xlu0 %2519 }
 0x393   : > { %2701 = vrot.lane.b32.xlu1 %v2636_v29, %s4655_s26  ;;  %2609 = vst.msk [vmem:[#allocation3 + $0x30] sm:$0xff] %vm571_vm2, %v2520_v61  ;;  %v6604_v29 = vld [vmem:[#allocation2 + $0xe2] sm:$0xff] }
 0x394   : > { %v2522_v8 = vpop.permute.xlu1 %2521 }
 0x395   : > { %2703 = vrot.lane.b32.xlu0 %v6527_v0, %s4655_s26  ;;  %2610 = vst.msk [vmem:[#allocation3 + $0x38] sm:$0xff] %vm571_vm2, %v2522_v8  ;;  %v6609_v8 = vld [vmem:[#allocation2 + $0xf2] sm:$0xff] }
 0x396   : > { %v2524_v12 = vpop.permute.xlu0 %2523 }
 0x397   : > { %2705 = vrot.lane.b32.xlu1 %v6532_v37, %s4655_s26  ;;  %2611 = vst.msk [vmem:[#allocation3 + $0x40] sm:$0xff] %vm571_vm2, %v2524_v12 }
 0x398   : > { %v2526_v30 = vpop.permute.xlu1 %2525 }
 0x399   : > { %2707 = vrot.lane.b32.xlu0 %v6537_v38, %s4655_s26  ;;  %2612 = vst.msk [vmem:[#allocation3 + $0x48] sm:$0xff] %vm571_vm2, %v2526_v30  ;;  %v6614_v30 = vld [vmem:[#allocation2 + $0xfa] sm:$0xff] }
 0x39b   : > { %2709 = vrot.lane.b32.xlu1 %v6542_v20, %s4655_s26 }
 0x39d   : > { %2711 = vrot.lane.b32.xlu0 %v6546_v4, %s4655_s26 }
 0x39f   : > { %2713 = vrot.lane.b32.xlu1 %v6550_v45, %s4655_s26 }
 0x3a1   : > { %2715 = vrot.lane.b32.xlu0 %v6554_v40, %s4655_s26 }
 0x3a2   : > { %v2528_v16 = vpop.permute.xlu0 %2527 }
 0x3a3   : > { %2717 = vrot.lane.b32.xlu1 %v6558_v10, %s4655_s26  ;;  %2613 = vst.msk [vmem:[#allocation3 + $0x50] sm:$0xff] %vm571_vm2, %v2528_v16  ;;  %v2657_v16 = vld [vmem:[#allocation2 + $0x10a] sm:$0xff] }
 0x3a4   : > { %v2530_v17 = vpop.permute.xlu1 %2529 }
 0x3a5   : > { %2719 = vrot.lane.b32.xlu0 %v6563_v27, %s4655_s26  ;;  %2614 = vst.msk [vmem:[#allocation3 + $0x58] sm:$0xff] %vm571_vm2, %v2530_v17  ;;  %v2658_v17 = vld [vmem:[#allocation2 + $0x112] sm:$0xff] }
 0x3a6   : > { %v2532_v54 = vpop.permute.xlu0 %2531 }
 0x3a7   : > { %2721 = vrot.lane.b32.xlu1 %v6568_v53, %s4655_s26  ;;  %2615 = vst.msk [vmem:[#allocation3 + $0x60] sm:$0xff] %vm571_vm2, %v2532_v54  ;;  %v2659_v54 = vld [vmem:[#allocation2 + $0x122] sm:$0xff] }
 0x3a8   : > { %v2534_v44 = vpop.permute.xlu1 %2533 }
 0x3a9   : > { %2723 = vrot.lane.b32.xlu0 %v6573_v31, %s4655_s26  ;;  %2616 = vst.msk [vmem:[#allocation3 + $0x68] sm:$0xff] %vm571_vm2, %v2534_v44  ;;  %v2660_v44 = vld [vmem:[#allocation2 + $0x12a] sm:$0xff] }
 0x3ab   : > { %2725 = vrot.lane.b32.xlu1 %v6578_v43, %s4655_s26 }
 0x3ad   : > { %2727 = vrot.lane.b32.xlu0 %v6582_v25, %s4655_s26 }
 0x3af   : > { %2729 = vrot.lane.b32.xlu1 %v6586_v34, %s4655_s26 }
 0x3b1   : > { %2731 = vrot.lane.b32.xlu0 %v6590_v41, %s4655_s26 }
 0x3b2   : > { %v2536_v63 = vpop.permute.xlu0 %2535 }
 0x3b3   : > { %2733 = vrot.lane.b32.xlu1 %v6594_v3, %s4655_s26  ;;  %2617 = vst.msk [vmem:[#allocation3 + $0x70] sm:$0xff] %vm571_vm2, %v2536_v63 }
 0x3b4   : > { %v2538_v21 = vpop.permute.xlu1 %2537 }
 0x3b5   : > { %2735 = vrot.lane.b32.xlu0 %v6599_v49, %s4655_s26  ;;  %2618 = vst.msk [vmem:[#allocation3 + $0x78] sm:$0xff] %vm571_vm2, %v2538_v21  ;;  %v2661_v21 = vld [vmem:[#allocation2 + $0x13a] sm:$0xff] }
 0x3b6   : > { %v2540_v61 = vpop.permute.xlu0 %2539 }
 0x3b7   : > { %2737 = vrot.lane.b32.xlu1 %v6604_v29, %s4655_s26  ;;  %2619 = vst.msk [vmem:[#allocation3 + $0x80] sm:$0xff] %vm571_vm2, %v2540_v61 }
 0x3b8   : > { %v2542_v12 = vpop.permute.xlu1 %2541 }
 0x3b9   : > { %2739 = vrot.lane.b32.xlu0 %v6609_v8, %s4655_s26  ;;  %2620 = vst.msk [vmem:[#allocation3 + $0x88] sm:$0xff] %vm571_vm2, %v2542_v12  ;;  %v2662_v12 = vld [vmem:[#allocation2 + $0x142] sm:$0xff] }
 0x3bb   : > { %2741 = vrot.lane.b32.xlu1 %v6614_v30, %s4655_s26 }
 0x3bd   : > { %2743 = vrot.lane.b32.xlu0 %v2657_v16, %s4655_s26 }
 0x3bf   : > { %2745 = vrot.lane.b32.xlu1 %v2658_v17, %s4655_s26  ;;  %v2663_v17 = vld [vmem:[#allocation2 + $0x152] sm:$0xff] }
 0x3c1   : > { %2747 = vrot.lane.b32.xlu0 %v2659_v54, %s4655_s26 }
 0x3c2   : > { %v2544_v63 = vpop.permute.xlu0 %2543 }
 0x3c3   : > { %2749 = vrot.lane.b32.xlu1 %v2660_v44, %s4655_s26  ;;  %2621 = vst.msk [vmem:[#allocation3 + $0x90] sm:$0xff] %vm571_vm2, %v2544_v63  ;;  %v2664_v44 = vld [vmem:[#allocation2 + $0x15a] sm:$0xff]  ;;  %v2665_v63 = vld [vmem:[#allocation2 + $0x16a] sm:$0xff] }
 0x3c4   : > { %v2546_v61 = vpop.permute.xlu1 %2545 }
 0x3c5   : > { %2751 = vrot.lane.b32.xlu0 %v2661_v21, %s4655_s26  ;;  %2622 = vst.msk [vmem:[#allocation3 + $0x98] sm:$0xff] %vm571_vm2, %v2546_v61  ;;  %v2666_v21 = vld [vmem:[#allocation2 + $0x172] sm:$0xff] }
 0x3c6   : > { %v2548_v16 = vpop.permute.xlu0 %2547 }
 0x3c7   : > { %2753 = vrot.lane.b32.xlu1 %v2662_v12, %s4655_s26  ;;  %2623 = vst.msk [vmem:[#allocation3 + $0xa0] sm:$0xff] %vm571_vm2, %v2548_v16 }
 0x3c8   : > { %v2550_v54 = vpop.permute.xlu1 %2549 }
 0x3c9   : > { %2755 = vrot.lane.b32.xlu0 %v2663_v17, %s4655_s26  ;;  %2624 = vst.msk [vmem:[#allocation3 + $0xa8] sm:$0xff] %vm571_vm2, %v2550_v54 }
 0x3cb   : > { %2757 = vrot.lane.b32.xlu1 %v2664_v44, %s4655_s26 }
 0x3cd   : > { %2759 = vrot.lane.b32.xlu0 %v2665_v63, %s4655_s26 }
 0x3cf   : > { %2761 = vrot.lane.b32.xlu1 %v2666_v21, %s4655_s26  ;;  %v4641_v21 = vld [vmem:[%s7337_s3 + $0x8] sm:$0xff]  }
 0x3d1   : > { %2891 = vrot.lane.b32.xlu0 %v6300_v6, %s4656_s27 }
 0x3d2   : > { %v2552_v61 = vpop.permute.xlu0 %2551 }
 0x3d3   : > { %2893 = vrot.lane.b32.xlu1 %v6312_v32, %s4656_s27  ;;  %2625 = vst.msk [vmem:[#allocation3 + $0xb0] sm:$0xff] %vm571_vm2, %v2552_v61 }
 0x3d4   : > { %v2554_v12 = vpop.permute.xlu1 %2553 }
 0x3d5   : > { %2895 = vrot.lane.b32.xlu0 %v6296_v1, %s4656_s27  ;;  %2626 = vst.msk [vmem:[#allocation3 + $0xb8] sm:$0xff] %vm571_vm2, %v2554_v12 }
 0x3d6   : > { %v2556_v16 = vpop.permute.xlu0 %2555 }
 0x3d7   : > { %2897 = vrot.lane.b32.xlu1 %v6308_v33, %s4656_s27  ;;  %2627 = vst.msk [vmem:[#allocation3 + $0xc0] sm:$0xff] %vm571_vm2, %v2556_v16 }
 0x3d8   : > { %v2558_v17 = vpop.permute.xlu1 %2557 }
 0x3d9   : > { %2899 = vrot.lane.b32.xlu0 %v6340_v15, %s4656_s27  ;;  %2628 = vst.msk [vmem:[#allocation3 + $0xc8] sm:$0xff] %vm571_vm2, %v2558_v17 }
 0x3db   : > { %2901 = vrot.lane.b32.xlu1 %v6352_v46, %s4656_s27 }
 0x3dd   : > { %2903 = vrot.lane.b32.xlu0 %v6336_v36, %s4656_s27 }
 0x3df   : > { %2905 = vrot.lane.b32.xlu1 %v6348_v18, %s4656_s27 }
 0x3e1   : > { %2907 = vrot.lane.b32.xlu0 %v6380_v55, %s4656_s27 }
 0x3e3   : > { %2909 = vrot.lane.b32.xlu1 %v6392_v5, %s4656_s27 }
 0x3e5   : > { %2911 = vrot.lane.b32.xlu0 %v6376_v57, %s4656_s27 }
 0x3e6   : > { %v2560_v6 = vpop.permute.xlu0 %2559 }
 0x3e7   : > { %2913 = vrot.lane.b32.xlu1 %v6388_v58, %s4656_s27  ;;  %2629 = vst.msk [vmem:[#allocation3 + $0xd0] sm:$0xff] %vm571_vm2, %v2560_v6 }
 0x3e8   : > { %v2562_v32 = vpop.permute.xlu1 %2561 }
 0x3e9   : > { %2915 = vrot.lane.b32.xlu0 %v6418_v23, %s4656_s27  ;;  %2630 = vst.msk [vmem:[#allocation3 + $0xd8] sm:$0xff] %vm571_vm2, %v2562_v32 }
 0x3ea   : > { %v2564_v54 = vpop.permute.xlu0 %2563 }
 0x3eb   : > { %2917 = vrot.lane.b32.xlu1 %v6426_v11, %s4656_s27  ;;  %2631 = vst.msk [vmem:[#allocation3 + $0xe0] sm:$0xff] %vm571_vm2, %v2564_v54 }
 0x3ec   : > { %v2566_v44 = vpop.permute.xlu1 %2565 }
 0x3ed   : > { %2919 = vrot.lane.b32.xlu0 %v6416_v28, %s4656_s27  ;;  %2632 = vst.msk [vmem:[#allocation3 + $0xe8] sm:$0xff] %vm571_vm2, %v2566_v44 }
 0x3ef   : > { %2921 = vrot.lane.b32.xlu1 %v6428_v14, %s4656_s27 }
 0x3f1   : > { %2923 = vrot.lane.b32.xlu0 %v6446_v39, %s4656_s27 }
 0x3f3   : > { %3083 = vrot.lane.b32.xlu1 %v6298_v26, %s4657_s28 }
 0x3f5   : > { %3085 = vrot.lane.b32.xlu0 %v6310_v9, %s4657_s28  ;;  %v4640_v9 = vld [vmem:[%s7337_s3] sm:$0xff]  }
 0x3f6   : > { %4574 = vmatprep.subr.bf16.mxu1 %v4640_v9 }
 0x3f7   : > { %3087 = vrot.lane.b32.xlu1 %v6321_v42, %s4657_s28  ;;  %4575 = vmatpush3.bf16.msra.mxu1 %v4640_v9 }
 0x3f8   : > { %4576 = vmatprep.subr.bf16.mxu1 %v4641_v21 }
 0x3f9   : > { %3089 = vrot.lane.b32.xlu0 %v6327_v35, %s4657_s28 }
 0x3fb   : > { %3275 = vrot.lane.b32.xlu1 %v6527_v0, %s4658_s29  ;;  %4577 = vmatpush3.bf16.msra.mxu1 %v4641_v21 }
 0x3fd   : > { %3277 = vrot.lane.b32.xlu0 %v6532_v37, %s4658_s29 }
 0x3ff   : > { %3279 = vrot.lane.b32.xlu1 %v6537_v38, %s4658_s29  ;;  %v2568_v63 = vpop.permute.xlu0 %2567 }
 0x400   : > { %2633 = vst.msk [vmem:[#allocation3 + $0xf0] sm:$0xff] %vm571_vm2, %v2568_v63 }
 0x401   : > { %v2570_v26 = vpop.permute.xlu1 %2569  ;;  %3281 = vrot.lane.b32.xlu0 %v6542_v20, %s4658_s29 }
 0x402   : > { %2634 = vst.msk [vmem:[#allocation3 + $0xf8] sm:$0xff] %vm571_vm2, %v2570_v26 }
 0x403   : > { %3467 = vrot.lane.b32.xlu1 %v6296_v1, %s4659_s30  ;;  %v2700_v0 = vpop.permute.xlu0 %2699 }
 0x404   : > { %2795 = vst.msk [vmem:[#allocation3] sm:$0xff] %vm764_vm3, %v2700_v0 }
 0x405   : > { %v2702_v37 = vpop.permute.xlu1 %2701  ;;  %3469 = vrot.lane.b32.xlu0 %v6308_v33, %s4659_s30  ;;  %v4642_v33 = vld [vmem:[%s7337_s3 + $0x10] sm:$0xff]  }
 0x406   : > { %2796 = vst.msk [vmem:[#allocation3 + $0x8] sm:$0xff] %vm764_vm3, %v2702_v37  ;;  %4578 = vmatprep.subr.bf16.mxu1 %v4642_v33 }
 0x407   : > { %3471 = vrot.lane.b32.xlu1 %v6340_v15, %s4659_s30  ;;  %v2704_v61 = vpop.permute.xlu0 %2703  ;;  %4579 = vmatpush3.bf16.msra.mxu1 %v4642_v33 }
 0x408   : > { %2797 = vst.msk [vmem:[#allocation3 + $0x10] sm:$0xff] %vm764_vm3, %v2704_v61 }
 0x409   : > { %v2706_v1 = vpop.permute.xlu1 %2705  ;;  %3473 = vrot.lane.b32.xlu0 %v6352_v46, %s4659_s30  ;;  %v4643_v46 = vld [vmem:[%s7337_s3 + $0x18] sm:$0xff]  }
 0x40a   : > { %2798 = vst.msk [vmem:[#allocation3 + $0x18] sm:$0xff] %vm764_vm3, %v2706_v1  ;;  %4580 = vmatprep.subr.bf16.mxu1 %v4643_v46 }
 0x40b   : > { %3659 = vrot.lane.b32.xlu1 %v6321_v42, %s4660_s10  ;;  %v2708_v12 = vpop.permute.xlu0 %2707  ;;  %4581 = vmatpush3.bf16.msra.mxu1 %v4643_v46 }
 0x40c   : > { %2799 = vst.msk [vmem:[#allocation3 + $0x20] sm:$0xff] %vm764_vm3, %v2708_v12 }
 0x40d   : > { %v2710_v15 = vpop.permute.xlu1 %2709  ;;  %3661 = vrot.lane.b32.xlu0 %v6327_v35, %s4660_s10  ;;  %v4644_v35 = vld [vmem:[%s7337_s3 + $0x20] ss:$0 sps:$4 sm:$0xff]  }
 0x40e   : > { %2800 = vst.msk [vmem:[#allocation3 + $0x28] sm:$0xff] %vm764_vm3, %v2710_v15  ;;  %4617 = vmatprep.subr.msk.bf16.mxu1 %vm2096_vm7, %v4644_v35  ;;  %v4119_v6 = vsel %vm2096_vm7, %v4644_v35, 0 }
 0x40f   : > { %3663 = vrot.lane.b32.xlu1 %v6338_v19, %s4660_s10  ;;  %v2712_v16 = vpop.permute.xlu0 %2711  ;;  %4583 = vmatpush3.bf16.msra.mxu1 %v4119_v6 }
 0x410   : > { %2801 = vst.msk [vmem:[#allocation3 + $0x30] sm:$0xff] %vm764_vm3, %v2712_v16 }
 0x411   : > { %v2714_v42 = vpop.permute.xlu1 %2713  ;;  %3665 = vrot.lane.b32.xlu0 %v6350_v22, %s4660_s10 }
 0x412   : > { %2802 = vst.msk [vmem:[#allocation3 + $0x38] sm:$0xff] %vm764_vm3, %v2714_v42 }
 0x413   : > { %3851 = vrot.lane.b32.xlu1 %v6537_v38, %s4661_s15  ;;  %v2716_v17 = vpop.permute.xlu0 %2715 }
 0x414   : > { %2803 = vst.msk [vmem:[#allocation3 + $0x40] sm:$0xff] %vm764_vm3, %v2716_v17 }
 0x415   : > { %v2718_v32 = vpop.permute.xlu1 %2717  ;;  %3853 = vrot.lane.b32.xlu0 %v6542_v20, %s4661_s15 }
 0x416   : > { %2804 = vst.msk [vmem:[#allocation3 + $0x48] sm:$0xff] %vm764_vm3, %v2718_v32 }
 0x417   : > { %3855 = vrot.lane.b32.xlu1 %v6546_v4, %s4661_s15  ;;  %v2720_v54 = vpop.permute.xlu0 %2719 }
 0x418   : > { %2805 = vst.msk [vmem:[#allocation3 + $0x50] sm:$0xff] %vm764_vm3, %v2720_v54 }
 0x419   : > { %v2722_v38 = vpop.permute.xlu1 %2721  ;;  %3857 = vrot.lane.b32.xlu0 %v6550_v45, %s4661_s15 }
 0x41a   : > { %2806 = vst.msk [vmem:[#allocation3 + $0x58] sm:$0xff] %vm764_vm3, %v2722_v38 }
 0x41b   : > { %3091 = vrot.lane.b32.xlu1 %v6338_v19, %s4657_s28  ;;  %v2724_v44 = vpop.permute.xlu0 %2723 }
 0x41c   : > { %2807 = vst.msk [vmem:[#allocation3 + $0x60] sm:$0xff] %vm764_vm3, %v2724_v44  ;;  %v3033_v44 = vld [vmem:[#allocation2 + $0xc1] sm:$0xff] }
 0x41d   : > { %v2726_v20 = vpop.permute.xlu1 %2725  ;;  %3093 = vrot.lane.b32.xlu0 %v6350_v22, %s4657_s28 }
 0x41e   : > { %2808 = vst.msk [vmem:[#allocation3 + $0x68] sm:$0xff] %vm764_vm3, %v2726_v20 }
 0x41f   : > { %3095 = vrot.lane.b32.xlu1 %v6361_v47, %s4657_s28  ;;  %v2728_v63 = vpop.permute.xlu0 %2727 }
 0x420   : > { %2809 = vst.msk [vmem:[#allocation3 + $0x70] sm:$0xff] %vm764_vm3, %v2728_v63  ;;  %v3034_v63 = vld [vmem:[#allocation2 + $0xc9] sm:$0xff] }
 0x421   : > { %v2730_v26 = vpop.permute.xlu1 %2729  ;;  %3097 = vrot.lane.b32.xlu0 %v6367_v13, %s4657_s28 }
 0x422   : > { %2810 = vst.msk [vmem:[#allocation3 + $0x78] sm:$0xff] %vm764_vm3, %v2730_v26 }
 0x423   : > { %3283 = vrot.lane.b32.xlu1 %v6546_v4, %s4658_s29  ;;  %v2732_v19 = vpop.permute.xlu0 %2731 }
 0x424   : > { %2811 = vst.msk [vmem:[#allocation3 + $0x80] sm:$0xff] %vm764_vm3, %v2732_v19 }
 0x425   : > { %v2734_v22 = vpop.permute.xlu1 %2733  ;;  %3285 = vrot.lane.b32.xlu0 %v6550_v45, %s4658_s29 }
 0x426   : > { %2812 = vst.msk [vmem:[#allocation3 + $0x88] sm:$0xff] %vm764_vm3, %v2734_v22 }
 0x427   : > { %3287 = vrot.lane.b32.xlu1 %v6554_v40, %s4658_s29  ;;  %v2736_v9 = vpop.permute.xlu0 %2735 }
 0x428   : > { %2813 = vst.msk [vmem:[#allocation3 + $0x90] sm:$0xff] %vm764_vm3, %v2736_v9 }
 0x429   : > { %v2738_v0 = vpop.permute.xlu1 %2737  ;;  %3289 = vrot.lane.b32.xlu0 %v6558_v10, %s4658_s29 }
 0x42a   : > { %2814 = vst.msk [vmem:[#allocation3 + $0x98] sm:$0xff] %vm764_vm3, %v2738_v0 }
 0x42b   : > { %3475 = vrot.lane.b32.xlu1 %v6336_v36, %s4659_s30  ;;  %v2740_v4 = vpop.permute.xlu0 %2739 }
 0x42c   : > { %2815 = vst.msk [vmem:[#allocation3 + $0xa0] sm:$0xff] %vm764_vm3, %v2740_v4 }
 0x42d   : > { %v2742_v45 = vpop.permute.xlu1 %2741  ;;  %3477 = vrot.lane.b32.xlu0 %v6348_v18, %s4659_s30 }
 0x42e   : > { %2816 = vst.msk [vmem:[#allocation3 + $0xa8] sm:$0xff] %vm764_vm3, %v2742_v45 }
 0x42f   : > { %3479 = vrot.lane.b32.xlu1 %v6380_v55, %s4659_s30  ;;  %v2744_v37 = vpop.permute.xlu0 %2743 }
 0x430   : > { %2817 = vst.msk [vmem:[#allocation3 + $0xb0] sm:$0xff] %vm764_vm3, %v2744_v37 }
 0x431   : > { %v2746_v21 = vpop.permute.xlu1 %2745  ;;  %3481 = vrot.lane.b32.xlu0 %v6392_v5, %s4659_s30 }
 0x432   : > { %2818 = vst.msk [vmem:[#allocation3 + $0xb8] sm:$0xff] %vm764_vm3, %v2746_v21  ;;  %v3610_v21 = vld [vmem:[#allocation2 + $0xe1] sm:$0xff] }
 0x433   : > { %3667 = vrot.lane.b32.xlu1 %v6361_v47, %s4660_s10  ;;  %v2748_v36 = vpop.permute.xlu0 %2747 }
 0x434   : > { %2819 = vst.msk [vmem:[#allocation3 + $0xc0] sm:$0xff] %vm764_vm3, %v2748_v36 }
 0x435   : > { %v2750_v18 = vpop.permute.xlu1 %2749  ;;  %3669 = vrot.lane.b32.xlu0 %v6367_v13, %s4660_s10 }
 0x436   : > { %2820 = vst.msk [vmem:[#allocation3 + $0xc8] sm:$0xff] %vm764_vm3, %v2750_v18 }
 0x437   : > { %3671 = vrot.lane.b32.xlu1 %v6378_v56, %s4660_s10  ;;  %v2752_v55 = vpop.permute.xlu0 %2751 }
 0x438   : > { %2821 = vst.msk [vmem:[#allocation3 + $0xd0] sm:$0xff] %vm764_vm3, %v2752_v55 }
 0x439   : > { %v2754_v5 = vpop.permute.xlu1 %2753  ;;  %3673 = vrot.lane.b32.xlu0 %v6390_v7, %s4660_s10 }
 0x43a   : > { %2822 = vst.msk [vmem:[#allocation3 + $0xd8] sm:$0xff] %vm764_vm3, %v2754_v5 }
 0x43b   : > { %3859 = vrot.lane.b32.xlu1 %v6554_v40, %s4661_s15  ;;  %v2756_v47 = vpop.permute.xlu0 %2755 }
 0x43c   : > { %2823 = vst.msk [vmem:[#allocation3 + $0xe0] sm:$0xff] %vm764_vm3, %v2756_v47 }
 0x43d   : > { %v2758_v13 = vpop.permute.xlu1 %2757  ;;  %3861 = vrot.lane.b32.xlu0 %v6558_v10, %s4661_s15 }
 0x43e   : > { %2824 = vst.msk [vmem:[#allocation3 + $0xe8] sm:$0xff] %vm764_vm3, %v2758_v13 }
 0x43f   : > { %3863 = vrot.lane.b32.xlu1 %v6563_v27, %s4661_s15  ;;  %v2760_v61 = vpop.permute.xlu0 %2759 }
 0x440   : > { %2825 = vst.msk [vmem:[#allocation3 + $0xf0] sm:$0xff] %vm764_vm3, %v2760_v61 }
 0x441   : > { %v2762_v1 = vpop.permute.xlu1 %2761  ;;  %3865 = vrot.lane.b32.xlu0 %v6568_v53, %s4661_s15 }
 0x442   : > { %2826 = vst.msk [vmem:[#allocation3 + $0xf8] sm:$0xff] %vm764_vm3, %v2762_v1 }
 0x443   : > { %3099 = vrot.lane.b32.xlu1 %v6378_v56, %s4657_s28  ;;  %v2892_v40 = vpop.permute.xlu0 %2891 }
 0x444   : > { %2987 = vst.msk [vmem:[#allocation3] sm:$0xff] %vm957_vm4, %v2892_v40 }
 0x445   : > { %v2894_v10 = vpop.permute.xlu1 %2893  ;;  %3101 = vrot.lane.b32.xlu0 %v6390_v7, %s4657_s28 }
 0x446   : > { %2988 = vst.msk [vmem:[#allocation3 + $0x8] sm:$0xff] %vm957_vm4, %v2894_v10 }
 0x447   : > { %3103 = vrot.lane.b32.xlu1 %v6401_v62, %s4657_s28  ;;  %v2896_v33 = vpop.permute.xlu0 %2895 }
 0x448   : > { %2989 = vst.msk [vmem:[#allocation3 + $0x10] sm:$0xff] %vm957_vm4, %v2896_v33 }
 0x449   : > { %v2898_v12 = vpop.permute.xlu1 %2897  ;;  %3105 = vrot.lane.b32.xlu0 %v6407_v24, %s4657_s28 }
 0x44a   : > { %2990 = vst.msk [vmem:[#allocation3 + $0x18] sm:$0xff] %vm957_vm4, %v2898_v12 }
 0x44b   : > { %3291 = vrot.lane.b32.xlu1 %v6563_v27, %s4658_s29  ;;  %v2900_v56 = vpop.permute.xlu0 %2899 }
 0x44c   : > { %2991 = vst.msk [vmem:[#allocation3 + $0x20] sm:$0xff] %vm957_vm4, %v2900_v56 }
 0x44d   : > { %v2902_v7 = vpop.permute.xlu1 %2901  ;;  %3293 = vrot.lane.b32.xlu0 %v6568_v53, %s4658_s29 }
 0x44e   : > { %2992 = vst.msk [vmem:[#allocation3 + $0x28] sm:$0xff] %vm957_vm4, %v2902_v7  ;;  %v3037_v7 = vld [vmem:[#allocation2 + $0xf1] sm:$0xff] }
 0x44f   : > { %3295 = vrot.lane.b32.xlu1 %v6573_v31, %s4658_s29  ;;  %v2904_v62 = vpop.permute.xlu0 %2903 }
 0x450   : > { %2993 = vst.msk [vmem:[#allocation3 + $0x30] sm:$0xff] %vm957_vm4, %v2904_v62 }
 0x451   : > { %v2906_v24 = vpop.permute.xlu1 %2905  ;;  %3297 = vrot.lane.b32.xlu0 %v6578_v43, %s4658_s29 }
 0x452   : > { %2994 = vst.msk [vmem:[#allocation3 + $0x38] sm:$0xff] %vm957_vm4, %v2906_v24  ;;  %v3038_v24 = vld [vmem:[#allocation2 + $0xf9] sm:$0xff] }
 0x453   : > { %3483 = vrot.lane.b32.xlu1 %v6376_v57, %s4659_s30  ;;  %v2908_v27 = vpop.permute.xlu0 %2907  ;;  %v3603_v57 = vld [vmem:[#allocation2 + $0x91] sm:$0xff] }
 0x454   : > { %2995 = vst.msk [vmem:[#allocation3 + $0x40] sm:$0xff] %vm957_vm4, %v2908_v27 }
 0x455   : > { %v2910_v53 = vpop.permute.xlu1 %2909  ;;  %3485 = vrot.lane.b32.xlu0 %v6388_v58, %s4659_s30  ;;  %v3604_v58 = vld [vmem:[#allocation2 + $0x99] sm:$0xff] }
 0x456   : > { %2996 = vst.msk [vmem:[#allocation3 + $0x48] sm:$0xff] %vm957_vm4, %v2910_v53 }
 0x457   : > { %3487 = vrot.lane.b32.xlu1 %v6418_v23, %s4659_s30  ;;  %v2912_v15 = vpop.permute.xlu0 %2911  ;;  %v3605_v23 = vld [vmem:[#allocation2 + $0xa9] sm:$0xff] }
 0x458   : > { %2997 = vst.msk [vmem:[#allocation3 + $0x50] sm:$0xff] %vm957_vm4, %v2912_v15 }
 0x459   : > { %v2914_v46 = vpop.permute.xlu1 %2913  ;;  %3489 = vrot.lane.b32.xlu0 %v6426_v11, %s4659_s30  ;;  %v3606_v11 = vld [vmem:[#allocation2 + $0xb1] sm:$0xff] }
 0x45a   : > { %2998 = vst.msk [vmem:[#allocation3 + $0x58] sm:$0xff] %vm957_vm4, %v2914_v46 }
 0x45b   : > { %3675 = vrot.lane.b32.xlu1 %v3603_v57, %s4660_s10  ;;  %v2916_v16 = vpop.permute.xlu0 %2915 }
 0x45c   : > { %2999 = vst.msk [vmem:[#allocation3 + $0x60] sm:$0xff] %vm957_vm4, %v2916_v16  ;;  %v3613_v16 = vld [vmem:[#allocation2 + $0x109] sm:$0xff] }
 0x45d   : > { %v2918_v42 = vpop.permute.xlu1 %2917  ;;  %3677 = vrot.lane.b32.xlu0 %v3604_v58, %s4660_s10 }
 0x45e   : > { %3000 = vst.msk [vmem:[#allocation3 + $0x68] sm:$0xff] %vm957_vm4, %v2918_v42  ;;  %v3614_v42 = vld [vmem:[#allocation2 + $0x111] sm:$0xff] }
 0x45f   : > { %3679 = vrot.lane.b32.xlu1 %v3605_v23, %s4660_s10  ;;  %v2920_v35 = vpop.permute.xlu0 %2919 }
 0x460   : > { %3001 = vst.msk [vmem:[#allocation3 + $0x70] sm:$0xff] %vm957_vm4, %v2920_v35 }
 0x461   : > { %v2922_v17 = vpop.permute.xlu1 %2921  ;;  %3681 = vrot.lane.b32.xlu0 %v3606_v11, %s4660_s10 }
 0x462   : > { %3002 = vst.msk [vmem:[#allocation3 + $0x78] sm:$0xff] %vm957_vm4, %v2922_v17  ;;  %v3803_v17 = vld [vmem:[#allocation2 + $0xf2] sm:$0xff] }
 0x463   : > { %3867 = vrot.lane.b32.xlu1 %v6573_v31, %s4661_s15  ;;  %v2924_v6 = vpop.permute.xlu0 %2923 }
 0x464   : > { %3003 = vst.msk [vmem:[#allocation3 + $0x80] sm:$0xff] %vm957_vm4, %v2924_v6 }
 0x465   : > { %v3084_v32 = vpop.permute.xlu1 %3083  ;;  %3869 = vrot.lane.b32.xlu0 %v6578_v43, %s4661_s15 }
 0x466   : > { %3179 = vst.msk [vmem:[#allocation3] sm:$0xff] %vm1150_vm5, %v3084_v32 }
 0x467   : > { %3871 = vrot.lane.b32.xlu1 %v6582_v25, %s4661_s15  ;;  %v3086_v54 = vpop.permute.xlu0 %3085 }
 0x468   : > { %3180 = vst.msk [vmem:[#allocation3 + $0x8] sm:$0xff] %vm1150_vm5, %v3086_v54  ;;  %v3804_v54 = vld [vmem:[#allocation2 + $0xfa] sm:$0xff] }
 0x469   : > { %v3088_v38 = vpop.permute.xlu1 %3087  ;;  %3873 = vrot.lane.b32.xlu0 %v6586_v34, %s4661_s15 }
 0x46a   : > { %3181 = vst.msk [vmem:[#allocation3 + $0x10] sm:$0xff] %vm1150_vm5, %v3088_v38 }
 0x46b   : > { %3107 = vrot.lane.b32.xlu1 %v3605_v23, %s4657_s28  ;;  %v3090_v31 = vpop.permute.xlu0 %3089 }
 0x46c   : > { %3182 = vst.msk [vmem:[#allocation3 + $0x18] sm:$0xff] %vm1150_vm5, %v3090_v31 }
 0x46d   : > { %v3276_v43 = vpop.permute.xlu1 %3275  ;;  %3109 = vrot.lane.b32.xlu0 %v3606_v11, %s4657_s28 }
 0x46e   : > { %3371 = vst.msk [vmem:[#allocation3] sm:$0xff] %vm1343_vm6, %v3276_v43 }
 0x46f   : > { %3111 = vrot.lane.b32.xlu1 %v3033_v44, %s4657_s28  ;;  %v3278_v20 = vpop.permute.xlu0 %3277 }
 0x470   : > { %3372 = vst.msk [vmem:[#allocation3 + $0x8] sm:$0xff] %vm1343_vm6, %v3278_v20 }
 0x471   : > { %v3280_v26 = vpop.permute.xlu1 %3279  ;;  %3113 = vrot.lane.b32.xlu0 %v3034_v63, %s4657_s28 }
 0x472   : > { %3373 = vst.msk [vmem:[#allocation3 + $0x10] sm:$0xff] %vm1343_vm6, %v3280_v26  ;;  %v3806_v26 = vld [vmem:[#allocation2 + $0x112] sm:$0xff] }
 0x473   : > { %3299 = vrot.lane.b32.xlu1 %v6582_v25, %s4658_s29  ;;  %v3282_v19 = vpop.permute.xlu0 %3281 }
 0x474   : > { %3374 = vst.msk [vmem:[#allocation3 + $0x18] sm:$0xff] %vm1343_vm6, %v3282_v19 }
 0x475   : > { %v3468_v22 = vpop.permute.xlu1 %3467  ;;  %3301 = vrot.lane.b32.xlu0 %v6586_v34, %s4658_s29 }
 0x476   : > { %3563 = vst.msk [vmem:[#allocation3] sm:$0xff] %vm1537_vm8, %v3468_v22 }
 0x477   : > { %3303 = vrot.lane.b32.xlu1 %v6590_v41, %s4658_s29  ;;  %v3470_v9 = vpop.permute.xlu0 %3469 }
 0x478   : > { %3564 = vst.msk [vmem:[#allocation3 + $0x8] sm:$0xff] %vm1537_vm8, %v3470_v9 }
 0x479   : > { %v3472_v0 = vpop.permute.xlu1 %3471  ;;  %3305 = vrot.lane.b32.xlu0 %v6594_v3, %s4658_s29 }
 0x47a   : > { %3565 = vst.msk [vmem:[#allocation3 + $0x10] sm:$0xff] %vm1537_vm8, %v3472_v0 }
 0x47b   : > { %3491 = vrot.lane.b32.xlu1 %v6416_v28, %s4659_s30  ;;  %v3474_v25 = vpop.permute.xlu0 %3473 }
 0x47c   : > { %3566 = vst.msk [vmem:[#allocation3 + $0x18] sm:$0xff] %vm1537_vm8, %v3474_v25 }
 0x47d   : > { %v3660_v34 = vpop.permute.xlu1 %3659  ;;  %3493 = vrot.lane.b32.xlu0 %v6428_v14, %s4659_s30 }
 0x47e   : > { %3755 = vst.msk [vmem:[#allocation3] sm:$0xff] %vm1730_vm9, %v3660_v34  ;;  %v3041_v34 = vld [vmem:[#allocation2 + $0x121] sm:$0xff] }
 0x47f   : > { %3495 = vrot.lane.b32.xlu1 %v6446_v39, %s4659_s30  ;;  %v3662_v4 = vpop.permute.xlu0 %3661  ;;  %v3609_v39 = vld [vmem:[#allocation2 + $0xd9] sm:$0xff] }
 0x480   : > { %3756 = vst.msk [vmem:[#allocation3 + $0x8] sm:$0xff] %vm1730_vm9, %v3662_v4 }
 0x481   : > { %v3664_v45 = vpop.permute.xlu1 %3663  ;;  %3497 = vrot.lane.b32.xlu0 %v6454_v51, %s4659_s30 }
 0x482   : > { %3757 = vst.msk [vmem:[#allocation3 + $0x10] sm:$0xff] %vm1730_vm9, %v3664_v45 }
 0x483   : > { %3683 = vrot.lane.b32.xlu1 %v3033_v44, %s4660_s10  ;;  %v3666_v28 = vpop.permute.xlu0 %3665  ;;  %v3805_v44 = vld [vmem:[#allocation2 + $0x10a] sm:$0xff] }
 0x484   : > { %3758 = vst.msk [vmem:[#allocation3 + $0x18] sm:$0xff] %vm1730_vm9, %v3666_v28 }
 0x485   : > { %v3852_v14 = vpop.permute.xlu1 %3851  ;;  %3685 = vrot.lane.b32.xlu0 %v3034_v63, %s4660_s10 }
 0x486   : > { %3947 = vst.msk [vmem:[#allocation3] sm:$0xff] %vm1923_vm10, %v3852_v14  ;;  %v3233_v14 = vld [vmem:[#allocation2 + $0x122] sm:$0xff] }
 0x487   : > { %3687 = vrot.lane.b32.xlu1 %v3609_v39, %s4660_s10  ;;  %v3854_v37 = vpop.permute.xlu0 %3853 }
 0x488   : > { %3948 = vst.msk [vmem:[#allocation3 + $0x8] sm:$0xff] %vm1923_vm10, %v3854_v37  ;;  %v3234_v37 = vld [vmem:[#allocation2 + $0x12a] sm:$0xff] }
 0x489   : > { %v3856_v36 = vpop.permute.xlu1 %3855  ;;  %3689 = vrot.lane.b32.xlu0 %v3610_v21, %s4660_s10 }
 0x48a   : > { %3949 = vst.msk [vmem:[#allocation3 + $0x10] sm:$0xff] %vm1923_vm10, %v3856_v36  ;;  %v3423_v36 = vld [vmem:[#allocation2 + $0x120] sm:$0xff] }
 0x48b   : > { %3875 = vrot.lane.b32.xlu1 %v6590_v41, %s4661_s15  ;;  %v3858_v18 = vpop.permute.xlu0 %3857 }
 0x48c   : > { %3950 = vst.msk [vmem:[#allocation3 + $0x18] sm:$0xff] %vm1923_vm10, %v3858_v18 }
 0x48d   : > { %v3092_v55 = vpop.permute.xlu1 %3091  ;;  %3877 = vrot.lane.b32.xlu0 %v6594_v3, %s4661_s15  ;;  %v3979_v47 = vld [vmem:[#allocation3] sm:$0xff] }
 0x48e   : > { %3183 = vst.msk [vmem:[#allocation3 + $0x20] sm:$0xff] %vm1150_vm5, %v3092_v55  ;;  %v3424_v55 = vld [vmem:[#allocation2 + $0x128] sm:$0xff] }
 0x48f   : > { %3879 = vrot.lane.b32.xlu1 %v6599_v49, %s4661_s15  ;;  %v3094_v5 = vpop.permute.xlu0 %3093  ;;  %v3980_v13 = vld [vmem:[#allocation3 + $0x8] sm:$0xff] }
 0x490   : > { %3184 = vst.msk [vmem:[#allocation3 + $0x28] sm:$0xff] %vm1150_vm5, %v3094_v5  ;;  %v4011_v61 = vpack.c.bf16 %v3980_v13, %v3979_v47  ;;  %v3425_v47 = vld [vmem:[#allocation2 + $0x138] sm:$0xff] }
 0x491   : > { %v3096_v1 = vpop.permute.xlu1 %3095  ;;  %3881 = vrot.lane.b32.xlu0 %v6604_v29, %s4661_s15  ;;  %v3981_v3 = vld [vmem:[#allocation3 + $0x10] sm:$0xff] }
 0x492   : > { %3185 = vst.msk [vmem:[#allocation3 + $0x30] sm:$0xff] %vm1150_vm5, %v3096_v1  ;;  %4584 = vmatprep.mubr.msk.bf16.mxu1 %vm2047_vm11, %v4011_v61  ;;  %v3426_v61 = vld [vmem:[#allocation2 + $0x140] sm:$0xff] }
 0x493   : > { %2925 = vrot.lane.b32.xlu1 %v6454_v51, %s4656_s27  ;;  %v3098_v41 = vpop.permute.xlu0 %3097  ;;  %v3982_v40 = vld [vmem:[#allocation3 + $0x18] sm:$0xff] }
 0x494   : > { %3186 = vst.msk [vmem:[#allocation3 + $0x38] sm:$0xff] %vm1150_vm5, %v3098_v41  ;;  %v4012_v10 = vpack.c.bf16 %v3982_v40, %v3981_v3 }
 0x495   : > { %v3284_v33 = vpop.permute.xlu1 %3283  ;;  %2927 = vrot.lane.b32.xlu0 %v6444_v48, %s4656_s27 }
 0x496   : > { %3375 = vst.msk [vmem:[#allocation3 + $0x20] sm:$0xff] %vm1343_vm6, %v3284_v33  ;;  %4585 = vmatmul.mubr.msk.bf16.vlgmr.msra.gmra.mrb[0].mxu1 %vm2047_vm11, %v4012_v10 }
 0x497   : > { %2929 = vrot.lane.b32.xlu1 %v6456_v59, %s4656_s27  ;;  %v3286_v12 = vpop.permute.xlu0 %3285 }
 0x498   : > { %3376 = vst.msk [vmem:[#allocation3 + $0x28] sm:$0xff] %vm1343_vm6, %v3286_v12 }
 0x499   : > { %v3288_v51 = vpop.permute.xlu1 %3287  ;;  %3115 = vrot.lane.b32.xlu0 %v3609_v39, %s4657_s28 }
 0x49a   : > { %3377 = vst.msk [vmem:[#allocation3 + $0x30] sm:$0xff] %vm1343_vm6, %v3288_v51 }
 0x49b   : > { %3117 = vrot.lane.b32.xlu1 %v3610_v21, %s4657_s28  ;;  %v3290_v56 = vpop.permute.xlu0 %3289 }
 0x49c   : > { %3378 = vst.msk [vmem:[#allocation3 + $0x38] sm:$0xff] %vm1343_vm6, %v3290_v56  ;;  %v3617_v56 = vld [vmem:[#allocation2 + $0x139] sm:$0xff] }
 0x49d   : > { %v3476_v62 = vpop.permute.xlu1 %3475  ;;  %3119 = vrot.lane.b32.xlu0 %v3037_v7, %s4657_s28 }
 0x49e   : > { %3567 = vst.msk [vmem:[#allocation3 + $0x20] sm:$0xff] %vm1537_vm8, %v3476_v62 }
 0x49f   : > { %3121 = vrot.lane.b32.xlu1 %v3038_v24, %s4657_s28  ;;  %v3478_v27 = vpop.permute.xlu0 %3477 }
 0x4a0   : > { %3568 = vst.msk [vmem:[#allocation3 + $0x28] sm:$0xff] %vm1537_vm8, %v3478_v27 }
 0x4a1   : > { %v3480_v53 = vpop.permute.xlu1 %3479  ;;  %3307 = vrot.lane.b32.xlu0 %v6599_v49, %s4658_s29 }
 0x4a2   : > { %3569 = vst.msk [vmem:[#allocation3 + $0x30] sm:$0xff] %vm1537_vm8, %v3480_v53 }
 0x4a3   : > { %3309 = vrot.lane.b32.xlu1 %v6604_v29, %s4658_s29  ;;  %v3482_v15 = vpop.permute.xlu0 %3481 }
 0x4a4   : > { %3570 = vst.msk [vmem:[#allocation3 + $0x38] sm:$0xff] %vm1537_vm8, %v3482_v15 }
 0x4a5   : > { %v3668_v46 = vpop.permute.xlu1 %3667  ;;  %3311 = vrot.lane.b32.xlu0 %v6609_v8, %s4658_s29 }
 0x4a6   : > { %3759 = vst.msk [vmem:[#allocation3 + $0x20] sm:$0xff] %vm1730_vm9, %v3668_v46  ;;  %v3809_v46 = vld [vmem:[#allocation2 + $0x13a] sm:$0xff] }
 0x4a7   : > { %3313 = vrot.lane.b32.xlu1 %v6614_v30, %s4658_s29  ;;  %v3670_v57 = vpop.permute.xlu0 %3669 }
 0x4a8   : > { %3760 = vst.msk [vmem:[#allocation3 + $0x28] sm:$0xff] %vm1730_vm9, %v3670_v57 }
 0x4a9   : > { %v3672_v49 = vpop.permute.xlu1 %3671  ;;  %3499 = vrot.lane.b32.xlu0 %v6444_v48, %s4659_s30 }
 0x4aa   : > { %3761 = vst.msk [vmem:[#allocation3 + $0x30] sm:$0xff] %vm1730_vm9, %v3672_v49  ;;  %v3810_v49 = vld [vmem:[#allocation2 + $0x142] sm:$0xff] }
 0x4ab   : > { %3501 = vrot.lane.b32.xlu1 %v6456_v59, %s4659_s30  ;;  %v3674_v29 = vpop.permute.xlu0 %3673 }
 0x4ac   : > { %3762 = vst.msk [vmem:[#allocation3 + $0x38] sm:$0xff] %vm1730_vm9, %v3674_v29 }
 0x4ad   : > { %v3860_v8 = vpop.permute.xlu1 %3859  ;;  %3503 = vrot.lane.b32.xlu0 %v6474_v60, %s4659_s30 }
 0x4ae   : > { %3951 = vst.msk [vmem:[#allocation3 + $0x20] sm:$0xff] %vm1923_vm10, %v3860_v8 }
 0x4af   : > { %3505 = vrot.lane.b32.xlu1 %v6482_v2, %s4659_s30  ;;  %v3862_v30 = vpop.permute.xlu0 %3861 }
 0x4b0   : > { %3952 = vst.msk [vmem:[#allocation3 + $0x28] sm:$0xff] %vm1923_vm10, %v3862_v30 }
 0x4b1   : > { %v3864_v48 = vpop.permute.xlu1 %3863  ;;  %3691 = vrot.lane.b32.xlu0 %v3037_v7, %s4660_s10 }
 0x4b2   : > { %3953 = vst.msk [vmem:[#allocation3 + $0x30] sm:$0xff] %vm1923_vm10, %v3864_v48  ;;  %v2853_v48 = vld [vmem:[#allocation2 + $0x150] sm:$0xff] }
 0x4b3   : > { %3693 = vrot.lane.b32.xlu1 %v3038_v24, %s4660_s10  ;;  %v3866_v59 = vpop.permute.xlu0 %3865  ;;  %v3618_v24 = vld [vmem:[#allocation2 + $0x141] sm:$0xff] }
 0x4b4   : > { %3954 = vst.msk [vmem:[#allocation3 + $0x38] sm:$0xff] %vm1923_vm10, %v3866_v59 }
 0x4b5   : > { %v3100_v58 = vpop.permute.xlu1 %3099  ;;  %3695 = vrot.lane.b32.xlu0 %v3613_v16, %s4660_s10  ;;  %v3983_v35 = vld [vmem:[#allocation3 + $0x20] sm:$0xff] }
 0x4b6   : > { %3187 = vst.msk [vmem:[#allocation3 + $0x40] sm:$0xff] %vm1150_vm5, %v3100_v58 }
 0x4b7   : > { %3697 = vrot.lane.b32.xlu1 %v3614_v42, %s4660_s10  ;;  %v3102_v23 = vpop.permute.xlu0 %3101  ;;  %v3984_v11 = vld [vmem:[#allocation3 + $0x28] sm:$0xff] }
 0x4b8   : > { %3188 = vst.msk [vmem:[#allocation3 + $0x48] sm:$0xff] %vm1150_vm5, %v3102_v23  ;;  %v4013_v6 = vpack.c.bf16 %v3984_v11, %v3983_v35  ;;  %v3045_v35 = vld [vmem:[#allocation2 + $0x151] sm:$0xff] }
 0x4b9   : > { %v3104_v32 = vpop.permute.xlu1 %3103  ;;  %3883 = vrot.lane.b32.xlu0 %v3803_v17, %s4661_s15  ;;  %v3985_v31 = vld [vmem:[#allocation3 + $0x30] sm:$0xff] }
 0x4ba   : > { %3189 = vst.msk [vmem:[#allocation3 + $0x50] sm:$0xff] %vm1150_vm5, %v3104_v32  ;;  %4588 = vmatprep.mubr.msk.bf16.mxu1 %vm2047_vm11, %v4013_v6  ;;  %v3046_v17 = vld [vmem:[#allocation2 + $0x159] sm:$0xff] }
 0x4bb   : > { %3885 = vrot.lane.b32.xlu1 %v3804_v54, %s4661_s15  ;;  %v3106_v38 = vpop.permute.xlu0 %3105  ;;  %v3986_v43 = vld [vmem:[#allocation3 + $0x38] sm:$0xff] }
 0x4bc   : > { %3190 = vst.msk [vmem:[#allocation3 + $0x58] sm:$0xff] %vm1150_vm5, %v3106_v38  ;;  %v4014_v20 = vpack.c.bf16 %v3986_v43, %v3985_v31  ;;  %v3237_v38 = vld [vmem:[#allocation2 + $0x152] sm:$0xff]  ;;  %v3238_v43 = vld [vmem:[#allocation2 + $0x15a] sm:$0xff] }
 0x4bd   : > { %v3292_v63 = vpop.permute.xlu1 %3291  ;;  %3887 = vrot.lane.b32.xlu0 %v3805_v44, %s4661_s15 }
 0x4be   : > { %3379 = vst.msk [vmem:[#allocation3 + $0x40] sm:$0xff] %vm1343_vm6, %v3292_v63  ;;  %4589 = vmatmul.mubr.msk.bf16.gmra.mrb[4].mxu1 %vm2047_vm11, %v4014_v20 }
 0x4bf   : > { %3889 = vrot.lane.b32.xlu1 %v3806_v26, %s4661_s15  ;;  %v3294_v19 = vpop.permute.xlu0 %3293 }
 0x4c0   : > { %3380 = vst.msk [vmem:[#allocation3 + $0x48] sm:$0xff] %vm1343_vm6, %v3294_v19 }
 0x4c1   : > { %v3296_v22 = vpop.permute.xlu1 %3295  ;;  %2931 = vrot.lane.b32.xlu0 %v6474_v60, %s4656_s27 }
 0x4c2   : > { %3381 = vst.msk [vmem:[#allocation3 + $0x50] sm:$0xff] %vm1343_vm6, %v3296_v22 }
 0x4c3   : > { %2933 = vrot.lane.b32.xlu1 %v6482_v2, %s4656_s27  ;;  %v3298_v9 = vpop.permute.xlu0 %3297 }
 0x4c4   : > { %3382 = vst.msk [vmem:[#allocation3 + $0x58] sm:$0xff] %vm1343_vm6, %v3298_v9 }
 0x4c5   : > { %v3484_v0 = vpop.permute.xlu1 %3483  ;;  %2935 = vrot.lane.b32.xlu0 %v6472_v50, %s4656_s27 }
 0x4c6   : > { %3571 = vst.msk [vmem:[#allocation3 + $0x40] sm:$0xff] %vm1537_vm8, %v3484_v0 }
 0x4c7   : > { %2937 = vrot.lane.b32.xlu1 %v6484_v52, %s4656_s27  ;;  %v3486_v25 = vpop.permute.xlu0 %3485  ;;  %v3042_v52 = vld [vmem:[#allocation2 + $0x129] sm:$0xff] }
 0x4c8   : > { %3572 = vst.msk [vmem:[#allocation3 + $0x48] sm:$0xff] %vm1537_vm8, %v3486_v25  ;;  %v3429_v25 = vld [vmem:[#allocation2 + $0x168] sm:$0xff] }
 0x4c9   : > { %v3488_v60 = vpop.permute.xlu1 %3487  ;;  %3123 = vrot.lane.b32.xlu0 %v3613_v16, %s4657_s28  ;;  %v2854_v16 = vld [vmem:[#allocation2 + $0x158] sm:$0xff] }
 0x4ca   : > { %3573 = vst.msk [vmem:[#allocation3 + $0x50] sm:$0xff] %vm1537_vm8, %v3488_v60 }
 0x4cb   : > { %3125 = vrot.lane.b32.xlu1 %v3614_v42, %s4657_s28  ;;  %v3490_v2 = vpop.permute.xlu0 %3489 }
 0x4cc   : > { %3574 = vst.msk [vmem:[#allocation3 + $0x58] sm:$0xff] %vm1537_vm8, %v3490_v2 }
 0x4cd   : > { %v3676_v50 = vpop.permute.xlu1 %3675  ;;  %3127 = vrot.lane.b32.xlu0 %v3041_v34, %s4657_s28 }
 0x4ce   : > { %3763 = vst.msk [vmem:[#allocation3 + $0x40] sm:$0xff] %vm1730_vm9, %v3676_v50 }
 0x4cf   : > { %3129 = vrot.lane.b32.xlu1 %v3042_v52, %s4657_s28  ;;  %v3678_v4 = vpop.permute.xlu0 %3677 }
 0x4d0   : > { %3764 = vst.msk [vmem:[#allocation3 + $0x48] sm:$0xff] %vm1730_vm9, %v3678_v4 }
 0x4d1   : > { %v3680_v45 = vpop.permute.xlu1 %3679  ;;  %3315 = vrot.lane.b32.xlu0 %v3805_v44, %s4658_s29 }
 0x4d2   : > { %3765 = vst.msk [vmem:[#allocation3 + $0x50] sm:$0xff] %vm1730_vm9, %v3680_v45  ;;  %v3621_v45 = vld [vmem:[#allocation2 + $0x169] sm:$0xff] }
 0x4d3   : > { %3317 = vrot.lane.b32.xlu1 %v3806_v26, %s4658_s29  ;;  %v3682_v28 = vpop.permute.xlu0 %3681 }
 0x4d4   : > { %3766 = vst.msk [vmem:[#allocation3 + $0x58] sm:$0xff] %vm1730_vm9, %v3682_v28 }
 0x4d5   : > { %v3868_v39 = vpop.permute.xlu1 %3867  ;;  %3319 = vrot.lane.b32.xlu0 %v3233_v14, %s4658_s29 }
 0x4d6   : > { %3955 = vst.msk [vmem:[#allocation3 + $0x40] sm:$0xff] %vm1923_vm10, %v3868_v39 }
 0x4d7   : > { %3321 = vrot.lane.b32.xlu1 %v3234_v37, %s4658_s29  ;;  %v3870_v21 = vpop.permute.xlu0 %3869 }
 0x4d8   : > { %3956 = vst.msk [vmem:[#allocation3 + $0x48] sm:$0xff] %vm1923_vm10, %v3870_v21 }
 0x4d9   : > { %v3872_v18 = vpop.permute.xlu1 %3871  ;;  %3507 = vrot.lane.b32.xlu0 %v3423_v36, %s4659_s30  ;;  %v3813_v36 = vld [vmem:[#allocation2 + $0x16a] sm:$0xff] }
 0x4da   : > { %3957 = vst.msk [vmem:[#allocation3 + $0x50] sm:$0xff] %vm1923_vm10, %v3872_v18 }
 0x4db   : > { %3509 = vrot.lane.b32.xlu1 %v3424_v55, %s4659_s30  ;;  %v3874_v5 = vpop.permute.xlu0 %3873  ;;  %v3814_v55 = vld [vmem:[#allocation2 + $0x172] sm:$0xff] }
 0x4dc   : > { %3958 = vst.msk [vmem:[#allocation3 + $0x58] sm:$0xff] %vm1923_vm10, %v3874_v5 }
 0x4dd   : > { %v3108_v13 = vpop.permute.xlu1 %3107  ;;  %3511 = vrot.lane.b32.xlu0 %v3425_v47, %s4659_s30  ;;  %v3987_v41 = vld [vmem:[#allocation3 + $0x40] sm:$0xff] }
 0x4de   : > { %3191 = vst.msk [vmem:[#allocation3 + $0x60] sm:$0xff] %vm1150_vm5, %v3108_v13 }
 0x4df   : > { %3513 = vrot.lane.b32.xlu1 %v3426_v61, %s4659_s30  ;;  %v3110_v1 = vpop.permute.xlu0 %3109  ;;  %v3988_v3 = vld [vmem:[#allocation3 + $0x48] sm:$0xff] }
 0x4e0   : > { %3192 = vst.msk [vmem:[#allocation3 + $0x68] sm:$0xff] %vm1150_vm5, %v3110_v1  ;;  %v4015_v40 = vpack.c.bf16 %v3988_v3, %v3987_v41  ;;  %v2858_v41 = vld [vmem:[#allocation2 + $0x188] sm:$0xff] }
 0x4e1   : > { %v3112_v10 = vpop.permute.xlu1 %3111  ;;  %3699 = vrot.lane.b32.xlu0 %v3041_v34, %s4660_s10  ;;  %v3989_v12 = vld [vmem:[#allocation3 + $0x50] sm:$0xff]  ;;  %v3430_v34 = vld [vmem:[#allocation2 + $0x170] sm:$0xff] }
 0x4e2   : > { %3193 = vst.msk [vmem:[#allocation3 + $0x70] sm:$0xff] %vm1150_vm5, %v3112_v10  ;;  %4592 = vmatprep.mubr.msk.bf16.mxu1 %vm2047_vm11, %v4015_v40 }
 0x4e3   : > { %3701 = vrot.lane.b32.xlu1 %v3042_v52, %s4660_s10  ;;  %v3114_v33 = vpop.permute.xlu0 %3113  ;;  %v3990_v51 = vld [vmem:[#allocation3 + $0x58] sm:$0xff] }
 0x4e4   : > { %3194 = vst.msk [vmem:[#allocation3 + $0x78] sm:$0xff] %vm1150_vm5, %v3114_v33  ;;  %v4016_v7 = vpack.c.bf16 %v3990_v51, %v3989_v12  ;;  %v3049_v33 = vld [vmem:[#allocation2 + $0x181] sm:$0xff]  ;;  %v3050_v51 = vld [vmem:[#allocation2 + $0x189] sm:$0xff] }
 0x4e5   : > { %v3300_v62 = vpop.permute.xlu1 %3299  ;;  %3703 = vrot.lane.b32.xlu0 %v3617_v56, %s4660_s10 }
 0x4e6   : > { %3383 = vst.msk [vmem:[#allocation3 + $0x60] sm:$0xff] %vm1343_vm6, %v3300_v62  ;;  %4593 = vmatmul.mubr.msk.bf16.gmra.mrb[8].mxu1 %vm2047_vm11, %v4016_v7 }
 0x4e7   : > { %3705 = vrot.lane.b32.xlu1 %v3618_v24, %s4660_s10  ;;  %v3302_v27 = vpop.permute.xlu0 %3301 }
 0x4e8   : > { %3384 = vst.msk [vmem:[#allocation3 + $0x68] sm:$0xff] %vm1343_vm6, %v3302_v27 }
 0x4e9   : > { %v3304_v53 = vpop.permute.xlu1 %3303  ;;  %3891 = vrot.lane.b32.xlu0 %v3233_v14, %s4661_s15  ;;  %v3622_v14 = vld [vmem:[#allocation2 + $0x171] sm:$0xff] }
 0x4ea   : > { %3385 = vst.msk [vmem:[#allocation3 + $0x70] sm:$0xff] %vm1343_vm6, %v3304_v53 }
 0x4eb   : > { %3893 = vrot.lane.b32.xlu1 %v3234_v37, %s4661_s15  ;;  %v3306_v15 = vpop.permute.xlu0 %3305 }
 0x4ec   : > { %3386 = vst.msk [vmem:[#allocation3 + $0x78] sm:$0xff] %vm1343_vm6, %v3306_v15 }
 0x4ed   : > { %v3492_v57 = vpop.permute.xlu1 %3491  ;;  %3895 = vrot.lane.b32.xlu0 %v3809_v46, %s4661_s15 }
 0x4ee   : > { %3575 = vst.msk [vmem:[#allocation3 + $0x60] sm:$0xff] %vm1537_vm8, %v3492_v57 }
 0x4ef   : > { %3897 = vrot.lane.b32.xlu1 %v3810_v49, %s4661_s15  ;;  %v3494_v29 = vpop.permute.xlu0 %3493 }
 0x4f0   : > { %3576 = vst.msk [vmem:[#allocation3 + $0x68] sm:$0xff] %vm1537_vm8, %v3494_v29 }
 0x4f1   : > { %v3496_v8 = vpop.permute.xlu1 %3495  ;;  %2939 = vrot.lane.b32.xlu0 %v3425_v47, %s4656_s27 }
 0x4f2   : > { %3577 = vst.msk [vmem:[#allocation3 + $0x70] sm:$0xff] %vm1537_vm8, %v3496_v8 }
 0x4f3   : > { %2941 = vrot.lane.b32.xlu1 %v3426_v61, %s4656_s27  ;;  %v3498_v30 = vpop.permute.xlu0 %3497  ;;  %v2857_v61 = vld [vmem:[#allocation2 + $0x180] sm:$0xff] }
 0x4f4   : > { %3578 = vst.msk [vmem:[#allocation3 + $0x78] sm:$0xff] %vm1537_vm8, %v3498_v30 }
 0x4f5   : > { %v3684_v59 = vpop.permute.xlu1 %3683  ;;  %2943 = vrot.lane.b32.xlu0 %v2853_v48, %s4656_s27 }
 0x4f6   : > { %3767 = vst.msk [vmem:[#allocation3 + $0x60] sm:$0xff] %vm1730_vm9, %v3684_v59  ;;  %v3433_v59 = vld [vmem:[#allocation2 + $0x198] sm:$0xff] }
 0x4f7   : > { %2945 = vrot.lane.b32.xlu1 %v2854_v16, %s4656_s27  ;;  %v3686_v58 = vpop.permute.xlu0 %3685 }
 0x4f8   : > { %3768 = vst.msk [vmem:[#allocation3 + $0x68] sm:$0xff] %vm1730_vm9, %v3686_v58  ;;  %v3434_v58 = vld [vmem:[#allocation2 + $0x1a0] sm:$0xff] }
 0x4f9   : > { %v3688_v42 = vpop.permute.xlu1 %3687  ;;  %3131 = vrot.lane.b32.xlu0 %v3617_v56, %s4657_s28 }
 0x4fa   : > { %3769 = vst.msk [vmem:[#allocation3 + $0x70] sm:$0xff] %vm1730_vm9, %v3688_v42 }
 0x4fb   : > { %3133 = vrot.lane.b32.xlu1 %v3618_v24, %s4657_s28  ;;  %v3690_v23 = vpop.permute.xlu0 %3689  ;;  %v3241_v24 = vld [vmem:[#allocation2 + $0x182] sm:$0xff] }
 0x4fc   : > { %3770 = vst.msk [vmem:[#allocation3 + $0x78] sm:$0xff] %vm1730_vm9, %v3690_v23 }
 0x4fd   : > { %v3876_v11 = vpop.permute.xlu1 %3875  ;;  %3135 = vrot.lane.b32.xlu0 %v3045_v35, %s4657_s28 }
 0x4fe   : > { %3959 = vst.msk [vmem:[#allocation3 + $0x60] sm:$0xff] %vm1923_vm10, %v3876_v11  ;;  %v3625_v11 = vld [vmem:[#allocation2 + $0x199] sm:$0xff] }
 0x4ff   : > { %3137 = vrot.lane.b32.xlu1 %v3046_v17, %s4657_s28  ;;  %v3878_v6 = vpop.permute.xlu0 %3877 }
 0x500   : > { %3960 = vst.msk [vmem:[#allocation3 + $0x68] sm:$0xff] %vm1923_vm10, %v3878_v6  ;;  %v3626_v6 = vld [vmem:[#allocation2 + $0x1a1] sm:$0xff] }
 0x501   : > { %v3880_v32 = vpop.permute.xlu1 %3879  ;;  %3323 = vrot.lane.b32.xlu0 %v3809_v46, %s4658_s29  ;;  %v3242_v46 = vld [vmem:[#allocation2 + $0x18a] sm:$0xff] }
 0x502   : > { %3961 = vst.msk [vmem:[#allocation3 + $0x70] sm:$0xff] %vm1923_vm10, %v3880_v32 }
 0x503   : > { %3325 = vrot.lane.b32.xlu1 %v3810_v49, %s4658_s29  ;;  %v3882_v54 = vpop.permute.xlu0 %3881 }
 0x504   : > { %3962 = vst.msk [vmem:[#allocation3 + $0x78] sm:$0xff] %vm1923_vm10, %v3882_v54 }
 0x505   : > { %v2926_v31 = vpop.permute.xlu1 %2925  ;;  %3327 = vrot.lane.b32.xlu0 %v3237_v38, %s4658_s29  ;;  %v3991_v20 = vld [vmem:[#allocation3 + $0x60] sm:$0xff] }
 0x506   : > { %3004 = vst.msk [vmem:[#allocation3 + $0x88] sm:$0xff] %vm957_vm4, %v2926_v31  ;;  %v3817_v31 = vld [vmem:[#allocation2 + $0x19a] sm:$0xff] }
 0x507   : > { %3329 = vrot.lane.b32.xlu1 %v3238_v43, %s4658_s29  ;;  %v2928_v44 = vpop.permute.xlu0 %2927  ;;  %v3992_v63 = vld [vmem:[#allocation3 + $0x68] sm:$0xff] }
 0x508   : > { %3005 = vst.msk [vmem:[#allocation3 + $0x90] sm:$0xff] %vm957_vm4, %v2928_v44  ;;  %v4017_v26 = vpack.c.bf16 %v3992_v63, %v3991_v20  ;;  %v3818_v44 = vld [vmem:[#allocation2 + $0x1a2] sm:$0xff] }
 0x509   : > { %v2930_v19 = vpop.permute.xlu1 %2929  ;;  %3515 = vrot.lane.b32.xlu0 %v2853_v48, %s4659_s30  ;;  %v3993_v9 = vld [vmem:[#allocation3 + $0x70] sm:$0xff] }
 0x50a   : > { %3006 = vst.msk [vmem:[#allocation3 + $0x98] sm:$0xff] %vm957_vm4, %v2930_v19  ;;  %4596 = vmatprep.mubr.msk.bf16.mxu1 %vm2047_vm11, %v4017_v26 }
 0x50b   : > { %3517 = vrot.lane.b32.xlu1 %v2854_v16, %s4659_s30  ;;  %v3116_v22 = vpop.permute.xlu0 %3115  ;;  %v3994_v0 = vld [vmem:[#allocation3 + $0x78] sm:$0xff] }
 0x50c   : > { %3195 = vst.msk [vmem:[#allocation3 + $0x80] sm:$0xff] %vm1150_vm5, %v3116_v22  ;;  %v4018_v60 = vpack.c.bf16 %v3994_v0, %v3993_v9 }
 0x50d   : > { %v3118_v2 = vpop.permute.xlu1 %3117  ;;  %3519 = vrot.lane.b32.xlu0 %v3429_v25, %s4659_s30 }
 0x50e   : > { %3196 = vst.msk [vmem:[#allocation3 + $0x88] sm:$0xff] %vm1150_vm5, %v3118_v2  ;;  %4597 = vmatmul.mubr.msk.bf16.gmra.mrb[12].mxu1 %vm2047_vm11, %v4018_v60 }
 0x50f   : > { %3521 = vrot.lane.b32.xlu1 %v3430_v34, %s4659_s30  ;;  %v3120_v50 = vpop.permute.xlu0 %3119 }
 0x510   : > { %3197 = vst.msk [vmem:[#allocation3 + $0x90] sm:$0xff] %vm1150_vm5, %v3120_v50 }
 0x511   : > { %v3122_v52 = vpop.permute.xlu1 %3121  ;;  %3707 = vrot.lane.b32.xlu0 %v3045_v35, %s4660_s10 }
 0x512   : > { %3198 = vst.msk [vmem:[#allocation3 + $0x98] sm:$0xff] %vm1150_vm5, %v3122_v52 }
 0x513   : > { %3709 = vrot.lane.b32.xlu1 %v3046_v17, %s4660_s10  ;;  %v3308_v4 = vpop.permute.xlu0 %3307 }
 0x514   : > { %3387 = vst.msk [vmem:[#allocation3 + $0x80] sm:$0xff] %vm1343_vm6, %v3308_v4 }
 0x515   : > { %v3310_v28 = vpop.permute.xlu1 %3309  ;;  %3711 = vrot.lane.b32.xlu0 %v3621_v45, %s4660_s10 }
 0x516   : > { %3388 = vst.msk [vmem:[#allocation3 + $0x88] sm:$0xff] %vm1343_vm6, %v3310_v28 }
 0x517   : > { %3713 = vrot.lane.b32.xlu1 %v3622_v14, %s4660_s10  ;;  %v3312_v39 = vpop.permute.xlu0 %3311 }
 0x518   : > { %3389 = vst.msk [vmem:[#allocation3 + $0x90] sm:$0xff] %vm1343_vm6, %v3312_v39  ;;  %v7142_v39 = vld [vmem:[%s7338_s4] ss:$0 sm:$0xff] }
 0x519   : > { %v3314_v37 = vpop.permute.xlu1 %3313  ;;  %3899 = vrot.lane.b32.xlu0 %v3237_v38, %s4661_s15 }
 0x51a   : > { %3390 = vst.msk [vmem:[#allocation3 + $0x98] sm:$0xff] %vm1343_vm6, %v3314_v37 }
 0x51b   : > { %3901 = vrot.lane.b32.xlu1 %v3238_v43, %s4661_s15  ;;  %v3500_v21 = vpop.permute.xlu0 %3499 }
 0x51c   : > { %3579 = vst.msk [vmem:[#allocation3 + $0x80] sm:$0xff] %vm1537_vm8, %v3500_v21 }
 0x51d   : > { %v3502_v18 = vpop.permute.xlu1 %3501  ;;  %3903 = vrot.lane.b32.xlu0 %v3813_v36, %s4661_s15 }
 0x51e   : > { %3580 = vst.msk [vmem:[#allocation3 + $0x88] sm:$0xff] %vm1537_vm8, %v3502_v18 }
 0x51f   : > { %3905 = vrot.lane.b32.xlu1 %v3814_v55, %s4661_s15  ;;  %v3504_v5 = vpop.permute.xlu0 %3503 }
 0x520   : > { %3581 = vst.msk [vmem:[#allocation3 + $0x90] sm:$0xff] %vm1537_vm8, %v3504_v5 }
 0x521   : > { %v3506_v47 = vpop.permute.xlu1 %3505  ;;  %2947 = vrot.lane.b32.xlu0 %v3429_v25, %s4656_s27 }
 0x522   : > { %3582 = vst.msk [vmem:[#allocation3 + $0x98] sm:$0xff] %vm1537_vm8, %v3506_v47 }
 0x523   : > { %2949 = vrot.lane.b32.xlu1 %v3430_v34, %s4656_s27  ;;  %v3692_v13 = vpop.permute.xlu0 %3691 }
 0x524   : > { %3771 = vst.msk [vmem:[#allocation3 + $0x80] sm:$0xff] %vm1730_vm9, %v3692_v13 }
 0x525   : > { %v3694_v1 = vpop.permute.xlu1 %3693  ;;  %2951 = vrot.lane.b32.xlu0 %v2857_v61, %s4656_s27 }
 0x526   : > { %3772 = vst.msk [vmem:[#allocation3 + $0x88] sm:$0xff] %vm1730_vm9, %v3694_v1 }
 0x527   : > { %2953 = vrot.lane.b32.xlu1 %v2858_v41, %s4656_s27  ;;  %v3696_v3 = vpop.permute.xlu0 %3695 }
 0x528   : > { %3773 = vst.msk [vmem:[#allocation3 + $0x90] sm:$0xff] %vm1730_vm9, %v3696_v3 }
 0x529   : > { %v3698_v40 = vpop.permute.xlu1 %3697  ;;  %3139 = vrot.lane.b32.xlu0 %v3621_v45, %s4657_s28 }
 0x52a   : > { %3774 = vst.msk [vmem:[#allocation3 + $0x98] sm:$0xff] %vm1730_vm9, %v3698_v40 }
 0x52b   : > { %3141 = vrot.lane.b32.xlu1 %v3622_v14, %s4657_s28  ;;  %v3884_v10 = vpop.permute.xlu0 %3883 }
 0x52c   : > { %3963 = vst.msk [vmem:[#allocation3 + $0x80] sm:$0xff] %vm1923_vm10, %v3884_v10 }
 0x52d   : > { %v3886_v12 = vpop.permute.xlu1 %3885  ;;  %3143 = vrot.lane.b32.xlu0 %v3049_v33, %s4657_s28 }
 0x52e   : > { %3964 = vst.msk [vmem:[#allocation3 + $0x88] sm:$0xff] %vm1923_vm10, %v3886_v12 }
 0x52f   : > { %3145 = vrot.lane.b32.xlu1 %v3050_v51, %s4657_s28  ;;  %v3888_v56 = vpop.permute.xlu0 %3887 }
 0x530   : > { %3965 = vst.msk [vmem:[#allocation3 + $0x90] sm:$0xff] %vm1923_vm10, %v3888_v56 }
 0x531   : > { %v3890_v7 = vpop.permute.xlu1 %3889  ;;  %3331 = vrot.lane.b32.xlu0 %v3813_v36, %s4658_s29 }
 0x532   : > { %3966 = vst.msk [vmem:[#allocation3 + $0x98] sm:$0xff] %vm1923_vm10, %v3890_v7 }
 0x533   : > { %3333 = vrot.lane.b32.xlu1 %v3814_v55, %s4658_s29  ;;  %v2932_v62 = vpop.permute.xlu0 %2931  ;;  %v3995_v53 = vld [vmem:[#allocation3 + $0x80] sm:$0xff] }
 0x534   : > { %3007 = vst.msk [vmem:[#allocation3 + $0xa0] sm:$0xff] %vm957_vm4, %v2932_v62  ;;  %v7516_v62 = vld [vmem:[#allocation7_spill] sm:$0xff] }
 0x535   : > { %v2934_v27 = vpop.permute.xlu1 %2933  ;;  %3335 = vrot.lane.b32.xlu0 %v3241_v24, %s4658_s29  ;;  %v3996_v15 = vld [vmem:[#allocation3 + $0x88] sm:$0xff] }
 0x536   : > { %3008 = vst.msk [vmem:[#allocation3 + $0xa8] sm:$0xff] %vm957_vm4, %v2934_v27  ;;  %v4019_v57 = vpack.c.bf16 %v3996_v15, %v3995_v53  ;;  %v7517_v53 = vld [vmem:[#allocation5_spill] sm:$0xff] }
 0x537   : > { %3337 = vrot.lane.b32.xlu1 %v3242_v46, %s4658_s29  ;;  %v2936_v49 = vpop.permute.xlu0 %2935  ;;  %v3997_v8 = vld [vmem:[#allocation3 + $0x90] sm:$0xff] }
 0x538   : > { %3009 = vst.msk [vmem:[#allocation3 + $0xb0] sm:$0xff] %vm957_vm4, %v2936_v49  ;;  %4600 = vmatprep.mubr.msk.bf16.mxu1 %vm2047_vm11, %v4019_v57 }
 0x539   : > { %v2938_v29 = vpop.permute.xlu1 %2937  ;;  %3523 = vrot.lane.b32.xlu0 %v2857_v61, %s4659_s30  ;;  %v3998_v30 = vld [vmem:[#allocation3 + $0x98] sm:$0xff] }
 0x53a   : > { %3010 = vst.msk [vmem:[#allocation3 + $0xb8] sm:$0xff] %vm957_vm4, %v2938_v29  ;;  %v4020_v48 = vpack.c.bf16 %v3998_v30, %v3997_v8 }
 0x53b   : > { %3525 = vrot.lane.b32.xlu1 %v2858_v41, %s4659_s30  ;;  %v3124_v16 = vpop.permute.xlu0 %3123  ;;  %v7514_v41 = vld [vmem:[#allocation6_spill] sm:$0xff] }
 0x53c   : > { %3199 = vst.msk [vmem:[#allocation3 + $0xa0] sm:$0xff] %vm1150_vm5, %v3124_v16  ;;  %4601 = vmatmul.mubr.msk.bf16.gmra.mrb[16].mxu1 %vm2047_vm11, %v4020_v48 }
 0x53d   : > { %v3126_v42 = vpop.permute.xlu1 %3125  ;;  %3527 = vrot.lane.b32.xlu0 %v3433_v59, %s4659_s30 }
 0x53e   : > { %3200 = vst.msk [vmem:[#allocation3 + $0xa8] sm:$0xff] %vm1150_vm5, %v3126_v42 }
 0x53f   : > { %3529 = vrot.lane.b32.xlu1 %v3434_v58, %s4659_s30  ;;  %v3128_v23 = vpop.permute.xlu0 %3127 }
 0x540   : > { %3201 = vst.msk [vmem:[#allocation3 + $0xb0] sm:$0xff] %vm1150_vm5, %v3128_v23 }
 0x541   : > { %v3130_v35 = vpop.permute.xlu1 %3129  ;;  %3715 = vrot.lane.b32.xlu0 %v3049_v33, %s4660_s10  ;;  %v7515_v33 = vld [vmem:[#allocation4_spill] sm:$0xff] }
 0x542   : > { %3202 = vst.msk [vmem:[#allocation3 + $0xb8] sm:$0xff] %vm1150_vm5, %v3130_v35 }
 0x543   : > { %3717 = vrot.lane.b32.xlu1 %v3050_v51, %s4660_s10  ;;  %v3316_v17 = vpop.permute.xlu0 %3315 }
 0x544   : > { %3391 = vst.msk [vmem:[#allocation3 + $0xa0] sm:$0xff] %vm1343_vm6, %v3316_v17 }
 0x545   : > { %v3318_v32 = vpop.permute.xlu1 %3317  ;;  %3719 = vrot.lane.b32.xlu0 %v3625_v11, %s4660_s10 }
 0x546   : > { %3392 = vst.msk [vmem:[#allocation3 + $0xa8] sm:$0xff] %vm1343_vm6, %v3318_v32 }
 0x547   : > { %3721 = vrot.lane.b32.xlu1 %v3626_v6, %s4660_s10  ;;  %v3320_v54 = vpop.permute.xlu0 %3319  ;;  %s7158_s10 = scalar_lea.vmem %s7339_s5, %s4488_s21 }
 0x548   : > { %3393 = vst.msk [vmem:[#allocation3 + $0xb0] sm:$0xff] %vm1343_vm6, %v3320_v54 }
 0x549   : > { %v3322_v38 = vpop.permute.xlu1 %3321  ;;  %3907 = vrot.lane.b32.xlu0 %v3241_v24, %s4661_s15 }
 0x54a   : > { %3394 = vst.msk [vmem:[#allocation3 + $0xb8] sm:$0xff] %vm1343_vm6, %v3322_v38 }
 0x54b   : > { %3909 = vrot.lane.b32.xlu1 %v3242_v46, %s4661_s15  ;;  %v3508_v43 = vpop.permute.xlu0 %3507 }
 0x54c   : > { %3583 = vst.msk [vmem:[#allocation3 + $0xa0] sm:$0xff] %vm1537_vm8, %v3508_v43 }
 0x54d   : > { %v3510_v20 = vpop.permute.xlu1 %3509  ;;  %3911 = vrot.lane.b32.xlu0 %v3817_v31, %s4661_s15 }
 0x54e   : > { %3584 = vst.msk [vmem:[#allocation3 + $0xa8] sm:$0xff] %vm1537_vm8, %v3510_v20 }
 0x54f   : > { %3913 = vrot.lane.b32.xlu1 %v3818_v44, %s4661_s15  ;;  %v3512_v63 = vpop.permute.xlu0 %3511 }
 0x550   : > { %3585 = vst.msk [vmem:[#allocation3 + $0xb0] sm:$0xff] %vm1537_vm8, %v3512_v63 }
 0x551   : > { %v3514_v26 = vpop.permute.xlu1 %3513 }
 0x552   : > { %3586 = vst.msk [vmem:[#allocation3 + $0xb8] sm:$0xff] %vm1537_vm8, %v3514_v26 }
 0x553   : > { %v3700_v19 = vpop.permute.xlu0 %3699 }
 0x554   : > { %3775 = vst.msk [vmem:[#allocation3 + $0xa0] sm:$0xff] %vm1730_vm9, %v3700_v19 }
 0x555   : > { %v3702_v22 = vpop.permute.xlu1 %3701 }
 0x556   : > { %3776 = vst.msk [vmem:[#allocation3 + $0xa8] sm:$0xff] %vm1730_vm9, %v3702_v22  ;;  %v7518_v22 = vld [vmem:[#allocation10_spill] sm:$0xff] }
 0x557   : > { %v3704_v9 = vpop.permute.xlu0 %3703 }
 0x558   : > { %3777 = vst.msk [vmem:[#allocation3 + $0xb0] sm:$0xff] %vm1730_vm9, %v3704_v9 }
 0x559   : > { %v3706_v0 = vpop.permute.xlu1 %3705 }
 0x55a   : > { %3778 = vst.msk [vmem:[#allocation3 + $0xb8] sm:$0xff] %vm1730_vm9, %v3706_v0 }
 0x55b   : > { %v3892_v25 = vpop.permute.xlu0 %3891 }
 0x55c   : > { %3967 = vst.msk [vmem:[#allocation3 + $0xa0] sm:$0xff] %vm1923_vm10, %v3892_v25 }
 0x55d   : > { %v3894_v60 = vpop.permute.xlu1 %3893 }
 0x55e   : > { %3968 = vst.msk [vmem:[#allocation3 + $0xa8] sm:$0xff] %vm1923_vm10, %v3894_v60  ;;  %v7519_v60 = vld [vmem:[#allocation8_spill] sm:$0xff] }
 0x55f   : > { %v3896_v2 = vpop.permute.xlu0 %3895 }
 0x560   : > { %3969 = vst.msk [vmem:[#allocation3 + $0xb0] sm:$0xff] %vm1923_vm10, %v3896_v2 }
 0x561   : > { %v3898_v34 = vpop.permute.xlu1 %3897 }
 0x562   : > { %3970 = vst.msk [vmem:[#allocation3 + $0xb8] sm:$0xff] %vm1923_vm10, %v3898_v34 }
 0x563   : > { %v2940_v50 = vpop.permute.xlu0 %2939  ;;  %v3999_v4 = vld [vmem:[#allocation3 + $0xa0] sm:$0xff] }
 0x564   : > { %3011 = vst.msk [vmem:[#allocation3 + $0xc0] sm:$0xff] %vm957_vm4, %v2940_v50 }
 0x565   : > { %v2942_v52 = vpop.permute.xlu1 %2941  ;;  %v4000_v45 = vld [vmem:[#allocation3 + $0xa8] sm:$0xff] }
 0x566   : > { %3012 = vst.msk [vmem:[#allocation3 + $0xc8] sm:$0xff] %vm957_vm4, %v2942_v52  ;;  %v4021_v28 = vpack.c.bf16 %v4000_v45, %v3999_v4 }
 0x567   : > { %v2944_v14 = vpop.permute.xlu0 %2943  ;;  %v4001_v36 = vld [vmem:[#allocation3 + $0xb0] sm:$0xff] }
 0x568   : > { %3013 = vst.msk [vmem:[#allocation3 + $0xd0] sm:$0xff] %vm957_vm4, %v2944_v14  ;;  %4604 = vmatprep.mubr.msk.bf16.mxu1 %vm2047_vm11, %v4021_v28  ;;  %v7520_v28 = vld [vmem:[#allocation11_spill] sm:$0xff] }
 0x569   : > { %v2946_v37 = vpop.permute.xlu1 %2945  ;;  %v4586_v21 = vpop.f32.mrb[0].mxu1  ;;  %v4002_v18 = vld [vmem:[#allocation3 + $0xb8] sm:$0xff] }
 0x56a   : > { %3014 = vst.msk [vmem:[#allocation3 + $0xd8] sm:$0xff] %vm957_vm4, %v2946_v37  ;;  %v4164_v55 = vadd.f32 %v4586_v21, %v7142_v39  ;;  %v4155_v5 = vpop.f32.mrb[1].mxu1  ;;  %v4022_v47 = vpack.c.bf16 %v4002_v18, %v4001_v36  ;;  %v7521_v36 = vld [vmem:[#allocation9_spill] sm:$0xff] }
 0x56b   : > { %v4156_v13 = vadd.f32 %v7142_v39, %v4155_v5  ;;  %v3132_v61 = vpop.permute.xlu0 %3131  ;;  %v4587_v1 = vpop.f32.mrb[2].mxu1 }
 0x56c   : > { %v4284_v3 = vadd.f32 %v4164_v55, %v7514_v41  ;;  %3203 = vst.msk [vmem:[#allocation3 + $0xc0] sm:$0xff] %vm1150_vm5, %v3132_v61  ;;  %v4167_v40 = vadd.f32 %v4587_v1, %v7142_v39  ;;  %v4158_v10 = vpop.f32.mrb[3].mxu1  ;;  %4605 = vmatmul.mubr.msk.bf16.gmra.mrb[20].mxu1 %vm2047_vm11, %v4022_v47 }
 0x56d   : > { %v4282_v12 = vadd.f32 %v4156_v13, %v7515_v33  ;;  %v4159_v51 = vadd.f32 %v7142_v39, %v4158_v10  ;;  %v3134_v56 = vpop.permute.xlu1 %3133 }
 0x56e   : > { %v4316_v7 = vmax.f32 %v4284_v3, 0.0  ;;  %v4285_v24 = vadd.f32 %v4167_v40, %v7516_v62  ;;  %3204 = vst.msk [vmem:[#allocation3 + $0xc8] sm:$0xff] %vm1150_vm5, %v3134_v56 }
 0x56f   : > { %v4314_v27 = vmax.f32 %v4282_v12, 0.0  ;;  %v4283_v15 = vadd.f32 %v4159_v51, %v7517_v53  ;;  %v3136_v46 = vpop.permute.xlu0 %3135 }
 0x570   : > { %4348 = vst.msk [vmem:[%s7158_s10 + $0x10] sm:$0xff] %vm258_vm0, %v4316_v7  ;;  %v4317_v57 = vmax.f32 %v4285_v24, 0.0 }
 0x571   : > { %3205 = vst.msk [vmem:[#allocation3 + $0xd0] sm:$0xff] %vm1150_vm5, %v3136_v46  ;;  %v4315_v49 = vmax.f32 %v4283_v15, 0.0  ;;  %v3138_v29 = vpop.permute.xlu1 %3137 }
 0x572   : > { %4346 = vst.msk [vmem:[%s7158_s10] sm:$0xff] %vm258_vm0, %v4314_v27  ;;  %4349 = vst.msk [vmem:[%s7158_s10 + $0x18] sm:$0xff] %vm258_vm0, %v4317_v57 }
 0x573   : > { %3206 = vst.msk [vmem:[#allocation3 + $0xd8] sm:$0xff] %vm1150_vm5, %v3138_v29  ;;  %v3324_v8 = vpop.permute.xlu0 %3323 }
 0x574   : > { %4347 = vst.msk [vmem:[%s7158_s10 + $0x8] sm:$0xff] %vm258_vm0, %v4315_v49 }
 0x575   : > { %3395 = vst.msk [vmem:[#allocation3 + $0xc0] sm:$0xff] %vm1343_vm6, %v3324_v8  ;;  %v3326_v30 = vpop.permute.xlu1 %3325 }
 0x576   : > { %3396 = vst.msk [vmem:[#allocation3 + $0xc8] sm:$0xff] %vm1343_vm6, %v3326_v30 }
 0x577   : > { %v3328_v48 = vpop.permute.xlu0 %3327 }
 0x578   : > { %3397 = vst.msk [vmem:[#allocation3 + $0xd0] sm:$0xff] %vm1343_vm6, %v3328_v48 }
 0x579   : > { %v3330_v59 = vpop.permute.xlu1 %3329 }
 0x57a   : > { %3398 = vst.msk [vmem:[#allocation3 + $0xd8] sm:$0xff] %vm1343_vm6, %v3330_v59 }
 0x57b   : > { %v3516_v16 = vpop.permute.xlu0 %3515 }
 0x57c   : > { %3587 = vst.msk [vmem:[#allocation3 + $0xc0] sm:$0xff] %vm1537_vm8, %v3516_v16 }
 0x57d   : > { %v3518_v58 = vpop.permute.xlu1 %3517 }
 0x57e   : > { %3588 = vst.msk [vmem:[#allocation3 + $0xc8] sm:$0xff] %vm1537_vm8, %v3518_v58  ;;  %v7522_v58 = vld [vmem:[#allocation14_spill] sm:$0xff] }
 0x57f   : > { %v3520_v42 = vpop.permute.xlu0 %3519 }
 0x580   : > { %3589 = vst.msk [vmem:[#allocation3 + $0xd0] sm:$0xff] %vm1537_vm8, %v3520_v42 }
 0x581   : > { %v3522_v23 = vpop.permute.xlu1 %3521 }
 0x582   : > { %3590 = vst.msk [vmem:[#allocation3 + $0xd8] sm:$0xff] %vm1537_vm8, %v3522_v23 }
 0x583   : > { %v3708_v35 = vpop.permute.xlu0 %3707 }
 0x584   : > { %3779 = vst.msk [vmem:[#allocation3 + $0xc0] sm:$0xff] %vm1730_vm9, %v3708_v35 }
 0x585   : > { %v3710_v11 = vpop.permute.xlu1 %3709 }
 0x586   : > { %3780 = vst.msk [vmem:[#allocation3 + $0xc8] sm:$0xff] %vm1730_vm9, %v3710_v11  ;;  %v7523_v11 = vld [vmem:[#allocation12_spill] sm:$0xff] }
 0x587   : > { %v3712_v17 = vpop.permute.xlu0 %3711 }
 0x588   : > { %3781 = vst.msk [vmem:[#allocation3 + $0xd0] sm:$0xff] %vm1730_vm9, %v3712_v17 }
 0x589   : > { %v3714_v6 = vpop.permute.xlu1 %3713 }
 0x58a   : > { %3782 = vst.msk [vmem:[#allocation3 + $0xd8] sm:$0xff] %vm1730_vm9, %v3714_v6 }
 0x58b   : > { %v3900_v32 = vpop.permute.xlu0 %3899 }
 0x58c   : > { %3971 = vst.msk [vmem:[#allocation3 + $0xc0] sm:$0xff] %vm1923_vm10, %v3900_v32 }
 0x58d   : > { %v3902_v54 = vpop.permute.xlu1 %3901 }
 0x58e   : > { %3972 = vst.msk [vmem:[#allocation3 + $0xc8] sm:$0xff] %vm1923_vm10, %v3902_v54 }
 0x58f   : > { %v3904_v38 = vpop.permute.xlu0 %3903 }
 0x590   : > { %3973 = vst.msk [vmem:[#allocation3 + $0xd0] sm:$0xff] %vm1923_vm10, %v3904_v38  ;;  %v7524_v38 = vld [vmem:[#allocation15_spill] sm:$0xff] }
 0x591   : > { %v3906_v31 = vpop.permute.xlu1 %3905  ;;  %v4590_v43 = vpop.f32.mrb[4].mxu1 }
 0x592   : > { %3974 = vst.msk [vmem:[#allocation3 + $0xd8] sm:$0xff] %vm1923_vm10, %v3906_v31  ;;  %v4180_v44 = vadd.f32 %v4590_v43, %v7142_v39  ;;  %v4171_v20 = vpop.f32.mrb[5].mxu1 }
 0x593   : > { %v4172_v63 = vadd.f32 %v7142_v39, %v4171_v20  ;;  %v2948_v26 = vpop.permute.xlu0 %2947  ;;  %v4591_v19 = vpop.f32.mrb[6].mxu1  ;;  %v4003_v52 = vld [vmem:[#allocation3 + $0xc0] sm:$0xff] }
 0x594   : > { %v4288_v9 = vadd.f32 %v4180_v44, %v7518_v22  ;;  %3015 = vst.msk [vmem:[#allocation3 + $0xe0] sm:$0xff] %vm957_vm4, %v2948_v26  ;;  %v4183_v0 = vadd.f32 %v4591_v19, %v7142_v39  ;;  %v4174_v25 = vpop.f32.mrb[7].mxu1  ;;  %v7525_v44 = vld [vmem:[#allocation13_spill] sm:$0xff] }
 0x595   : > { %v4286_v2 = vadd.f32 %v4172_v63, %v7519_v60  ;;  %v4175_v34 = vadd.f32 %v7142_v39, %v4174_v25  ;;  %v2950_v50 = vpop.permute.xlu1 %2949  ;;  %v4004_v4 = vld [vmem:[#allocation3 + $0xc8] sm:$0xff] }
 0x596   : > { %v4320_v45 = vmax.f32 %v4288_v9, 0.0  ;;  %v4289_v14 = vadd.f32 %v4183_v0, %v7520_v28  ;;  %3016 = vst.msk [vmem:[#allocation3 + $0xe8] sm:$0xff] %vm957_vm4, %v2950_v50  ;;  %v4023_v37 = vpack.c.bf16 %v4004_v4, %v4003_v52 }
 0x597   : > { %v4318_v21 = vmax.f32 %v4286_v2, 0.0  ;;  %v4287_v18 = vadd.f32 %v4175_v34, %v7521_v36  ;;  %v2952_v55 = vpop.permute.xlu0 %2951  ;;  %v4005_v61 = vld [vmem:[#allocation3 + $0xd0] sm:$0xff] }
 0x598   : > { %4352 = vst.msk [vmem:[%s7158_s10 + $0x30] sm:$0xff] %vm258_vm0, %v4320_v45  ;;  %v4321_v5 = vmax.f32 %v4289_v14, 0.0  ;;  %4608 = vmatprep.mubr.msk.bf16.mxu1 %vm2047_vm11, %v4023_v37  ;;  %v7526_v14 = vld [vmem:[#allocation18_spill] sm:$0xff] }
 0x599   : > { %3017 = vst.msk [vmem:[#allocation3 + $0xf0] sm:$0xff] %vm957_vm4, %v2952_v55  ;;  %v4319_v47 = vmax.f32 %v4287_v18, 0.0  ;;  %v2954_v13 = vpop.permute.xlu1 %2953  ;;  %v4006_v1 = vld [vmem:[#allocation3 + $0xd8] sm:$0xff]  ;;  %v7527_v18 = vld [vmem:[#allocation16_spill] sm:$0xff] }
 0x59a   : > { %4350 = vst.msk [vmem:[%s7158_s10 + $0x20] sm:$0xff] %vm258_vm0, %v4318_v21  ;;  %4353 = vst.msk [vmem:[%s7158_s10 + $0x38] sm:$0xff] %vm258_vm0, %v4321_v5  ;;  %v4024_v41 = vpack.c.bf16 %v4006_v1, %v4005_v61 }
 0x59b   : > { %3018 = vst.msk [vmem:[#allocation3 + $0xf8] sm:$0xff] %vm957_vm4, %v2954_v13  ;;  %v3140_v3 = vpop.permute.xlu0 %3139  ;;  %v7528_v13 = vld [vmem:[#allocation19_spill] sm:$0xff] }
 0x59c   : > { %4351 = vst.msk [vmem:[%s7158_s10 + $0x28] sm:$0xff] %vm258_vm0, %v4319_v47  ;;  %4609 = vmatmul.mubr.msk.bf16.gmra.mrb[24].mxu1 %vm2047_vm11, %v4024_v41  ;;  %v7529_v41 = vld [vmem:[#allocation17_spill] sm:$0xff] }
 0x59d   : > { %3207 = vst.msk [vmem:[#allocation3 + $0xe0] sm:$0xff] %vm1150_vm5, %v3140_v3  ;;  %v3142_v40 = vpop.permute.xlu1 %3141 }
 0x59e   : > { %3208 = vst.msk [vmem:[#allocation3 + $0xe8] sm:$0xff] %vm1150_vm5, %v3142_v40 }
 0x59f   : > { %v3144_v10 = vpop.permute.xlu0 %3143 }
 0x5a0   : > { %3209 = vst.msk [vmem:[#allocation3 + $0xf0] sm:$0xff] %vm1150_vm5, %v3144_v10 }
 0x5a1   : > { %v3146_v33 = vpop.permute.xlu1 %3145 }
 0x5a2   : > { %3210 = vst.msk [vmem:[#allocation3 + $0xf8] sm:$0xff] %vm1150_vm5, %v3146_v33 }
 0x5a3   : > { %v3332_v12 = vpop.permute.xlu0 %3331 }
 0x5a4   : > { %3399 = vst.msk [vmem:[#allocation3 + $0xe0] sm:$0xff] %vm1343_vm6, %v3332_v12 }
 0x5a5   : > { %v3334_v51 = vpop.permute.xlu1 %3333 }
 0x5a6   : > { %3400 = vst.msk [vmem:[#allocation3 + $0xe8] sm:$0xff] %vm1343_vm6, %v3334_v51 }
 0x5a7   : > { %v3336_v56 = vpop.permute.xlu0 %3335 }
 0x5a8   : > { %3401 = vst.msk [vmem:[#allocation3 + $0xf0] sm:$0xff] %vm1343_vm6, %v3336_v56 }
 0x5a9   : > { %v3338_v7 = vpop.permute.xlu1 %3337 }
 0x5aa   : > { %3402 = vst.msk [vmem:[#allocation3 + $0xf8] sm:$0xff] %vm1343_vm6, %v3338_v7 }
 0x5ab   : > { %v3524_v62 = vpop.permute.xlu0 %3523 }
 0x5ac   : > { %3591 = vst.msk [vmem:[#allocation3 + $0xe0] sm:$0xff] %vm1537_vm8, %v3524_v62  ;;  %v7530_v62 = vld [vmem:[#allocation22_spill] sm:$0xff] }
 0x5ad   : > { %v3526_v24 = vpop.permute.xlu1 %3525 }
 0x5ae   : > { %3592 = vst.msk [vmem:[#allocation3 + $0xe8] sm:$0xff] %vm1537_vm8, %v3526_v24 }
 0x5af   : > { %v3528_v27 = vpop.permute.xlu0 %3527 }
 0x5b0   : > { %3593 = vst.msk [vmem:[#allocation3 + $0xf0] sm:$0xff] %vm1537_vm8, %v3528_v27 }
 0x5b1   : > { %v3530_v53 = vpop.permute.xlu1 %3529 }
 0x5b2   : > { %3594 = vst.msk [vmem:[#allocation3 + $0xf8] sm:$0xff] %vm1537_vm8, %v3530_v53 }
 0x5b3   : > { %v3716_v15 = vpop.permute.xlu0 %3715 }
 0x5b4   : > { %3783 = vst.msk [vmem:[#allocation3 + $0xe0] sm:$0xff] %vm1730_vm9, %v3716_v15  ;;  %v7531_v15 = vld [vmem:[#allocation20_spill] sm:$0xff] }
 0x5b5   : > { %v3718_v46 = vpop.permute.xlu1 %3717 }
 0x5b6   : > { %3784 = vst.msk [vmem:[#allocation3 + $0xe8] sm:$0xff] %vm1730_vm9, %v3718_v46 }
 0x5b7   : > { %v3720_v57 = vpop.permute.xlu0 %3719 }
 0x5b8   : > { %3785 = vst.msk [vmem:[#allocation3 + $0xf0] sm:$0xff] %vm1730_vm9, %v3720_v57 }
 0x5b9   : > { %v3722_v49 = vpop.permute.xlu1 %3721  ;;  %v4594_v29 = vpop.f32.mrb[8].mxu1 }
 0x5ba   : > { %3786 = vst.msk [vmem:[#allocation3 + $0xf8] sm:$0xff] %vm1730_vm9, %v3722_v49  ;;  %v4196_v8 = vadd.f32 %v4594_v29, %v7142_v39  ;;  %v4187_v30 = vpop.f32.mrb[9].mxu1  ;;  %v7532_v29 = vld [vmem:[#allocation23_spill] sm:$0xff] }
 0x5bb   : > { %v4188_v48 = vadd.f32 %v7142_v39, %v4187_v30  ;;  %v3908_v59 = vpop.permute.xlu0 %3907  ;;  %v4595_v16 = vpop.f32.mrb[10].mxu1 }
 0x5bc   : > { %v4292_v42 = vadd.f32 %v4196_v8, %v7522_v58  ;;  %3975 = vst.msk [vmem:[#allocation3 + $0xe0] sm:$0xff] %vm1923_vm10, %v3908_v59  ;;  %v4199_v23 = vadd.f32 %v4595_v16, %v7142_v39  ;;  %v4190_v35 = vpop.f32.mrb[11].mxu1 }
 0x5bd   : > { %v4290_v17 = vadd.f32 %v4188_v48, %v7523_v11  ;;  %v4191_v6 = vadd.f32 %v7142_v39, %v4190_v35  ;;  %v3910_v32 = vpop.permute.xlu1 %3909  ;;  %v7533_v48 = vld [vmem:[#allocation21_spill] sm:$0xff] }
 0x5be   : > { %v4324_v54 = vmax.f32 %v4292_v42, 0.0  ;;  %v4293_v31 = vadd.f32 %v4199_v23, %v7524_v38  ;;  %3976 = vst.msk [vmem:[#allocation3 + $0xe8] sm:$0xff] %vm1923_vm10, %v3910_v32 }
 0x5bf   : > { %v4322_v43 = vmax.f32 %v4290_v17, 0.0  ;;  %v4291_v20 = vadd.f32 %v4191_v6, %v7525_v44  ;;  %v3912_v63 = vpop.permute.xlu0 %3911  ;;  %v7534_v6 = vld [vmem:[#allocation26_spill] sm:$0xff] }
 0x5c0   : > { %4356 = vst.msk [vmem:[%s7158_s10 + $0x50] sm:$0xff] %vm258_vm0, %v4324_v54  ;;  %v4325_v26 = vmax.f32 %v4293_v31, 0.0  ;;  %v7535_v31 = vld [vmem:[#allocation24_spill] sm:$0xff] }
 0x5c1   : > { %3977 = vst.msk [vmem:[#allocation3 + $0xf0] sm:$0xff] %vm1923_vm10, %v3912_v63  ;;  %v4323_v19 = vmax.f32 %v4291_v20, 0.0  ;;  %v3914_v22 = vpop.permute.xlu1 %3913  ;;  %v7536_v63 = vld [vmem:[#allocation27_spill] sm:$0xff] }
 0x5c2   : > { %4354 = vst.msk [vmem:[%s7158_s10 + $0x40] sm:$0xff] %vm258_vm0, %v4322_v43  ;;  %4357 = vst.msk [vmem:[%s7158_s10 + $0x58] sm:$0xff] %vm258_vm0, %v4325_v26 }
 0x5c3   : > { %3978 = vst.msk [vmem:[#allocation3 + $0xf8] sm:$0xff] %vm1923_vm10, %v3914_v22  ;;  %v4007_v9 = vld [vmem:[#allocation3 + $0xe0] sm:$0xff]  ;;  %v7537_v22 = vld [vmem:[#allocation25_spill] sm:$0xff] }
 0x5c4   : > { %4355 = vst.msk [vmem:[%s7158_s10 + $0x48] sm:$0xff] %vm258_vm0, %v4323_v19 }
 0x5c5   : > { %v4008_v0 = vld [vmem:[#allocation3 + $0xe8] sm:$0xff] }
 0x5c6   : > { %v4025_v25 = vpack.c.bf16 %v4008_v0, %v4007_v9 }
 0x5c8   : > { %v4009_v60 = vld [vmem:[#allocation3 + $0xf0] sm:$0xff]  ;;  %4612 = vmatprep.mubr.msk.bf16.mxu1 %vm2047_vm11, %v4025_v25 }
 0x5ca   : > { %v4010_v2 = vld [vmem:[#allocation3 + $0xf8] sm:$0xff] }
 0x5cb   : > { %v4026_v34 = vpack.c.bf16 %v4010_v2, %v4009_v60 }
 0x5cd   : > { %4613 = vmatmul.mubr.msk.bf16.gmra.mrb[28].mxu1 %vm2047_vm11, %v4026_v34 }
 0x5e1   : > { %v4598_v50 = vpop.f32.mrb[12].mxu1 }
 0x5e2   : > { %v4212_v52 = vadd.f32 %v4598_v50, %v7142_v39  ;;  %v4203_v4 = vpop.f32.mrb[13].mxu1 }
 0x5e3   : > { %v4204_v45 = vadd.f32 %v7142_v39, %v4203_v4  ;;  %v4599_v28 = vpop.f32.mrb[14].mxu1  ;;  %v7538_v4 = vld [vmem:[#allocation30_spill] sm:$0xff] }
 0x5e4   : > { %v4296_v37 = vadd.f32 %v4212_v52, %v7526_v14  ;;  %v4215_v21 = vadd.f32 %v4599_v28, %v7142_v39  ;;  %v4206_v36 = vpop.f32.mrb[15].mxu1 }
 0x5e5   : > { %v4294_v55 = vadd.f32 %v4204_v45, %v7527_v18  ;;  %v4207_v5 = vadd.f32 %v7142_v39, %v4206_v36 }
 0x5e6   : > { %v4328_v47 = vmax.f32 %v4296_v37, 0.0  ;;  %v4297_v61 = vadd.f32 %v4215_v21, %v7528_v13  ;;  %v7539_v37 = vld [vmem:[#allocation28_spill] sm:$0xff]  ;;  %v7541_v13 = vld [vmem:[#allocation29_spill] sm:$0xff] }
 0x5e7   : > { %v4326_v1 = vmax.f32 %v4294_v55, 0.0  ;;  %v4295_v3 = vadd.f32 %v4207_v5, %v7529_v41  ;;  %v7540_v55 = vld [vmem:[#allocation31_spill] sm:$0xff] }
 0x5e8   : > { %4360 = vst.msk [vmem:[%s7158_s10 + $0x70] sm:$0xff] %vm258_vm0, %v4328_v47  ;;  %v4329_v40 = vmax.f32 %v4297_v61, 0.0 }
 0x5e9   : > { %4358 = vst.msk [vmem:[%s7158_s10 + $0x60] sm:$0xff] %vm258_vm0, %v4326_v1  ;;  %v4327_v10 = vmax.f32 %v4295_v3, 0.0 }
 0x5ea   : > { %4361 = vst.msk [vmem:[%s7158_s10 + $0x78] sm:$0xff] %vm258_vm0, %v4329_v40 }
 0x5eb   : > { %4359 = vst.msk [vmem:[%s7158_s10 + $0x68] sm:$0xff] %vm258_vm0, %v4327_v10 }
 0x60f   : > { %v4602_v33 = vpop.f32.mrb[16].mxu1 }
 0x610   : > { %v4228_v12 = vadd.f32 %v4602_v33, %v7142_v39  ;;  %v4219_v51 = vpop.f32.mrb[17].mxu1 }
 0x611   : > { %v4220_v56 = vadd.f32 %v7142_v39, %v4219_v51  ;;  %v4603_v7 = vpop.f32.mrb[18].mxu1  ;;  %v7542_v51 = vld [vmem:[#allocation38_spill] sm:$0xff] }
 0x612   : > { %v4300_v24 = vadd.f32 %v4228_v12, %v7530_v62  ;;  %v4231_v27 = vadd.f32 %v4603_v7, %v7142_v39  ;;  %v4222_v53 = vpop.f32.mrb[19].mxu1 }
 0x613   : > { %v4298_v46 = vadd.f32 %v4220_v56, %v7531_v15  ;;  %v4223_v57 = vadd.f32 %v7142_v39, %v4222_v53 }
 0x614   : > { %v4332_v49 = vmax.f32 %v4300_v24, 0.0  ;;  %v4301_v8 = vadd.f32 %v4231_v27, %v7532_v29  ;;  %v7543_v24 = vld [vmem:[#allocation32_spill] sm:$0xff]  ;;  %v7545_v29 = vld [vmem:[#allocation33_spill] sm:$0xff] }
 0x615   : > { %v4330_v30 = vmax.f32 %v4298_v46, 0.0  ;;  %v4299_v59 = vadd.f32 %v4223_v57, %v7533_v48  ;;  %v7544_v46 = vld [vmem:[#allocation39_spill] sm:$0xff] }
 0x616   : > { %4364 = vst.msk [vmem:[%s7158_s10 + $0x90] sm:$0xff] %vm258_vm0, %v4332_v49  ;;  %v4333_v16 = vmax.f32 %v4301_v8, 0.0 }
 0x617   : > { %4362 = vst.msk [vmem:[%s7158_s10 + $0x80] sm:$0xff] %vm258_vm0, %v4330_v30  ;;  %v4331_v58 = vmax.f32 %v4299_v59, 0.0 }
 0x618   : > { %4365 = vst.msk [vmem:[%s7158_s10 + $0x98] sm:$0xff] %vm258_vm0, %v4333_v16 }
 0x619   : > { %4363 = vst.msk [vmem:[%s7158_s10 + $0x88] sm:$0xff] %vm258_vm0, %v4331_v58 }
 0x63f   : > { %v4606_v42 = vpop.f32.mrb[20].mxu1 }
 0x640   : > { %v4244_v23 = vadd.f32 %v4606_v42, %v7142_v39  ;;  %v4235_v35 = vpop.f32.mrb[21].mxu1 }
 0x641   : > { %v4236_v11 = vadd.f32 %v7142_v39, %v4235_v35  ;;  %v4607_v17 = vpop.f32.mrb[22].mxu1 }
 0x642   : > { %v4304_v32 = vadd.f32 %v4244_v23, %v7534_v6  ;;  %v4247_v54 = vadd.f32 %v4607_v17, %v7142_v39  ;;  %v4238_v38 = vpop.f32.mrb[23].mxu1 }
 0x643   : > { %v4302_v43 = vadd.f32 %v4236_v11, %v7535_v31  ;;  %v4239_v44 = vadd.f32 %v7142_v39, %v4238_v38 }
 0x644   : > { %v4336_v20 = vmax.f32 %v4304_v32, 0.0  ;;  %v4305_v26 = vadd.f32 %v4247_v54, %v7536_v63 }
 0x645   : > { %v4334_v19 = vmax.f32 %v4302_v43, 0.0  ;;  %v4303_v9 = vadd.f32 %v4239_v44, %v7537_v22 }
 0x646   : > { %4368 = vst.msk [vmem:[%s7158_s10 + $0xb0] sm:$0xff] %vm258_vm0, %v4336_v20  ;;  %v4337_v0 = vmax.f32 %v4305_v26, 0.0 }
 0x647   : > { %4366 = vst.msk [vmem:[%s7158_s10 + $0xa0] sm:$0xff] %vm258_vm0, %v4334_v19  ;;  %v4335_v25 = vmax.f32 %v4303_v9, 0.0 }
 0x648   : > { %4369 = vst.msk [vmem:[%s7158_s10 + $0xb8] sm:$0xff] %vm258_vm0, %v4337_v0 }
 0x649   : > { %4367 = vst.msk [vmem:[%s7158_s10 + $0xa8] sm:$0xff] %vm258_vm0, %v4335_v25 }
 0x66f   : > { %v4610_v60 = vpop.f32.mrb[24].mxu1 }
 0x670   : > { %v4260_v2 = vadd.f32 %v4610_v60, %v7142_v39  ;;  %v4251_v34 = vpop.f32.mrb[25].mxu1 }
 0x671   : > { %v4252_v50 = vadd.f32 %v7142_v39, %v4251_v34  ;;  %v4611_v52 = vpop.f32.mrb[26].mxu1 }
 0x672   : > { %v4308_v45 = vadd.f32 %v4260_v2, %v7538_v4  ;;  %v4263_v28 = vadd.f32 %v4611_v52, %v7142_v39  ;;  %v4254_v14 = vpop.f32.mrb[27].mxu1 }
 0x673   : > { %v4306_v21 = vadd.f32 %v4252_v50, %v7539_v37  ;;  %v4255_v36 = vadd.f32 %v7142_v39, %v4254_v14 }
 0x674   : > { %v4340_v18 = vmax.f32 %v4308_v45, 0.0  ;;  %v4309_v5 = vadd.f32 %v4263_v28, %v7540_v55 }
 0x675   : > { %v4338_v47 = vmax.f32 %v4306_v21, 0.0  ;;  %v4307_v61 = vadd.f32 %v4255_v36, %v7541_v13 }
 0x676   : > { %4372 = vst.msk [vmem:[%s7158_s10 + $0xd0] sm:$0xff] %vm258_vm0, %v4340_v18  ;;  %v4341_v1 = vmax.f32 %v4309_v5, 0.0 }
 0x677   : > { %4370 = vst.msk [vmem:[%s7158_s10 + $0xc0] sm:$0xff] %vm258_vm0, %v4338_v47  ;;  %v4339_v41 = vmax.f32 %v4307_v61, 0.0 }
 0x678   : > { %4373 = vst.msk [vmem:[%s7158_s10 + $0xd8] sm:$0xff] %vm258_vm0, %v4341_v1 }
 0x679   : > { %4371 = vst.msk [vmem:[%s7158_s10 + $0xc8] sm:$0xff] %vm258_vm0, %v4339_v41 }
 0x6a0   : > { %v4614_v3 = vpop.f32.mrb[28].mxu1 }
 0x6a1   : > { %v4276_v40 = vadd.f32 %v4614_v3, %v7142_v39  ;;  %v4267_v10 = vpop.f32.mrb[29].mxu1 }
 0x6a2   : > { %v4268_v33 = vadd.f32 %v7142_v39, %v4267_v10  ;;  %v4615_v12 = vpop.f32.mrb[30].mxu1 }
 0x6a3   : > { %v4312_v56 = vadd.f32 %v4276_v40, %v7542_v51  ;;  %v4279_v7 = vadd.f32 %v4615_v12, %v7142_v39  ;;  %v4270_v62 = vpop.f32.mrb[31].mxu1 }
 0x6a4   : > { %v4310_v27 = vadd.f32 %v4268_v33, %v7543_v24  ;;  %v4271_v53 = vadd.f32 %v7142_v39, %v4270_v62 }
 0x6a5   : > { %v4344_v15 = vmax.f32 %v4312_v56, 0.0  ;;  %v4313_v57 = vadd.f32 %v4279_v7, %v7544_v46 }
 0x6a6   : > { %v4342_v49 = vmax.f32 %v4310_v27, 0.0  ;;  %v4311_v8 = vadd.f32 %v4271_v53, %v7545_v29 }
 0x6a7   : > { %4376 = vst.msk [vmem:[%s7158_s10 + $0xf0] sm:$0xff] %vm258_vm0, %v4344_v15  ;;  %v4345_v30 = vmax.f32 %v4313_v57, 0.0 }
 0x6a8   : > { %4374 = vst.msk [vmem:[%s7158_s10 + $0xe0] sm:$0xff] %vm258_vm0, %v4342_v49  ;;  %v4343_v48 = vmax.f32 %v4311_v8, 0.0 }
 0x6a9   : > { %4377 = vst.msk [vmem:[%s7158_s10 + $0xf8] sm:$0xff] %vm258_vm0, %v4345_v30 }
 0x6aa   : > { %4375 = vst.msk [vmem:[%s7158_s10 + $0xe8] sm:$0xff] %vm258_vm0, %v4343_v48 }
 0x6ab PF: > { %s15_s18 = sadd.s32 1, %s4651_s18  }
 0x6ac   : > { %p12_p4 = scmp.ge.s32.totalorder %s15_s18, 4  }
 0x6ae   :  { %14 = sbr.rel (!%p12_p4) target bundleno = 1 (0x1), region = 72 }

</bundles_post_ra>
